<compile_context>
chip_gen: v5e
topology: v5e:2x2
jax: 0.10.0
libtpu: 0.0.40
codegen_flags: <defaults>
</compile_context>

<pallas_src>
import functools

import jax
import jax.numpy as jnp
from jax.experimental import pallas as pl
from jax.experimental.pallas import tpu as pltpu

EPS = 1e-5                       # nn.BatchNorm2d default eps
CPAD = 128                       # lane-dense channel padding
_VMEM_LIMIT = 32 * 1024 * 1024   # fits v5e/v6e/v7x scoped-VMEM budgets


# ---------------------------------------------------------------------------
# Kernel 1: ConvTranspose2d(k=2, s=2) fused with interleave + channel-concat.
# ---------------------------------------------------------------------------

def _up_concat_kernel(x_ref, w_ref, b_ref, s_ref, o_ref, *, out_c, skip_c):
    # x_ref:  (1, H, W, Cin)           f32
    # w_ref:  (Cin, 4*CPAD)            bf16, columns ordered (di, dj, c_pad)
    # b_ref:  (1, 4*CPAD)              f32
    # s_ref:  (1, H, 2, W, 2*skip_c)   f32   dims: (n, h, di, w, (dj, c))
    # o_ref:  (1, H, 2, W, 2*CPAD)     f32   dims: (n, h, di, w, (dj, c_pad))
    xb = x_ref[0].astype(jnp.bfloat16)                              # (H, W, Cin)
    H, W, Cin = xb.shape
    y = jnp.dot(xb.reshape(H * W, Cin), w_ref[...],
                preferred_element_type=jnp.float32) + b_ref[...]    # (H*W, 4*CPAD)
    for di in range(2):
        part = y[:, di * 2 * CPAD:(di + 1) * 2 * CPAD].reshape(H, W, 2 * CPAD)
        o_ref[0, :, di, :, :] = part          # up-conv channels, pad channels = 0
        s_di = s_ref[0, :, di, :, :]                                # (H, W, 2*skip_c)
        # place the skip feature maps right after the up-conv channels
        o_ref[0, :, di, :, out_c:out_c + skip_c] = s_di[:, :, :skip_c]
        o_ref[0, :, di, :, CPAD + out_c:CPAD + out_c + skip_c] = s_di[:, :, skip_c:]


def _up_concat(x_nhwc, w_up, b_up, skip_r, out_c, skip_c):
    N, H, W, Cin = x_nhwc.shape
    kernel = functools.partial(_up_concat_kernel, out_c=out_c, skip_c=skip_c)
    out = pl.pallas_call(
        kernel,
        out_shape=jax.ShapeDtypeStruct((N, H, 2, W, 2 * CPAD), jnp.float32),
        grid=(N,),
        in_specs=[
            pl.BlockSpec((1, H, W, Cin), lambda n: (n, 0, 0, 0)),
            pl.BlockSpec((Cin, 4 * CPAD), lambda n: (0, 0)),
            pl.BlockSpec((1, 4 * CPAD), lambda n: (0, 0)),
            pl.BlockSpec((1, H, 2, W, 2 * skip_c), lambda n: (n, 0, 0, 0, 0)),
        ],
        out_specs=pl.BlockSpec((1, H, 2, W, 2 * CPAD), lambda n: (n, 0, 0, 0, 0)),
        compiler_params=pltpu.CompilerParams(
            dimension_semantics=("parallel",),
            vmem_limit_bytes=_VMEM_LIMIT),
    )(x_nhwc.astype(jnp.float32), w_up, b_up, skip_r.astype(jnp.float32))
    # (N, H, 2, W, 2, CPAD) -> (N, 2H, 2W, CPAD): pure row-major reshape (free).
    return out.reshape(N, 2 * H, 2 * W, CPAD)


# ---------------------------------------------------------------------------
# Kernel 2: conv_block = Conv3x3 + BN(training) + ReLU + Conv3x3 + BN + ReLU,
# fully fused in a single 3-pass kernel.  Conv outputs are kept in a
# batch-resident VMEM cache across passes so nothing is recomputed and the
# conv1 activation never touches HBM.
# ---------------------------------------------------------------------------

def _conv_block_kernel(x_ref, w1_ref, g1_ref, b1_ref, w2_ref, g2_ref, b2_ref,
                       o_ref, xpad_ref, h1_ref, h2_ref,
                       s1_ref, q1_ref, s2_ref, q2_ref, *, inv_m):
    # Grid (p, n): p = pass, n = image.
    #   p == 0: conv1(image n) -> h1 cache, accumulate BN1 sum / sum-of-squares
    #   p == 1: BN1 + ReLU (folded scale/shift), conv2 -> h2 cache, BN2 stats
    #   p == 2: BN2 + ReLU, write lane-dense output block
    p = pl.program_id(0)
    n = pl.program_id(1)
    _, Hs, Ws, C = x_ref.shape

    @pl.when(jnp.logical_and(p == 0, n == 0))
    def _init():
        xpad_ref[...] = jnp.zeros_like(xpad_ref)   # zero halo border once
        s1_ref[...] = jnp.zeros_like(s1_ref)
        q1_ref[...] = jnp.zeros_like(q1_ref)
        s2_ref[...] = jnp.zeros_like(s2_ref)
        q2_ref[...] = jnp.zeros_like(q2_ref)

    def conv3(w_ref):
        # in-kernel im2col from the halo-padded VMEM scratch (border stays 0)
        acc = jnp.zeros((Hs * Ws, C), jnp.float32)
        for ky in range(3):
            for kx in range(3):
                win = xpad_ref[ky:ky + Hs, kx:kx + Ws, :].astype(jnp.bfloat16)
                acc = acc + jnp.dot(win.reshape(Hs * Ws, C), w_ref[ky, kx],
                                    preferred_element_type=jnp.float32)
        return acc

    def bn_scale_shift(s_ref, q_ref, g_ref, b_ref):
        mean = s_ref[...] * inv_m
        var = jnp.maximum(q_ref[...] * inv_m - mean * mean, 0.0)
        scale = g_ref[...] * jax.lax.rsqrt(var + EPS)   # EUP rsqrt (free slot)
        shift = b_ref[...] - mean * scale
        return scale, shift

    @pl.when(p == 0)
    def _pass0():
        xpad_ref[1:Hs + 1, 1:Ws + 1, :] = x_ref[0]
        acc = conv3(w1_ref)
        h1_ref[n] = acc.reshape(Hs, Ws, C)
        s1_ref[...] += jnp.sum(acc, axis=0, keepdims=True)
        q1_ref[...] += jnp.sum(acc * acc, axis=0, keepdims=True)

    @pl.when(p == 1)
    def _pass1():
        scale, shift = bn_scale_shift(s1_ref, q1_ref, g1_ref, b1_ref)
        a1 = jnp.maximum(h1_ref[n].reshape(Hs * Ws, C) * scale + shift, 0.0)
        xpad_ref[1:Hs + 1, 1:Ws + 1, :] = a1.reshape(Hs, Ws, C)
        acc = conv3(w2_ref)
        h2_ref[n] = acc.reshape(Hs, Ws, C)
        s2_ref[...] += jnp.sum(acc, axis=0, keepdims=True)
        q2_ref[...] += jnp.sum(acc * acc, axis=0, keepdims=True)

    @pl.when(p == 2)
    def _pass2():
        scale, shift = bn_scale_shift(s2_ref, q2_ref, g2_ref, b2_ref)
        y = jnp.maximum(h2_ref[n].reshape(Hs * Ws, C) * scale + shift, 0.0)
        o_ref[0] = y.reshape(Hs, Ws, C)


def _conv_block(x, w1, g1, b1, w2, g2, b2):
    # NOTE: the conv-output caches are batch-resident in VMEM, which is fine for
    # these small decoder shapes (N*Hs*Ws*128*4 bytes each); larger problems
    # would tile the batch/spatial dims instead.
    N, Hs, Ws, C = x.shape
    kernel = functools.partial(_conv_block_kernel,
                               inv_m=1.0 / float(N * Hs * Ws))
    return pl.pallas_call(
        kernel,
        out_shape=jax.ShapeDtypeStruct((N, Hs, Ws, C), jnp.float32),
        grid=(3, N),   # (pass, image)
        in_specs=[
            # x is only consumed in pass 0; later passes pin block 0 so the
            # pipeline skips the redundant DMAs.
            pl.BlockSpec((1, Hs, Ws, C),
                         lambda p, n: (jnp.where(p == 0, n, 0), 0, 0, 0)),
            pl.BlockSpec((3, 3, C, C), lambda p, n: (0, 0, 0, 0)),
            pl.BlockSpec((1, C), lambda p, n: (0, 0)),
            pl.BlockSpec((1, C), lambda p, n: (0, 0)),
            pl.BlockSpec((3, 3, C, C), lambda p, n: (0, 0, 0, 0)),
            pl.BlockSpec((1, C), lambda p, n: (0, 0)),
            pl.BlockSpec((1, C), lambda p, n: (0, 0)),
        ],
        # Output is only written in pass 2; earlier passes map to block 0 so no
        # garbage blocks are ever written back to HBM.
        out_specs=pl.BlockSpec((1, Hs, Ws, C),
                               lambda p, n: (jnp.where(p == 2, n, 0), 0, 0, 0)),
        scratch_shapes=[
            pltpu.VMEM((Hs + 2, Ws + 2, C), jnp.float32),  # halo-padded image
            pltpu.VMEM((N, Hs, Ws, C), jnp.float32),       # conv1 output cache
            pltpu.VMEM((N, Hs, Ws, C), jnp.float32),       # conv2 output cache
            pltpu.VMEM((1, C), jnp.float32),               # BN1 sum
            pltpu.VMEM((1, C), jnp.float32),               # BN1 sum of squares
            pltpu.VMEM((1, C), jnp.float32),               # BN2 sum
            pltpu.VMEM((1, C), jnp.float32),               # BN2 sum of squares
        ],
        compiler_params=pltpu.CompilerParams(
            dimension_semantics=("arbitrary", "arbitrary"),
            vmem_limit_bytes=_VMEM_LIMIT),
    )(x, w1, g1, b1, w2, g2, b2)


# ---------------------------------------------------------------------------
# Parameter packing (tiny, one-time XLA ops)
# ---------------------------------------------------------------------------

def _pack_up_weight(w_torch):
    # torch ConvTranspose2d weight (Cin, Cout, 2, 2) -> (Cin, 4*CPAD) bf16,
    # columns ordered (di, dj, c) with c zero-padded to CPAD lanes.
    cin, cout = w_torch.shape[0], w_torch.shape[1]
    w = jnp.transpose(w_torch, (0, 2, 3, 1))                       # (Cin, 2, 2, Cout)
    w = jnp.pad(w, ((0, 0), (0, 0), (0, 0), (0, CPAD - cout)))
    return w.reshape(cin, 4 * CPAD).astype(jnp.bfloat16)


def _pack_up_bias(b):
    bp = jnp.pad(b, (0, CPAD - b.shape[0]))
    return jnp.tile(bp, 4).reshape(1, 4 * CPAD).astype(jnp.float32)


def _pack_conv3_weight(w_torch):
    # torch Conv2d weight (Cout, Cin, 3, 3) -> (3, 3, CPAD, CPAD) bf16, zero-padded.
    cout, cin = w_torch.shape[0], w_torch.shape[1]
    w = jnp.transpose(w_torch, (2, 3, 1, 0))
    w = jnp.pad(w, ((0, 0), (0, 0), (0, CPAD - cin), (0, CPAD - cout)))
    return w.astype(jnp.bfloat16)


def _pack_bn_param(v):
    return jnp.pad(v, (0, CPAD - v.shape[0])).reshape(1, CPAD).astype(jnp.float32)


# ---------------------------------------------------------------------------
# decoder_block forward
# ---------------------------------------------------------------------------

def decoder_block_forward(params, inputs_nchw, skip_nchw):
    """decoder_block.forward: up-conv -> concat(channels) -> conv_block."""
    N, _, H, W = inputs_nchw.shape
    skip_c = skip_nchw.shape[1]
    out_c = params["up_w"].shape[1]

    x = jnp.transpose(inputs_nchw, (0, 2, 3, 1))          # NCHW -> NHWC
    s = jnp.transpose(skip_nchw, (0, 2, 3, 1))            # (N, 2H, 2W, skip_c)
    skip_r = s.reshape(N, H, 2, W, 2 * skip_c)            # free view for kernel 1

    w_up = _pack_up_weight(params["up_w"])
    b_up = _pack_up_bias(params["up_b"])
    w1 = _pack_conv3_weight(params["conv1_w"])
    w2 = _pack_conv3_weight(params["conv2_w"])
    g1, b1 = _pack_bn_param(params["bn1_g"]), _pack_bn_param(params["bn1_b"])
    g2, b2 = _pack_bn_param(params["bn2_g"]), _pack_bn_param(params["bn2_b"])
    # conv1_b / conv2_b are omitted on purpose: BatchNorm's mean subtraction
    # cancels a per-channel bias added right before it, so the adds are waste.
    # TODO(synk): training-mode BatchNorm running_mean/running_var buffer
    # updates are not tracked (the forward output does not depend on them).

    x = _up_concat(x, w_up, b_up, skip_r, out_c, skip_c)   # (N, 2H, 2W, CPAD)
    x = _conv_block(x, w1, g1, b1, w2, g2, b2)             # conv1+bn1+relu+conv2+bn2+relu

    return jnp.transpose(x[..., :out_c], (0, 3, 1, 2))     # NHWC -> NCHW


# ---------------------------------------------------------------------------
# Pure-JAX reference (f32), mirrors the PyTorch module exactly
# ---------------------------------------------------------------------------

def _reference_forward(params, inputs_nchw, skip_nchw):
    x = jnp.transpose(inputs_nchw, (0, 2, 3, 1))
    s = jnp.transpose(skip_nchw, (0, 2, 3, 1))
    N, H, W, Cin = x.shape
    Cout = params["up_w"].shape[1]
    w2 = jnp.transpose(params["up_w"], (0, 2, 3, 1)).reshape(Cin, 4 * Cout)
    y = x.reshape(N * H * W, Cin) @ w2 + jnp.tile(params["up_b"], 4)
    y = y.reshape(N, H, W, 2, 2, Cout)
    y = jnp.transpose(y, (0, 1, 3, 2, 4, 5)).reshape(N, 2 * H, 2 * W, Cout)
    x = jnp.concatenate([y, s], axis=-1)

    def conv3(x, w, b):
        n, h, wd, cin = x.shape
        co = w.shape[0]
        xp = jnp.pad(x, ((0, 0), (1, 1), (1, 1), (0, 0)))
        patches = jnp.concatenate(
            [xp[:, ky:ky + h, kx:kx + wd, :] for ky in range(3) for kx in range(3)],
            axis=-1)
        wm = jnp.transpose(w, (2, 3, 1, 0)).reshape(9 * cin, co)
        return (patches.reshape(n * h * wd, 9 * cin) @ wm + b).reshape(n, h, wd, co)

    def bn_relu(x, g, b):
        m = x.mean(axis=(0, 1, 2), keepdims=True)
        v = ((x - m) ** 2).mean(axis=(0, 1, 2), keepdims=True)
        return jnp.maximum((x - m) * jax.lax.rsqrt(v + EPS) * g + b, 0.0)

    x = conv3(x, params["conv1_w"], params["conv1_b"])
    x = bn_relu(x, params["bn1_g"], params["bn1_b"])
    x = conv3(x, params["conv2_w"], params["conv2_b"])
    x = bn_relu(x, params["bn2_g"], params["bn2_b"])
    return jnp.transpose(x, (0, 3, 1, 2))


# ---------------------------------------------------------------------------
# Main
# ---------------------------------------------------------------------------

if __name__ == "__main__":
    key = jax.random.PRNGKey(0)
    in_c, out_c = 8, 4
    N, H, W = 2, 8, 8                    # `inputs` spatial; `skip` is 2H x 2W
    cat_c = out_c + out_c

    ks = jax.random.split(key, 10)
    params = {
        # ConvTranspose2d(in_c, out_c, 2, 2): weight (in_c, out_c, 2, 2)
        "up_w":    jax.random.normal(ks[0], (in_c, out_c, 2, 2), jnp.float32) * 0.1,
        "up_b":    jax.random.normal(ks[1], (out_c,), jnp.float32) * 0.1,
        # Conv2d(cat_c, out_c, 3, padding=1): weight (out_c, cat_c, 3, 3)
        "conv1_w": jax.random.normal(ks[2], (out_c, cat_c, 3, 3), jnp.float32) * 0.1,
        "conv1_b": jax.random.normal(ks[3], (out_c,), jnp.float32) * 0.1,
        "bn1_g":   jnp.ones((out_c,), jnp.float32),
        "bn1_b":   jnp.zeros((out_c,), jnp.float32),
        # Conv2d(out_c, out_c, 3, padding=1)
        "conv2_w": jax.random.normal(ks[4], (out_c, out_c, 3, 3), jnp.float32) * 0.1,
        "conv2_b": jax.random.normal(ks[5], (out_c,), jnp.float32) * 0.1,
        "bn2_g":   jnp.ones((out_c,), jnp.float32),
        "bn2_b":   jnp.zeros((out_c,), jnp.float32),
    }

    inputs = jax.random.normal(ks[6], (N, in_c, H, W), jnp.float32)
    skip = jax.random.normal(ks[7], (N, out_c, 2 * H, 2 * W), jnp.float32)

    fwd = jax.jit(decoder_block_forward)
    out = jax.block_until_ready(fwd(params, inputs, skip))

    assert out.shape == (N, out_c, 2 * H, 2 * W), out.shape
    assert bool(jnp.all(jnp.isfinite(out)))

    ref = _reference_forward(params, inputs, skip)
    max_err = float(jnp.max(jnp.abs(out - ref)))
    assert max_err < 0.1, f"max abs error vs f32 reference: {max_err}"

    print("KERNEL_OK")
</pallas_src>

<mosaic_0001>
module attributes {stable_mosaic.version = 11 : i64} {
  func.func @_up_concat_kernel(%arg0: i32, %arg1: memref<1x8x8x8xf32, #tpu.memory_space<vmem>>, %arg2: memref<8x512xbf16, #tpu.memory_space<vmem>>, %arg3: memref<1x512xf32, #tpu.memory_space<vmem>>, %arg4: memref<1x8x2x8x8xf32, #tpu.memory_space<vmem>>, %arg5: memref<1x8x2x8x256xf32, #tpu.memory_space<vmem>>) attributes {dimension_semantics = [#tpu.dimension_semantics<parallel>], iteration_bounds = array<i64: 2>, scalar_prefetch = 0 : i64, scratch_operands = 0 : i64, tpu.core_type = #tpu.core_type<tc>, window_params = [{transform_indices = @transform_0, window_bounds = array<i64: 1, 8, 8, 8>}, {pipeline_mode = #tpu.pipeline_mode<synchronous>, transform_indices = @transform_1, window_bounds = array<i64: 8, 512>}, {pipeline_mode = #tpu.pipeline_mode<synchronous>, transform_indices = @transform_2, window_bounds = array<i64: 1, 512>}, {transform_indices = @transform_3, window_bounds = array<i64: 1, 8, 2, 8, 8>}, {transform_indices = @transform_4, window_bounds = array<i64: 1, 8, 2, 8, 256>}]} {
    %c0 = arith.constant 0 : index
    %c0_0 = arith.constant 0 : index
    %c0_1 = arith.constant 0 : index
    %c0_2 = arith.constant 0 : index
    %0 = vector.load %arg1[%c0, %c0_0, %c0_1, %c0_2] : memref<1x8x8x8xf32, #tpu.memory_space<vmem>>, vector<1x8x8x8xf32>
    %1 = vector.shape_cast %0 : vector<1x8x8x8xf32> to vector<8x8x8xf32>
    %2 = arith.truncf %1 : vector<8x8x8xf32> to vector<8x8x8xbf16>
    %3 = vector.shape_cast %2 : vector<8x8x8xbf16> to vector<64x8xbf16>
    %c0_3 = arith.constant 0 : index
    %c0_4 = arith.constant 0 : index
    %4 = vector.load %arg2[%c0_3, %c0_4] : memref<8x512xbf16, #tpu.memory_space<vmem>>, vector<8x512xbf16>
    %cst = arith.constant dense<0.000000e+00> : vector<64x512xf32>
    %5 = tpu.matmul %3, %4, %cst {dimension_numbers = #tpu.dot_dimension_numbers<[1], [0], [0], [1], [0, 0, 1, 1], [], []>} : vector<64x8xbf16>, vector<8x512xbf16>, vector<64x512xf32> -> vector<64x512xf32>
    %c0_5 = arith.constant 0 : index
    %c0_6 = arith.constant 0 : index
    %6 = vector.load %arg3[%c0_5, %c0_6] : memref<1x512xf32, #tpu.memory_space<vmem>>, vector<1x512xf32>
    %7 = vector.broadcast %6 : vector<1x512xf32> to vector<64x512xf32>
    %8 = arith.addf %5, %7 : vector<64x512xf32>
    %9 = vector.extract_strided_slice %8 {offsets = [0, 0], sizes = [64, 256], strides = [1, 1]} : vector<64x512xf32> to vector<64x256xf32>
    %10 = vector.shape_cast %9 : vector<64x256xf32> to vector<8x8x256xf32>
    %c0_7 = arith.constant 0 : index
    %c0_8 = arith.constant 0 : index
    %c0_9 = arith.constant 0 : index
    %c0_10 = arith.constant 0 : index
    %c0_11 = arith.constant 0 : index
    %11 = vector.load %arg5[%c0_7, %c0_8, %c0_9, %c0_10, %c0_11] : memref<1x8x2x8x256xf32, #tpu.memory_space<vmem>>, vector<1x8x1x8x256xf32>
    %12 = vector.shape_cast %11 : vector<1x8x1x8x256xf32> to vector<8x8x256xf32>
    %13 = vector.shape_cast %10 : vector<8x8x256xf32> to vector<1x8x1x8x256xf32>
    tpu.vector_store %arg5[%c0_7, %c0_8, %c0_9, %c0_10, %c0_11], %13 {strides = array<i32>} : memref<1x8x2x8x256xf32, #tpu.memory_space<vmem>>, vector<1x8x1x8x256xf32>,
    %c0_12 = arith.constant 0 : index
    %c0_13 = arith.constant 0 : index
    %c0_14 = arith.constant 0 : index
    %c0_15 = arith.constant 0 : index
    %c0_16 = arith.constant 0 : index
    %14 = vector.load %arg4[%c0_12, %c0_13, %c0_14, %c0_15, %c0_16] : memref<1x8x2x8x8xf32, #tpu.memory_space<vmem>>, vector<1x8x1x8x8xf32>
    %15 = vector.shape_cast %14 : vector<1x8x1x8x8xf32> to vector<8x8x8xf32>
    %16 = vector.extract_strided_slice %15 {offsets = [0, 0, 0], sizes = [8, 8, 4], strides = [1, 1, 1]} : vector<8x8x8xf32> to vector<8x8x4xf32>
    %c0_17 = arith.constant 0 : index
    %c0_18 = arith.constant 0 : index
    %c0_19 = arith.constant 0 : index
    %c0_20 = arith.constant 0 : index
    %c4 = arith.constant 4 : index
    %17 = vector.load %arg5[%c0_17, %c0_18, %c0_19, %c0_20, %c4] : memref<1x8x2x8x256xf32, #tpu.memory_space<vmem>>, vector<1x8x1x8x4xf32>
    %18 = vector.shape_cast %17 : vector<1x8x1x8x4xf32> to vector<8x8x4xf32>
    %19 = vector.shape_cast %16 : vector<8x8x4xf32> to vector<1x8x1x8x4xf32>
    tpu.vector_store %arg5[%c0_17, %c0_18, %c0_19, %c0_20, %c4], %19 {strides = array<i32>} : memref<1x8x2x8x256xf32, #tpu.memory_space<vmem>>, vector<1x8x1x8x4xf32>,
    %20 = vector.extract_strided_slice %15 {offsets = [0, 0, 4], sizes = [8, 8, 4], strides = [1, 1, 1]} : vector<8x8x8xf32> to vector<8x8x4xf32>
    %c0_21 = arith.constant 0 : index
    %c0_22 = arith.constant 0 : index
    %c0_23 = arith.constant 0 : index
    %c0_24 = arith.constant 0 : index
    %c132 = arith.constant 132 : index
    %21 = vector.load %arg5[%c0_21, %c0_22, %c0_23, %c0_24, %c132] : memref<1x8x2x8x256xf32, #tpu.memory_space<vmem>>, vector<1x8x1x8x4xf32>
    %22 = vector.shape_cast %21 : vector<1x8x1x8x4xf32> to vector<8x8x4xf32>
    %23 = vector.shape_cast %20 : vector<8x8x4xf32> to vector<1x8x1x8x4xf32>
    tpu.vector_store %arg5[%c0_21, %c0_22, %c0_23, %c0_24, %c132], %23 {strides = array<i32>} : memref<1x8x2x8x256xf32, #tpu.memory_space<vmem>>, vector<1x8x1x8x4xf32>,
    %24 = vector.extract_strided_slice %8 {offsets = [0, 256], sizes = [64, 256], strides = [1, 1]} : vector<64x512xf32> to vector<64x256xf32>
    %25 = vector.shape_cast %24 : vector<64x256xf32> to vector<8x8x256xf32>
    %c0_25 = arith.constant 0 : index
    %c0_26 = arith.constant 0 : index
    %c1 = arith.constant 1 : index
    %c0_27 = arith.constant 0 : index
    %c0_28 = arith.constant 0 : index
    %26 = vector.load %arg5[%c0_25, %c0_26, %c1, %c0_27, %c0_28] : memref<1x8x2x8x256xf32, #tpu.memory_space<vmem>>, vector<1x8x1x8x256xf32>
    %27 = vector.shape_cast %26 : vector<1x8x1x8x256xf32> to vector<8x8x256xf32>
    %28 = vector.shape_cast %25 : vector<8x8x256xf32> to vector<1x8x1x8x256xf32>
    tpu.vector_store %arg5[%c0_25, %c0_26, %c1, %c0_27, %c0_28], %28 {strides = array<i32>} : memref<1x8x2x8x256xf32, #tpu.memory_space<vmem>>, vector<1x8x1x8x256xf32>,
    %c0_29 = arith.constant 0 : index
    %c0_30 = arith.constant 0 : index
    %c1_31 = arith.constant 1 : index
    %c0_32 = arith.constant 0 : index
    %c0_33 = arith.constant 0 : index
    %29 = vector.load %arg4[%c0_29, %c0_30, %c1_31, %c0_32, %c0_33] : memref<1x8x2x8x8xf32, #tpu.memory_space<vmem>>, vector<1x8x1x8x8xf32>
    %30 = vector.shape_cast %29 : vector<1x8x1x8x8xf32> to vector<8x8x8xf32>
    %31 = vector.extract_strided_slice %30 {offsets = [0, 0, 0], sizes = [8, 8, 4], strides = [1, 1, 1]} : vector<8x8x8xf32> to vector<8x8x4xf32>
    %c0_34 = arith.constant 0 : index
    %c0_35 = arith.constant 0 : index
    %c1_36 = arith.constant 1 : index
    %c0_37 = arith.constant 0 : index
    %c4_38 = arith.constant 4 : index
    %32 = vector.load %arg5[%c0_34, %c0_35, %c1_36, %c0_37, %c4_38] : memref<1x8x2x8x256xf32, #tpu.memory_space<vmem>>, vector<1x8x1x8x4xf32>
    %33 = vector.shape_cast %32 : vector<1x8x1x8x4xf32> to vector<8x8x4xf32>
    %34 = vector.shape_cast %31 : vector<8x8x4xf32> to vector<1x8x1x8x4xf32>
    tpu.vector_store %arg5[%c0_34, %c0_35, %c1_36, %c0_37, %c4_38], %34 {strides = array<i32>} : memref<1x8x2x8x256xf32, #tpu.memory_space<vmem>>, vector<1x8x1x8x4xf32>,
    %35 = vector.extract_strided_slice %30 {offsets = [0, 0, 4], sizes = [8, 8, 4], strides = [1, 1, 1]} : vector<8x8x8xf32> to vector<8x8x4xf32>
    %c0_39 = arith.constant 0 : index
    %c0_40 = arith.constant 0 : index
    %c1_41 = arith.constant 1 : index
    %c0_42 = arith.constant 0 : index
    %c132_43 = arith.constant 132 : index
    %36 = vector.load %arg5[%c0_39, %c0_40, %c1_41, %c0_42, %c132_43] : memref<1x8x2x8x256xf32, #tpu.memory_space<vmem>>, vector<1x8x1x8x4xf32>
    %37 = vector.shape_cast %36 : vector<1x8x1x8x4xf32> to vector<8x8x4xf32>
    %38 = vector.shape_cast %35 : vector<8x8x4xf32> to vector<1x8x1x8x4xf32>
    tpu.vector_store %arg5[%c0_39, %c0_40, %c1_41, %c0_42, %c132_43], %38 {strides = array<i32>} : memref<1x8x2x8x256xf32, #tpu.memory_space<vmem>>, vector<1x8x1x8x4xf32>,
    return
  }
  func.func @transform_0(%arg0: i32) -> (i32, i32, i32, i32) {
    %c0_i32 = arith.constant 0 : i32
    %c0_i32_0 = arith.constant 0 : i32
    %c0_i32_1 = arith.constant 0 : i32
    %c0_i32_2 = arith.constant 0 : i32
    return %arg0, %c0_i32, %c0_i32_0, %c0_i32_1 : i32, i32, i32, i32
  }
  func.func @transform_1(%arg0: i32) -> (i32, i32) {
    %c0_i32 = arith.constant 0 : i32
    %c0_i32_0 = arith.constant 0 : i32
    %c0_i32_1 = arith.constant 0 : i32
    return %c0_i32, %c0_i32_0 : i32, i32
  }
  func.func @transform_2(%arg0: i32) -> (i32, i32) {
    %c0_i32 = arith.constant 0 : i32
    %c0_i32_0 = arith.constant 0 : i32
    %c0_i32_1 = arith.constant 0 : i32
    return %c0_i32, %c0_i32_0 : i32, i32
  }
  func.func @transform_3(%arg0: i32) -> (i32, i32, i32, i32, i32) {
    %c0_i32 = arith.constant 0 : i32
    %c0_i32_0 = arith.constant 0 : i32
    %c0_i32_1 = arith.constant 0 : i32
    %c0_i32_2 = arith.constant 0 : i32
    %c0_i32_3 = arith.constant 0 : i32
    return %arg0, %c0_i32, %c0_i32_0, %c0_i32_1, %c0_i32_2 : i32, i32, i32, i32, i32
  }
  func.func @transform_4(%arg0: i32) -> (i32, i32, i32, i32, i32) {
    %c0_i32 = arith.constant 0 : i32
    %c0_i32_0 = arith.constant 0 : i32
    %c0_i32_1 = arith.constant 0 : i32
    %c0_i32_2 = arith.constant 0 : i32
    %c0_i32_3 = arith.constant 0 : i32
    return %arg0, %c0_i32, %c0_i32_0, %c0_i32_1, %c0_i32_2 : i32, i32, i32, i32, i32
  }
}

module attributes {stable_mosaic.version = 11 : i64} {
  func.func @_conv_block_kernel(%arg0: i32, %arg1: i32, %arg2: memref<1x16x16x128xf32, #tpu.memory_space<vmem>>, %arg3: memref<3x3x128x128xbf16, #tpu.memory_space<vmem>>, %arg4: memref<1x128xf32, #tpu.memory_space<vmem>>, %arg5: memref<1x128xf32, #tpu.memory_space<vmem>>, %arg6: memref<3x3x128x128xbf16, #tpu.memory_space<vmem>>, %arg7: memref<1x128xf32, #tpu.memory_space<vmem>>, %arg8: memref<1x128xf32, #tpu.memory_space<vmem>>, %arg9: memref<1x16x16x128xf32, #tpu.memory_space<vmem>>, %arg10: memref<18x18x128xf32, #tpu.memory_space<vmem>>, %arg11: memref<2x16x16x128xf32, #tpu.memory_space<vmem>>, %arg12: memref<2x16x16x128xf32, #tpu.memory_space<vmem>>, %arg13: memref<1x128xf32, #tpu.memory_space<vmem>>, %arg14: memref<1x128xf32, #tpu.memory_space<vmem>>, %arg15: memref<1x128xf32, #tpu.memory_space<vmem>>, %arg16: memref<1x128xf32, #tpu.memory_space<vmem>>) attributes {dimension_semantics = [#tpu.dimension_semantics<arbitrary>, #tpu.dimension_semantics<arbitrary>], iteration_bounds = array<i64: 3, 2>, scalar_prefetch = 0 : i64, scratch_operands = 7 : i64, tpu.core_type = #tpu.core_type<tc>, window_params = [{transform_indices = @transform_0, window_bounds = array<i64: 1, 16, 16, 128>}, {pipeline_mode = #tpu.pipeline_mode<synchronous>, transform_indices = @transform_1, window_bounds = array<i64: 3, 3, 128, 128>}, {pipeline_mode = #tpu.pipeline_mode<synchronous>, transform_indices = @transform_2, window_bounds = array<i64: 1, 128>}, {pipeline_mode = #tpu.pipeline_mode<synchronous>, transform_indices = @transform_3, window_bounds = array<i64: 1, 128>}, {pipeline_mode = #tpu.pipeline_mode<synchronous>, transform_indices = @transform_4, window_bounds = array<i64: 3, 3, 128, 128>}, {pipeline_mode = #tpu.pipeline_mode<synchronous>, transform_indices = @transform_5, window_bounds = array<i64: 1, 128>}, {pipeline_mode = #tpu.pipeline_mode<synchronous>, transform_indices = @transform_6, window_bounds = array<i64: 1, 128>}, {transform_indices = @transform_7, window_bounds = array<i64: 1, 16, 16, 128>}]} {
    %c0_i32 = arith.constant 0 : i32
    %0 = arith.cmpi eq, %arg0, %c0_i32 : i32
    %c0_i32_0 = arith.constant 0 : i32
    %1 = arith.cmpi eq, %arg1, %c0_i32_0 : i32
    %2 = arith.andi %0, %1 : i1
    %3 = arith.extui %2 : i1 to i32
    %c0_i32_1 = arith.constant 0 : i32
    %4 = arith.cmpi ne, %3, %c0_i32_1 : i32
    scf.if %4 {
      %cst = arith.constant 0.000000e+00 : f32
      %14 = vector.broadcast %cst : f32 to vector<18x18x128xf32>
      %c0 = arith.constant 0 : index
      %c0_6 = arith.constant 0 : index
      %c0_7 = arith.constant 0 : index
      %15 = vector.load %arg10[%c0, %c0_6, %c0_7] : memref<18x18x128xf32, #tpu.memory_space<vmem>>, vector<18x18x128xf32>
      tpu.vector_store %arg10[%c0, %c0_6, %c0_7], %14 {strides = array<i32>} : memref<18x18x128xf32, #tpu.memory_space<vmem>>, vector<18x18x128xf32>,
      %cst_8 = arith.constant 0.000000e+00 : f32
      %16 = vector.broadcast %cst_8 : f32 to vector<1x128xf32>
      %c0_9 = arith.constant 0 : index
      %c0_10 = arith.constant 0 : index
      %17 = vector.load %arg13[%c0_9, %c0_10] : memref<1x128xf32, #tpu.memory_space<vmem>>, vector<1x128xf32>
      tpu.vector_store %arg13[%c0_9, %c0_10], %16 {strides = array<i32>} : memref<1x128xf32, #tpu.memory_space<vmem>>, vector<1x128xf32>,
      %cst_11 = arith.constant 0.000000e+00 : f32
      %18 = vector.broadcast %cst_11 : f32 to vector<1x128xf32>
      %c0_12 = arith.constant 0 : index
      %c0_13 = arith.constant 0 : index
      %19 = vector.load %arg14[%c0_12, %c0_13] : memref<1x128xf32, #tpu.memory_space<vmem>>, vector<1x128xf32>
      tpu.vector_store %arg14[%c0_12, %c0_13], %18 {strides = array<i32>} : memref<1x128xf32, #tpu.memory_space<vmem>>, vector<1x128xf32>,
      %cst_14 = arith.constant 0.000000e+00 : f32
      %20 = vector.broadcast %cst_14 : f32 to vector<1x128xf32>
      %c0_15 = arith.constant 0 : index
      %c0_16 = arith.constant 0 : index
      %21 = vector.load %arg15[%c0_15, %c0_16] : memref<1x128xf32, #tpu.memory_space<vmem>>, vector<1x128xf32>
      tpu.vector_store %arg15[%c0_15, %c0_16], %20 {strides = array<i32>} : memref<1x128xf32, #tpu.memory_space<vmem>>, vector<1x128xf32>,
      %cst_17 = arith.constant 0.000000e+00 : f32
      %22 = vector.broadcast %cst_17 : f32 to vector<1x128xf32>
      %c0_18 = arith.constant 0 : index
      %c0_19 = arith.constant 0 : index
      %23 = vector.load %arg16[%c0_18, %c0_19] : memref<1x128xf32, #tpu.memory_space<vmem>>, vector<1x128xf32>
      tpu.vector_store %arg16[%c0_18, %c0_19], %22 {strides = array<i32>} : memref<1x128xf32, #tpu.memory_space<vmem>>, vector<1x128xf32>,
    } else {
    }
    %c0_i32_2 = arith.constant 0 : i32
    %5 = arith.cmpi eq, %arg0, %c0_i32_2 : i32
    %6 = arith.extui %5 : i1 to i32
    %c0_i32_3 = arith.constant 0 : i32
    %7 = arith.cmpi ne, %6, %c0_i32_3 : i32
    scf.if %7 {
      %c0 = arith.constant 0 : index
      %c0_6 = arith.constant 0 : index
      %c0_7 = arith.constant 0 : index
      %c0_8 = arith.constant 0 : index
      %14 = vector.load %arg2[%c0, %c0_6, %c0_7, %c0_8] : memref<1x16x16x128xf32, #tpu.memory_space<vmem>>, vector<1x16x16x128xf32>
      %15 = vector.shape_cast %14 : vector<1x16x16x128xf32> to vector<16x16x128xf32>
      %c1 = arith.constant 1 : index
      %c1_9 = arith.constant 1 : index
      %c0_10 = arith.constant 0 : index
      %16 = vector.load %arg10[%c1, %c1_9, %c0_10] : memref<18x18x128xf32, #tpu.memory_space<vmem>>, vector<16x16x128xf32>
      tpu.vector_store %arg10[%c1, %c1_9, %c0_10], %15 {strides = array<i32>} : memref<18x18x128xf32, #tpu.memory_space<vmem>>, vector<16x16x128xf32>,
      %cst = arith.constant 0.000000e+00 : f32
      %17 = vector.broadcast %cst : f32 to vector<256x128xf32>
      %c0_11 = arith.constant 0 : index
      %c0_12 = arith.constant 0 : index
      %c0_13 = arith.constant 0 : index
      %18 = vector.load %arg10[%c0_11, %c0_12, %c0_13] : memref<18x18x128xf32, #tpu.memory_space<vmem>>, vector<16x16x128xf32>
      %19 = arith.truncf %18 : vector<16x16x128xf32> to vector<16x16x128xbf16>
      %20 = vector.shape_cast %19 : vector<16x16x128xbf16> to vector<256x128xbf16>
      %c0_14 = arith.constant 0 : index
      %c0_15 = arith.constant 0 : index
      %c0_16 = arith.constant 0 : index
      %c0_17 = arith.constant 0 : index
      %21 = vector.load %arg3[%c0_14, %c0_15, %c0_16, %c0_17] : memref<3x3x128x128xbf16, #tpu.memory_space<vmem>>, vector<1x1x128x128xbf16>
      %22 = vector.shape_cast %21 : vector<1x1x128x128xbf16> to vector<128x128xbf16>
      %cst_18 = arith.constant dense<0.000000e+00> : vector<256x128xf32>
      %23 = tpu.matmul %20, %22, %cst_18 {dimension_numbers = #tpu.dot_dimension_numbers<[1], [0], [0], [1], [0, 0, 1, 1], [], []>} : vector<256x128xbf16>, vector<128x128xbf16>, vector<256x128xf32> -> vector<256x128xf32>
      %24 = arith.addf %17, %23 : vector<256x128xf32>
      %c0_19 = arith.constant 0 : index
      %c1_20 = arith.constant 1 : index
      %c0_21 = arith.constant 0 : index
      %25 = vector.load %arg10[%c0_19, %c1_20, %c0_21] : memref<18x18x128xf32, #tpu.memory_space<vmem>>, vector<16x16x128xf32>
      %26 = arith.truncf %25 : vector<16x16x128xf32> to vector<16x16x128xbf16>
      %27 = vector.shape_cast %26 : vector<16x16x128xbf16> to vector<256x128xbf16>
      %c0_22 = arith.constant 0 : index
      %c1_23 = arith.constant 1 : index
      %c0_24 = arith.constant 0 : index
      %c0_25 = arith.constant 0 : index
      %28 = vector.load %arg3[%c0_22, %c1_23, %c0_24, %c0_25] : memref<3x3x128x128xbf16, #tpu.memory_space<vmem>>, vector<1x1x128x128xbf16>
      %29 = vector.shape_cast %28 : vector<1x1x128x128xbf16> to vector<128x128xbf16>
      %cst_26 = arith.constant dense<0.000000e+00> : vector<256x128xf32>
      %30 = tpu.matmul %27, %29, %cst_26 {dimension_numbers = #tpu.dot_dimension_numbers<[1], [0], [0], [1], [0, 0, 1, 1], [], []>} : vector<256x128xbf16>, vector<128x128xbf16>, vector<256x128xf32> -> vector<256x128xf32>
      %31 = arith.addf %24, %30 : vector<256x128xf32>
      %c0_27 = arith.constant 0 : index
      %c2 = arith.constant 2 : index
      %c0_28 = arith.constant 0 : index
      %32 = vector.load %arg10[%c0_27, %c2, %c0_28] : memref<18x18x128xf32, #tpu.memory_space<vmem>>, vector<16x16x128xf32>
      %33 = arith.truncf %32 : vector<16x16x128xf32> to vector<16x16x128xbf16>
      %34 = vector.shape_cast %33 : vector<16x16x128xbf16> to vector<256x128xbf16>
      %c0_29 = arith.constant 0 : index
      %c2_30 = arith.constant 2 : index
      %c0_31 = arith.constant 0 : index
      %c0_32 = arith.constant 0 : index
      %35 = vector.load %arg3[%c0_29, %c2_30, %c0_31, %c0_32] : memref<3x3x128x128xbf16, #tpu.memory_space<vmem>>, vector<1x1x128x128xbf16>
      %36 = vector.shape_cast %35 : vector<1x1x128x128xbf16> to vector<128x128xbf16>
      %cst_33 = arith.constant dense<0.000000e+00> : vector<256x128xf32>
      %37 = tpu.matmul %34, %36, %cst_33 {dimension_numbers = #tpu.dot_dimension_numbers<[1], [0], [0], [1], [0, 0, 1, 1], [], []>} : vector<256x128xbf16>, vector<128x128xbf16>, vector<256x128xf32> -> vector<256x128xf32>
      %38 = arith.addf %31, %37 : vector<256x128xf32>
      %c1_34 = arith.constant 1 : index
      %c0_35 = arith.constant 0 : index
      %c0_36 = arith.constant 0 : index
      %39 = vector.load %arg10[%c1_34, %c0_35, %c0_36] : memref<18x18x128xf32, #tpu.memory_space<vmem>>, vector<16x16x128xf32>
      %40 = arith.truncf %39 : vector<16x16x128xf32> to vector<16x16x128xbf16>
      %41 = vector.shape_cast %40 : vector<16x16x128xbf16> to vector<256x128xbf16>
      %c1_37 = arith.constant 1 : index
      %c0_38 = arith.constant 0 : index
      %c0_39 = arith.constant 0 : index
      %c0_40 = arith.constant 0 : index
      %42 = vector.load %arg3[%c1_37, %c0_38, %c0_39, %c0_40] : memref<3x3x128x128xbf16, #tpu.memory_space<vmem>>, vector<1x1x128x128xbf16>
      %43 = vector.shape_cast %42 : vector<1x1x128x128xbf16> to vector<128x128xbf16>
      %cst_41 = arith.constant dense<0.000000e+00> : vector<256x128xf32>
      %44 = tpu.matmul %41, %43, %cst_41 {dimension_numbers = #tpu.dot_dimension_numbers<[1], [0], [0], [1], [0, 0, 1, 1], [], []>} : vector<256x128xbf16>, vector<128x128xbf16>, vector<256x128xf32> -> vector<256x128xf32>
      %45 = arith.addf %38, %44 : vector<256x128xf32>
      %c1_42 = arith.constant 1 : index
      %c1_43 = arith.constant 1 : index
      %c0_44 = arith.constant 0 : index
      %46 = vector.load %arg10[%c1_42, %c1_43, %c0_44] : memref<18x18x128xf32, #tpu.memory_space<vmem>>, vector<16x16x128xf32>
      %47 = arith.truncf %46 : vector<16x16x128xf32> to vector<16x16x128xbf16>
      %48 = vector.shape_cast %47 : vector<16x16x128xbf16> to vector<256x128xbf16>
      %c1_45 = arith.constant 1 : index
      %c1_46 = arith.constant 1 : index
      %c0_47 = arith.constant 0 : index
      %c0_48 = arith.constant 0 : index
      %49 = vector.load %arg3[%c1_45, %c1_46, %c0_47, %c0_48] : memref<3x3x128x128xbf16, #tpu.memory_space<vmem>>, vector<1x1x128x128xbf16>
      %50 = vector.shape_cast %49 : vector<1x1x128x128xbf16> to vector<128x128xbf16>
      %cst_49 = arith.constant dense<0.000000e+00> : vector<256x128xf32>
      %51 = tpu.matmul %48, %50, %cst_49 {dimension_numbers = #tpu.dot_dimension_numbers<[1], [0], [0], [1], [0, 0, 1, 1], [], []>} : vector<256x128xbf16>, vector<128x128xbf16>, vector<256x128xf32> -> vector<256x128xf32>
      %52 = arith.addf %45, %51 : vector<256x128xf32>
      %c1_50 = arith.constant 1 : index
      %c2_51 = arith.constant 2 : index
      %c0_52 = arith.constant 0 : index
      %53 = vector.load %arg10[%c1_50, %c2_51, %c0_52] : memref<18x18x128xf32, #tpu.memory_space<vmem>>, vector<16x16x128xf32>
      %54 = arith.truncf %53 : vector<16x16x128xf32> to vector<16x16x128xbf16>
      %55 = vector.shape_cast %54 : vector<16x16x128xbf16> to vector<256x128xbf16>
      %c1_53 = arith.constant 1 : index
      %c2_54 = arith.constant 2 : index
      %c0_55 = arith.constant 0 : index
      %c0_56 = arith.constant 0 : index
      %56 = vector.load %arg3[%c1_53, %c2_54, %c0_55, %c0_56] : memref<3x3x128x128xbf16, #tpu.memory_space<vmem>>, vector<1x1x128x128xbf16>
      %57 = vector.shape_cast %56 : vector<1x1x128x128xbf16> to vector<128x128xbf16>
      %cst_57 = arith.constant dense<0.000000e+00> : vector<256x128xf32>
      %58 = tpu.matmul %55, %57, %cst_57 {dimension_numbers = #tpu.dot_dimension_numbers<[1], [0], [0], [1], [0, 0, 1, 1], [], []>} : vector<256x128xbf16>, vector<128x128xbf16>, vector<256x128xf32> -> vector<256x128xf32>
      %59 = arith.addf %52, %58 : vector<256x128xf32>
      %c2_58 = arith.constant 2 : index
      %c0_59 = arith.constant 0 : index
      %c0_60 = arith.constant 0 : index
      %60 = vector.load %arg10[%c2_58, %c0_59, %c0_60] : memref<18x18x128xf32, #tpu.memory_space<vmem>>, vector<16x16x128xf32>
      %61 = arith.truncf %60 : vector<16x16x128xf32> to vector<16x16x128xbf16>
      %62 = vector.shape_cast %61 : vector<16x16x128xbf16> to vector<256x128xbf16>
      %c2_61 = arith.constant 2 : index
      %c0_62 = arith.constant 0 : index
      %c0_63 = arith.constant 0 : index
      %c0_64 = arith.constant 0 : index
      %63 = vector.load %arg3[%c2_61, %c0_62, %c0_63, %c0_64] : memref<3x3x128x128xbf16, #tpu.memory_space<vmem>>, vector<1x1x128x128xbf16>
      %64 = vector.shape_cast %63 : vector<1x1x128x128xbf16> to vector<128x128xbf16>
      %cst_65 = arith.constant dense<0.000000e+00> : vector<256x128xf32>
      %65 = tpu.matmul %62, %64, %cst_65 {dimension_numbers = #tpu.dot_dimension_numbers<[1], [0], [0], [1], [0, 0, 1, 1], [], []>} : vector<256x128xbf16>, vector<128x128xbf16>, vector<256x128xf32> -> vector<256x128xf32>
      %66 = arith.addf %59, %65 : vector<256x128xf32>
      %c2_66 = arith.constant 2 : index
      %c1_67 = arith.constant 1 : index
      %c0_68 = arith.constant 0 : index
      %67 = vector.load %arg10[%c2_66, %c1_67, %c0_68] : memref<18x18x128xf32, #tpu.memory_space<vmem>>, vector<16x16x128xf32>
      %68 = arith.truncf %67 : vector<16x16x128xf32> to vector<16x16x128xbf16>
      %69 = vector.shape_cast %68 : vector<16x16x128xbf16> to vector<256x128xbf16>
      %c2_69 = arith.constant 2 : index
      %c1_70 = arith.constant 1 : index
      %c0_71 = arith.constant 0 : index
      %c0_72 = arith.constant 0 : index
      %70 = vector.load %arg3[%c2_69, %c1_70, %c0_71, %c0_72] : memref<3x3x128x128xbf16, #tpu.memory_space<vmem>>, vector<1x1x128x128xbf16>
      %71 = vector.shape_cast %70 : vector<1x1x128x128xbf16> to vector<128x128xbf16>
      %cst_73 = arith.constant dense<0.000000e+00> : vector<256x128xf32>
      %72 = tpu.matmul %69, %71, %cst_73 {dimension_numbers = #tpu.dot_dimension_numbers<[1], [0], [0], [1], [0, 0, 1, 1], [], []>} : vector<256x128xbf16>, vector<128x128xbf16>, vector<256x128xf32> -> vector<256x128xf32>
      %73 = arith.addf %66, %72 : vector<256x128xf32>
      %c2_74 = arith.constant 2 : index
      %c2_75 = arith.constant 2 : index
      %c0_76 = arith.constant 0 : index
      %74 = vector.load %arg10[%c2_74, %c2_75, %c0_76] : memref<18x18x128xf32, #tpu.memory_space<vmem>>, vector<16x16x128xf32>
      %75 = arith.truncf %74 : vector<16x16x128xf32> to vector<16x16x128xbf16>
      %76 = vector.shape_cast %75 : vector<16x16x128xbf16> to vector<256x128xbf16>
      %c2_77 = arith.constant 2 : index
      %c2_78 = arith.constant 2 : index
      %c0_79 = arith.constant 0 : index
      %c0_80 = arith.constant 0 : index
      %77 = vector.load %arg3[%c2_77, %c2_78, %c0_79, %c0_80] : memref<3x3x128x128xbf16, #tpu.memory_space<vmem>>, vector<1x1x128x128xbf16>
      %78 = vector.shape_cast %77 : vector<1x1x128x128xbf16> to vector<128x128xbf16>
      %cst_81 = arith.constant dense<0.000000e+00> : vector<256x128xf32>
      %79 = tpu.matmul %76, %78, %cst_81 {dimension_numbers = #tpu.dot_dimension_numbers<[1], [0], [0], [1], [0, 0, 1, 1], [], []>} : vector<256x128xbf16>, vector<128x128xbf16>, vector<256x128xf32> -> vector<256x128xf32>
      %80 = arith.addf %73, %79 : vector<256x128xf32>
      %81 = vector.shape_cast %80 : vector<256x128xf32> to vector<16x16x128xf32>
      %82 = arith.index_cast %arg1 : i32 to index
      %c0_82 = arith.constant 0 : index
      %c0_83 = arith.constant 0 : index
      %c0_84 = arith.constant 0 : index
      %83 = vector.load %arg11[%82, %c0_82, %c0_83, %c0_84] : memref<2x16x16x128xf32, #tpu.memory_space<vmem>>, vector<1x16x16x128xf32>
      %84 = vector.shape_cast %83 : vector<1x16x16x128xf32> to vector<16x16x128xf32>
      %85 = vector.shape_cast %81 : vector<16x16x128xf32> to vector<1x16x16x128xf32>
      tpu.vector_store %arg11[%82, %c0_82, %c0_83, %c0_84], %85 {strides = array<i32>} : memref<2x16x16x128xf32, #tpu.memory_space<vmem>>, vector<1x16x16x128xf32>,
      %c0_85 = arith.constant 0 : index
      %c0_86 = arith.constant 0 : index
      %86 = vector.load %arg13[%c0_85, %c0_86] : memref<1x128xf32, #tpu.memory_space<vmem>>, vector<1x128xf32>
      %cst_87 = arith.constant dense<0.000000e+00> : vector<128xf32>
      %87 = vector.multi_reduction <add>, %80, %cst_87 [0] : vector<256x128xf32> to vector<128xf32>
      %88 = vector.shape_cast %87 : vector<128xf32> to vector<1x128xf32>
      %89 = arith.addf %86, %88 : vector<1x128xf32>
      %c0_88 = arith.constant 0 : index
      %c0_89 = arith.constant 0 : index
      %90 = vector.load %arg13[%c0_88, %c0_89] : memref<1x128xf32, #tpu.memory_space<vmem>>, vector<1x128xf32>
      tpu.vector_store %arg13[%c0_88, %c0_89], %89 {strides = array<i32>} : memref<1x128xf32, #tpu.memory_space<vmem>>, vector<1x128xf32>,
      %c0_90 = arith.constant 0 : index
      %c0_91 = arith.constant 0 : index
      %91 = vector.load %arg14[%c0_90, %c0_91] : memref<1x128xf32, #tpu.memory_space<vmem>>, vector<1x128xf32>
      %92 = arith.mulf %80, %80 : vector<256x128xf32>
      %cst_92 = arith.constant dense<0.000000e+00> : vector<128xf32>
      %93 = vector.multi_reduction <add>, %92, %cst_92 [0] : vector<256x128xf32> to vector<128xf32>
      %94 = vector.shape_cast %93 : vector<128xf32> to vector<1x128xf32>
      %95 = arith.addf %91, %94 : vector<1x128xf32>
      %c0_93 = arith.constant 0 : index
      %c0_94 = arith.constant 0 : index
      %96 = vector.load %arg14[%c0_93, %c0_94] : memref<1x128xf32, #tpu.memory_space<vmem>>, vector<1x128xf32>
      tpu.vector_store %arg14[%c0_93, %c0_94], %95 {strides = array<i32>} : memref<1x128xf32, #tpu.memory_space<vmem>>, vector<1x128xf32>,
    } else {
    }
    %c1_i32 = arith.constant 1 : i32
    %8 = arith.cmpi eq, %arg0, %c1_i32 : i32
    %9 = arith.extui %8 : i1 to i32
    %c0_i32_4 = arith.constant 0 : i32
    %10 = arith.cmpi ne, %9, %c0_i32_4 : i32
    scf.if %10 {
      %c0 = arith.constant 0 : index
      %c0_6 = arith.constant 0 : index
      %14 = vector.load %arg13[%c0, %c0_6] : memref<1x128xf32, #tpu.memory_space<vmem>>, vector<1x128xf32>
      %cst = arith.constant 0.001953125 : f32
      %15 = vector.broadcast %cst : f32 to vector<1x128xf32>
      %16 = arith.mulf %14, %15 : vector<1x128xf32>
      %c0_7 = arith.constant 0 : index
      %c0_8 = arith.constant 0 : index
      %17 = vector.load %arg14[%c0_7, %c0_8] : memref<1x128xf32, #tpu.memory_space<vmem>>, vector<1x128xf32>
      %cst_9 = arith.constant 0.001953125 : f32
      %18 = vector.broadcast %cst_9 : f32 to vector<1x128xf32>
      %19 = arith.mulf %17, %18 : vector<1x128xf32>
      %20 = arith.mulf %16, %16 : vector<1x128xf32>
      %21 = arith.subf %19, %20 : vector<1x128xf32>
      %cst_10 = arith.constant 0.000000e+00 : f32
      %22 = vector.broadcast %cst_10 : f32 to vector<1x128xf32>
      %23 = arith.maximumf %21, %22 : vector<1x128xf32>
      %c0_11 = arith.constant 0 : index
      %c0_12 = arith.constant 0 : index
      %24 = vector.load %arg4[%c0_11, %c0_12] : memref<1x128xf32, #tpu.memory_space<vmem>>, vector<1x128xf32>
      %cst_13 = arith.constant 9.99999974E-6 : f32
      %25 = vector.broadcast %cst_13 : f32 to vector<1x128xf32>
      %26 = arith.addf %23, %25 : vector<1x128xf32>
      %27 = math.rsqrt %26 : vector<1x128xf32>
      %28 = arith.mulf %24, %27 : vector<1x128xf32>
      %c0_14 = arith.constant 0 : index
      %c0_15 = arith.constant 0 : index
      %29 = vector.load %arg5[%c0_14, %c0_15] : memref<1x128xf32, #tpu.memory_space<vmem>>, vector<1x128xf32>
      %30 = arith.mulf %16, %28 : vector<1x128xf32>
      %31 = arith.subf %29, %30 : vector<1x128xf32>
      %32 = arith.index_cast %arg1 : i32 to index
      %c0_16 = arith.constant 0 : index
      %c0_17 = arith.constant 0 : index
      %c0_18 = arith.constant 0 : index
      %33 = vector.load %arg11[%32, %c0_16, %c0_17, %c0_18] : memref<2x16x16x128xf32, #tpu.memory_space<vmem>>, vector<1x16x16x128xf32>
      %34 = vector.shape_cast %33 : vector<1x16x16x128xf32> to vector<16x16x128xf32>
      %35 = vector.shape_cast %34 : vector<16x16x128xf32> to vector<256x128xf32>
      %36 = vector.broadcast %28 : vector<1x128xf32> to vector<256x128xf32>
      %37 = arith.mulf %35, %36 : vector<256x128xf32>
      %38 = vector.broadcast %31 : vector<1x128xf32> to vector<256x128xf32>
      %39 = arith.addf %37, %38 : vector<256x128xf32>
      %cst_19 = arith.constant 0.000000e+00 : f32
      %40 = vector.broadcast %cst_19 : f32 to vector<256x128xf32>
      %41 = arith.maximumf %39, %40 : vector<256x128xf32>
      %42 = vector.shape_cast %41 : vector<256x128xf32> to vector<16x16x128xf32>
      %c1 = arith.constant 1 : index
      %c1_20 = arith.constant 1 : index
      %c0_21 = arith.constant 0 : index
      %43 = vector.load %arg10[%c1, %c1_20, %c0_21] : memref<18x18x128xf32, #tpu.memory_space<vmem>>, vector<16x16x128xf32>
      tpu.vector_store %arg10[%c1, %c1_20, %c0_21], %42 {strides = array<i32>} : memref<18x18x128xf32, #tpu.memory_space<vmem>>, vector<16x16x128xf32>,
      %cst_22 = arith.constant 0.000000e+00 : f32
      %44 = vector.broadcast %cst_22 : f32 to vector<256x128xf32>
      %c0_23 = arith.constant 0 : index
      %c0_24 = arith.constant 0 : index
      %c0_25 = arith.constant 0 : index
      %45 = vector.load %arg10[%c0_23, %c0_24, %c0_25] : memref<18x18x128xf32, #tpu.memory_space<vmem>>, vector<16x16x128xf32>
      %46 = arith.truncf %45 : vector<16x16x128xf32> to vector<16x16x128xbf16>
      %47 = vector.shape_cast %46 : vector<16x16x128xbf16> to vector<256x128xbf16>
      %c0_26 = arith.constant 0 : index
      %c0_27 = arith.constant 0 : index
      %c0_28 = arith.constant 0 : index
      %c0_29 = arith.constant 0 : index
      %48 = vector.load %arg6[%c0_26, %c0_27, %c0_28, %c0_29] : memref<3x3x128x128xbf16, #tpu.memory_space<vmem>>, vector<1x1x128x128xbf16>
      %49 = vector.shape_cast %48 : vector<1x1x128x128xbf16> to vector<128x128xbf16>
      %cst_30 = arith.constant dense<0.000000e+00> : vector<256x128xf32>
      %50 = tpu.matmul %47, %49, %cst_30 {dimension_numbers = #tpu.dot_dimension_numbers<[1], [0], [0], [1], [0, 0, 1, 1], [], []>} : vector<256x128xbf16>, vector<128x128xbf16>, vector<256x128xf32> -> vector<256x128xf32>
      %51 = arith.addf %44, %50 : vector<256x128xf32>
      %c0_31 = arith.constant 0 : index
      %c1_32 = arith.constant 1 : index
      %c0_33 = arith.constant 0 : index
      %52 = vector.load %arg10[%c0_31, %c1_32, %c0_33] : memref<18x18x128xf32, #tpu.memory_space<vmem>>, vector<16x16x128xf32>
      %53 = arith.truncf %52 : vector<16x16x128xf32> to vector<16x16x128xbf16>
      %54 = vector.shape_cast %53 : vector<16x16x128xbf16> to vector<256x128xbf16>
      %c0_34 = arith.constant 0 : index
      %c1_35 = arith.constant 1 : index
      %c0_36 = arith.constant 0 : index
      %c0_37 = arith.constant 0 : index
      %55 = vector.load %arg6[%c0_34, %c1_35, %c0_36, %c0_37] : memref<3x3x128x128xbf16, #tpu.memory_space<vmem>>, vector<1x1x128x128xbf16>
      %56 = vector.shape_cast %55 : vector<1x1x128x128xbf16> to vector<128x128xbf16>
      %cst_38 = arith.constant dense<0.000000e+00> : vector<256x128xf32>
      %57 = tpu.matmul %54, %56, %cst_38 {dimension_numbers = #tpu.dot_dimension_numbers<[1], [0], [0], [1], [0, 0, 1, 1], [], []>} : vector<256x128xbf16>, vector<128x128xbf16>, vector<256x128xf32> -> vector<256x128xf32>
      %58 = arith.addf %51, %57 : vector<256x128xf32>
      %c0_39 = arith.constant 0 : index
      %c2 = arith.constant 2 : index
      %c0_40 = arith.constant 0 : index
      %59 = vector.load %arg10[%c0_39, %c2, %c0_40] : memref<18x18x128xf32, #tpu.memory_space<vmem>>, vector<16x16x128xf32>
      %60 = arith.truncf %59 : vector<16x16x128xf32> to vector<16x16x128xbf16>
      %61 = vector.shape_cast %60 : vector<16x16x128xbf16> to vector<256x128xbf16>
      %c0_41 = arith.constant 0 : index
      %c2_42 = arith.constant 2 : index
      %c0_43 = arith.constant 0 : index
      %c0_44 = arith.constant 0 : index
      %62 = vector.load %arg6[%c0_41, %c2_42, %c0_43, %c0_44] : memref<3x3x128x128xbf16, #tpu.memory_space<vmem>>, vector<1x1x128x128xbf16>
      %63 = vector.shape_cast %62 : vector<1x1x128x128xbf16> to vector<128x128xbf16>
      %cst_45 = arith.constant dense<0.000000e+00> : vector<256x128xf32>
      %64 = tpu.matmul %61, %63, %cst_45 {dimension_numbers = #tpu.dot_dimension_numbers<[1], [0], [0], [1], [0, 0, 1, 1], [], []>} : vector<256x128xbf16>, vector<128x128xbf16>, vector<256x128xf32> -> vector<256x128xf32>
      %65 = arith.addf %58, %64 : vector<256x128xf32>
      %c1_46 = arith.constant 1 : index
      %c0_47 = arith.constant 0 : index
      %c0_48 = arith.constant 0 : index
      %66 = vector.load %arg10[%c1_46, %c0_47, %c0_48] : memref<18x18x128xf32, #tpu.memory_space<vmem>>, vector<16x16x128xf32>
      %67 = arith.truncf %66 : vector<16x16x128xf32> to vector<16x16x128xbf16>
      %68 = vector.shape_cast %67 : vector<16x16x128xbf16> to vector<256x128xbf16>
      %c1_49 = arith.constant 1 : index
      %c0_50 = arith.constant 0 : index
      %c0_51 = arith.constant 0 : index
      %c0_52 = arith.constant 0 : index
      %69 = vector.load %arg6[%c1_49, %c0_50, %c0_51, %c0_52] : memref<3x3x128x128xbf16, #tpu.memory_space<vmem>>, vector<1x1x128x128xbf16>
      %70 = vector.shape_cast %69 : vector<1x1x128x128xbf16> to vector<128x128xbf16>
      %cst_53 = arith.constant dense<0.000000e+00> : vector<256x128xf32>
      %71 = tpu.matmul %68, %70, %cst_53 {dimension_numbers = #tpu.dot_dimension_numbers<[1], [0], [0], [1], [0, 0, 1, 1], [], []>} : vector<256x128xbf16>, vector<128x128xbf16>, vector<256x128xf32> -> vector<256x128xf32>
      %72 = arith.addf %65, %71 : vector<256x128xf32>
      %c1_54 = arith.constant 1 : index
      %c1_55 = arith.constant 1 : index
      %c0_56 = arith.constant 0 : index
      %73 = vector.load %arg10[%c1_54, %c1_55, %c0_56] : memref<18x18x128xf32, #tpu.memory_space<vmem>>, vector<16x16x128xf32>
      %74 = arith.truncf %73 : vector<16x16x128xf32> to vector<16x16x128xbf16>
      %75 = vector.shape_cast %74 : vector<16x16x128xbf16> to vector<256x128xbf16>
      %c1_57 = arith.constant 1 : index
      %c1_58 = arith.constant 1 : index
      %c0_59 = arith.constant 0 : index
      %c0_60 = arith.constant 0 : index
      %76 = vector.load %arg6[%c1_57, %c1_58, %c0_59, %c0_60] : memref<3x3x128x128xbf16, #tpu.memory_space<vmem>>, vector<1x1x128x128xbf16>
      %77 = vector.shape_cast %76 : vector<1x1x128x128xbf16> to vector<128x128xbf16>
      %cst_61 = arith.constant dense<0.000000e+00> : vector<256x128xf32>
      %78 = tpu.matmul %75, %77, %cst_61 {dimension_numbers = #tpu.dot_dimension_numbers<[1], [0], [0], [1], [0, 0, 1, 1], [], []>} : vector<256x128xbf16>, vector<128x128xbf16>, vector<256x128xf32> -> vector<256x128xf32>
      %79 = arith.addf %72, %78 : vector<256x128xf32>
      %c1_62 = arith.constant 1 : index
      %c2_63 = arith.constant 2 : index
      %c0_64 = arith.constant 0 : index
      %80 = vector.load %arg10[%c1_62, %c2_63, %c0_64] : memref<18x18x128xf32, #tpu.memory_space<vmem>>, vector<16x16x128xf32>
      %81 = arith.truncf %80 : vector<16x16x128xf32> to vector<16x16x128xbf16>
      %82 = vector.shape_cast %81 : vector<16x16x128xbf16> to vector<256x128xbf16>
      %c1_65 = arith.constant 1 : index
      %c2_66 = arith.constant 2 : index
      %c0_67 = arith.constant 0 : index
      %c0_68 = arith.constant 0 : index
      %83 = vector.load %arg6[%c1_65, %c2_66, %c0_67, %c0_68] : memref<3x3x128x128xbf16, #tpu.memory_space<vmem>>, vector<1x1x128x128xbf16>
      %84 = vector.shape_cast %83 : vector<1x1x128x128xbf16> to vector<128x128xbf16>
      %cst_69 = arith.constant dense<0.000000e+00> : vector<256x128xf32>
      %85 = tpu.matmul %82, %84, %cst_69 {dimension_numbers = #tpu.dot_dimension_numbers<[1], [0], [0], [1], [0, 0, 1, 1], [], []>} : vector<256x128xbf16>, vector<128x128xbf16>, vector<256x128xf32> -> vector<256x128xf32>
      %86 = arith.addf %79, %85 : vector<256x128xf32>
      %c2_70 = arith.constant 2 : index
      %c0_71 = arith.constant 0 : index
      %c0_72 = arith.constant 0 : index
      %87 = vector.load %arg10[%c2_70, %c0_71, %c0_72] : memref<18x18x128xf32, #tpu.memory_space<vmem>>, vector<16x16x128xf32>
      %88 = arith.truncf %87 : vector<16x16x128xf32> to vector<16x16x128xbf16>
      %89 = vector.shape_cast %88 : vector<16x16x128xbf16> to vector<256x128xbf16>
      %c2_73 = arith.constant 2 : index
      %c0_74 = arith.constant 0 : index
      %c0_75 = arith.constant 0 : index
      %c0_76 = arith.constant 0 : index
      %90 = vector.load %arg6[%c2_73, %c0_74, %c0_75, %c0_76] : memref<3x3x128x128xbf16, #tpu.memory_space<vmem>>, vector<1x1x128x128xbf16>
      %91 = vector.shape_cast %90 : vector<1x1x128x128xbf16> to vector<128x128xbf16>
      %cst_77 = arith.constant dense<0.000000e+00> : vector<256x128xf32>
      %92 = tpu.matmul %89, %91, %cst_77 {dimension_numbers = #tpu.dot_dimension_numbers<[1], [0], [0], [1], [0, 0, 1, 1], [], []>} : vector<256x128xbf16>, vector<128x128xbf16>, vector<256x128xf32> -> vector<256x128xf32>
      %93 = arith.addf %86, %92 : vector<256x128xf32>
      %c2_78 = arith.constant 2 : index
      %c1_79 = arith.constant 1 : index
      %c0_80 = arith.constant 0 : index
      %94 = vector.load %arg10[%c2_78, %c1_79, %c0_80] : memref<18x18x128xf32, #tpu.memory_space<vmem>>, vector<16x16x128xf32>
      %95 = arith.truncf %94 : vector<16x16x128xf32> to vector<16x16x128xbf16>
      %96 = vector.shape_cast %95 : vector<16x16x128xbf16> to vector<256x128xbf16>
      %c2_81 = arith.constant 2 : index
      %c1_82 = arith.constant 1 : index
      %c0_83 = arith.constant 0 : index
      %c0_84 = arith.constant 0 : index
      %97 = vector.load %arg6[%c2_81, %c1_82, %c0_83, %c0_84] : memref<3x3x128x128xbf16, #tpu.memory_space<vmem>>, vector<1x1x128x128xbf16>
      %98 = vector.shape_cast %97 : vector<1x1x128x128xbf16> to vector<128x128xbf16>
      %cst_85 = arith.constant dense<0.000000e+00> : vector<256x128xf32>
      %99 = tpu.matmul %96, %98, %cst_85 {dimension_numbers = #tpu.dot_dimension_numbers<[1], [0], [0], [1], [0, 0, 1, 1], [], []>} : vector<256x128xbf16>, vector<128x128xbf16>, vector<256x128xf32> -> vector<256x128xf32>
      %100 = arith.addf %93, %99 : vector<256x128xf32>
      %c2_86 = arith.constant 2 : index
      %c2_87 = arith.constant 2 : index
      %c0_88 = arith.constant 0 : index
      %101 = vector.load %arg10[%c2_86, %c2_87, %c0_88] : memref<18x18x128xf32, #tpu.memory_space<vmem>>, vector<16x16x128xf32>
      %102 = arith.truncf %101 : vector<16x16x128xf32> to vector<16x16x128xbf16>
      %103 = vector.shape_cast %102 : vector<16x16x128xbf16> to vector<256x128xbf16>
      %c2_89 = arith.constant 2 : index
      %c2_90 = arith.constant 2 : index
      %c0_91 = arith.constant 0 : index
      %c0_92 = arith.constant 0 : index
      %104 = vector.load %arg6[%c2_89, %c2_90, %c0_91, %c0_92] : memref<3x3x128x128xbf16, #tpu.memory_space<vmem>>, vector<1x1x128x128xbf16>
      %105 = vector.shape_cast %104 : vector<1x1x128x128xbf16> to vector<128x128xbf16>
      %cst_93 = arith.constant dense<0.000000e+00> : vector<256x128xf32>
      %106 = tpu.matmul %103, %105, %cst_93 {dimension_numbers = #tpu.dot_dimension_numbers<[1], [0], [0], [1], [0, 0, 1, 1], [], []>} : vector<256x128xbf16>, vector<128x128xbf16>, vector<256x128xf32> -> vector<256x128xf32>
      %107 = arith.addf %100, %106 : vector<256x128xf32>
      %108 = vector.shape_cast %107 : vector<256x128xf32> to vector<16x16x128xf32>
      %109 = arith.index_cast %arg1 : i32 to index
      %c0_94 = arith.constant 0 : index
      %c0_95 = arith.constant 0 : index
      %c0_96 = arith.constant 0 : index
      %110 = vector.load %arg12[%109, %c0_94, %c0_95, %c0_96] : memref<2x16x16x128xf32, #tpu.memory_space<vmem>>, vector<1x16x16x128xf32>
      %111 = vector.shape_cast %110 : vector<1x16x16x128xf32> to vector<16x16x128xf32>
      %112 = vector.shape_cast %108 : vector<16x16x128xf32> to vector<1x16x16x128xf32>
      tpu.vector_store %arg12[%109, %c0_94, %c0_95, %c0_96], %112 {strides = array<i32>} : memref<2x16x16x128xf32, #tpu.memory_space<vmem>>, vector<1x16x16x128xf32>,
      %c0_97 = arith.constant 0 : index
      %c0_98 = arith.constant 0 : index
      %113 = vector.load %arg15[%c0_97, %c0_98] : memref<1x128xf32, #tpu.memory_space<vmem>>, vector<1x128xf32>
      %cst_99 = arith.constant dense<0.000000e+00> : vector<128xf32>
      %114 = vector.multi_reduction <add>, %107, %cst_99 [0] : vector<256x128xf32> to vector<128xf32>
      %115 = vector.shape_cast %114 : vector<128xf32> to vector<1x128xf32>
      %116 = arith.addf %113, %115 : vector<1x128xf32>
      %c0_100 = arith.constant 0 : index
      %c0_101 = arith.constant 0 : index
      %117 = vector.load %arg15[%c0_100, %c0_101] : memref<1x128xf32, #tpu.memory_space<vmem>>, vector<1x128xf32>
      tpu.vector_store %arg15[%c0_100, %c0_101], %116 {strides = array<i32>} : memref<1x128xf32, #tpu.memory_space<vmem>>, vector<1x128xf32>,
      %c0_102 = arith.constant 0 : index
      %c0_103 = arith.constant 0 : index
      %118 = vector.load %arg16[%c0_102, %c0_103] : memref<1x128xf32, #tpu.memory_space<vmem>>, vector<1x128xf32>
      %119 = arith.mulf %107, %107 : vector<256x128xf32>
      %cst_104 = arith.constant dense<0.000000e+00> : vector<128xf32>
      %120 = vector.multi_reduction <add>, %119, %cst_104 [0] : vector<256x128xf32> to vector<128xf32>
      %121 = vector.shape_cast %120 : vector<128xf32> to vector<1x128xf32>
      %122 = arith.addf %118, %121 : vector<1x128xf32>
      %c0_105 = arith.constant 0 : index
      %c0_106 = arith.constant 0 : index
      %123 = vector.load %arg16[%c0_105, %c0_106] : memref<1x128xf32, #tpu.memory_space<vmem>>, vector<1x128xf32>
      tpu.vector_store %arg16[%c0_105, %c0_106], %122 {strides = array<i32>} : memref<1x128xf32, #tpu.memory_space<vmem>>, vector<1x128xf32>,
    } else {
    }
    %c2_i32 = arith.constant 2 : i32
    %11 = arith.cmpi eq, %arg0, %c2_i32 : i32
    %12 = arith.extui %11 : i1 to i32
    %c0_i32_5 = arith.constant 0 : i32
    %13 = arith.cmpi ne, %12, %c0_i32_5 : i32
    scf.if %13 {
      %c0 = arith.constant 0 : index
      %c0_6 = arith.constant 0 : index
      %14 = vector.load %arg15[%c0, %c0_6] : memref<1x128xf32, #tpu.memory_space<vmem>>, vector<1x128xf32>
      %cst = arith.constant 0.001953125 : f32
      %15 = vector.broadcast %cst : f32 to vector<1x128xf32>
      %16 = arith.mulf %14, %15 : vector<1x128xf32>
      %c0_7 = arith.constant 0 : index
      %c0_8 = arith.constant 0 : index
      %17 = vector.load %arg16[%c0_7, %c0_8] : memref<1x128xf32, #tpu.memory_space<vmem>>, vector<1x128xf32>
      %cst_9 = arith.constant 0.001953125 : f32
      %18 = vector.broadcast %cst_9 : f32 to vector<1x128xf32>
      %19 = arith.mulf %17, %18 : vector<1x128xf32>
      %20 = arith.mulf %16, %16 : vector<1x128xf32>
      %21 = arith.subf %19, %20 : vector<1x128xf32>
      %cst_10 = arith.constant 0.000000e+00 : f32
      %22 = vector.broadcast %cst_10 : f32 to vector<1x128xf32>
      %23 = arith.maximumf %21, %22 : vector<1x128xf32>
      %c0_11 = arith.constant 0 : index
      %c0_12 = arith.constant 0 : index
      %24 = vector.load %arg7[%c0_11, %c0_12] : memref<1x128xf32, #tpu.memory_space<vmem>>, vector<1x128xf32>
      %cst_13 = arith.constant 9.99999974E-6 : f32
      %25 = vector.broadcast %cst_13 : f32 to vector<1x128xf32>
      %26 = arith.addf %23, %25 : vector<1x128xf32>
      %27 = math.rsqrt %26 : vector<1x128xf32>
      %28 = arith.mulf %24, %27 : vector<1x128xf32>
      %c0_14 = arith.constant 0 : index
      %c0_15 = arith.constant 0 : index
      %29 = vector.load %arg8[%c0_14, %c0_15] : memref<1x128xf32, #tpu.memory_space<vmem>>, vector<1x128xf32>
      %30 = arith.mulf %16, %28 : vector<1x128xf32>
      %31 = arith.subf %29, %30 : vector<1x128xf32>
      %32 = arith.index_cast %arg1 : i32 to index
      %c0_16 = arith.constant 0 : index
      %c0_17 = arith.constant 0 : index
      %c0_18 = arith.constant 0 : index
      %33 = vector.load %arg12[%32, %c0_16, %c0_17, %c0_18] : memref<2x16x16x128xf32, #tpu.memory_space<vmem>>, vector<1x16x16x128xf32>
      %34 = vector.shape_cast %33 : vector<1x16x16x128xf32> to vector<16x16x128xf32>
      %35 = vector.shape_cast %34 : vector<16x16x128xf32> to vector<256x128xf32>
      %36 = vector.broadcast %28 : vector<1x128xf32> to vector<256x128xf32>
      %37 = arith.mulf %35, %36 : vector<256x128xf32>
      %38 = vector.broadcast %31 : vector<1x128xf32> to vector<256x128xf32>
      %39 = arith.addf %37, %38 : vector<256x128xf32>
      %cst_19 = arith.constant 0.000000e+00 : f32
      %40 = vector.broadcast %cst_19 : f32 to vector<256x128xf32>
      %41 = arith.maximumf %39, %40 : vector<256x128xf32>
      %42 = vector.shape_cast %41 : vector<256x128xf32> to vector<16x16x128xf32>
      %c0_20 = arith.constant 0 : index
      %c0_21 = arith.constant 0 : index
      %c0_22 = arith.constant 0 : index
      %c0_23 = arith.constant 0 : index
      %43 = vector.load %arg9[%c0_20, %c0_21, %c0_22, %c0_23] : memref<1x16x16x128xf32, #tpu.memory_space<vmem>>, vector<1x16x16x128xf32>
      %44 = vector.shape_cast %43 : vector<1x16x16x128xf32> to vector<16x16x128xf32>
      %45 = vector.shape_cast %42 : vector<16x16x128xf32> to vector<1x16x16x128xf32>
      tpu.vector_store %arg9[%c0_20, %c0_21, %c0_22, %c0_23], %45 {strides = array<i32>} : memref<1x16x16x128xf32, #tpu.memory_space<vmem>>, vector<1x16x16x128xf32>,
    } else {
    }
    return
  }
  func.func @transform_0(%arg0: i32, %arg1: i32) -> (i32, i32, i32, i32) {
    %c0_i32 = arith.constant 0 : i32
    %0 = arith.cmpi eq, %arg0, %c0_i32 : i32
    %c0_i32_0 = arith.constant 0 : i32
    %1 = arith.select %0, %arg1, %c0_i32_0 : i32
    %c0_i32_1 = arith.constant 0 : i32
    %c0_i32_2 = arith.constant 0 : i32
    %c0_i32_3 = arith.constant 0 : i32
    %c0_i32_4 = arith.constant 0 : i32
    return %1, %c0_i32_1, %c0_i32_2, %c0_i32_3 : i32, i32, i32, i32
  }
  func.func @transform_1(%arg0: i32, %arg1: i32) -> (i32, i32, i32, i32) {
    %c0_i32 = arith.constant 0 : i32
    %c0_i32_0 = arith.constant 0 : i32
    %c0_i32_1 = arith.constant 0 : i32
    %c0_i32_2 = arith.constant 0 : i32
    %c0_i32_3 = arith.constant 0 : i32
    return %c0_i32, %c0_i32_0, %c0_i32_1, %c0_i32_2 : i32, i32, i32, i32
  }
  func.func @transform_2(%arg0: i32, %arg1: i32) -> (i32, i32) {
    %c0_i32 = arith.constant 0 : i32
    %c0_i32_0 = arith.constant 0 : i32
    %c0_i32_1 = arith.constant 0 : i32
    return %c0_i32, %c0_i32_0 : i32, i32
  }
  func.func @transform_3(%arg0: i32, %arg1: i32) -> (i32, i32) {
    %c0_i32 = arith.constant 0 : i32
    %c0_i32_0 = arith.constant 0 : i32
    %c0_i32_1 = arith.constant 0 : i32
    return %c0_i32, %c0_i32_0 : i32, i32
  }
  func.func @transform_4(%arg0: i32, %arg1: i32) -> (i32, i32, i32, i32) {
    %c0_i32 = arith.constant 0 : i32
    %c0_i32_0 = arith.constant 0 : i32
    %c0_i32_1 = arith.constant 0 : i32
    %c0_i32_2 = arith.constant 0 : i32
    %c0_i32_3 = arith.constant 0 : i32
    return %c0_i32, %c0_i32_0, %c0_i32_1, %c0_i32_2 : i32, i32, i32, i32
  }
  func.func @transform_5(%arg0: i32, %arg1: i32) -> (i32, i32) {
    %c0_i32 = arith.constant 0 : i32
    %c0_i32_0 = arith.constant 0 : i32
    %c0_i32_1 = arith.constant 0 : i32
    return %c0_i32, %c0_i32_0 : i32, i32
  }
  func.func @transform_6(%arg0: i32, %arg1: i32) -> (i32, i32) {
    %c0_i32 = arith.constant 0 : i32
    %c0_i32_0 = arith.constant 0 : i32
    %c0_i32_1 = arith.constant 0 : i32
    return %c0_i32, %c0_i32_0 : i32, i32
  }
  func.func @transform_7(%arg0: i32, %arg1: i32) -> (i32, i32, i32, i32) {
    %c2_i32 = arith.constant 2 : i32
    %0 = arith.cmpi eq, %arg0, %c2_i32 : i32
    %c0_i32 = arith.constant 0 : i32
    %1 = arith.select %0, %arg1, %c0_i32 : i32
    %c0_i32_0 = arith.constant 0 : i32
    %c0_i32_1 = arith.constant 0 : i32
    %c0_i32_2 = arith.constant 0 : i32
    %c0_i32_3 = arith.constant 0 : i32
    return %1, %c0_i32_0, %c0_i32_1, %c0_i32_2 : i32, i32, i32, i32
  }
}

</mosaic_0001>

<bundles_post_ra>
// kernel: tile.8
= control target key start
LH: loop header
LB: loop body
LE: loop exit
PB: predicated region body
PF: predicated region fallthrough
CT: control target
= control target key end

     0   :  { %s22_s0 = inlined_call_operand.vmem [shape: f32[128], index: 0, kind: input, shape index: {}]   ;;  %s23_s1 = inlined_call_operand.vmem [shape: f32[4,128], index: 1, kind: output, shape index: {}]  }
   0x1   :  { %v4_v0 = vld [vmem:[%s22_s0] ss:$0 sm:$0xff] }
   0x2   :  { %5 = vst [vmem:[%s23_s1] sm:$0xf] %v4_v0 }

// kernel: decoder_block_forward.2
= control target key start
LH: loop header
LB: loop body
LE: loop exit
PB: predicated region body
PF: predicated region fallthrough
CT: control target
= control target key end

     0   :  { %s748_s15 = smov 0   ;;  %s1049_s0 = inlined_call_operand.vmem [shape: f32[2,8,8,8], index: 0, kind: input, shape index: {}]   ;;  %s1050_s1 = inlined_call_operand.vmem [shape: bf16[8,512], index: 1, kind: input, shape index: {}]   ;;  %s1051_s2 = inlined_call_operand.vmem [shape: f32[1,512], index: 2, kind: input, shape index: {}]   ;;  %s1052_s3 = inlined_call_operand.vmem [shape: f32[2,8,2,8,8], index: 3, kind: input, shape index: {}]   ;;  %s1053_s4 = inlined_call_operand.vmem [shape: f32[2,8,2,8,256], index: 4, kind: output, shape index: {}]  }
   0x1 LB: > { %s633_s16 = sadd.s32 4294967295, %s720_s15   ;;  %p637_p0 = scmp.ge.s32.totalorder %s720_s15, 1  ;;  %s720_s15 = sphi %s748_s15, %s14_s15  }
   0x2   : > { %p172_p1 = scmp.lt.s32.totalorder %s720_s15, 3 }
   0x4   : > { %p173_p2 = pnand %p637_p0, %p172_p1 }
   0x5   : > { %p203_p3 = scmp.lt.s32.totalorder (!%p173_p2), %s633_s16, 1  ;;  %s722_s29 = smov (!%p173_p2), 4  }
   0x6   : > { %176 = sbr.rel (%p173_p2) target bundleno = 217 (0xd9), region = 36 }
   0xb   : > { %v235_v0 = vld [vmem:[%s1050_s1] sm:$0xff]  ;;  %v236_v1 = vld [vmem:[%s1050_s1 + $0x8] sm:$0xff]  ;;  %vm290_vm0 = vcmask 1043456   ;;  %s1055_s16 = smov (!%p203_p3, %s633_s16), 1  ;;  %vm277_vm1 = vcmask 64512   ;;  %vm475_vm2 = vcmask 64544  }
   0xc   : > { %v269_v2 = vunpack.c.l.b16 %v235_v0  ;;  %v270_v3 = vunpack.c.h.b16 %v235_v0  ;;  %v271_v4 = vunpack.c.l.b16 %v236_v1  ;;  %v272_v5 = vunpack.c.h.b16 %v236_v1  ;;  %s702_s21 = sshll.u32 %s1055_s16, 6  ;;  %s703_s25 = sshll.u32 %s1055_s16, 7  ;;  %v237_v58 = vld [vmem:[%s1051_s2] sm:$0xf] }
   0xd   : > { %s768_s24 = scalar_lea.vmem %s1049_s0, %s702_s21  ;;  %s776_s28 = scalar_lea.vmem %s1052_s3, %s703_s25  ;;  %v881_v59 = vperm.slane %v237_v58, 0  ;;  %v883_v60 = vperm.slane %v237_v58, 1 }
   0xe   : > { %v273_v6 = vpack.c.b16 %v269_v2, %v269_v2  ;;  %v274_v7 = vpack.c.b16 %v270_v3, %v270_v3  ;;  %v275_v8 = vpack.c.b16 %v271_v4, %v271_v4  ;;  %v276_v9 = vpack.c.b16 %v272_v5, %v272_v5  ;;  %v219_v14 = vld [vmem:[%s768_s24] sm:$0xff]  ;;  %v220_v15 = vld [vmem:[%s768_s24 + $0x8] sm:$0xff]  ;;  %v221_v21 = vld [vmem:[%s768_s24 + $0x10] sm:$0xff]  ;;  %s704_s6 = sshll.u32 %s1055_s16, 8 }
   0xf   : > { %v227_v16 = vpack.c.bf16 %v219_v14, %v219_v14  ;;  %v228_v17 = vpack.c.bf16 %v220_v15, %v220_v15  ;;  %v222_v22 = vld [vmem:[%s768_s24 + $0x18] sm:$0xff]  ;;  %v785_v23 = vld [vmem:[%s776_s28] sm:$0xff]  ;;  %v229_v25 = vpack.c.bf16 %v221_v21, %v221_v21  ;;  %v795_v27 = vld [vmem:[%s776_s28 + $0x10] sm:$0xff]  ;;  %s888_s9 = scalar_lea.vmem %s1053_s4, %s704_s6  ;;  %v894_v2 = vperm.slane %v237_v58, 2 }
  0x10   : > { %v292_v10 = vsel %vm290_vm0, %v273_v6, 0  ;;  %v295_v11 = vsel %vm290_vm0, %v274_v7, 0  ;;  %v298_v12 = vsel %vm290_vm0, %v275_v8, 0  ;;  %v301_v13 = vsel %vm290_vm0, %v276_v9, 0  ;;  %v788_v24 = vld [vmem:[%s776_s28 + $0x20] sm:$0xff]  ;;  %451 = vrot.lane.b32.xlu0 %v785_v23, %s722_s29  ;;  %v224_v32 = vld [vmem:[%s768_s24 + $0x28] sm:$0xff] }
  0x11   : > { %310 = vmatpush.bf16.msra.mxu0 %v292_v10  ;;  %339 = vmatpush.bf16.msra.mxu1 %v295_v11  ;;  %v255_v18 = vunpack.c.l.b16 %v227_v16  ;;  %v256_v19 = vunpack.c.l.b16 %v228_v17  ;;  %v230_v26 = vpack.c.bf16 %v222_v22, %v222_v22  ;;  %v257_v28 = vunpack.c.l.b16 %v229_v25  ;;  %v223_v31 = vld [vmem:[%s768_s24 + $0x20] sm:$0xff]  ;;  %v806_v33 = vld [vmem:[%s776_s28 + $0x30] sm:$0xff]  ;;  %v824_v39 = vld [vmem:[%s776_s28 + $0x18] sm:$0xff] }
  0x12   : > { %368 = vmatpush.bf16.msra.mxu2 %v298_v12  ;;  %397 = vmatpush.bf16.msra.mxu3 %v301_v13  ;;  %v809_v34 = vld [vmem:[%s776_s28 + $0x60] sm:$0xff]  ;;  %v231_v36 = vpack.c.bf16 %v223_v31, %v223_v31  ;;  %v232_v37 = vpack.c.bf16 %v224_v32, %v224_v32  ;;  %v821_v38 = vld [vmem:[%s776_s28 + $0x70] sm:$0xff]  ;;  %v836_v44 = vld [vmem:[%s776_s28 + $0x28] sm:$0xff]  ;;  %v896_v3 = vperm.slane %v237_v58, 3 }
  0x13   : > { %v263_v20 = vpack.c.b16 %v256_v19, %v255_v18  ;;  %455 = vrot.lane.b32.xlu1 %v788_v24, %s722_s29  ;;  %v258_v29 = vunpack.c.l.b16 %v230_v26  ;;  %v816_v35 = vld [vmem:[%s776_s28 + $0x40] sm:$0xff]  ;;  %v827_v42 = vld [vmem:[%s776_s28 + $0x50] sm:$0xff]  ;;  %v839_v45 = vld [vmem:[%s776_s28 + $0x48] sm:$0xff] }
  0x14   : > { %459 = vrot.lane.b32.xlu2 %v816_v35, %s722_s29  ;;  %v259_v40 = vunpack.c.l.b16 %v231_v36  ;;  %v260_v41 = vunpack.c.l.b16 %v232_v37  ;;  %v676_v46 = vld [vmem:[%s776_s28 + $0x8] sm:$0xff]  ;;  %v225_v47 = vld [vmem:[%s768_s24 + $0x30] sm:$0xff]  ;;  %v226_v48 = vld [vmem:[%s768_s24 + $0x38] sm:$0xff] }
  0x15   : > { %644 = vmatmul.msk.bf16.vlgmr.msra.gmra.mxu0 %vm277_vm1, %v263_v20  ;;  %648 = vmatmul.msk.bf16.vlgmr.msra.gmra.mxu1 %vm277_vm1, %v263_v20  ;;  %v264_v30 = vpack.c.b16 %v258_v29, %v257_v28  ;;  %v233_v49 = vpack.c.bf16 %v225_v47, %v225_v47  ;;  %v234_v50 = vpack.c.bf16 %v226_v48, %v226_v48  ;;  %v854_v51 = vld [vmem:[%s776_s28 + $0x58] sm:$0xff]  ;;  %v871_v57 = vld [vmem:[%s776_s28 + $0x68] sm:$0xff] }
  0x16   : > { %652 = vmatmul.msk.bf16.vlgmr.msra.gmra.mxu2 %vm277_vm1, %v263_v20  ;;  %656 = vmatmul.msk.bf16.vlgmr.msra.gmra.mxu3 %vm277_vm1, %v263_v20  ;;  %v265_v43 = vpack.c.b16 %v260_v41, %v259_v40  ;;  %v857_v52 = vld [vmem:[%s776_s28 + $0x78] sm:$0xff] }
  0x17   : > { %v261_v53 = vunpack.c.l.b16 %v233_v49  ;;  %v262_v54 = vunpack.c.l.b16 %v234_v50  ;;  %v860_v55 = vld [vmem:[%s776_s28 + $0x38] sm:$0xff] }
  0x18   : > { %453 = vrot.lane.b32.xlu0 %v795_v27, %s722_s29 }
  0x19   : > { %v266_v56 = vpack.c.b16 %v262_v54, %v261_v53 }
  0x1b   : > { %457 = vrot.lane.b32.xlu1 %v806_v33, %s722_s29 }
  0x1c   : > { %461 = vrot.lane.b32.xlu2 %v827_v42, %s722_s29 }
  0x20   : > { %463 = vrot.lane.b32.xlu0 %v809_v34, %s722_s29 }
  0x23   : > { %465 = vrot.lane.b32.xlu1 %v821_v38, %s722_s29 }
  0x24   : > { %526 = vrot.lane.b32.xlu2 %v676_v46, %s722_s29 }
  0x25   : > { %645 = vmatmul.msk.bf16.gmra.mxu0 %vm277_vm1, %v264_v30  ;;  %649 = vmatmul.msk.bf16.gmra.mxu1 %vm277_vm1, %v264_v30 }
  0x26   : > { %653 = vmatmul.msk.bf16.gmra.mxu2 %vm277_vm1, %v264_v30  ;;  %657 = vmatmul.msk.bf16.gmra.mxu3 %vm277_vm1, %v264_v30 }
  0x28   : > { %528 = vrot.lane.b32.xlu0 %v824_v39, %s722_s29 }
  0x2b   : > { %530 = vrot.lane.b32.xlu1 %v836_v44, %s722_s29 }
  0x2c   : > { %532 = vrot.lane.b32.xlu2 %v860_v55, %s722_s29 }
  0x30   : > { %534 = vrot.lane.b32.xlu0 %v839_v45, %s722_s29 }
  0x33   : > { %536 = vrot.lane.b32.xlu1 %v854_v51, %s722_s29 }
  0x34   : > { %538 = vrot.lane.b32.xlu2 %v871_v57, %s722_s29 }
  0x35   : > { %646 = vmatmul.msk.bf16.gmra.mxu0 %vm277_vm1, %v265_v43  ;;  %650 = vmatmul.msk.bf16.gmra.mxu1 %vm277_vm1, %v265_v43 }
  0x36   : > { %654 = vmatmul.msk.bf16.gmra.mxu2 %vm277_vm1, %v265_v43  ;;  %658 = vmatmul.msk.bf16.gmra.mxu3 %vm277_vm1, %v265_v43 }
  0x38   : > { %540 = vrot.lane.b32.xlu0 %v857_v52, %s722_s29 }
  0x45   : > { %647 = vmatmul.msk.bf16.gmra.mxu0 %vm277_vm1, %v266_v56  ;;  %651 = vmatmul.msk.bf16.gmra.mxu1 %vm277_vm1, %v266_v56 }
  0x46   : > { %655 = vmatmul.msk.bf16.gmra.mxu2 %vm277_vm1, %v266_v56  ;;  %659 = vmatmul.msk.bf16.gmra.mxu3 %vm277_vm1, %v266_v56 }
  0x6e   : > { %v898_v4 = vpop.permute.xlu2 %459 }
  0x76   : > { %v914_v14 = vpop.permute.xlu2 %461 }
  0x7e   : > { %v527_v26 = vpop.permute.xlu2 %526 }
  0x82   : > { %v452_v61 = vpop.permute.xlu0 %451 }
  0x85   : > { %v456_v15 = vpop.permute.xlu1 %455 }
  0x86   : > { %v533_v50 = vpop.permute.xlu2 %532 }
  0x8a   : > { %v454_v13 = vpop.permute.xlu0 %453 }
  0x8d   : > { %v458_v37 = vpop.permute.xlu1 %457 }
  0x92   : > { %v312_v62 = vpop.f32.mrf.mxu0  ;;  %v341_v63 = vpop.f32.mrf.mxu1 }
  0x93   : > { %v313_v0 = vadd.f32 %v312_v62, %v881_v59  ;;  %v342_v1 = vadd.f32 %v341_v63, %v883_v60  ;;  %v931_v25 = vpop.permute.xlu0 %463 }
  0x95   : > { %419 = vst [vmem:[%s888_s9] sm:$0xff] %v313_v0  ;;  %v466_v49 = vpop.permute.xlu1 %465 }
  0x96   : > { %420 = vst [vmem:[%s888_s9 + $0x8] sm:$0xff] %v342_v1 }
  0x97   : > { %484 = vst.msk [vmem:[%s888_s9 + $0x8] sm:$0xff] %vm475_vm2, %v785_v23 }
  0x98   : > { %476 = vst.msk [vmem:[%s888_s9] sm:$0xff] %vm475_vm2, %v452_v61 }
  0x99   : > { %v370_v5 = vpop.f32.mrf.mxu2  ;;  %v399_v6 = vpop.f32.mrf.mxu3 }
  0x9a   : > { %v371_v7 = vadd.f32 %v370_v5, %v894_v2  ;;  %v400_v8 = vadd.f32 %v399_v6, %v896_v3  ;;  %v314_v9 = vpop.f32.mrf.mxu0  ;;  %v343_v10 = vpop.f32.mrf.mxu1 }
  0x9b   : > { %v315_v11 = vadd.f32 %v314_v9, %v881_v59  ;;  %v344_v12 = vadd.f32 %v343_v10, %v883_v60 }
  0x9c   : > { %660 = vst [vmem:[%s888_s9 + $0x10] sm:$0xff] %v371_v7 }
  0x9d   : > { %661 = vst [vmem:[%s888_s9 + $0x18] sm:$0xff] %v400_v8  ;;  %v531_v63 = vpop.permute.xlu1 %530 }
  0x9e   : > { %692 = vst.msk [vmem:[%s888_s9 + $0x18] sm:$0xff] %vm475_vm2, %v676_v46 }
  0x9f   : > { %421 = vst [vmem:[%s888_s9 + $0x20] sm:$0xff] %v315_v11 }
  0xa0   : > { %422 = vst [vmem:[%s888_s9 + $0x28] sm:$0xff] %v344_v12 }
  0xa1   : > { %485 = vst.msk [vmem:[%s888_s9 + $0x28] sm:$0xff] %vm475_vm2, %v795_v27  ;;  %v372_v16 = vpop.f32.mrf.mxu2  ;;  %v401_v17 = vpop.f32.mrf.mxu3 }
  0xa2   : > { %v373_v18 = vadd.f32 %v372_v16, %v894_v2  ;;  %v402_v19 = vadd.f32 %v401_v17, %v896_v3  ;;  %v317_v20 = vpop.f32.mrf.mxu0  ;;  %v346_v21 = vpop.f32.mrf.mxu1  ;;  %477 = vst.msk [vmem:[%s888_s9 + $0x20] sm:$0xff] %vm475_vm2, %v454_v13 }
  0xa3   : > { %v318_v22 = vadd.f32 %v317_v20, %v881_v59  ;;  %v347_v23 = vadd.f32 %v346_v21, %v883_v60  ;;  %684 = vst.msk [vmem:[%s888_s9 + $0x10] sm:$0xff] %vm475_vm2, %v527_v26 }
  0xa4   : > { %662 = vst [vmem:[%s888_s9 + $0x30] sm:$0xff] %v373_v18 }
  0xa5   : > { %663 = vst [vmem:[%s888_s9 + $0x38] sm:$0xff] %v402_v19 }
  0xa6   : > { %693 = vst.msk [vmem:[%s888_s9 + $0x38] sm:$0xff] %vm475_vm2, %v824_v39  ;;  %v529_v39 = vpop.permute.xlu0 %528 }
  0xa7   : > { %423 = vst [vmem:[%s888_s9 + $0x40] sm:$0xff] %v318_v22 }
  0xa8   : > { %424 = vst [vmem:[%s888_s9 + $0x48] sm:$0xff] %v347_v23 }
  0xa9   : > { %486 = vst.msk [vmem:[%s888_s9 + $0x48] sm:$0xff] %vm475_vm2, %v788_v24  ;;  %v375_v27 = vpop.f32.mrf.mxu2  ;;  %v404_v28 = vpop.f32.mrf.mxu3 }
  0xaa   : > { %v376_v29 = vadd.f32 %v375_v27, %v894_v2  ;;  %v405_v30 = vadd.f32 %v404_v28, %v896_v3  ;;  %v319_v31 = vpop.f32.mrf.mxu0  ;;  %v348_v32 = vpop.f32.mrf.mxu1  ;;  %478 = vst.msk [vmem:[%s888_s9 + $0x40] sm:$0xff] %vm475_vm2, %v456_v15 }
  0xab   : > { %v320_v36 = vadd.f32 %v319_v31, %v881_v59  ;;  %v349_v24 = vadd.f32 %v348_v32, %v883_v60  ;;  %685 = vst.msk [vmem:[%s888_s9 + $0x30] sm:$0xff] %vm475_vm2, %v529_v39 }
  0xac   : > { %664 = vst [vmem:[%s888_s9 + $0x50] sm:$0xff] %v376_v29 }
  0xad   : > { %665 = vst [vmem:[%s888_s9 + $0x58] sm:$0xff] %v405_v30 }
  0xae   : > { %694 = vst.msk [vmem:[%s888_s9 + $0x58] sm:$0xff] %vm475_vm2, %v836_v44  ;;  %v535_v8 = vpop.permute.xlu0 %534 }
  0xaf   : > { %425 = vst [vmem:[%s888_s9 + $0x60] sm:$0xff] %v320_v36 }
  0xb0   : > { %426 = vst [vmem:[%s888_s9 + $0x68] sm:$0xff] %v349_v24 }
  0xb1   : > { %487 = vst.msk [vmem:[%s888_s9 + $0x68] sm:$0xff] %vm475_vm2, %v806_v33  ;;  %v377_v40 = vpop.f32.mrf.mxu2  ;;  %v406_v41 = vpop.f32.mrf.mxu3 }
  0xb2   : > { %v378_v43 = vadd.f32 %v377_v40, %v894_v2  ;;  %v407_v46 = vadd.f32 %v406_v41, %v896_v3  ;;  %v322_v47 = vpop.f32.mrf.mxu0  ;;  %v351_v44 = vpop.f32.mrf.mxu1  ;;  %479 = vst.msk [vmem:[%s888_s9 + $0x60] sm:$0xff] %vm475_vm2, %v458_v37 }
  0xb3   : > { %v323_v48 = vadd.f32 %v322_v47, %v881_v59  ;;  %v352_v33 = vadd.f32 %v351_v44, %v883_v60  ;;  %686 = vst.msk [vmem:[%s888_s9 + $0x50] sm:$0xff] %vm475_vm2, %v531_v63 }
  0xb4   : > { %666 = vst [vmem:[%s888_s9 + $0x70] sm:$0xff] %v378_v43 }
  0xb5   : > { %667 = vst [vmem:[%s888_s9 + $0x78] sm:$0xff] %v407_v46 }
  0xb6   : > { %695 = vst.msk [vmem:[%s888_s9 + $0x78] sm:$0xff] %vm475_vm2, %v860_v55  ;;  %v541_v18 = vpop.permute.xlu0 %540 }
  0xb7   : > { %427 = vst [vmem:[%s888_s9 + $0x80] sm:$0xff] %v323_v48 }
  0xb8   : > { %428 = vst [vmem:[%s888_s9 + $0x88] sm:$0xff] %v352_v33 }
  0xb9   : > { %488 = vst.msk [vmem:[%s888_s9 + $0x88] sm:$0xff] %vm475_vm2, %v816_v35  ;;  %v380_v53 = vpop.f32.mrf.mxu2  ;;  %v409_v54 = vpop.f32.mrf.mxu3 }
  0xba   : > { %480 = vst.msk [vmem:[%s888_s9 + $0x80] sm:$0xff] %vm475_vm2, %v898_v4  ;;  %v381_v56 = vadd.f32 %v380_v53, %v894_v2  ;;  %v410_v55 = vadd.f32 %v409_v54, %v896_v3  ;;  %v324_v58 = vpop.f32.mrf.mxu0  ;;  %v353_v61 = vpop.f32.mrf.mxu1 }
  0xbb   : > { %v325_v62 = vadd.f32 %v324_v58, %v881_v59  ;;  %687 = vst.msk [vmem:[%s888_s9 + $0x70] sm:$0xff] %vm475_vm2, %v533_v50  ;;  %v354_v35 = vadd.f32 %v353_v61, %v883_v60 }
  0xbc   : > { %668 = vst [vmem:[%s888_s9 + $0x90] sm:$0xff] %v381_v56 }
  0xbd   : > { %669 = vst [vmem:[%s888_s9 + $0x98] sm:$0xff] %v410_v55 }
  0xbe   : > { %696 = vst.msk [vmem:[%s888_s9 + $0x98] sm:$0xff] %vm475_vm2, %v839_v45 }
  0xbf   : > { %429 = vst [vmem:[%s888_s9 + $0xa0] sm:$0xff] %v325_v62 }
  0xc0   : > { %430 = vst [vmem:[%s888_s9 + $0xa8] sm:$0xff] %v354_v35 }
  0xc1   : > { %489 = vst.msk [vmem:[%s888_s9 + $0xa8] sm:$0xff] %vm475_vm2, %v827_v42  ;;  %v382_v0 = vpop.f32.mrf.mxu2  ;;  %v411_v1 = vpop.f32.mrf.mxu3 }
  0xc2   : > { %481 = vst.msk [vmem:[%s888_s9 + $0xa0] sm:$0xff] %vm475_vm2, %v914_v14  ;;  %v383_v4 = vadd.f32 %v382_v0, %v894_v2  ;;  %v412_v45 = vadd.f32 %v411_v1, %v896_v3  ;;  %v327_v5 = vpop.f32.mrf.mxu0  ;;  %v356_v6 = vpop.f32.mrf.mxu1 }
  0xc3   : > { %v328_v7 = vadd.f32 %v327_v5, %v881_v59  ;;  %v357_v42 = vadd.f32 %v356_v6, %v883_v60  ;;  %688 = vst.msk [vmem:[%s888_s9 + $0x90] sm:$0xff] %vm475_vm2, %v535_v8 }
  0xc4   : > { %670 = vst [vmem:[%s888_s9 + $0xb0] sm:$0xff] %v383_v4 }
  0xc5   : > { %671 = vst [vmem:[%s888_s9 + $0xb8] sm:$0xff] %v412_v45 }
  0xc6   : > { %697 = vst.msk [vmem:[%s888_s9 + $0xb8] sm:$0xff] %vm475_vm2, %v854_v51 }
  0xc7   : > { %431 = vst [vmem:[%s888_s9 + $0xc0] sm:$0xff] %v328_v7 }
  0xc8   : > { %482 = vst.msk [vmem:[%s888_s9 + $0xc0] sm:$0xff] %vm475_vm2, %v931_v25 }
  0xc9   : > { %432 = vst [vmem:[%s888_s9 + $0xc8] sm:$0xff] %v357_v42  ;;  %v385_v9 = vpop.f32.mrf.mxu2  ;;  %v414_v10 = vpop.f32.mrf.mxu3 }
  0xca   : > { %490 = vst.msk [vmem:[%s888_s9 + $0xc8] sm:$0xff] %vm475_vm2, %v809_v34  ;;  %v386_v11 = vadd.f32 %v385_v9, %v894_v2  ;;  %v415_v51 = vadd.f32 %v414_v10, %v896_v3  ;;  %v329_v12 = vpop.f32.mrf.mxu0  ;;  %v358_v13 = vpop.f32.mrf.mxu1 }
  0xcb   : > { %v330_v14 = vadd.f32 %v329_v12, %v881_v59  ;;  %v359_v15 = vadd.f32 %v358_v13, %v883_v60  ;;  %v539_v34 = vpop.permute.xlu2 %538 }
  0xcc   : > { %672 = vst [vmem:[%s888_s9 + $0xd0] sm:$0xff] %v386_v11 }
  0xcd   : > { %673 = vst [vmem:[%s888_s9 + $0xd8] sm:$0xff] %v415_v51 }
  0xce   : > { %698 = vst.msk [vmem:[%s888_s9 + $0xd8] sm:$0xff] %vm475_vm2, %v871_v57  ;;  %v537_v57 = vpop.permute.xlu1 %536 }
  0xcf   : > { %433 = vst [vmem:[%s888_s9 + $0xe0] sm:$0xff] %v330_v14 }
  0xd0   : > { %483 = vst.msk [vmem:[%s888_s9 + $0xe0] sm:$0xff] %vm475_vm2, %v466_v49 }
  0xd1   : > { %434 = vst [vmem:[%s888_s9 + $0xe8] sm:$0xff] %v359_v15  ;;  %v387_v59 = vpop.f32.mrf.mxu2  ;;  %v416_v16 = vpop.f32.mrf.mxu3 }
  0xd2   : > { %491 = vst.msk [vmem:[%s888_s9 + $0xe8] sm:$0xff] %vm475_vm2, %v821_v38  ;;  %v388_v17 = vadd.f32 %v387_v59, %v894_v2  ;;  %v417_v60 = vadd.f32 %v416_v16, %v896_v3 }
  0xd3   : > { %690 = vst.msk [vmem:[%s888_s9 + $0xd0] sm:$0xff] %vm475_vm2, %v539_v34 }
  0xd4   : > { %674 = vst [vmem:[%s888_s9 + $0xf0] sm:$0xff] %v388_v17 }
  0xd5   : > { %675 = vst [vmem:[%s888_s9 + $0xf8] sm:$0xff] %v417_v60 }
  0xd6   : > { %699 = vst.msk [vmem:[%s888_s9 + $0xf8] sm:$0xff] %vm475_vm2, %v857_v52 }
  0xd7   : > { %689 = vst.msk [vmem:[%s888_s9 + $0xb0] sm:$0xff] %vm475_vm2, %v537_v57 }
  0xd8   : > { %691 = vst.msk [vmem:[%s888_s9 + $0xf0] sm:$0xff] %vm475_vm2, %v541_v18 }
  0xd9 PF: > { %s14_s15 = sadd.s32 1, %s720_s15  }
  0xda   : > { %p11_p4 = scmp.ge.s32.totalorder %s14_s15, 4  }
  0xdc   :  { %13 = sbr.rel (!%p11_p4) target bundleno = 1 (0x1), region = 71 }

// kernel: decoder_block_forward.3
= control target key start
LH: loop header
LB: loop body
LE: loop exit
PB: predicated region body
PF: predicated region fallthrough
CT: control target
= control target key end

     0   :  { %s8479_s24 = smov 0   ;;  %s8481_s25 = smov 0   ;;  %s10021_s0 = inlined_call_operand.vmem [shape: f32[2,16,16,128], index: 0, kind: input, shape index: {}]   ;;  %s10022_s1 = inlined_call_operand.vmem [shape: bf16[3,3,128,128], index: 1, kind: input, shape index: {}]   ;;  %s10023_s2 = inlined_call_operand.vmem [shape: f32[1,128], index: 2, kind: input, shape index: {}]   ;;  %s10024_s3 = inlined_call_operand.vmem [shape: f32[1,128], index: 3, kind: input, shape index: {}]   ;;  %s10025_s4 = inlined_call_operand.vmem [shape: bf16[3,3,128,128], index: 4, kind: input, shape index: {}]   ;;  %s10026_s5 = inlined_call_operand.vmem [shape: f32[1,128], index: 5, kind: input, shape index: {}]   ;;  %s10027_s6 = inlined_call_operand.vmem [shape: f32[1,128], index: 6, kind: input, shape index: {}]   ;;  %s10028_s7 = inlined_call_operand.vmem [shape: f32[2,16,16,128], index: 7, kind: output, shape index: {}]  }
   0x1   :  { %s8483_s26 = smov 0   ;;  %s8485_s27 = smov 0  }
   0x2   :  { %s8487_s28 = smov 0  }
   0x3 LB: > { %s26_s29 = sadd.s32 1, %s8428_s26  ;;  %s29_s30 = sadd.s32 1, %s8432_s27  ;;  %s8436_s28 = sphi %s8487_s28, %s17_s28   ;;  %s8432_s27 = sphi %s8485_s27, %s10032_s27   ;;  %s8428_s26 = sphi %s8483_s26, %s10031_s26   ;;  %s8424_s25 = sphi %s8481_s25, %s10030_s25   ;;  %s8420_s24 = sphi %s8479_s24, %s10029_s24  }
   0x4   : > { %p27_p0 = scmp.ge.s32.totalorder %s26_s29, 2  ;;  %p7314_p1 = scmp.ge.s32.totalorder %s8436_s28, 1 }
   0x5   : > { %p261_p2 = scmp.lt.s32.totalorder %s8436_s28, 7 }
   0x6   : > { %s10034_s29 = smov (%p27_p0, %s26_s29), 0  ;;  %s10036_s30 = smov (!%p27_p0, %s29_s30), %s8432_s27 }
   0x7   : > { %p262_p3 = pnand %p7314_p1, %p261_p2  ;;  %p31_p4 = scmp.ge.s32.totalorder %s10036_s30, 3 }
   0x8   : > { %p297_p5 = scmp.eq.s32.totalorder (!%p262_p3), %s8424_s25, 0  ;;  %p306_p6 = scmp.eq.s32.totalorder (!%p262_p3), %s8424_s25, 2 }
   0x9   : > { %s10038_s30 = smov (%p31_p4, %s10036_s30), 0  ;;  %265 = sbr.rel (%p262_p3) target bundleno = 1706 (0x6aa), region = 48 }
   0xa   : > { %p316_p7 = scmp.eq.s32.totalorder (!%p262_p3), %s8420_s24, 0 }
   0xc   : > { %p317_p9 = pnand (!%p262_p3), %p316_p7, %p297_p5 }
   0xe   : > { %s298_s8 = scalar_select %p297_p5, %s8420_s24, 0 }
   0xf   : > { %s307_s9 = scalar_select %p306_p6, %s8420_s24, 0 }
  0x10   : > { %p299_p8 = scmp.lt.s32.totalorder %s298_s8, 1 }
  0x11   : > { %p308_p10 = scmp.lt.s32.totalorder %s307_s9, 1  ;;  %320 = sbr.rel (%p317_p9) target bundleno = 81 (0x51), region = 52 }
  0x12   : > { %s10040_s8 = smov (!%p299_p8, %s298_s8), 1 }
  0x13   : > { %s10042_s9 = smov (!%p308_p10, %s307_s9), 1  ;;  %s8159_s10 = sshll.u32 %s10040_s8, 8 }
  0x14   : > { %s8521_s13 = scalar_lea.vmem %s10021_s0, %s8159_s10  ;;  %s8160_s14 = sshll.u32 %s10042_s9, 8 }
  0x15   : > { %s8526_s17 = scalar_lea.vmem %s10028_s7, %s8160_s14 }
  0x16   : > { %v8438_v0 = vmov 0.0  }
  0x17   : > { %321 = vst [vmem:[#allocation2] sm:$0xff] %v8438_v0 }
  0x18   : > { %322 = vst [vmem:[#allocation2 + $0x8] sm:$0xff] %v8438_v0 }
  0x19   : > { %323 = vst [vmem:[#allocation2 + $0x10] sm:$0x3] %v8438_v0 }
  0x1a   : > { %324 = vst [vmem:[#allocation2 + $0x18] sm:$0xff] %v8438_v0 }
  0x1b   : > { %325 = vst [vmem:[#allocation2 + $0x20] sm:$0xff] %v8438_v0 }
  0x1c   : > { %326 = vst [vmem:[#allocation2 + $0x28] sm:$0x3] %v8438_v0 }
  0x1d   : > { %327 = vst [vmem:[#allocation2 + $0x30] sm:$0xff] %v8438_v0 }
  0x1e   : > { %328 = vst [vmem:[#allocation2 + $0x38] sm:$0xff] %v8438_v0 }
  0x1f   : > { %329 = vst [vmem:[#allocation2 + $0x40] sm:$0x3] %v8438_v0 }
  0x20   : > { %330 = vst [vmem:[#allocation2 + $0x48] sm:$0xff] %v8438_v0 }
  0x21   : > { %331 = vst [vmem:[#allocation2 + $0x50] sm:$0xff] %v8438_v0 }
  0x22   : > { %332 = vst [vmem:[#allocation2 + $0x58] sm:$0x3] %v8438_v0 }
  0x23   : > { %333 = vst [vmem:[#allocation2 + $0x60] sm:$0xff] %v8438_v0 }
  0x24   : > { %334 = vst [vmem:[#allocation2 + $0x68] sm:$0xff] %v8438_v0 }
  0x25   : > { %335 = vst [vmem:[#allocation2 + $0x70] sm:$0x3] %v8438_v0 }
  0x26   : > { %336 = vst [vmem:[#allocation2 + $0x78] sm:$0xff] %v8438_v0 }
  0x27   : > { %337 = vst [vmem:[#allocation2 + $0x80] sm:$0xff] %v8438_v0 }
  0x28   : > { %338 = vst [vmem:[#allocation2 + $0x88] sm:$0x3] %v8438_v0 }
  0x29   : > { %339 = vst [vmem:[#allocation2 + $0x90] sm:$0xff] %v8438_v0 }
  0x2a   : > { %340 = vst [vmem:[#allocation2 + $0x98] sm:$0xff] %v8438_v0 }
  0x2b   : > { %341 = vst [vmem:[#allocation2 + $0xa0] sm:$0x3] %v8438_v0 }
  0x2c   : > { %342 = vst [vmem:[#allocation2 + $0xa8] sm:$0xff] %v8438_v0 }
  0x2d   : > { %343 = vst [vmem:[#allocation2 + $0xb0] sm:$0xff] %v8438_v0 }
  0x2e   : > { %344 = vst [vmem:[#allocation2 + $0xb8] sm:$0x3] %v8438_v0 }
  0x2f   : > { %345 = vst [vmem:[#allocation2 + $0xc0] sm:$0xff] %v8438_v0 }
  0x30   : > { %346 = vst [vmem:[#allocation2 + $0xc8] sm:$0xff] %v8438_v0 }
  0x31   : > { %347 = vst [vmem:[#allocation2 + $0xd0] sm:$0x3] %v8438_v0 }
  0x32   : > { %348 = vst [vmem:[#allocation2 + $0xd8] sm:$0xff] %v8438_v0 }
  0x33   : > { %349 = vst [vmem:[#allocation2 + $0xe0] sm:$0xff] %v8438_v0 }
  0x34   : > { %350 = vst [vmem:[#allocation2 + $0xe8] sm:$0x3] %v8438_v0 }
  0x35   : > { %351 = vst [vmem:[#allocation2 + $0xf0] sm:$0xff] %v8438_v0 }
  0x36   : > { %352 = vst [vmem:[#allocation2 + $0xf8] sm:$0xff] %v8438_v0 }
  0x37   : > { %353 = vst [vmem:[#allocation2 + $0x100] sm:$0x3] %v8438_v0 }
  0x38   : > { %354 = vst [vmem:[#allocation2 + $0x108] sm:$0xff] %v8438_v0 }
  0x39   : > { %355 = vst [vmem:[#allocation2 + $0x110] sm:$0xff] %v8438_v0 }
  0x3a   : > { %356 = vst [vmem:[#allocation2 + $0x118] sm:$0x3] %v8438_v0 }
  0x3b   : > { %357 = vst [vmem:[#allocation2 + $0x120] sm:$0xff] %v8438_v0 }
  0x3c   : > { %358 = vst [vmem:[#allocation2 + $0x128] sm:$0xff] %v8438_v0 }
  0x3d   : > { %359 = vst [vmem:[#allocation2 + $0x130] sm:$0x3] %v8438_v0 }
  0x3e   : > { %360 = vst [vmem:[#allocation2 + $0x138] sm:$0xff] %v8438_v0 }
  0x3f   : > { %361 = vst [vmem:[#allocation2 + $0x140] sm:$0xff] %v8438_v0 }
  0x40   : > { %362 = vst [vmem:[#allocation2 + $0x148] sm:$0x3] %v8438_v0 }
  0x41   : > { %363 = vst [vmem:[#allocation2 + $0x150] sm:$0xff] %v8438_v0 }
  0x42   : > { %364 = vst [vmem:[#allocation2 + $0x158] sm:$0xff] %v8438_v0 }
  0x43   : > { %365 = vst [vmem:[#allocation2 + $0x160] sm:$0x3] %v8438_v0 }
  0x44   : > { %366 = vst [vmem:[#allocation2 + $0x168] sm:$0xff] %v8438_v0 }
  0x45   : > { %367 = vst [vmem:[#allocation2 + $0x170] sm:$0xff] %v8438_v0 }
  0x46   : > { %368 = vst [vmem:[#allocation2 + $0x178] sm:$0x3] %v8438_v0 }
  0x47   : > { %369 = vst [vmem:[#allocation2 + $0x180] sm:$0xff] %v8438_v0 }
  0x48   : > { %370 = vst [vmem:[#allocation2 + $0x188] sm:$0xff] %v8438_v0 }
  0x49   : > { %371 = vst [vmem:[#allocation2 + $0x190] sm:$0x3] %v8438_v0 }
  0x4a   : > { %372 = vst [vmem:[#allocation2 + $0x198] sm:$0xff] %v8438_v0 }
  0x4b   : > { %373 = vst [vmem:[#allocation2 + $0x1a0] sm:$0xff] %v8438_v0 }
  0x4c   : > { %374 = vst [vmem:[#allocation2 + $0x1a8] sm:$0x3] %v8438_v0 }
  0x4d   : > { %375 = vst [vmem:[#allocation5] sm:$0x1] %v8438_v0 }
  0x4e   : > { %376 = vst [vmem:[#allocation6] sm:$0x1] %v8438_v0 }
  0x4f   : > { %377 = vst [vmem:[#allocation7] sm:$0x1] %v8438_v0 }
  0x50   : > { %378 = vst [vmem:[#allocation8] sm:$0x1] %v8438_v0 }
  0x51 PF: > { %p7319_p11 = scmp.ne.s32.totalorder %s8424_s25, 0 }
  0x52   : > { %s7736_s21 = sshll.u32 (!%p7319_p11), %s8420_s24, 8 }
  0x53   : > { %381 = sbr.rel (%p7319_p11) target bundleno = 845 (0x34d), region = 56  ;;  %s9122_s22 = scalar_lea.vmem (!%p7319_p11), [#allocation3], %s7736_s21 }
  0x58   : > { %v8176_v1 = vld [vmem:[%s10022_s1 + $0x78] sm:$0xff]  ;;  %v8175_v2 = vld [vmem:[%s10022_s1 + $0x70] sm:$0xff]  ;;  %v8174_v7 = vld [vmem:[%s10022_s1 + $0x68] sm:$0xff] }
  0x59   : > { %8305 = vmatpush.bf16.msra.mxu1 %v8176_v1  ;;  %8306 = vmatpush.bf16.msra.mxu2 %v8176_v1  ;;  %v8536_v3 = vld [vmem:[%s8521_s13 + $0x30] sm:$0xff]  ;;  %v8539_v4 = vld [vmem:[%s8521_s13 + $0x38] sm:$0xff]  ;;  %v8560_v10 = vld [vmem:[%s8521_s13 + $0x40] sm:$0xff] }
  0x5a   : > { %8307 = vmatpush.bf16.msra.mxu3 %v8176_v1  ;;  %752 = vmatpush.bf16.msra.mxu0 %v8176_v1  ;;  %421 = vst [vmem:[#allocation2 + $0x61] sm:$0xff] %v8536_v3  ;;  %v8544_v5 = vld [vmem:[%s8521_s13 + $0x70] sm:$0xff]  ;;  %v8547_v6 = vld [vmem:[%s8521_s13 + $0x78] sm:$0xff]  ;;  %v8563_v11 = vld [vmem:[%s8521_s13 + $0x48] sm:$0xff]  ;;  %v567_v23 = vpack.c.bf16 %v8536_v3, %v8536_v3  ;;  %v568_v25 = vpack.c.bf16 %v8539_v4, %v8539_v4 }
  0x5b   : > { %422 = vst [vmem:[#allocation2 + $0x69] sm:$0xff] %v8539_v4  ;;  %v8555_v8 = vld [vmem:[%s8521_s13 + $0xb0] sm:$0xff]  ;;  %v405_v9 = vld [vmem:[%s8521_s13 + $0xb8] sm:$0xff]  ;;  %v8173_v12 = vld [vmem:[%s10022_s1 + $0x60] sm:$0xff]  ;;  %v575_v26 = vpack.c.bf16 %v8544_v5, %v8544_v5  ;;  %v576_v27 = vpack.c.bf16 %v8547_v6, %v8547_v6  ;;  %v569_v0 = vpack.c.bf16 %v8560_v10, %v8560_v10  ;;  %v570_v1 = vpack.c.bf16 %v8563_v11, %v8563_v11 }
  0x5c   : > { %429 = vst [vmem:[#allocation2 + $0xc1] sm:$0xff] %v8544_v5  ;;  %v8571_v13 = vld [vmem:[%s8521_s13 + $0x80] sm:$0xff]  ;;  %v8574_v14 = vld [vmem:[%s8521_s13 + $0x88] sm:$0xff]  ;;  %v8172_v16 = vld [vmem:[%s10022_s1 + $0x58] sm:$0xff]  ;;  %v583_v28 = vpack.c.bf16 %v8555_v8, %v8555_v8  ;;  %v584_v31 = vpack.c.bf16 %v405_v9, %v405_v9  ;;  %v648_v34 = vunpack.c.l.b16 %v567_v23  ;;  %v649_v35 = vunpack.c.l.b16 %v568_v25 }
  0x5d   : > { %8308 = vmatpush.bf16.msra.mxu1 %v8175_v2  ;;  %8309 = vmatpush.bf16.msra.mxu2 %v8175_v2  ;;  %430 = vst [vmem:[#allocation2 + $0xc9] sm:$0xff] %v8547_v6  ;;  %v8579_v15 = vld [vmem:[%s8521_s13 + $0xc0] sm:$0xff]  ;;  %v8585_v17 = vld [vmem:[%s8521_s13 + $0xc8] sm:$0xff]  ;;  %v8171_v20 = vld [vmem:[%s10022_s1 + $0x50] sm:$0xff]  ;;  %v656_v36 = vunpack.c.l.b16 %v575_v26  ;;  %v657_v37 = vunpack.c.l.b16 %v576_v27  ;;  %v578_v3 = vpack.c.bf16 %v8574_v14, %v8574_v14 }
  0x5e   : > { %8310 = vmatpush.bf16.msra.mxu3 %v8175_v2  ;;  %753 = vmatpush.bf16.msra.mxu0 %v8175_v2  ;;  %437 = vst [vmem:[#allocation2 + $0x121] sm:$0xff] %v8555_v8  ;;  %v8590_v18 = vld [vmem:[%s8521_s13] sm:$0xff]  ;;  %v8593_v19 = vld [vmem:[%s8521_s13 + $0x8] sm:$0xff]  ;;  %v8603_v24 = vld [vmem:[%s8521_s13 + $0x50] sm:$0xff]  ;;  %v664_v39 = vunpack.c.l.b16 %v583_v28  ;;  %v665_v40 = vunpack.c.l.b16 %v584_v31  ;;  %v8637_v47 = vpack.c.b16 %v649_v35, %v648_v34  ;;  %v577_v2 = vpack.c.bf16 %v8571_v13, %v8571_v13 }
  0x5f   : > { %438 = vst [vmem:[#allocation2 + $0x129] sm:$0xff] %v405_v9  ;;  %v527_v21 = vld [vmem:[#allocation2 + $0x1] sm:$0xff]  ;;  %v528_v22 = vld [vmem:[#allocation2 + $0x9] sm:$0xff]  ;;  %v8614_v29 = vld [vmem:[%s8521_s13 + $0x58] sm:$0xff]  ;;  %v680_v48 = vpack.c.b16 %v657_v37, %v656_v36  ;;  %v585_v5 = vpack.c.bf16 %v8579_v15, %v8579_v15  ;;  %v586_v6 = vpack.c.bf16 %v8585_v17, %v8585_v17  ;;  %v562_v8 = vpack.c.bf16 %v8593_v19, %v8593_v19 }
  0x60   : > { %423 = vst [vmem:[#allocation2 + $0x79] sm:$0xff] %v8560_v10  ;;  %v8170_v30 = vld [vmem:[%s10022_s1 + $0x48] sm:$0xff]  ;;  %v559_v32 = vpack.c.bf16 %v527_v21, %v527_v21  ;;  %v560_v33 = vpack.c.bf16 %v528_v22, %v528_v22  ;;  %v8169_v38 = vld [vmem:[%s10022_s1 + $0x40] sm:$0xff]  ;;  %v8625_v43 = vld [vmem:[%s8521_s13 + $0x90] sm:$0xff]  ;;  %v684_v50 = vpack.c.b16 %v665_v40, %v664_v39 }
  0x61   : > { %8311 = vmatpush.bf16.msra.mxu1 %v8174_v7  ;;  %8312 = vmatpush.bf16.msra.mxu2 %v8174_v7  ;;  %424 = vst [vmem:[#allocation2 + $0x81] sm:$0xff] %v8563_v11  ;;  %v8184_v44 = vld [vmem:[%s10022_s1 + $0xb8] sm:$0xff]  ;;  %v8641_v49 = vld [vmem:[%s8521_s13 + $0xd0] sm:$0xff]  ;;  %v8182_v61 = vld [vmem:[%s10022_s1 + $0xa8] sm:$0xff] }
  0x62   : > { %8313 = vmatpush.bf16.msra.mxu3 %v8174_v7  ;;  %754 = vmatpush.bf16.msra.mxu0 %v8174_v7  ;;  %431 = vst [vmem:[#allocation2 + $0xd9] sm:$0xff] %v8571_v13  ;;  %v640_v41 = vunpack.c.l.b16 %v559_v32  ;;  %v641_v42 = vunpack.c.l.b16 %v560_v33  ;;  %v8192_v45 = vld [vmem:[%s10022_s1 + $0xf8] sm:$0xff]  ;;  %v8655_v55 = vld [vmem:[%s8521_s13 + $0x10] sm:$0xff]  ;;  %v8190_v62 = vld [vmem:[%s10022_s1 + $0xe8] sm:$0xff]  ;;  %v561_v7 = vpack.c.bf16 %v8590_v18, %v8590_v18  ;;  %v650_v13 = vunpack.c.l.b16 %v569_v0 }
  0x63   : > { %432 = vst [vmem:[#allocation2 + $0xe1] sm:$0xff] %v8574_v14  ;;  %v8634_v46 = vld [vmem:[%s8521_s13 + $0x98] sm:$0xff]  ;;  %v8183_v56 = vld [vmem:[%s10022_s1 + $0xb0] sm:$0xff]  ;;  %v8682_v63 = vld [vmem:[%s8521_s13 + $0x60] sm:$0xff]  ;;  %v651_v14 = vunpack.c.l.b16 %v570_v1 }
  0x64   : > { %439 = vst [vmem:[#allocation2 + $0x139] sm:$0xff] %v8579_v15  ;;  %v672_v51 = vpack.c.b16 %v641_v42, %v640_v41  ;;  %v8644_v52 = vld [vmem:[%s8521_s13 + $0xd8] sm:$0xff]  ;;  %v8191_v57 = vld [vmem:[%s10022_s1 + $0xf0] sm:$0xff]  ;;  %v8693_v4 = vld [vmem:[%s8521_s13 + $0x68] sm:$0xff]  ;;  %v658_v15 = vunpack.c.l.b16 %v577_v2 }
  0x65   : > { %8314 = vmatpush.bf16.msra.mxu1 %v8173_v12  ;;  %8315 = vmatpush.bf16.msra.mxu2 %v8173_v12  ;;  %440 = vst [vmem:[#allocation2 + $0x141] sm:$0xff] %v8585_v17  ;;  %v8168_v53 = vld [vmem:[%s10022_s1 + $0x38] sm:$0xff]  ;;  %v8167_v59 = vld [vmem:[%s10022_s1 + $0x30] sm:$0xff]  ;;  %v8166_v9 = vld [vmem:[%s10022_s1 + $0x28] sm:$0xff]  ;;  %v666_v17 = vunpack.c.l.b16 %v585_v5  ;;  %v8736_v28 = vpack.c.b16 %v651_v14, %v650_v13  ;;  %v574_v13 = vpack.c.bf16 %v8693_v4, %v8693_v4 }
  0x66   : > { %8316 = vmatpush.bf16.msra.mxu3 %v8173_v12  ;;  %755 = vmatpush.bf16.msra.mxu0 %v8173_v12  ;;  %415 = vst [vmem:[#allocation2 + $0x19] sm:$0xff] %v8590_v18  ;;  %v8200_v54 = vld [vmem:[%s10022_s1 + $0x138] sm:$0xff]  ;;  %v8199_v60 = vld [vmem:[%s10022_s1 + $0x130] sm:$0xff]  ;;  %v8198_v10 = vld [vmem:[%s10022_s1 + $0x128] sm:$0xff]  ;;  %v667_v18 = vunpack.c.l.b16 %v586_v6 }
  0x67   : > { %416 = vst [vmem:[#allocation2 + $0x21] sm:$0xff] %v8593_v19  ;;  %v8664_v58 = vld [vmem:[%s8521_s13 + $0x18] sm:$0xff]  ;;  %v8181_v11 = vld [vmem:[%s10022_s1 + $0xa0] sm:$0xff]  ;;  %v642_v19 = vunpack.c.l.b16 %v561_v7  ;;  %v8733_v27 = vld [vmem:[%s8521_s13 + $0xa8] sm:$0xff] }
  0x68   : > { %425 = vst [vmem:[#allocation2 + $0x91] sm:$0xff] %v8603_v24  ;;  %v8189_v12 = vld [vmem:[%s10022_s1 + $0xe0] sm:$0xff]  ;;  %v8180_v25 = vld [vmem:[%s10022_s1 + $0x98] sm:$0xff]  ;;  %v685_v32 = vpack.c.b16 %v667_v18, %v666_v17  ;;  %v8745_v34 = vld [vmem:[%s8521_s13 + $0xe8] sm:$0xff] }
  0x69   : > { %8317 = vmatpush.bf16.msra.mxu1 %v8172_v16  ;;  %8318 = vmatpush.bf16.msra.mxu2 %v8172_v16  ;;  %426 = vst [vmem:[#allocation2 + $0x99] sm:$0xff] %v8614_v29  ;;  %v8165_v21 = vld [vmem:[%s10022_s1 + $0x20] sm:$0xff]  ;;  %v8188_v26 = vld [vmem:[%s10022_s1 + $0xd8] sm:$0xff]  ;;  %v8187_v39 = vld [vmem:[%s10022_s1 + $0xd0] sm:$0xff]  ;;  %v590_v17 = vpack.c.bf16 %v8745_v34, %v8745_v34 }
  0x6a   : > { %8319 = vmatpush.bf16.msra.mxu3 %v8172_v16  ;;  %756 = vmatpush.bf16.msra.mxu0 %v8172_v16  ;;  %433 = vst [vmem:[#allocation2 + $0xf1] sm:$0xff] %v8625_v43  ;;  %v659_v16 = vunpack.c.l.b16 %v578_v3  ;;  %v8197_v22 = vld [vmem:[%s10022_s1 + $0x120] sm:$0xff]  ;;  %v8164_v35 = vld [vmem:[%s10022_s1 + $0x18] sm:$0xff]  ;;  %v8765_v40 = vld [vmem:[%s8521_s13 + $0x28] sm:$0xff] }
  0x6b   : > { %434 = vst [vmem:[#allocation2 + $0xf9] sm:$0xff] %v8634_v46  ;;  %v8724_v23 = vld [vmem:[%s8521_s13 + $0xa0] sm:$0xff]  ;;  %v8196_v36 = vld [vmem:[%s10022_s1 + $0x118] sm:$0xff]  ;;  %v8163_v41 = vld [vmem:[%s10022_s1 + $0x10] sm:$0xff] }
  0x6c   : > { %441 = vst [vmem:[#allocation2 + $0x151] sm:$0xff] %v8641_v49  ;;  %v8740_v31 = vld [vmem:[%s8521_s13 + $0xe0] sm:$0xff]  ;;  %v8195_v42 = vld [vmem:[%s10022_s1 + $0x110] sm:$0xff]  ;;  %v581_v14 = vpack.c.bf16 %v8724_v23, %v8724_v23 }
  0x6d   : > { %8320 = vmatpush.bf16.msra.mxu1 %v8171_v20  ;;  %8321 = vmatpush.bf16.msra.mxu2 %v8171_v20  ;;  %442 = vst [vmem:[#allocation2 + $0x159] sm:$0xff] %v8644_v52  ;;  %v8756_v37 = vld [vmem:[%s8521_s13 + $0x20] sm:$0xff] }
  0x6e   : > { %8322 = vmatpush.bf16.msra.mxu3 %v8171_v20  ;;  %757 = vmatpush.bf16.msra.mxu0 %v8171_v20  ;;  %417 = vst [vmem:[#allocation2 + $0x31] sm:$0xff] %v8655_v55  ;;  %v643_v20 = vunpack.c.l.b16 %v562_v8  ;;  %v8161_v1 = vld [vmem:[%s10022_s1] sm:$0xff]  ;;  %v8216_v8 = vld [vmem:[%s10022_s1 + $0x1b8] sm:$0xff] }
  0x6f   : > { %418 = vst [vmem:[#allocation2 + $0x39] sm:$0xff] %v8664_v58  ;;  %v8193_v2 = vld [vmem:[%s10022_s1 + $0x100] sm:$0xff] }
  0x70   : > { %427 = vst [vmem:[#allocation2 + $0xa9] sm:$0xff] %v8682_v63  ;;  %v8742_v33 = vpack.c.b16 %v643_v20, %v642_v19  ;;  %v655_v19 = vunpack.c.l.b16 %v574_v13  ;;  %v662_v20 = vunpack.c.l.b16 %v581_v14 }
  0x71   : > { %8323 = vmatpush.bf16.msra.mxu1 %v8170_v30  ;;  %8324 = vmatpush.bf16.msra.mxu2 %v8170_v30  ;;  %428 = vst [vmem:[#allocation2 + $0xb1] sm:$0xff] %v8693_v4  ;;  %v566_v4 = vpack.c.bf16 %v8765_v40, %v8765_v40 }
  0x72   : > { %8325 = vmatpush.bf16.msra.mxu3 %v8170_v30  ;;  %758 = vmatpush.bf16.msra.mxu0 %v8170_v30  ;;  %435 = vst [vmem:[#allocation2 + $0x109] sm:$0xff] %v8724_v23  ;;  %v681_v30 = vpack.c.b16 %v659_v16, %v658_v15  ;;  %v582_v15 = vpack.c.bf16 %v8733_v27, %v8733_v27  ;;  %v671_v23 = vunpack.c.l.b16 %v590_v17 }
  0x73   : > { %436 = vst [vmem:[#allocation2 + $0x111] sm:$0xff] %v8733_v27  ;;  %v589_v16 = vpack.c.bf16 %v8740_v31, %v8740_v31 }
  0x74   : > { %443 = vst [vmem:[#allocation2 + $0x169] sm:$0xff] %v8740_v31 }
  0x75   : > { %8326 = vmatpush.bf16.msra.mxu1 %v8169_v38  ;;  %8327 = vmatpush.bf16.msra.mxu2 %v8169_v38  ;;  %444 = vst [vmem:[#allocation2 + $0x171] sm:$0xff] %v8745_v34  ;;  %v447_v34 = vld [vmem:[#allocation2] sm:$0xff] }
  0x76   : > { %8328 = vmatpush.bf16.msra.mxu3 %v8169_v38  ;;  %759 = vmatpush.bf16.msra.mxu0 %v8169_v38  ;;  %v8179_v38 = vld [vmem:[%s10022_s1 + $0x90] sm:$0xff]  ;;  %419 = vst [vmem:[#allocation2 + $0x49] sm:$0xff] %v8756_v37 }
  0x77   : > { %420 = vst [vmem:[#allocation2 + $0x51] sm:$0xff] %v8765_v40  ;;  %v479_v40 = vpack.c.bf16 %v447_v34, %v447_v34 }
  0x78   : > { %780 = vmatmul.bf16.vlgmr.msra.gmra.mxu1 %v8637_v47  ;;  %800 = vmatmul.bf16.vlgmr.msra.gmra.mxu2 %v680_v48  ;;  %v571_v48 = vpack.c.bf16 %v8603_v24, %v8603_v24  ;;  %v564_v24 = vpack.c.bf16 %v8664_v58, %v8664_v58 }
  0x79   : > { %1299 = vmatpush.bf16.msrb.mxu2 %v8184_v44  ;;  %820 = vmatmul.bf16.vlgmr.msra.gmra.mxu3 %v684_v50  ;;  %v8178_v44 = vld [vmem:[%s10022_s1 + $0x88] sm:$0xff]  ;;  %v572_v50 = vpack.c.bf16 %v8614_v29, %v8614_v29 }
  0x7a   : > { %1645 = vmatpush.bf16.msrb.mxu3 %v8192_v45  ;;  %760 = vmatmul.bf16.vlgmr.msra.gmra.mxu0 %v672_v51  ;;  %v8186_v45 = vld [vmem:[%s10022_s1 + $0xc8] sm:$0xff]  ;;  %v579_v51 = vpack.c.bf16 %v8625_v43, %v8625_v43  ;;  %v645_v0 = vunpack.c.l.b16 %v564_v24 }
  0x7b   : > { %985 = vmatpush.bf16.msrb.mxu1 %v8168_v53  ;;  %1991 = vmatpush.bf16.msrb.mxu0 %v8200_v54  ;;  %v580_v53 = vpack.c.bf16 %v8634_v46, %v8634_v46  ;;  %v587_v54 = vpack.c.bf16 %v8641_v49, %v8641_v49  ;;  %v8162_v29 = vld [vmem:[%s10022_s1 + $0x8] sm:$0xff]  ;;  %v8177_v46 = vld [vmem:[%s10022_s1 + $0x80] sm:$0xff] }
  0x7c   : > { %v8194_v43 = vld [vmem:[%s10022_s1 + $0x108] sm:$0xff]  ;;  %v8185_v49 = vld [vmem:[%s10022_s1 + $0xc0] sm:$0xff]  ;;  %v660_v58 = vunpack.c.l.b16 %v579_v51 }
  0x7d   : > { %1300 = vmatpush.bf16.msrb.mxu2 %v8183_v56  ;;  %v588_v56 = vpack.c.bf16 %v8644_v52, %v8644_v52  ;;  %v652_v52 = vunpack.c.l.b16 %v571_v48  ;;  %v1424_v13 = vld [vmem:[#allocation2 + $0x48] sm:$0xff] }
  0x7e   : > { %1646 = vmatpush.bf16.msrb.mxu3 %v8191_v57  ;;  %v563_v57 = vpack.c.bf16 %v8655_v55, %v8655_v55  ;;  %v653_v55 = vunpack.c.l.b16 %v572_v50  ;;  %v873_v50 = vunpack.c.l.b16 %v479_v40  ;;  %v1425_v14 = vld [vmem:[#allocation2 + $0x50] sm:$0xff]  ;;  %v1456_v17 = vpack.c.bf16 %v1424_v13, %v1424_v13 }
  0x7f   : > { %986 = vmatpush.bf16.msrb.mxu1 %v8167_v59  ;;  %1992 = vmatpush.bf16.msrb.mxu0 %v8199_v60  ;;  %v661_v59 = vunpack.c.l.b16 %v580_v53  ;;  %v668_v60 = vunpack.c.l.b16 %v587_v54 }
  0x80   : > { %v8817_v3 = vpack.c.b16 %v653_v55, %v652_v52  ;;  %v8215_v52 = vld [vmem:[%s10022_s1 + $0x1b0] sm:$0xff] }
  0x81   : > { %1301 = vmatpush.bf16.msrb.mxu2 %v8182_v61  ;;  %v669_v61 = vunpack.c.l.b16 %v588_v56  ;;  %v682_v5 = vpack.c.b16 %v661_v59, %v660_v58  ;;  %v8223_v55 = vld [vmem:[%s10022_s1 + $0x1f0] sm:$0xff] }
  0x82   : > { %1647 = vmatpush.bf16.msrb.mxu3 %v8190_v62  ;;  %v644_v62 = vunpack.c.l.b16 %v563_v57  ;;  %v8207_v58 = vld [vmem:[%s10022_s1 + $0x170] sm:$0xff] }
  0x83   : > { %987 = vmatpush.bf16.msrb.mxu1 %v8166_v9  ;;  %1993 = vmatpush.bf16.msrb.mxu0 %v8198_v10  ;;  %v686_v6 = vpack.c.b16 %v669_v61, %v668_v60  ;;  %v8224_v9 = vld [vmem:[%s10022_s1 + $0x1f8] sm:$0xff]  ;;  %v1422_v59 = vld [vmem:[#allocation2 + $0x30] sm:$0xff] }
  0x84   : > { %v8819_v7 = vpack.c.b16 %v645_v0, %v644_v62  ;;  %v8208_v10 = vld [vmem:[%s10022_s1 + $0x178] sm:$0xff]  ;;  %v8231_v61 = vld [vmem:[%s10022_s1 + $0x230] sm:$0xff]  ;;  %v1454_v0 = vpack.c.bf16 %v1422_v59, %v1422_v59 }
  0x85   : > { %1302 = vmatpush.bf16.msrb.mxu2 %v8181_v11  ;;  %v8232_v11 = vld [vmem:[%s10022_s1 + $0x238] sm:$0xff] }
  0x86   : > { %1648 = vmatpush.bf16.msrb.mxu3 %v8189_v12  ;;  %v573_v12 = vpack.c.bf16 %v8682_v63, %v8682_v63  ;;  %v565_v63 = vpack.c.bf16 %v8756_v37, %v8756_v37  ;;  %v1075_v37 = vld [vmem:[#allocation2 + $0xa] sm:$0xff]  ;;  %v1423_v60 = vld [vmem:[#allocation2 + $0x38] sm:$0xff] }
  0x87   : > { %988 = vmatpush.bf16.msrb.mxu1 %v8165_v21  ;;  %1994 = vmatpush.bf16.msrb.mxu0 %v8197_v22  ;;  %v663_v21 = vunpack.c.l.b16 %v582_v15  ;;  %v670_v22 = vunpack.c.l.b16 %v589_v16 }
  0x88   : > { %785 = vmatmul.bf16.gmra.mxu1 %v8736_v28  ;;  %805 = vmatmul.bf16.gmra.mxu2 %v681_v30  ;;  %v654_v18 = vunpack.c.l.b16 %v573_v12  ;;  %v1079_v12 = vld [vmem:[#allocation2 + $0x3a] sm:$0xff] }
  0x89   : > { %1303 = vmatpush.bf16.msrb.mxu2 %v8180_v25  ;;  %825 = vmatmul.bf16.gmra.mxu3 %v685_v32  ;;  %v646_v25 = vunpack.c.l.b16 %v565_v63  ;;  %v683_v30 = vpack.c.b16 %v663_v21, %v662_v20  ;;  %v687_v31 = vpack.c.b16 %v671_v23, %v670_v22  ;;  %v1111_v16 = vpack.c.bf16 %v1079_v12, %v1079_v12  ;;  %v1080_v23 = vld [vmem:[#allocation2 + $0x4a] sm:$0xff]  ;;  %v8229_v12 = vld [vmem:[%s10022_s1 + $0x220] sm:$0xff] }
  0x8a   : > { %1649 = vmatpush.bf16.msrb.mxu3 %v8188_v26  ;;  %765 = vmatmul.bf16.gmra.mxu0 %v8742_v33  ;;  %v647_v26 = vunpack.c.l.b16 %v566_v4  ;;  %v8851_v27 = vpack.c.b16 %v655_v19, %v654_v18  ;;  %v1457_v63 = vpack.c.bf16 %v1425_v14, %v1425_v14  ;;  %v1537_v19 = vunpack.c.l.b16 %v1456_v17 }
  0x8b   : > { %989 = vmatpush.bf16.msrb.mxu1 %v8164_v35  ;;  %1995 = vmatpush.bf16.msrb.mxu0 %v8196_v36  ;;  %v448_v35 = vld [vmem:[#allocation2 + $0x8] sm:$0xff]  ;;  %v1192_v18 = vunpack.c.l.b16 %v1111_v16  ;;  %v1112_v34 = vpack.c.bf16 %v1080_v23, %v1080_v23 }
  0x8c   : > { %v8853_v32 = vpack.c.b16 %v647_v26, %v646_v25  ;;  %v1074_v36 = vld [vmem:[#allocation2 + $0x2] sm:$0xff]  ;;  %v1538_v20 = vunpack.c.l.b16 %v1457_v63 }
  0x8d   : > { %1304 = vmatpush.bf16.msrb.mxu2 %v8179_v38  ;;  %v1420_v38 = vld [vmem:[#allocation2 + $0x18] sm:$0xff]  ;;  %v8214_v25 = vld [vmem:[%s10022_s1 + $0x1a8] sm:$0xff] }
  0x8e   : > { %1650 = vmatpush.bf16.msrb.mxu3 %v8187_v39  ;;  %v1421_v39 = vld [vmem:[#allocation2 + $0x20] sm:$0xff]  ;;  %v1567_v22 = vpack.c.b16 %v1538_v20, %v1537_v19  ;;  %v8222_v26 = vld [vmem:[%s10022_s1 + $0x1e8] sm:$0xff] }
  0x8f   : > { %990 = vmatpush.bf16.msrb.mxu1 %v8163_v41  ;;  %1996 = vmatpush.bf16.msrb.mxu0 %v8195_v42  ;;  %v480_v41 = vpack.c.bf16 %v448_v35, %v448_v35  ;;  %v1106_v42 = vpack.c.bf16 %v1074_v36, %v1074_v36  ;;  %v1453_v48 = vpack.c.bf16 %v1421_v39, %v1421_v39  ;;  %v8206_v36 = vld [vmem:[%s10022_s1 + $0x168] sm:$0xff]  ;;  %v1193_v39 = vunpack.c.l.b16 %v1112_v34 }
  0x90   : > { %v1432_v23 = vld [vmem:[#allocation2 + $0xa8] sm:$0xff] }
  0x91   : > { %1305 = vmatpush.bf16.msrb.mxu2 %v8178_v44  ;;  %v1107_v44 = vpack.c.bf16 %v1075_v37, %v1075_v37  ;;  %v874_v51 = vunpack.c.l.b16 %v480_v41  ;;  %v1187_v53 = vunpack.c.l.b16 %v1106_v42  ;;  %v1534_v57 = vunpack.c.l.b16 %v1453_v48  ;;  %v1082_v48 = vld [vmem:[#allocation2 + $0x62] sm:$0xff] }
  0x92   : > { %1651 = vmatpush.bf16.msrb.mxu3 %v8186_v45  ;;  %v1452_v45 = vpack.c.bf16 %v1420_v38, %v1420_v38  ;;  %v8230_v38 = vld [vmem:[%s10022_s1 + $0x228] sm:$0xff] }
  0x93   : > { %991 = vmatpush.bf16.msrb.mxu1 %v8162_v29  ;;  %1997 = vmatpush.bf16.msrb.mxu0 %v8194_v43  ;;  %v1188_v54 = vunpack.c.l.b16 %v1107_v44  ;;  %v905_v24 = vpack.c.b16 %v874_v51, %v873_v50  ;;  %v1083_v50 = vld [vmem:[#allocation2 + $0x6a] sm:$0xff]  ;;  %v1428_v51 = vld [vmem:[#allocation2 + $0x78] sm:$0xff] }
  0x94   : > { %v1533_v56 = vunpack.c.l.b16 %v1452_v45 }
  0x95   : > { %1306 = vmatpush.bf16.msrb.mxu2 %v8177_v46  ;;  %v1219_v29 = vpack.c.b16 %v1188_v54, %v1187_v53  ;;  %v1076_v46 = vld [vmem:[#allocation2 + $0x1a] sm:$0xff]  ;;  %v1114_v54 = vpack.c.bf16 %v1082_v48, %v1082_v48 }
  0x96   : > { %1652 = vmatpush.bf16.msrb.mxu3 %v8185_v49  ;;  %v1565_v43 = vpack.c.b16 %v1534_v57, %v1533_v56  ;;  %v1077_v49 = vld [vmem:[#allocation2 + $0x22] sm:$0xff]  ;;  %v1115_v56 = vpack.c.bf16 %v1083_v50, %v1083_v50  ;;  %v1460_v57 = vpack.c.bf16 %v1428_v51, %v1428_v51  ;;  %v1088_v50 = vld [vmem:[#allocation2 + $0xaa] sm:$0xff]  ;;  %v1089_v51 = vld [vmem:[#allocation2 + $0xb2] sm:$0xff] }
  0x97   : > { %992 = vmatpush.bf16.msrb.mxu1 %v8161_v1  ;;  %1998 = vmatpush.bf16.msrb.mxu0 %v8193_v2  ;;  %v1109_v62 = vpack.c.bf16 %v1077_v49, %v1077_v49  ;;  %v1455_v1 = vpack.c.bf16 %v1423_v60, %v1423_v60  ;;  %v1429_v53 = vld [vmem:[#allocation2 + $0x80] sm:$0xff] }
  0x98   : > { %790 = vmatmul.bf16.gmra.mxu1 %v8817_v3  ;;  %810 = vmatmul.bf16.gmra.mxu2 %v682_v5  ;;  %v1085_v60 = vld [vmem:[#allocation2 + $0x82] sm:$0xff] }
  0x99   : > { %830 = vmatmul.bf16.gmra.mxu3 %v686_v6  ;;  %2684 = vmatpush.bf16.msra.mxu2 %v8216_v8  ;;  %v1190_v5 = vunpack.c.l.b16 %v1109_v62  ;;  %v1535_v6 = vunpack.c.l.b16 %v1454_v0  ;;  %v1536_v8 = vunpack.c.l.b16 %v1455_v1  ;;  %v1430_v62 = vld [vmem:[#allocation2 + $0x90] sm:$0xff]  ;;  %v1431_v0 = vld [vmem:[#allocation2 + $0x98] sm:$0xff] }
  0x9a   : > { %770 = vmatmul.bf16.gmra.mxu0 %v8819_v7  ;;  %3030 = vmatpush.bf16.msra.mxu3 %v8224_v9 }
  0x9b   : > { %2337 = vmatpush.bf16.msra.mxu1 %v8208_v10  ;;  %3376 = vmatpush.bf16.msra.mxu0 %v8232_v11  ;;  %v1566_v10 = vpack.c.b16 %v1536_v8, %v1535_v6  ;;  %v1078_v11 = vld [vmem:[#allocation2 + $0x32] sm:$0xff]  ;;  %v1117_v6 = vpack.c.bf16 %v1085_v60, %v1085_v60 }
  0x9c   : > { %v1110_v15 = vpack.c.bf16 %v1078_v11, %v1078_v11 }
  0x9d   : > { %2685 = vmatpush.bf16.msra.mxu2 %v8215_v52  ;;  %v1198_v14 = vunpack.c.l.b16 %v1117_v6 }
  0x9e   : > { %3031 = vmatpush.bf16.msra.mxu3 %v8223_v55  ;;  %v1191_v4 = vunpack.c.l.b16 %v1110_v15 }
  0x9f   : > { %2338 = vmatpush.bf16.msra.mxu1 %v8207_v58  ;;  %3377 = vmatpush.bf16.msra.mxu0 %v8231_v61  ;;  %v8213_v61 = vld [vmem:[%s10022_s1 + $0x1a0] sm:$0xff] }
  0xa0   : > { %v1221_v21 = vpack.c.b16 %v1192_v18, %v1191_v4 }
  0xa1   : > { %2686 = vmatpush.bf16.msra.mxu2 %v8214_v25 }
  0xa2   : > { %3032 = vmatpush.bf16.msra.mxu3 %v8222_v26 }
  0xa3   : > { %2339 = vmatpush.bf16.msra.mxu1 %v8206_v36  ;;  %3378 = vmatpush.bf16.msra.mxu0 %v8230_v38 }
  0xa5   : > { %2687 = vmatpush.bf16.msra.mxu2 %v8213_v61 }
  0xa7   : > { %3379 = vmatpush.bf16.msra.mxu0 %v8229_v12 }
  0xa8   : > { %795 = vmatmul.bf16.gmra.mxu1 %v8851_v27  ;;  %815 = vmatmul.bf16.gmra.mxu2 %v683_v30  ;;  %v1426_v30 = vld [vmem:[#allocation2 + $0x60] sm:$0xff] }
  0xa9   : > { %835 = vmatmul.bf16.gmra.mxu3 %v687_v31  ;;  %v1427_v31 = vld [vmem:[#allocation2 + $0x68] sm:$0xff] }
  0xaa   : > { %775 = vmatmul.bf16.gmra.mxu0 %v8853_v32  ;;  %v1459_v37 = vpack.c.bf16 %v1427_v31, %v1427_v31 }
  0xac   : > { %v1540_v42 = vunpack.c.l.b16 %v1459_v37 }
  0xb8   : > { %993 = vmatmul.bf16.vlgmr.msrb.gmra.mxu1 %v905_v24  ;;  %1307 = vmatmul.bf16.vlgmr.msrb.gmra.mxu2 %v1219_v29  ;;  %v1461_v24 = vpack.c.bf16 %v1429_v53, %v1429_v53  ;;  %v1195_v29 = vunpack.c.l.b16 %v1114_v54  ;;  %v1434_v53 = vld [vmem:[#allocation2 + $0xc0] sm:$0xff]  ;;  %v8212_v54 = vld [vmem:[%s10022_s1 + $0x198] sm:$0xff] }
  0xb9   : > { %1653 = vmatmul.bf16.vlgmr.msrb.gmra.mxu3 %v1565_v43  ;;  %2688 = vmatpush.bf16.msra.mxu2 %v8212_v54 }
  0xba   : > { %1999 = vmatmul.bf16.vlgmr.msrb.gmra.mxu0 %v8742_v33  ;;  %v1108_v33 = vpack.c.bf16 %v1076_v46, %v1076_v46  ;;  %v1541_v46 = vunpack.c.l.b16 %v1460_v57  ;;  %v1542_v49 = vunpack.c.l.b16 %v1461_v24  ;;  %v1435_v57 = vld [vmem:[#allocation2 + $0xc8] sm:$0xff] }
  0xbb   : > { %v1780_v24 = vld [vmem:[#allocation2 + $0xc1] sm:$0xff] }
  0xbc   : > { %v1189_v2 = vunpack.c.l.b16 %v1108_v33  ;;  %v1569_v58 = vpack.c.b16 %v1542_v49, %v1541_v46  ;;  %v8221_v33 = vld [vmem:[%s10022_s1 + $0x1e0] sm:$0xff]  ;;  %v1120_v49 = vpack.c.bf16 %v1088_v50, %v1088_v50  ;;  %v1812_v60 = vpack.c.bf16 %v1780_v24, %v1780_v24 }
  0xbd   : > { %3033 = vmatpush.bf16.msra.mxu3 %v8221_v33 }
  0xbe   : > { %v1220_v9 = vpack.c.b16 %v1190_v5, %v1189_v2 }
  0xc8   : > { %998 = vmatmul.bf16.gmra.mxu1 %v1565_v43  ;;  %1312 = vmatmul.bf16.gmra.mxu2 %v1220_v9  ;;  %v1196_v43 = vunpack.c.l.b16 %v1115_v56  ;;  %v1462_v9 = vpack.c.bf16 %v1430_v62, %v1430_v62  ;;  %v8220_v56 = vld [vmem:[%s10022_s1 + $0x1d8] sm:$0xff] }
  0xc9   : > { %1658 = vmatmul.bf16.gmra.mxu3 %v1566_v10  ;;  %v8204_v62 = vld [vmem:[%s10022_s1 + $0x158] sm:$0xff] }
  0xca   : > { %2004 = vmatmul.bf16.gmra.mxu0 %v8819_v7  ;;  %v1081_v7 = vld [vmem:[#allocation2 + $0x52] sm:$0xff]  ;;  %v1223_v52 = vpack.c.b16 %v1196_v43, %v1195_v29  ;;  %v1543_v15 = vunpack.c.l.b16 %v1462_v9  ;;  %v1781_v29 = vld [vmem:[#allocation2 + $0xc9] sm:$0xff]  ;;  %3034 = vmatpush.bf16.msra.mxu3 %v8220_v56 }
  0xcb   : > { %v1113_v35 = vpack.c.bf16 %v1081_v7, %v1081_v7  ;;  %v1433_v7 = vld [vmem:[#allocation2 + $0xb0] sm:$0xff]  ;;  %v1813_v61 = vpack.c.bf16 %v1781_v29, %v1781_v29 }
  0xcc   : > { %v1465_v36 = vpack.c.bf16 %v1433_v7, %v1433_v7  ;;  %v1436_v7 = vld [vmem:[#allocation2 + $0xd8] sm:$0xff] }
  0xcd   : > { %v1194_v40 = vunpack.c.l.b16 %v1113_v35  ;;  %v1464_v35 = vpack.c.bf16 %v1432_v23, %v1432_v23  ;;  %v1894_v12 = vunpack.c.l.b16 %v1813_v61  ;;  %v1091_v23 = vld [vmem:[#allocation2 + $0xca] sm:$0xff] }
  0xcf   : > { %v1222_v44 = vpack.c.b16 %v1194_v40, %v1193_v39  ;;  %v1545_v39 = vunpack.c.l.b16 %v1464_v35  ;;  %v1783_v35 = vld [vmem:[#allocation2 + $0xe1] sm:$0xff] }
  0xd8   : > { %1003 = vmatmul.bf16.gmra.mxu1 %v1566_v10  ;;  %1317 = vmatmul.bf16.gmra.mxu2 %v1221_v21  ;;  %v1463_v10 = vpack.c.bf16 %v1431_v0, %v1431_v0  ;;  %v1086_v21 = vld [vmem:[#allocation2 + $0x92] sm:$0xff] }
  0xd9   : > { %1663 = vmatmul.bf16.gmra.mxu3 %v1567_v22  ;;  %v8228_v0 = vld [vmem:[%s10022_s1 + $0x218] sm:$0xff] }
  0xda   : > { %2009 = vmatmul.bf16.gmra.mxu0 %v8853_v32  ;;  %v1458_v32 = vpack.c.bf16 %v1426_v30, %v1426_v30  ;;  %v1544_v16 = vunpack.c.l.b16 %v1463_v10  ;;  %v1118_v30 = vpack.c.bf16 %v1086_v21, %v1086_v21  ;;  %v1893_v10 = vunpack.c.l.b16 %v1812_v60 }
  0xdb   : > { %3380 = vmatpush.bf16.msra.mxu0 %v8228_v0 }
  0xdc   : > { %v1539_v41 = vunpack.c.l.b16 %v1458_v32  ;;  %v1570_v19 = vpack.c.b16 %v1544_v16, %v1543_v15  ;;  %v1199_v37 = vunpack.c.l.b16 %v1118_v30  ;;  %v1437_v30 = vld [vmem:[#allocation2 + $0xe0] sm:$0xff] }
  0xdd   : > { %v1469_v50 = vpack.c.bf16 %v1437_v30, %v1437_v30 }
  0xde   : > { %v1568_v45 = vpack.c.b16 %v1540_v42, %v1539_v41 }
  0xdf   : > { %v1550_v24 = vunpack.c.l.b16 %v1469_v50 }
  0xe8   : > { %1008 = vmatmul.bf16.gmra.mxu1 %v1567_v22  ;;  %1322 = vmatmul.bf16.gmra.mxu2 %v1222_v44  ;;  %v1087_v22 = vld [vmem:[#allocation2 + $0x9a] sm:$0xff] }
  0xe9   : > { %1668 = vmatmul.bf16.gmra.mxu3 %v1568_v45  ;;  %v1119_v31 = vpack.c.bf16 %v1087_v22, %v1087_v22  ;;  %v1090_v22 = vld [vmem:[#allocation2 + $0xc2] sm:$0xff] }
  0xea   : > { %2014 = vmatmul.bf16.gmra.mxu0 %v8637_v47  ;;  %v1084_v47 = vld [vmem:[#allocation2 + $0x7a] sm:$0xff] }
  0xeb   : > { %v1116_v5 = vpack.c.bf16 %v1084_v47, %v1084_v47  ;;  %v1200_v38 = vunpack.c.l.b16 %v1119_v31  ;;  %v1467_v47 = vpack.c.bf16 %v1435_v57, %v1435_v57  ;;  %v1782_v31 = vld [vmem:[#allocation2 + $0xd9] sm:$0xff] }
  0xed   : > { %v1197_v13 = vunpack.c.l.b16 %v1116_v5  ;;  %v1225_v42 = vpack.c.b16 %v1200_v38, %v1199_v37  ;;  %v1201_v5 = vunpack.c.l.b16 %v1120_v49  ;;  %v1548_v9 = vunpack.c.l.b16 %v1467_v47 }
  0xee   : > { %v1122_v38 = vpack.c.bf16 %v1090_v22, %v1090_v22  ;;  %v1785_v22 = vld [vmem:[#allocation2 + $0xf9] sm:$0xff] }
  0xef   : > { %v1224_v4 = vpack.c.b16 %v1198_v14, %v1197_v13 }
  0xf0   : > { %v1203_v54 = vunpack.c.l.b16 %v1122_v38 }
  0xf5   : > { %v8885_v55 = vpop.f32.mrf.mxu1 }
  0xf7   : > { %v8887_v59 = vpop.f32.mrf.mxu0 }
  0xf8   : > { %1013 = vmatmul.bf16.gmra.mxu1 %v1568_v45  ;;  %1327 = vmatmul.bf16.gmra.mxu2 %v1223_v52 }
  0xf9   : > { %1673 = vmatmul.bf16.gmra.mxu3 %v1569_v58 }
  0xfa   : > { %2019 = vmatmul.bf16.gmra.mxu0 %v8736_v28  ;;  %v8205_v28 = vld [vmem:[%s10022_s1 + $0x160] sm:$0xff] }
  0xfb   : > { %v8896_v1 = vpop.f32.mrf.mxu2  ;;  %2340 = vmatpush.bf16.msra.mxu1 %v8205_v28 }
  0xfc   : > { %v8898_v2 = vpop.f32.mrf.mxu3 }
  0xfd   : > { %v8903_v8 = vpop.f32.mrf.mxu1 }
  0xff   : > { %v8905_v11 = vpop.f32.mrf.mxu0  ;;  %2341 = vmatpush.bf16.msra.mxu1 %v8204_v62 }
 0x103   : > { %v8910_v17 = vpop.f32.mrf.mxu2 }
 0x104   : > { %v8912_v63 = vpop.f32.mrf.mxu3 }
 0x105   : > { %v8914_v18 = vpop.f32.mrf.mxu1 }
 0x107   : > { %v8916_v20 = vpop.f32.mrf.mxu0 }
 0x108   : > { %1018 = vmatmul.bf16.gmra.mxu1 %v1569_v58  ;;  %1332 = vmatmul.bf16.gmra.mxu2 %v1224_v4  ;;  %v1466_v58 = vpack.c.bf16 %v1434_v53, %v1434_v53 }
 0x109   : > { %1678 = vmatmul.bf16.gmra.mxu3 %v1570_v19 }
 0x10a   : > { %2024 = vmatmul.bf16.gmra.mxu0 %v8817_v3  ;;  %v1546_v3 = vunpack.c.l.b16 %v1465_v36  ;;  %v1547_v28 = vunpack.c.l.b16 %v1466_v58 }
 0x10b   : > { %v8919_v25 = vpop.f32.mrf.mxu2 }
 0x10c   : > { %v8921_v26 = vpop.f32.mrf.mxu3  ;;  %v1571_v45 = vpack.c.b16 %v1546_v3, %v1545_v39  ;;  %v1572_v4 = vpack.c.b16 %v1548_v9, %v1547_v28  ;;  %v1123_v39 = vpack.c.bf16 %v1091_v23, %v1091_v23  ;;  %v1093_v28 = vld [vmem:[#allocation2 + $0xe2] sm:$0xff]  ;;  %v1438_v9 = vld [vmem:[#allocation2 + $0xf0] sm:$0xff] }
 0x10d   : > { %v8923_v34 = vpop.f32.mrf.mxu1  ;;  %v1125_v30 = vpack.c.bf16 %v1093_v28, %v1093_v28 }
 0x10e   : > { %v1204_v56 = vunpack.c.l.b16 %v1123_v39 }
 0x10f   : > { %v8925_v32 = vpop.f32.mrf.mxu0 }
 0x110   : > { %v1227_v47 = vpack.c.b16 %v1204_v56, %v1203_v54  ;;  %v8203_v54 = vld [vmem:[%s10022_s1 + $0x150] sm:$0xff] }
 0x111   : > { %v8227_v56 = vld [vmem:[%s10022_s1 + $0x210] sm:$0xff]  ;;  %2342 = vmatpush.bf16.msra.mxu1 %v8203_v54 }
 0x112   : > { %3381 = vmatpush.bf16.msra.mxu0 %v8227_v56 }
 0x113   : > { %v8927_v40 = vpop.f32.mrf.mxu2 }
 0x114   : > { %v8929_v41 = vpop.f32.mrf.mxu3 }
 0x115   : > { %v8931_v44 = vpop.f32.mrf.mxu1 }
 0x117   : > { %v8933_v48 = vpop.f32.mrf.mxu0 }
 0x118   : > { %1023 = vmatmul.bf16.gmra.mxu1 %v1570_v19  ;;  %1337 = vmatmul.bf16.gmra.mxu2 %v1225_v42  ;;  %v1918_v19 = vpack.c.b16 %v1894_v12, %v1893_v10  ;;  %v1468_v42 = vpack.c.bf16 %v1436_v7, %v1436_v7  ;;  %v8211_v10 = vld [vmem:[%s10022_s1 + $0x190] sm:$0xff] }
 0x119   : > { %1683 = vmatmul.bf16.gmra.mxu3 %v1571_v45  ;;  %v8219_v12 = vld [vmem:[%s10022_s1 + $0x1d0] sm:$0xff]  ;;  %2689 = vmatpush.bf16.msra.mxu2 %v8211_v10 }
 0x11a   : > { %2029 = vmatmul.bf16.gmra.mxu0 %v8851_v27  ;;  %v1121_v27 = vpack.c.bf16 %v1089_v51, %v1089_v51  ;;  %v1815_v51 = vpack.c.bf16 %v1783_v35, %v1783_v35  ;;  %v1549_v57 = vunpack.c.l.b16 %v1468_v42  ;;  %3035 = vmatpush.bf16.msra.mxu3 %v8219_v12  ;;  %v1470_v35 = vpack.c.bf16 %v1438_v9, %v1438_v9 }
 0x11b   : > { %v8942_v43 = vpop.f32.mrf.mxu2  ;;  %v1817_v42 = vpack.c.bf16 %v1785_v22, %v1785_v22 }
 0x11c   : > { %v8944_v46 = vpop.f32.mrf.mxu3  ;;  %v1202_v6 = vunpack.c.l.b16 %v1121_v27  ;;  %v1896_v49 = vunpack.c.l.b16 %v1815_v51  ;;  %v1573_v61 = vpack.c.b16 %v1550_v24, %v1549_v57  ;;  %v1206_v24 = vunpack.c.l.b16 %v1125_v30  ;;  %v1786_v30 = vld [vmem:[#allocation2 + $0x109] sm:$0xff] }
 0x11d   : > { %v8946_v52 = vpop.f32.mrf.mxu1 }
 0x11e   : > { %v1226_v15 = vpack.c.b16 %v1202_v6, %v1201_v5  ;;  %v1092_v6 = vld [vmem:[#allocation2 + $0xda] sm:$0xff] }
 0x11f   : > { %v8948_v33 = vpop.f32.mrf.mxu0  ;;  %v1124_v7 = vpack.c.bf16 %v1092_v6, %v1092_v6 }
 0x121   : > { %v1205_v57 = vunpack.c.l.b16 %v1124_v7  ;;  %v1441_v7 = vld [vmem:[#allocation2 + $0x110] sm:$0xff] }
 0x122   : > { %v1473_v54 = vpack.c.bf16 %v1441_v7, %v1441_v7 }
 0x123   : > { %v8956_v13 = vpop.f32.mrf.mxu2  ;;  %v1228_v28 = vpack.c.b16 %v1206_v24, %v1205_v57 }
 0x124   : > { %v8958_v14 = vpop.f32.mrf.mxu3 }
 0x125   : > { %v8960_v16 = vpop.f32.mrf.mxu1 }
 0x127   : > { %v8962_v21 = vpop.f32.mrf.mxu0 }
 0x128   : > { %1028 = vmatmul.bf16.gmra.mxu1 %v1571_v45  ;;  %1342 = vmatmul.bf16.gmra.mxu2 %v1226_v15  ;;  %v1814_v45 = vpack.c.bf16 %v1782_v31, %v1782_v31  ;;  %v1439_v15 = vld [vmem:[#allocation2 + $0xf8] sm:$0xff] }
 0x129   : > { %1688 = vmatmul.bf16.gmra.mxu3 %v1572_v4  ;;  %v1471_v38 = vpack.c.bf16 %v1439_v15, %v1439_v15 }
 0x12a   : > { %2034 = vmatmul.bf16.gmra.mxu0 %v1918_v19  ;;  %v1895_v29 = vunpack.c.l.b16 %v1814_v45  ;;  %v1784_v19 = vld [vmem:[#allocation2 + $0xf1] sm:$0xff] }
 0x12b   : > { %v8964_v36 = vpop.f32.mrf.mxu2  ;;  %v1816_v39 = vpack.c.bf16 %v1784_v19, %v1784_v19 }
 0x12c   : > { %v8966_v37 = vpop.f32.mrf.mxu3  ;;  %v1919_v62 = vpack.c.b16 %v1896_v49, %v1895_v29  ;;  %v1551_v49 = vunpack.c.l.b16 %v1470_v35 }
 0x12d   : > { %v8968_v3 = vpop.f32.mrf.mxu1 }
 0x12f   : > { %v8970_v53 = vpop.f32.mrf.mxu0 }
 0x133   : > { %v8972_v27 = vpop.f32.mrf.mxu2 }
 0x134   : > { %v8974_v58 = vpop.f32.mrf.mxu3 }
 0x135   : > { %v994_v60 = vpop.f32.mrf.mxu1 }
 0x136   : > { %v995_v0 = vadd.f32 %v994_v60, %v8887_v59  ;;  %v1897_v60 = vunpack.c.l.b16 %v1816_v39 }
 0x137   : > { %v2000_v5 = vpop.f32.mrf.mxu0 }
 0x138   : > { %1033 = vmatmul.bf16.gmra.mxu1 %v1572_v4  ;;  %1347 = vmatmul.bf16.gmra.mxu2 %v1227_v47  ;;  %v1552_v47 = vunpack.c.l.b16 %v1471_v38 }
 0x139   : > { %1693 = vmatmul.bf16.gmra.mxu3 %v1573_v61 }
 0x13a   : > { %2039 = vmatmul.bf16.gmra.mxu0 %v1919_v62  ;;  %v1898_v62 = vunpack.c.l.b16 %v1817_v42  ;;  %v1574_v10 = vpack.c.b16 %v1552_v47, %v1551_v49 }
 0x13b   : > { %v1308_v59 = vpop.f32.mrf.mxu2 }
 0x13c   : > { %v1388_v4 = vadd.f32 %v1308_v59, %v995_v0  ;;  %v1654_v23 = vpop.f32.mrf.mxu3  ;;  %v1920_v12 = vpack.c.b16 %v1898_v62, %v1897_v60 }
 0x13d   : > { %v996_v31 = vpop.f32.mrf.mxu1 }
 0x13e   : > { %v1734_v50 = vadd.f32 %v1654_v23, %v1388_v4  ;;  %v997_v45 = vadd.f32 %v996_v31, %v8905_v11  ;;  %v1095_v4 = vld [vmem:[#allocation2 + $0xfa] sm:$0xff]  ;;  %v1440_v23 = vld [vmem:[#allocation2 + $0x108] sm:$0xff]  ;;  %v1787_v31 = vld [vmem:[#allocation2 + $0x111] sm:$0xff] }
 0x13f   : > { %v2002_v51 = vpop.f32.mrf.mxu0  ;;  %v1819_v56 = vpack.c.bf16 %v1787_v31, %v1787_v31 }
 0x140   : > { %v8990_v29 = vadd.f32 %v2000_v5, %v1734_v50  ;;  %v1094_v5 = vld [vmem:[#allocation2 + $0xf2] sm:$0xff]  ;;  %v1127_v50 = vpack.c.bf16 %v1095_v4, %v1095_v4 }
 0x141   : > { %v1126_v42 = vpack.c.bf16 %v1094_v5, %v1094_v5 }
 0x142   : > { %v1208_v47 = vunpack.c.l.b16 %v1127_v50  ;;  %v1789_v50 = vld [vmem:[#allocation2 + $0x129] sm:$0xff] }
 0x143   : > { %v1310_v11 = vpop.f32.mrf.mxu2  ;;  %v1207_v49 = vunpack.c.l.b16 %v1126_v42  ;;  %v1443_v42 = vld [vmem:[#allocation2 + $0x128] sm:$0xff] }
 0x144   : > { %v1389_v0 = vadd.f32 %v1310_v11, %v997_v45  ;;  %v1656_v6 = vpop.f32.mrf.mxu3  ;;  %v1554_v11 = vunpack.c.l.b16 %v1473_v54 }
 0x145   : > { %v999_v9 = vpop.f32.mrf.mxu1 }
 0x146   : > { %v1735_v15 = vadd.f32 %v1656_v6, %v1389_v0  ;;  %v1000_v19 = vadd.f32 %v999_v9, %v8916_v20  ;;  %v1472_v20 = vpack.c.bf16 %v1440_v23, %v1440_v23  ;;  %v1900_v6 = vunpack.c.l.b16 %v1819_v56 }
 0x147   : > { %v2005_v22 = vpop.f32.mrf.mxu0 }
 0x148   : > { %1038 = vmatmul.bf16.gmra.mxu1 %v1573_v61  ;;  %1352 = vmatmul.bf16.gmra.mxu2 %v1228_v28  ;;  %v8993_v59 = vadd.f32 %v2002_v51, %v1735_v15  ;;  %v1818_v61 = vpack.c.bf16 %v1786_v30, %v1786_v30  ;;  %v1553_v62 = vunpack.c.l.b16 %v1472_v20  ;;  %v1229_v15 = vpack.c.b16 %v1208_v47, %v1207_v49  ;;  %v1096_v30 = vld [vmem:[#allocation2 + $0x10a] sm:$0xff] }
 0x149   : > { %1698 = vmatmul.bf16.gmra.mxu3 %v1574_v10  ;;  %v1128_v54 = vpack.c.bf16 %v1096_v30, %v1096_v30  ;;  %v1821_v49 = vpack.c.bf16 %v1789_v50, %v1789_v50 }
 0x14a   : > { %2044 = vmatmul.bf16.gmra.mxu0 %v1920_v12  ;;  %v1899_v0 = vunpack.c.l.b16 %v1818_v61  ;;  %v1575_v5 = vpack.c.b16 %v1554_v11, %v1553_v62 }
 0x14b   : > { %v1313_v35 = vpop.f32.mrf.mxu2 }
 0x14c   : > { %v1390_v38 = vadd.f32 %v1313_v35, %v1000_v19  ;;  %v1659_v39 = vpop.f32.mrf.mxu3  ;;  %v1921_v4 = vpack.c.b16 %v1900_v6, %v1899_v0  ;;  %v1442_v35 = vld [vmem:[#allocation2 + $0x120] sm:$0xff]  ;;  %v8202_v0 = vld [vmem:[%s10022_s1 + $0x148] sm:$0xff] }
 0x14d   : > { %v1001_v45 = vpop.f32.mrf.mxu1  ;;  %v8226_v6 = vld [vmem:[%s10022_s1 + $0x208] sm:$0xff]  ;;  %2343 = vmatpush.bf16.msra.mxu1 %v8202_v0 }
 0x14e   : > { %v1736_v51 = vadd.f32 %v1659_v39, %v1390_v38  ;;  %v1002_v57 = vadd.f32 %v1001_v45, %v8925_v32  ;;  %v8210_v38 = vld [vmem:[%s10022_s1 + $0x188] sm:$0xff]  ;;  %3382 = vmatpush.bf16.msra.mxu0 %v8226_v6 }
 0x14f   : > { %v2007_v24 = vpop.f32.mrf.mxu0  ;;  %v8218_v39 = vld [vmem:[%s10022_s1 + $0x1c8] sm:$0xff]  ;;  %2690 = vmatpush.bf16.msra.mxu2 %v8210_v38 }
 0x150   : > { %v8996_v60 = vadd.f32 %v2005_v22, %v1736_v51  ;;  %v1097_v22 = vld [vmem:[#allocation2 + $0x112] sm:$0xff]  ;;  %3036 = vmatpush.bf16.msra.mxu3 %v8218_v39  ;;  %v1474_v51 = vpack.c.bf16 %v1442_v35, %v1442_v35 }
 0x151   : > { %v1129_v61 = vpack.c.bf16 %v1097_v22, %v1097_v22 }
 0x153   : > { %v1315_v28 = vpop.f32.mrf.mxu2 }
 0x154   : > { %v1391_v9 = vadd.f32 %v1315_v28, %v1002_v57  ;;  %v1661_v12 = vpop.f32.mrf.mxu3  ;;  %v1475_v57 = vpack.c.bf16 %v1443_v42, %v1443_v42  ;;  %v1209_v28 = vunpack.c.l.b16 %v1128_v54  ;;  %v1445_v54 = vld [vmem:[#allocation2 + $0x140] sm:$0xff] }
 0x155   : > { %v1004_v19 = vpop.f32.mrf.mxu1  ;;  %v1477_v0 = vpack.c.bf16 %v1445_v54, %v1445_v54 }
 0x156   : > { %v1737_v23 = vadd.f32 %v1661_v12, %v1391_v9  ;;  %v1005_v7 = vadd.f32 %v1004_v19, %v8933_v48  ;;  %v1788_v48 = vld [vmem:[#allocation2 + $0x121] sm:$0xff]  ;;  %v1210_v9 = vunpack.c.l.b16 %v1129_v61  ;;  %v1556_v19 = vunpack.c.l.b16 %v1475_v57  ;;  %v1790_v61 = vld [vmem:[#allocation2 + $0x139] sm:$0xff] }
 0x157   : > { %v2010_v32 = vpop.f32.mrf.mxu0 }
 0x158   : > { %1043 = vmatmul.bf16.gmra.mxu1 %v1574_v10  ;;  %1357 = vmatmul.bf16.gmra.mxu2 %v1229_v15  ;;  %v8999_v31 = vadd.f32 %v2007_v24, %v1737_v23  ;;  %v1820_v24 = vpack.c.bf16 %v1788_v48, %v1788_v48  ;;  %v1555_v15 = vunpack.c.l.b16 %v1474_v51  ;;  %v1902_v23 = vunpack.c.l.b16 %v1821_v49 }
 0x159   : > { %1703 = vmatmul.bf16.gmra.mxu3 %v1575_v5  ;;  %v1230_v22 = vpack.c.b16 %v1210_v9, %v1209_v28 }
 0x15a   : > { %2049 = vmatmul.bf16.gmra.mxu0 %v1921_v4  ;;  %v1901_v4 = vunpack.c.l.b16 %v1820_v24  ;;  %v1576_v38 = vpack.c.b16 %v1556_v19, %v1555_v15 }
 0x15b   : > { %v1318_v10 = vpop.f32.mrf.mxu2 }
 0x15c   : > { %v1392_v45 = vadd.f32 %v1318_v10, %v1005_v7  ;;  %v1664_v20 = vpop.f32.mrf.mxu3  ;;  %v1922_v39 = vpack.c.b16 %v1902_v23, %v1901_v4 }
 0x15d   : > { %v1006_v56 = vpop.f32.mrf.mxu1 }
 0x15e   : > { %v1738_v47 = vadd.f32 %v1664_v20, %v1392_v45  ;;  %v1007_v62 = vadd.f32 %v1006_v56, %v8948_v33  ;;  %v1099_v45 = vld [vmem:[#allocation2 + $0x12a] sm:$0xff]  ;;  %v1444_v20 = vld [vmem:[#allocation2 + $0x138] sm:$0xff]  ;;  %v1791_v56 = vld [vmem:[#allocation2 + $0x141] sm:$0xff] }
 0x15f   : > { %v2012_v11 = vpop.f32.mrf.mxu0  ;;  %v1823_v6 = vpack.c.bf16 %v1791_v56, %v1791_v56  ;;  %v1447_v56 = vld [vmem:[#allocation2 + $0x158] sm:$0xff] }
 0x160   : > { %v9014_v12 = vadd.f32 %v2010_v32, %v1738_v47  ;;  %v1098_v32 = vld [vmem:[#allocation2 + $0x122] sm:$0xff]  ;;  %v1131_v47 = vpack.c.bf16 %v1099_v45, %v1099_v45 }
 0x161   : > { %v1130_v49 = vpack.c.bf16 %v1098_v32, %v1098_v32 }
 0x162   : > { %v1212_v19 = vunpack.c.l.b16 %v1131_v47 }
 0x163   : > { %v1320_v33 = vpop.f32.mrf.mxu2  ;;  %v1211_v15 = vunpack.c.l.b16 %v1130_v49  ;;  %v8217_v49 = vld [vmem:[%s10022_s1 + $0x1c0] sm:$0xff] }
 0x164   : > { %v1393_v7 = vadd.f32 %v1320_v33, %v1007_v62  ;;  %v1666_v30 = vpop.f32.mrf.mxu3  ;;  %v1558_v33 = vunpack.c.l.b16 %v1477_v0  ;;  %3037 = vmatpush.bf16.msra.mxu3 %v8217_v49 }
 0x165   : > { %v1009_v35 = vpop.f32.mrf.mxu1 }
 0x166   : > { %v1739_v42 = vadd.f32 %v1666_v30, %v1393_v7  ;;  %v1010_v48 = vadd.f32 %v1009_v35, %v8962_v21  ;;  %v1476_v21 = vpack.c.bf16 %v1444_v20, %v1444_v20  ;;  %v1904_v30 = vunpack.c.l.b16 %v1823_v6 }
 0x167   : > { %v2015_v50 = vpop.f32.mrf.mxu0 }
 0x168   : > { %1048 = vmatmul.bf16.gmra.mxu1 %v1575_v5  ;;  %1362 = vmatmul.bf16.gmra.mxu2 %v1230_v22  ;;  %v9017_v10 = vadd.f32 %v2012_v11, %v1739_v42  ;;  %v1822_v5 = vpack.c.bf16 %v1790_v61, %v1790_v61  ;;  %v1557_v23 = vunpack.c.l.b16 %v1476_v21  ;;  %v1231_v42 = vpack.c.b16 %v1212_v19, %v1211_v15  ;;  %v1446_v61 = vld [vmem:[#allocation2 + $0x150] sm:$0xff]  ;;  %v9035_v21 = vld [vmem:[%s8521_s13 + $0xf8] sm:$0xff] }
 0x169   : > { %1708 = vmatmul.bf16.gmra.mxu3 %v1576_v38  ;;  %446 = vst [vmem:[#allocation2 + $0x189] sm:$0xff] %v9035_v21  ;;  %v1478_v15 = vpack.c.bf16 %v1446_v61, %v1446_v61  ;;  %v1479_v19 = vpack.c.bf16 %v1447_v56, %v1447_v56 }
 0x16a   : > { %2054 = vmatmul.bf16.gmra.mxu0 %v1922_v39  ;;  %v1903_v7 = vunpack.c.l.b16 %v1822_v5  ;;  %v1577_v32 = vpack.c.b16 %v1558_v33, %v1557_v23 }
 0x16b   : > { %v1323_v51 = vpop.f32.mrf.mxu2 }
 0x16c   : > { %v1394_v57 = vadd.f32 %v1323_v51, %v1010_v48  ;;  %v1669_v24 = vpop.f32.mrf.mxu3  ;;  %v1923_v45 = vpack.c.b16 %v1904_v30, %v1903_v7  ;;  %v8201_v30 = vld [vmem:[%s10022_s1 + $0x140] sm:$0xff] }
 0x16d   : > { %v1011_v62 = vpop.f32.mrf.mxu1  ;;  %2344 = vmatpush.bf16.msra.mxu1 %v8201_v30 }
 0x16e   : > { %v1740_v11 = vadd.f32 %v1669_v24, %v1394_v57  ;;  %v1012_v28 = vadd.f32 %v1011_v62, %v8970_v53  ;;  %v1100_v53 = vld [vmem:[#allocation2 + $0x13a] sm:$0xff]  ;;  %v1792_v57 = vld [vmem:[#allocation2 + $0x151] sm:$0xff] }
 0x16f   : > { %v2017_v9 = vpop.f32.mrf.mxu0  ;;  %v8209_v24 = vld [vmem:[%s10022_s1 + $0x180] sm:$0xff]  ;;  %v9032_v62 = vld [vmem:[%s8521_s13 + $0xf0] sm:$0xff] }
 0x170   : > { %v9020_v4 = vadd.f32 %v2015_v50, %v1740_v11  ;;  %v1101_v50 = vld [vmem:[#allocation2 + $0x142] sm:$0xff]  ;;  %2691 = vmatpush.bf16.msra.mxu2 %v8209_v24  ;;  %445 = vst [vmem:[#allocation2 + $0x181] sm:$0xff] %v9032_v62  ;;  %v1132_v11 = vpack.c.bf16 %v1100_v53, %v1100_v53 }
 0x173   : > { %v1325_v22 = vpop.f32.mrf.mxu2 }
 0x174   : > { %v1395_v35 = vadd.f32 %v1325_v22, %v1012_v28  ;;  %v1671_v39 = vpop.f32.mrf.mxu3  ;;  %v1133_v28 = vpack.c.bf16 %v1101_v50, %v1101_v50  ;;  %v8225_v22 = vld [vmem:[%s10022_s1 + $0x200] sm:$0xff] }
 0x175   : > { %v1014_v48 = vpop.f32.mrf.mxu1  ;;  %3383 = vmatpush.bf16.msra.mxu0 %v8225_v22 }
 0x176   : > { %v1741_v20 = vadd.f32 %v1671_v39, %v1395_v35  ;;  %v1015_v47 = vadd.f32 %v1014_v48, %v8885_v55  ;;  %v1824_v55 = vpack.c.bf16 %v1792_v57, %v1792_v57  ;;  %v1213_v35 = vunpack.c.l.b16 %v1132_v11  ;;  %v1103_v11 = vld [vmem:[#allocation2 + $0x15a] sm:$0xff] }
 0x177   : > { %v2020_v54 = vpop.f32.mrf.mxu0  ;;  %v1214_v39 = vunpack.c.l.b16 %v1133_v28  ;;  %v1559_v48 = vunpack.c.l.b16 %v1478_v15  ;;  %v1448_v28 = vld [vmem:[#allocation2 + $0x168] sm:$0xff]  ;;  %v1135_v22 = vpack.c.bf16 %v1103_v11, %v1103_v11 }
 0x178   : > { %1053 = vmatmul.bf16.gmra.mxu1 %v1576_v38  ;;  %1367 = vmatmul.bf16.gmra.mxu2 %v1231_v42  ;;  %v9022_v51 = vadd.f32 %v2017_v9, %v1741_v20  ;;  %v1793_v38 = vld [vmem:[#allocation2 + $0x159] sm:$0xff]  ;;  %v1905_v20 = vunpack.c.l.b16 %v1824_v55  ;;  %v1794_v15 = vld [vmem:[#allocation2 + $0x169] sm:$0xff] }
 0x179   : > { %1713 = vmatmul.bf16.gmra.mxu3 %v1577_v32  ;;  %v1825_v23 = vpack.c.bf16 %v1793_v38, %v1793_v38  ;;  %v1232_v24 = vpack.c.b16 %v1214_v39, %v1213_v35 }
 0x17a   : > { %2059 = vmatmul.bf16.gmra.mxu0 %v1923_v45  ;;  %v1560_v45 = vunpack.c.l.b16 %v1479_v19  ;;  %v1795_v19 = vld [vmem:[#allocation2 + $0x171] sm:$0xff] }
 0x17b   : > { %v1328_v0 = vpop.f32.mrf.mxu2  ;;  %v1906_v53 = vunpack.c.l.b16 %v1825_v23 }
 0x17c   : > { %v1396_v5 = vadd.f32 %v1328_v0, %v1015_v47  ;;  %v1674_v6 = vpop.f32.mrf.mxu3  ;;  %v1578_v47 = vpack.c.b16 %v1560_v45, %v1559_v48  ;;  %v1827_v48 = vpack.c.bf16 %v1795_v19, %v1795_v19 }
 0x17d   : > { %v1016_v9 = vpop.f32.mrf.mxu1  ;;  %v1924_v38 = vpack.c.b16 %v1906_v53, %v1905_v20 }
 0x17e   : > { %v1742_v33 = vadd.f32 %v1674_v6, %v1396_v5  ;;  %v1017_v50 = vadd.f32 %v1016_v9, %v8903_v8  ;;  %v1449_v9 = vld [vmem:[#allocation2 + $0x170] sm:$0xff] }
 0x17f   : > { %v2022_v7 = vpop.f32.mrf.mxu0  ;;  %v1481_v39 = vpack.c.bf16 %v1449_v9, %v1449_v9 }
 0x180   : > { %v9045_v42 = vadd.f32 %v2020_v54, %v1742_v33  ;;  %v1102_v54 = vld [vmem:[#allocation2 + $0x152] sm:$0xff] }
 0x181   : > { %v1134_v30 = vpack.c.bf16 %v1102_v54, %v1102_v54 }
 0x183   : > { %v1330_v61 = vpop.f32.mrf.mxu2  ;;  %v1215_v53 = vunpack.c.l.b16 %v1134_v30  ;;  %v1451_v30 = vld [vmem:[#allocation2 + $0x188] sm:$0xff] }
 0x184   : > { %v1397_v56 = vadd.f32 %v1330_v61, %v1017_v50  ;;  %v1676_v57 = vpop.f32.mrf.mxu3  ;;  %v1216_v50 = vunpack.c.l.b16 %v1135_v22 }
 0x185   : > { %v1019_v49 = vpop.f32.mrf.mxu1 }
 0x186   : > { %v1743_v0 = vadd.f32 %v1676_v57, %v1397_v56  ;;  %v1020_v8 = vadd.f32 %v1019_v49, %v8914_v18  ;;  %v1562_v56 = vunpack.c.l.b16 %v1481_v39  ;;  %v1233_v11 = vpack.c.b16 %v1216_v50, %v1215_v53 }
 0x187   : > { %v2025_v5 = vpop.f32.mrf.mxu0  ;;  %v1483_v53 = vpack.c.bf16 %v1451_v30, %v1451_v30 }
 0x188   : > { %1058 = vmatmul.bf16.gmra.mxu1 %v1577_v32  ;;  %1372 = vmatmul.bf16.gmra.mxu2 %v1232_v24  ;;  %v9048_v6 = vadd.f32 %v2022_v7, %v1743_v0  ;;  %v1480_v32 = vpack.c.bf16 %v1448_v28, %v1448_v28  ;;  %v1826_v7 = vpack.c.bf16 %v1794_v15, %v1794_v15  ;;  %v1908_v24 = vunpack.c.l.b16 %v1827_v48 }
 0x189   : > { %1718 = vmatmul.bf16.gmra.mxu3 %v1578_v47 }
 0x18a   : > { %2064 = vmatmul.bf16.gmra.mxu0 %v1924_v38  ;;  %v1561_v18 = vunpack.c.l.b16 %v1480_v32  ;;  %v1907_v57 = vunpack.c.l.b16 %v1826_v7 }
 0x18b   : > { %v1333_v55 = vpop.f32.mrf.mxu2 }
 0x18c   : > { %v1398_v23 = vadd.f32 %v1333_v55, %v1020_v8  ;;  %v1679_v33 = vpop.f32.mrf.mxu3  ;;  %v1579_v8 = vpack.c.b16 %v1562_v56, %v1561_v18  ;;  %v1925_v9 = vpack.c.b16 %v1908_v24, %v1907_v57 }
 0x18d   : > { %v1021_v35 = vpop.f32.mrf.mxu1 }
 0x18e   : > { %v1744_v45 = vadd.f32 %v1679_v33, %v1398_v23  ;;  %v1022_v49 = vadd.f32 %v1021_v35, %v8923_v34  ;;  %v1105_v23 = vld [vmem:[#allocation2 + $0x172] sm:$0xff]  ;;  %v1450_v34 = vld [vmem:[#allocation2 + $0x180] sm:$0xff] }
 0x18f   : > { %v2027_v20 = vpop.f32.mrf.mxu0  ;;  %v1137_v7 = vpack.c.bf16 %v1105_v23, %v1105_v23 }
 0x190   : > { %v9051_v61 = vadd.f32 %v2025_v5, %v1744_v45  ;;  %v1104_v5 = vld [vmem:[#allocation2 + $0x16a] sm:$0xff]  ;;  %v1482_v45 = vpack.c.bf16 %v1450_v34, %v1450_v34  ;;  %v2112_v34 = vld [vmem:[#allocation2 + $0x1a] sm:$0xff] }
 0x191   : > { %v1136_v39 = vpack.c.bf16 %v1104_v5, %v1104_v5 }
 0x192   : > { %v1563_v24 = vunpack.c.l.b16 %v1482_v45 }
 0x193   : > { %v1335_v38 = vpop.f32.mrf.mxu2  ;;  %v1217_v56 = vunpack.c.l.b16 %v1136_v39  ;;  %v2806_v39 = vld [vmem:[#allocation2 + $0x39] sm:$0xff] }
 0x194   : > { %v1399_v0 = vadd.f32 %v1335_v38, %v1022_v49  ;;  %v1681_v54 = vpop.f32.mrf.mxu3  ;;  %v1564_v49 = vunpack.c.l.b16 %v1483_v53  ;;  %v2144_v53 = vpack.c.bf16 %v2112_v34, %v2112_v34 }
 0x195   : > { %v1024_v28 = vpop.f32.mrf.mxu1 }
 0x196   : > { %v1745_v15 = vadd.f32 %v1681_v54, %v1399_v0  ;;  %v1025_v33 = vadd.f32 %v1024_v28, %v8931_v44  ;;  %v1218_v44 = vunpack.c.l.b16 %v1137_v7  ;;  %v1580_v5 = vpack.c.b16 %v1564_v49, %v1563_v24  ;;  %v3151_v7 = vld [vmem:[#allocation2 + $0x32] sm:$0xff] }
 0x197   : > { %v2030_v19 = vpop.f32.mrf.mxu0  ;;  %v2838_v24 = vpack.c.bf16 %v2806_v39, %v2806_v39  ;;  %v3183_v49 = vpack.c.bf16 %v3151_v7, %v3151_v7 }
 0x198   : > { %1063 = vmatmul.bf16.gmra.mxu1 %v1578_v47  ;;  %1377 = vmatmul.bf16.gmra.mxu2 %v1233_v11  ;;  %v9054_v55 = vadd.f32 %v2027_v20, %v1745_v15  ;;  %v1828_v47 = vpack.c.bf16 %v9032_v62, %v9032_v62  ;;  %v1829_v20 = vpack.c.bf16 %v9035_v21, %v9035_v21 }
 0x199   : > { %1723 = vmatmul.bf16.gmra.mxu3 %v1579_v8  ;;  %v1234_v15 = vpack.c.b16 %v1218_v44, %v1217_v56 }
 0x19a   : > { %2069 = vmatmul.bf16.gmra.mxu0 %v1925_v9  ;;  %v1909_v38 = vunpack.c.l.b16 %v1828_v47  ;;  %v1910_v0 = vunpack.c.l.b16 %v1829_v20 }
 0x19b   : > { %v1338_v22 = vpop.f32.mrf.mxu2 }
 0x19c   : > { %v1400_v35 = vadd.f32 %v1338_v22, %v1025_v33  ;;  %v1684_v32 = vpop.f32.mrf.mxu3  ;;  %v1926_v23 = vpack.c.b16 %v1910_v0, %v1909_v38  ;;  %v2459_v22 = vld [vmem:[#allocation2 + $0x30] sm:$0xff] }
 0x19d   : > { %v1026_v48 = vpop.f32.mrf.mxu1 }
 0x19e   : > { %v1746_v50 = vadd.f32 %v1684_v32, %v1400_v35  ;;  %v1027_v54 = vadd.f32 %v1026_v48, %v8946_v52  ;;  %v2460_v35 = vld [vmem:[#allocation2 + $0x38] sm:$0xff] }
 0x19f   : > { %v2032_v18 = vpop.f32.mrf.mxu0  ;;  %v2805_v52 = vld [vmem:[#allocation2 + $0x31] sm:$0xff]  ;;  %v3152_v48 = vld [vmem:[#allocation2 + $0x3a] sm:$0xff]  ;;  %v2492_v56 = vpack.c.bf16 %v2460_v35, %v2460_v35 }
 0x1a0   : > { %v9061_v57 = vadd.f32 %v2030_v19, %v1746_v50  ;;  %v2113_v19 = vld [vmem:[#allocation2 + $0x22] sm:$0xff]  ;;  %v2491_v50 = vpack.c.bf16 %v2459_v22, %v2459_v22  ;;  %v3184_v38 = vpack.c.bf16 %v3152_v48, %v3152_v48 }
 0x1a3   : > { %v1340_v11 = vpop.f32.mrf.mxu2 }
 0x1a4   : > { %v1401_v28 = vadd.f32 %v1340_v11, %v1027_v54  ;;  %v1686_v9 = vpop.f32.mrf.mxu3  ;;  %v2225_v11 = vunpack.c.l.b16 %v2144_v53 }
 0x1a5   : > { %v1029_v62 = vpop.f32.mrf.mxu1 }
 0x1a6   : > { %v1747_v21 = vadd.f32 %v1686_v9, %v1401_v28  ;;  %v1030_v32 = vadd.f32 %v1029_v62, %v8960_v16  ;;  %v2572_v16 = vunpack.c.l.b16 %v2491_v50  ;;  %v2573_v9 = vunpack.c.l.b16 %v2492_v56  ;;  %v2808_v50 = vld [vmem:[#allocation2 + $0x51] sm:$0xff] }
 0x1a7   : > { %v2035_v33 = vpop.f32.mrf.mxu0  ;;  %v3153_v56 = vld [vmem:[#allocation2 + $0x4a] sm:$0xff] }
 0x1a8   : > { %1068 = vmatmul.bf16.gmra.mxu1 %v1579_v8  ;;  %1382 = vmatmul.bf16.gmra.mxu2 %v1234_v15  ;;  %v9064_v30 = vadd.f32 %v2032_v18, %v1747_v21  ;;  %v2145_v8 = vpack.c.bf16 %v2113_v19, %v2113_v19  ;;  %v2837_v18 = vpack.c.bf16 %v2805_v52, %v2805_v52  ;;  %v3265_v21 = vunpack.c.l.b16 %v3184_v38 }
 0x1a9   : > { %1728 = vmatmul.bf16.gmra.mxu3 %v1580_v5  ;;  %v2919_v5 = vunpack.c.l.b16 %v2838_v24 }
 0x1aa   : > { %2074 = vmatmul.bf16.gmra.mxu0 %v1926_v23  ;;  %v2226_v28 = vunpack.c.l.b16 %v2145_v8  ;;  %v2918_v62 = vunpack.c.l.b16 %v2837_v18  ;;  %v3264_v23 = vunpack.c.l.b16 %v3183_v49  ;;  %v2807_v8 = vld [vmem:[#allocation2 + $0x49] sm:$0xff] }
 0x1ab   : > { %v1343_v45 = vpop.f32.mrf.mxu2 }
 0x1ac   : > { %v1402_v47 = vadd.f32 %v1343_v45, %v1030_v32  ;;  %v1689_v20 = vpop.f32.mrf.mxu3  ;;  %v2257_v52 = vpack.c.b16 %v2226_v28, %v2225_v11  ;;  %v2604_v32 = vpack.c.b16 %v2573_v9, %v2572_v16  ;;  %v2950_v7 = vpack.c.b16 %v2919_v5, %v2918_v62 }
 0x1ad   : > { %v1031_v44 = vpop.f32.mrf.mxu1  ;;  %v3296_v48 = vpack.c.b16 %v3265_v21, %v3264_v23  ;;  %v2839_v28 = vpack.c.bf16 %v2807_v8, %v2807_v8  ;;  %v2840_v16 = vpack.c.bf16 %v2808_v50, %v2808_v50 }
 0x1ae   : > { %v1748_v0 = vadd.f32 %v1689_v20, %v1402_v47  ;;  %v1032_v34 = vadd.f32 %v1031_v44, %v8968_v3  ;;  %v2461_v47 = vld [vmem:[#allocation2 + $0x48] sm:$0xff]  ;;  %v2462_v20 = vld [vmem:[#allocation2 + $0x50] sm:$0xff] }
 0x1af   : > { %v2037_v54 = vpop.f32.mrf.mxu0  ;;  %v3154_v44 = vld [vmem:[#allocation2 + $0x52] sm:$0xff]  ;;  %v2493_v38 = vpack.c.bf16 %v2461_v47, %v2461_v47 }
 0x1b0   : > { %v9067_v15 = vadd.f32 %v2035_v33, %v1748_v0  ;;  %v2494_v0 = vpack.c.bf16 %v2462_v20, %v2462_v20  ;;  %v3186_v9 = vpack.c.bf16 %v3154_v44, %v3154_v44  ;;  %v2464_v44 = vld [vmem:[#allocation2 + $0x68] sm:$0xff] }
 0x1b1   : > { %v2574_v23 = vunpack.c.l.b16 %v2493_v38  ;;  %v3156_v38 = vld [vmem:[#allocation2 + $0x6a] sm:$0xff] }
 0x1b2   : > { %v2575_v21 = vunpack.c.l.b16 %v2494_v0 }
 0x1b3   : > { %v1345_v19 = vpop.f32.mrf.mxu2 }
 0x1b4   : > { %v1403_v22 = vadd.f32 %v1345_v19, %v1032_v34  ;;  %v1691_v35 = vpop.f32.mrf.mxu3  ;;  %v2921_v19 = vunpack.c.l.b16 %v2840_v16 }
 0x1b5   : > { %v1034_v39 = vpop.f32.mrf.mxu1 }
 0x1b6   : > { %v1749_v45 = vadd.f32 %v1691_v35, %v1403_v22  ;;  %v1035_v3 = vadd.f32 %v1034_v39, %v8896_v1  ;;  %v2920_v1 = vunpack.c.l.b16 %v2839_v28  ;;  %v3267_v35 = vunpack.c.l.b16 %v3186_v9 }
 0x1b7   : > { %v2040_v53 = vpop.f32.mrf.mxu0 }
 0x1b8   : > { %2345 = vmatmul.bf16.vlgmr.msra.gmra.mxu1 %v2257_v52  ;;  %2692 = vmatmul.bf16.vlgmr.msra.gmra.mxu2 %v2604_v32  ;;  %v9070_v33 = vadd.f32 %v2037_v54, %v1749_v45  ;;  %v3185_v54 = vpack.c.bf16 %v3153_v56, %v3153_v56  ;;  %v2605_v45 = vpack.c.b16 %v2575_v21, %v2574_v23 }
 0x1b9   : > { %3038 = vmatmul.bf16.vlgmr.msra.gmra.mxu3 %v2950_v7  ;;  %v2951_v20 = vpack.c.b16 %v2921_v19, %v2920_v1  ;;  %v3188_v23 = vpack.c.bf16 %v3156_v38, %v3156_v38  ;;  %v2466_v38 = vld [vmem:[#allocation2 + $0x80] sm:$0xff] }
 0x1ba   : > { %3384 = vmatmul.bf16.vlgmr.msra.gmra.mxu0 %v3296_v48  ;;  %v3266_v22 = vunpack.c.l.b16 %v3185_v54  ;;  %v2496_v54 = vpack.c.bf16 %v2464_v44, %v2464_v44 }
 0x1bb   : > { %v1348_v18 = vpop.f32.mrf.mxu2 }
 0x1bc   : > { %v1404_v24 = vadd.f32 %v1348_v18, %v1035_v3  ;;  %v1694_v49 = vpop.f32.mrf.mxu3  ;;  %v3297_v8 = vpack.c.b16 %v3267_v35, %v3266_v22  ;;  %v2809_v18 = vld [vmem:[#allocation2 + $0x61] sm:$0xff]  ;;  %v2577_v22 = vunpack.c.l.b16 %v2496_v54 }
 0x1bd   : > { %v1036_v11 = vpop.f32.mrf.mxu1 }
 0x1be   : > { %v1750_v62 = vadd.f32 %v1694_v49, %v1404_v24  ;;  %v1037_v52 = vadd.f32 %v1036_v11, %v8910_v17  ;;  %v2810_v24 = vld [vmem:[#allocation2 + $0x69] sm:$0xff] }
 0x1bf   : > { %v2042_v5 = vpop.f32.mrf.mxu0  ;;  %v3155_v49 = vld [vmem:[#allocation2 + $0x62] sm:$0xff] }
 0x1c0   : > { %v9073_v34 = vadd.f32 %v2040_v53, %v1750_v62  ;;  %v2463_v53 = vld [vmem:[#allocation2 + $0x60] sm:$0xff]  ;;  %v2842_v62 = vpack.c.bf16 %v2810_v24, %v2810_v24 }
 0x1c1   : > { %v2495_v16 = vpack.c.bf16 %v2463_v53, %v2463_v53 }
 0x1c3   : > { %v1350_v32 = vpop.f32.mrf.mxu2  ;;  %v2576_v19 = vunpack.c.l.b16 %v2495_v16  ;;  %v3158_v16 = vld [vmem:[#allocation2 + $0x82] sm:$0xff] }
 0x1c4   : > { %v1405_v39 = vadd.f32 %v1350_v32, %v1037_v52  ;;  %v1696_v7 = vpop.f32.mrf.mxu3  ;;  %v2923_v52 = vunpack.c.l.b16 %v2842_v62 }
 0x1c5   : > { %v1039_v47 = vpop.f32.mrf.mxu1 }
 0x1c6   : > { %v1751_v3 = vadd.f32 %v1696_v7, %v1405_v39  ;;  %v1040_v17 = vadd.f32 %v1039_v47, %v8919_v25  ;;  %v3269_v39 = vunpack.c.l.b16 %v3188_v23 }
 0x1c7   : > { %v2045_v50 = vpop.f32.mrf.mxu0 }
 0x1c8   : > { %2350 = vmatmul.bf16.gmra.mxu1 %v3296_v48  ;;  %2697 = vmatmul.bf16.gmra.mxu2 %v2605_v45  ;;  %v9076_v56 = vadd.f32 %v2042_v5, %v1751_v3  ;;  %v2841_v48 = vpack.c.bf16 %v2809_v18, %v2809_v18  ;;  %v3187_v5 = vpack.c.bf16 %v3155_v49, %v3155_v49 }
 0x1c9   : > { %3043 = vmatmul.bf16.gmra.mxu3 %v2951_v20  ;;  %v2606_v3 = vpack.c.b16 %v2577_v22, %v2576_v19  ;;  %v3190_v19 = vpack.c.bf16 %v3158_v16, %v3158_v16  ;;  %v2468_v16 = vld [vmem:[#allocation2 + $0x98] sm:$0xff] }
 0x1ca   : > { %3389 = vmatmul.bf16.gmra.mxu0 %v3297_v8  ;;  %v2922_v25 = vunpack.c.l.b16 %v2841_v48  ;;  %v3268_v32 = vunpack.c.l.b16 %v3187_v5  ;;  %v2498_v5 = vpack.c.bf16 %v2466_v38, %v2466_v38 }
 0x1cb   : > { %v1353_v0 = vpop.f32.mrf.mxu2 }
 0x1cc   : > { %v1406_v11 = vadd.f32 %v1353_v0, %v1040_v17  ;;  %v1699_v28 = vpop.f32.mrf.mxu3  ;;  %v2952_v44 = vpack.c.b16 %v2923_v52, %v2922_v25  ;;  %v3298_v18 = vpack.c.b16 %v3269_v39, %v3268_v32  ;;  %v2811_v0 = vld [vmem:[#allocation2 + $0x79] sm:$0xff]  ;;  %v2579_v32 = vunpack.c.l.b16 %v2498_v5 }
 0x1cd   : > { %v1041_v9 = vpop.f32.mrf.mxu1 }
 0x1ce   : > { %v1752_v21 = vadd.f32 %v1699_v28, %v1406_v11  ;;  %v1042_v7 = vadd.f32 %v1041_v9, %v8927_v40  ;;  %v2812_v11 = vld [vmem:[#allocation2 + $0x81] sm:$0xff] }
 0x1cf   : > { %v2047_v1 = vpop.f32.mrf.mxu0  ;;  %v3157_v28 = vld [vmem:[#allocation2 + $0x7a] sm:$0xff] }
 0x1d0   : > { %v9079_v35 = vadd.f32 %v2045_v50, %v1752_v21  ;;  %v2465_v50 = vld [vmem:[#allocation2 + $0x78] sm:$0xff]  ;;  %v2844_v21 = vpack.c.bf16 %v2812_v11, %v2812_v11 }
 0x1d1   : > { %v2497_v62 = vpack.c.bf16 %v2465_v50, %v2465_v50 }
 0x1d3   : > { %v1355_v45 = vpop.f32.mrf.mxu2  ;;  %v2578_v52 = vunpack.c.l.b16 %v2497_v62  ;;  %v3160_v62 = vld [vmem:[#allocation2 + $0x9a] sm:$0xff] }
 0x1d4   : > { %v1407_v47 = vadd.f32 %v1355_v45, %v1042_v7  ;;  %v1701_v20 = vpop.f32.mrf.mxu3  ;;  %v2925_v7 = vunpack.c.l.b16 %v2844_v21 }
 0x1d5   : > { %v1044_v53 = vpop.f32.mrf.mxu1 }
 0x1d6   : > { %v1753_v17 = vadd.f32 %v1701_v20, %v1407_v47  ;;  %v1045_v40 = vadd.f32 %v1044_v53, %v8942_v43  ;;  %v3271_v47 = vunpack.c.l.b16 %v3190_v19 }
 0x1d7   : > { %v2050_v24 = vpop.f32.mrf.mxu0 }
 0x1d8   : > { %2355 = vmatmul.bf16.gmra.mxu1 %v3297_v8  ;;  %2702 = vmatmul.bf16.gmra.mxu2 %v2606_v3  ;;  %v9082_v49 = vadd.f32 %v2047_v1, %v1753_v17  ;;  %v2843_v8 = vpack.c.bf16 %v2811_v0, %v2811_v0  ;;  %v3189_v1 = vpack.c.bf16 %v3157_v28, %v3157_v28 }
 0x1d9   : > { %3048 = vmatmul.bf16.gmra.mxu3 %v2952_v44  ;;  %v2607_v17 = vpack.c.b16 %v2579_v32, %v2578_v52  ;;  %v3192_v52 = vpack.c.bf16 %v3160_v62, %v3160_v62  ;;  %v2470_v62 = vld [vmem:[#allocation2 + $0xb0] sm:$0xff] }
 0x1da   : > { %3394 = vmatmul.bf16.gmra.mxu0 %v3298_v18  ;;  %v2924_v43 = vunpack.c.l.b16 %v2843_v8  ;;  %v3270_v45 = vunpack.c.l.b16 %v3189_v1  ;;  %v2500_v1 = vpack.c.bf16 %v2468_v16, %v2468_v16 }
 0x1db   : > { %v1358_v54 = vpop.f32.mrf.mxu2 }
 0x1dc   : > { %v1408_v9 = vadd.f32 %v1358_v54, %v1045_v40  ;;  %v1704_v48 = vpop.f32.mrf.mxu3  ;;  %v2953_v38 = vpack.c.b16 %v2925_v7, %v2924_v43  ;;  %v3299_v0 = vpack.c.b16 %v3271_v47, %v3270_v45  ;;  %v2813_v54 = vld [vmem:[#allocation2 + $0x91] sm:$0xff]  ;;  %v2581_v45 = vunpack.c.l.b16 %v2500_v1 }
 0x1dd   : > { %v1046_v23 = vpop.f32.mrf.mxu1 }
 0x1de   : > { %v1754_v22 = vadd.f32 %v1704_v48, %v1408_v9  ;;  %v1047_v20 = vadd.f32 %v1046_v23, %v8956_v13  ;;  %v2814_v9 = vld [vmem:[#allocation2 + $0x99] sm:$0xff] }
 0x1df   : > { %v2052_v25 = vpop.f32.mrf.mxu0  ;;  %v3159_v48 = vld [vmem:[#allocation2 + $0x92] sm:$0xff] }
 0x1e0   : > { %v9085_v39 = vadd.f32 %v2050_v24, %v1754_v22  ;;  %v2467_v24 = vld [vmem:[#allocation2 + $0x90] sm:$0xff]  ;;  %v2846_v22 = vpack.c.bf16 %v2814_v9, %v2814_v9 }
 0x1e1   : > { %v2499_v21 = vpack.c.bf16 %v2467_v24, %v2467_v24 }
 0x1e3   : > { %v1360_v3 = vpop.f32.mrf.mxu2  ;;  %v2580_v7 = vunpack.c.l.b16 %v2499_v21  ;;  %v3162_v21 = vld [vmem:[#allocation2 + $0xb2] sm:$0xff] }
 0x1e4   : > { %v1409_v53 = vadd.f32 %v1360_v3, %v1047_v20  ;;  %v1706_v44 = vpop.f32.mrf.mxu3  ;;  %v2927_v20 = vunpack.c.l.b16 %v2846_v22 }
 0x1e5   : > { %v1049_v50 = vpop.f32.mrf.mxu1 }
 0x1e6   : > { %v1755_v40 = vadd.f32 %v1706_v44, %v1409_v53  ;;  %v1050_v13 = vadd.f32 %v1049_v50, %v8964_v36  ;;  %v3273_v53 = vunpack.c.l.b16 %v3192_v52 }
 0x1e7   : > { %v2055_v11 = vpop.f32.mrf.mxu0 }
 0x1e8   : > { %2360 = vmatmul.bf16.gmra.mxu1 %v3298_v18  ;;  %2707 = vmatmul.bf16.gmra.mxu2 %v2607_v17  ;;  %v9088_v28 = vadd.f32 %v2052_v25, %v1755_v40  ;;  %v2845_v18 = vpack.c.bf16 %v2813_v54, %v2813_v54  ;;  %v3191_v25 = vpack.c.bf16 %v3159_v48, %v3159_v48 }
 0x1e9   : > { %3053 = vmatmul.bf16.gmra.mxu3 %v2953_v38  ;;  %v2608_v40 = vpack.c.b16 %v2581_v45, %v2580_v7  ;;  %v3194_v7 = vpack.c.bf16 %v3162_v21, %v3162_v21  ;;  %v2472_v21 = vld [vmem:[#allocation2 + $0xc8] sm:$0xff] }
 0x1ea   : > { %3399 = vmatmul.bf16.gmra.mxu0 %v3299_v0  ;;  %v2926_v36 = vunpack.c.l.b16 %v2845_v18  ;;  %v3272_v3 = vunpack.c.l.b16 %v3191_v25  ;;  %v2502_v25 = vpack.c.bf16 %v2470_v62, %v2470_v62 }
 0x1eb   : > { %v1363_v5 = vpop.f32.mrf.mxu2 }
 0x1ec   : > { %v1410_v23 = vadd.f32 %v1363_v5, %v1050_v13  ;;  %v1709_v8 = vpop.f32.mrf.mxu3  ;;  %v2954_v16 = vpack.c.b16 %v2927_v20, %v2926_v36  ;;  %v3300_v54 = vpack.c.b16 %v3273_v53, %v3272_v3  ;;  %v2815_v5 = vld [vmem:[#allocation2 + $0xa9] sm:$0xff]  ;;  %v2583_v3 = vunpack.c.l.b16 %v2502_v25 }
 0x1ed   : > { %v1051_v19 = vpop.f32.mrf.mxu1 }
 0x1ee   : > { %v1756_v32 = vadd.f32 %v1709_v8, %v1410_v23  ;;  %v1052_v44 = vadd.f32 %v1051_v19, %v8972_v27  ;;  %v2816_v23 = vld [vmem:[#allocation2 + $0xb1] sm:$0xff] }
 0x1ef   : > { %v2057_v43 = vpop.f32.mrf.mxu0  ;;  %v3161_v8 = vld [vmem:[#allocation2 + $0xaa] sm:$0xff] }
 0x1f0   : > { %v9091_v47 = vadd.f32 %v2055_v11, %v1756_v32  ;;  %v2469_v11 = vld [vmem:[#allocation2 + $0xa8] sm:$0xff]  ;;  %v2848_v32 = vpack.c.bf16 %v2816_v23, %v2816_v23 }
 0x1f1   : > { %v2501_v22 = vpack.c.bf16 %v2469_v11, %v2469_v11 }
 0x1f3   : > { %v1365_v17 = vpop.f32.mrf.mxu2  ;;  %v2582_v20 = vunpack.c.l.b16 %v2501_v22  ;;  %v3164_v22 = vld [vmem:[#allocation2 + $0xca] sm:$0xff] }
 0x1f4   : > { %v1411_v50 = vadd.f32 %v1365_v17, %v1052_v44  ;;  %v1711_v38 = vpop.f32.mrf.mxu3  ;;  %v2929_v44 = vunpack.c.l.b16 %v2848_v32 }
 0x1f5   : > { %v1054_v24 = vpop.f32.mrf.mxu1 }
 0x1f6   : > { %v1757_v13 = vadd.f32 %v1711_v38, %v1411_v50  ;;  %v1055_v27 = vadd.f32 %v1054_v24, %v8898_v2  ;;  %v3275_v50 = vunpack.c.l.b16 %v3194_v7 }
 0x1f7   : > { %v2060_v9 = vpop.f32.mrf.mxu0 }
 0x1f8   : > { %2365 = vmatmul.bf16.gmra.mxu1 %v3299_v0  ;;  %2712 = vmatmul.bf16.gmra.mxu2 %v2608_v40  ;;  %v9094_v48 = vadd.f32 %v2057_v43, %v1757_v13  ;;  %v2847_v0 = vpack.c.bf16 %v2815_v5, %v2815_v5  ;;  %v3193_v43 = vpack.c.bf16 %v3161_v8, %v3161_v8 }
 0x1f9   : > { %3058 = vmatmul.bf16.gmra.mxu3 %v2954_v16  ;;  %v2609_v13 = vpack.c.b16 %v2583_v3, %v2582_v20  ;;  %v3196_v20 = vpack.c.bf16 %v3164_v22, %v3164_v22  ;;  %v2474_v22 = vld [vmem:[#allocation2 + $0xe0] sm:$0xff] }
 0x1fa   : > { %3404 = vmatmul.bf16.gmra.mxu0 %v3300_v54  ;;  %v2928_v2 = vunpack.c.l.b16 %v2847_v0  ;;  %v3274_v17 = vunpack.c.l.b16 %v3193_v43  ;;  %v2504_v43 = vpack.c.bf16 %v2472_v21, %v2472_v21 }
 0x1fb   : > { %v1368_v1 = vpop.f32.mrf.mxu2 }
 0x1fc   : > { %v1412_v19 = vadd.f32 %v1368_v1, %v1055_v27  ;;  %v1714_v18 = vpop.f32.mrf.mxu3  ;;  %v2955_v62 = vpack.c.b16 %v2929_v44, %v2928_v2  ;;  %v3301_v5 = vpack.c.b16 %v3275_v50, %v3274_v17  ;;  %v2817_v1 = vld [vmem:[#allocation2 + $0xc1] sm:$0xff]  ;;  %v2585_v17 = vunpack.c.l.b16 %v2504_v43 }
 0x1fd   : > { %v1056_v52 = vpop.f32.mrf.mxu1 }
 0x1fe   : > { %v1758_v45 = vadd.f32 %v1714_v18, %v1412_v19  ;;  %v1057_v38 = vadd.f32 %v1056_v52, %v8912_v63  ;;  %v2818_v19 = vld [vmem:[#allocation2 + $0xc9] sm:$0xff] }
 0x1ff   : > { %v2062_v36 = vpop.f32.mrf.mxu0  ;;  %v3163_v18 = vld [vmem:[#allocation2 + $0xc2] sm:$0xff] }
 0x200   : > { %v9097_v53 = vadd.f32 %v2060_v9, %v1758_v45  ;;  %v2471_v9 = vld [vmem:[#allocation2 + $0xc0] sm:$0xff]  ;;  %v2850_v45 = vpack.c.bf16 %v2818_v19, %v2818_v19 }
 0x201   : > { %v2503_v32 = vpack.c.bf16 %v2471_v9, %v2471_v9 }
 0x203   : > { %v1370_v40 = vpop.f32.mrf.mxu2  ;;  %v2584_v44 = vunpack.c.l.b16 %v2503_v32  ;;  %v3166_v32 = vld [vmem:[#allocation2 + $0xe2] sm:$0xff] }
 0x204   : > { %v1413_v24 = vadd.f32 %v1370_v40, %v1057_v38  ;;  %v1716_v16 = vpop.f32.mrf.mxu3  ;;  %v2931_v38 = vunpack.c.l.b16 %v2850_v45 }
 0x205   : > { %v1059_v11 = vpop.f32.mrf.mxu1 }
 0x206   : > { %v1759_v27 = vadd.f32 %v1716_v16, %v1413_v24  ;;  %v1060_v63 = vadd.f32 %v1059_v11, %v8921_v26  ;;  %v3277_v24 = vunpack.c.l.b16 %v3196_v20 }
 0x207   : > { %v2065_v23 = vpop.f32.mrf.mxu0 }
 0x208   : > { %2370 = vmatmul.bf16.gmra.mxu1 %v3300_v54  ;;  %2717 = vmatmul.bf16.gmra.mxu2 %v2609_v13  ;;  %v9100_v8 = vadd.f32 %v2062_v36, %v1759_v27  ;;  %v2849_v54 = vpack.c.bf16 %v2817_v1, %v2817_v1  ;;  %v3195_v36 = vpack.c.bf16 %v3163_v18, %v3163_v18 }
 0x209   : > { %3063 = vmatmul.bf16.gmra.mxu3 %v2955_v62  ;;  %v2610_v27 = vpack.c.b16 %v2585_v17, %v2584_v44  ;;  %v3198_v44 = vpack.c.bf16 %v3166_v32, %v3166_v32  ;;  %v2476_v32 = vld [vmem:[#allocation2 + $0xf8] sm:$0xff] }
 0x20a   : > { %3409 = vmatmul.bf16.gmra.mxu0 %v3301_v5  ;;  %v2930_v26 = vunpack.c.l.b16 %v2849_v54  ;;  %v3276_v40 = vunpack.c.l.b16 %v3195_v36  ;;  %v2506_v36 = vpack.c.bf16 %v2474_v22, %v2474_v22 }
 0x20b   : > { %v1373_v25 = vpop.f32.mrf.mxu2 }
 0x20c   : > { %v1414_v52 = vadd.f32 %v1373_v25, %v1060_v63  ;;  %v1719_v0 = vpop.f32.mrf.mxu3  ;;  %v2956_v21 = vpack.c.b16 %v2931_v38, %v2930_v26  ;;  %v3302_v1 = vpack.c.b16 %v3277_v24, %v3276_v40  ;;  %v2819_v25 = vld [vmem:[#allocation2 + $0xd9] sm:$0xff]  ;;  %v2587_v40 = vunpack.c.l.b16 %v2506_v36 }
 0x20d   : > { %v1061_v7 = vpop.f32.mrf.mxu1 }
 0x20e   : > { %v1760_v3 = vadd.f32 %v1719_v0, %v1414_v52  ;;  %v1062_v16 = vadd.f32 %v1061_v7, %v8929_v41  ;;  %v2820_v52 = vld [vmem:[#allocation2 + $0xe1] sm:$0xff] }
 0x20f   : > { %v2067_v2 = vpop.f32.mrf.mxu0  ;;  %v3165_v0 = vld [vmem:[#allocation2 + $0xda] sm:$0xff] }
 0x210   : > { %v9103_v50 = vadd.f32 %v2065_v23, %v1760_v3  ;;  %v2473_v23 = vld [vmem:[#allocation2 + $0xd8] sm:$0xff]  ;;  %v2852_v3 = vpack.c.bf16 %v2820_v52, %v2820_v52 }
 0x211   : > { %v2505_v45 = vpack.c.bf16 %v2473_v23, %v2473_v23 }
 0x213   : > { %v1375_v13 = vpop.f32.mrf.mxu2  ;;  %v2586_v38 = vunpack.c.l.b16 %v2505_v45  ;;  %v3168_v45 = vld [vmem:[#allocation2 + $0xfa] sm:$0xff] }
 0x214   : > { %v1415_v11 = vadd.f32 %v1375_v13, %v1062_v16  ;;  %v1721_v62 = vpop.f32.mrf.mxu3  ;;  %v2933_v16 = vunpack.c.l.b16 %v2852_v3 }
 0x215   : > { %v1064_v9 = vpop.f32.mrf.mxu1 }
 0x216   : > { %v1761_v63 = vadd.f32 %v1721_v62, %v1415_v11  ;;  %v1065_v41 = vadd.f32 %v1064_v9, %v8944_v46  ;;  %v3279_v11 = vunpack.c.l.b16 %v3198_v44 }
 0x217   : > { %v2070_v19 = vpop.f32.mrf.mxu0 }
 0x218   : > { %2375 = vmatmul.bf16.gmra.mxu1 %v3301_v5  ;;  %2722 = vmatmul.bf16.gmra.mxu2 %v2610_v27  ;;  %v9106_v18 = vadd.f32 %v2067_v2, %v1761_v63  ;;  %v2851_v5 = vpack.c.bf16 %v2819_v25, %v2819_v25  ;;  %v3197_v2 = vpack.c.bf16 %v3165_v0, %v3165_v0 }
 0x219   : > { %3068 = vmatmul.bf16.gmra.mxu3 %v2956_v21  ;;  %v2611_v63 = vpack.c.b16 %v2587_v40, %v2586_v38  ;;  %v3200_v38 = vpack.c.bf16 %v3168_v45, %v3168_v45  ;;  %v2478_v45 = vld [vmem:[#allocation2 + $0x110] sm:$0xff] }
 0x21a   : > { %3414 = vmatmul.bf16.gmra.mxu0 %v3302_v1  ;;  %v2932_v46 = vunpack.c.l.b16 %v2851_v5  ;;  %v3278_v13 = vunpack.c.l.b16 %v3197_v2  ;;  %v2508_v2 = vpack.c.bf16 %v2476_v32, %v2476_v32 }
 0x21b   : > { %v1378_v43 = vpop.f32.mrf.mxu2 }
 0x21c   : > { %v1416_v7 = vadd.f32 %v1378_v43, %v1065_v41  ;;  %v1724_v54 = vpop.f32.mrf.mxu3  ;;  %v2957_v22 = vpack.c.b16 %v2933_v16, %v2932_v46  ;;  %v3303_v25 = vpack.c.b16 %v3279_v11, %v3278_v13  ;;  %v2821_v43 = vld [vmem:[#allocation2 + $0xf1] sm:$0xff]  ;;  %v2589_v13 = vunpack.c.l.b16 %v2508_v2 }
 0x21d   : > { %v1066_v20 = vpop.f32.mrf.mxu1 }
 0x21e   : > { %v1762_v17 = vadd.f32 %v1724_v54, %v1416_v7  ;;  %v1067_v62 = vadd.f32 %v1066_v20, %v8958_v14  ;;  %v2822_v7 = vld [vmem:[#allocation2 + $0xf9] sm:$0xff] }
 0x21f   : > { %v2072_v26 = vpop.f32.mrf.mxu0  ;;  %v3167_v54 = vld [vmem:[#allocation2 + $0xf2] sm:$0xff] }
 0x220   : > { %v9109_v24 = vadd.f32 %v2070_v19, %v1762_v17  ;;  %v2475_v19 = vld [vmem:[#allocation2 + $0xf0] sm:$0xff]  ;;  %v2854_v17 = vpack.c.bf16 %v2822_v7, %v2822_v7 }
 0x221   : > { %v2507_v3 = vpack.c.bf16 %v2475_v19, %v2475_v19 }
 0x223   : > { %v1380_v27 = vpop.f32.mrf.mxu2  ;;  %v2588_v16 = vunpack.c.l.b16 %v2507_v3  ;;  %v3170_v3 = vld [vmem:[#allocation2 + $0x112] sm:$0xff] }
 0x224   : > { %v1417_v9 = vadd.f32 %v1380_v27, %v1067_v62  ;;  %v1726_v21 = vpop.f32.mrf.mxu3  ;;  %v2935_v62 = vunpack.c.l.b16 %v2854_v17 }
 0x225   : > { %v1069_v23 = vpop.f32.mrf.mxu1 }
 0x226   : > { %v1763_v41 = vadd.f32 %v1726_v21, %v1417_v9  ;;  %v1070_v14 = vadd.f32 %v1069_v23, %v8966_v37  ;;  %v3281_v9 = vunpack.c.l.b16 %v3200_v38 }
 0x227   : > { %v2075_v52 = vpop.f32.mrf.mxu0 }
 0x228   : > { %2380 = vmatmul.bf16.gmra.mxu1 %v3302_v1  ;;  %2727 = vmatmul.bf16.gmra.mxu2 %v2611_v63  ;;  %v9112_v0 = vadd.f32 %v2072_v26, %v1763_v41  ;;  %v2853_v1 = vpack.c.bf16 %v2821_v43, %v2821_v43  ;;  %v3199_v26 = vpack.c.bf16 %v3167_v54, %v3167_v54  ;;  %v2477_v54 = vld [vmem:[#allocation2 + $0x108] sm:$0xff] }
 0x229   : > { %3073 = vmatmul.bf16.gmra.mxu3 %v2957_v22  ;;  %v2612_v41 = vpack.c.b16 %v2589_v13, %v2588_v16  ;;  %v2509_v17 = vpack.c.bf16 %v2477_v54, %v2477_v54  ;;  %v3202_v16 = vpack.c.bf16 %v3170_v3, %v3170_v3  ;;  %v2480_v3 = vld [vmem:[#allocation2 + $0x128] sm:$0xff] }
 0x22a   : > { %3419 = vmatmul.bf16.gmra.mxu0 %v3303_v25  ;;  %v2934_v37 = vunpack.c.l.b16 %v2853_v1  ;;  %v3280_v27 = vunpack.c.l.b16 %v3199_v26  ;;  %v2510_v26 = vpack.c.bf16 %v2478_v45, %v2478_v45 }
 0x22b   : > { %v1383_v36 = vpop.f32.mrf.mxu2 }
 0x22c   : > { %v1418_v20 = vadd.f32 %v1383_v36, %v1070_v14  ;;  %v1729_v5 = vpop.f32.mrf.mxu3  ;;  %v2958_v32 = vpack.c.b16 %v2935_v62, %v2934_v37  ;;  %v3304_v43 = vpack.c.b16 %v3281_v9, %v3280_v27  ;;  %v2823_v36 = vld [vmem:[#allocation2 + $0x109] sm:$0xff]  ;;  %v2590_v27 = vunpack.c.l.b16 %v2509_v17 }
 0x22d   : > { %v1071_v44 = vpop.f32.mrf.mxu1  ;;  %v2855_v38 = vpack.c.bf16 %v2823_v36, %v2823_v36  ;;  %v2591_v9 = vunpack.c.l.b16 %v2510_v26  ;;  %v2826_v26 = vld [vmem:[#allocation2 + $0x129] sm:$0xff] }
 0x22e   : > { %v1764_v40 = vadd.f32 %v1729_v5, %v1418_v20  ;;  %v1072_v21 = vadd.f32 %v1071_v44, %v8974_v58  ;;  %v2824_v20 = vld [vmem:[#allocation2 + $0x111] sm:$0xff] }
 0x22f   : > { %v2077_v46 = vpop.f32.mrf.mxu0  ;;  %v3169_v5 = vld [vmem:[#allocation2 + $0x10a] sm:$0xff] }
 0x230   : > { %v9115_v11 = vadd.f32 %v2075_v52, %v1764_v40  ;;  %v2856_v40 = vpack.c.bf16 %v2824_v20, %v2824_v20 }
 0x233   : > { %v1385_v63 = vpop.f32.mrf.mxu2 }
 0x234   : > { %v1419_v23 = vadd.f32 %v1385_v63, %v1072_v21  ;;  %v1731_v22 = vpop.f32.mrf.mxu3  ;;  %v2937_v21 = vunpack.c.l.b16 %v2856_v40 }
 0x235   : > { %v2346_v19 = vpop.f32.mrf.mxu1 }
 0x236   : > { %v1765_v14 = vadd.f32 %v1731_v22, %v1419_v23  ;;  %v2426_v58 = vadd.f32 %v2346_v19, %v8990_v29  ;;  %v2936_v29 = vunpack.c.l.b16 %v2855_v38  ;;  %v3283_v23 = vunpack.c.l.b16 %v3202_v16  ;;  %v3172_v38 = vld [vmem:[#allocation2 + $0x12a] sm:$0xff] }
 0x237   : > { %v3385_v7 = vpop.f32.mrf.mxu0 }
 0x238   : > { %2385 = vmatmul.bf16.gmra.mxu1 %v3303_v25  ;;  %2732 = vmatmul.bf16.gmra.mxu2 %v2612_v41  ;;  %v9118_v52 = vadd.f32 %v2077_v46, %v1765_v14  ;;  %v3201_v46 = vpack.c.bf16 %v3169_v5, %v3169_v5  ;;  %v2613_v14 = vpack.c.b16 %v2591_v9, %v2590_v27  ;;  %v2479_v5 = vld [vmem:[#allocation2 + $0x120] sm:$0xff] }
 0x239   : > { %3078 = vmatmul.bf16.gmra.mxu3 %v2958_v32  ;;  %v2959_v45 = vpack.c.b16 %v2937_v21, %v2936_v29  ;;  %v2858_v29 = vpack.c.bf16 %v2826_v26, %v2826_v26 }
 0x23a   : > { %3424 = vmatmul.bf16.gmra.mxu0 %v3304_v43  ;;  %v3282_v63 = vunpack.c.l.b16 %v3201_v46 }
 0x23b   : > { %v2693_v2 = vpop.f32.mrf.mxu2 }
 0x23c   : > { %v2773_v44 = vadd.f32 %v2693_v2, %v2426_v58  ;;  %v3039_v1 = vpop.f32.mrf.mxu3  ;;  %v2825_v2 = vld [vmem:[#allocation2 + $0x121] sm:$0xff] }
 0x23d   : > { %v2348_v25 = vpop.f32.mrf.mxu1  ;;  %v2857_v9 = vpack.c.bf16 %v2825_v2, %v2825_v2 }
 0x23e   : > { %v3119_v13 = vadd.f32 %v3039_v1, %v2773_v44  ;;  %v2427_v22 = vadd.f32 %v2348_v25, %v8993_v59  ;;  %v3171_v25 = vld [vmem:[#allocation2 + $0x122] sm:$0xff] }
 0x23f   : > { %v3387_v37 = vpop.f32.mrf.mxu0  ;;  %v3203_v21 = vpack.c.bf16 %v3171_v25, %v3171_v25 }
 0x240   : > { %v3465_v62 = vadd.f32 %v3385_v7, %v3119_v13  ;;  %v3305_v7 = vpack.c.b16 %v3283_v23, %v3282_v63  ;;  %v3204_v63 = vpack.c.bf16 %v3172_v38, %v3172_v38 }
 0x242   : > { %3499 = vst [vmem:[%s9122_s22] sm:$0xff] %v3465_v62  ;;  %v3572_v44 = vmul.f32 %v3465_v62, %v3465_v62 }
 0x243   : > { %v2695_v41 = vpop.f32.mrf.mxu2 }
 0x244   : > { %v2774_v19 = vadd.f32 %v2695_v41, %v2427_v22  ;;  %v3041_v32 = vpop.f32.mrf.mxu3 }
 0x245   : > { %v2351_v54 = vpop.f32.mrf.mxu1 }
 0x246   : > { %v3120_v36 = vadd.f32 %v3041_v32, %v2774_v19  ;;  %v2428_v17 = vadd.f32 %v2351_v54, %v8996_v60  ;;  %v2938_v19 = vunpack.c.l.b16 %v2857_v9  ;;  %v2939_v32 = vunpack.c.l.b16 %v2858_v29  ;;  %v3174_v9 = vld [vmem:[#allocation2 + $0x142] sm:$0xff] }
 0x247   : > { %v3390_v58 = vpop.f32.mrf.mxu0  ;;  %v3285_v54 = vunpack.c.l.b16 %v3204_v63 }
 0x248   : > { %v3466_v20 = vadd.f32 %v3387_v37, %v3120_v36  ;;  %2390 = vmatmul.bf16.gmra.mxu1 %v3304_v43  ;;  %2737 = vmatmul.bf16.gmra.mxu2 %v2613_v14  ;;  %v2511_v43 = vpack.c.bf16 %v2479_v5, %v2479_v5  ;;  %v2512_v37 = vpack.c.bf16 %v2480_v3, %v2480_v3  ;;  %v3284_v14 = vunpack.c.l.b16 %v3203_v21 }
 0x249   : > { %3083 = vmatmul.bf16.gmra.mxu3 %v2959_v45  ;;  %v2960_v26 = vpack.c.b16 %v2939_v32, %v2938_v19  ;;  %v3206_v32 = vpack.c.bf16 %v3174_v9, %v3174_v9  ;;  %v2484_v9 = vld [vmem:[#allocation2 + $0x158] sm:$0xff] }
 0x24a   : > { %3429 = vmatmul.bf16.gmra.mxu0 %v3305_v7  ;;  %3500 = vst [vmem:[%s9122_s22 + $0x8] sm:$0xff] %v3466_v20  ;;  %v3532_v59 = vadd.f32 %v3466_v20, %v3465_v62  ;;  %v3573_v1 = vmul.f32 %v3466_v20, %v3466_v20  ;;  %v2592_v41 = vunpack.c.l.b16 %v2511_v43  ;;  %v2593_v60 = vunpack.c.l.b16 %v2512_v37  ;;  %v2828_v37 = vld [vmem:[#allocation2 + $0x141] sm:$0xff] }
 0x24b   : > { %v2698_v40 = vpop.f32.mrf.mxu2 }
 0x24c   : > { %v3604_v46 = vadd.f32 %v3573_v1, %v3572_v44  ;;  %v2775_v16 = vadd.f32 %v2698_v40, %v2428_v17  ;;  %v3044_v13 = vpop.f32.mrf.mxu3  ;;  %v2614_v1 = vpack.c.b16 %v2593_v60, %v2592_v41  ;;  %v2860_v60 = vpack.c.bf16 %v2828_v37, %v2828_v37 }
 0x24d   : > { %v2353_v27 = vpop.f32.mrf.mxu1 }
 0x24e   : > { %v3121_v23 = vadd.f32 %v3044_v13, %v2775_v16  ;;  %v2429_v20 = vadd.f32 %v2353_v27, %v8999_v31  ;;  %v2482_v16 = vld [vmem:[#allocation2 + $0x140] sm:$0xff] }
 0x24f   : > { %v3392_v62 = vpop.f32.mrf.mxu0  ;;  %v2827_v13 = vld [vmem:[#allocation2 + $0x139] sm:$0xff] }
 0x250   : > { %v3467_v22 = vadd.f32 %v3390_v58, %v3121_v23  ;;  %v3306_v58 = vpack.c.b16 %v3285_v54, %v3284_v14  ;;  %v3173_v27 = vld [vmem:[#allocation2 + $0x13a] sm:$0xff]  ;;  %v2859_v41 = vpack.c.bf16 %v2827_v13, %v2827_v13 }
 0x251   : > { %v3205_v19 = vpack.c.bf16 %v3173_v27, %v3173_v27 }
 0x252   : > { %3501 = vst [vmem:[%s9122_s22 + $0x10] sm:$0xff] %v3467_v22  ;;  %v3533_v45 = vadd.f32 %v3532_v59, %v3467_v22  ;;  %v3574_v36 = vmul.f32 %v3467_v22, %v3467_v22  ;;  %v2481_v59 = vld [vmem:[#allocation2 + $0x138] sm:$0xff] }
 0x253   : > { %v2700_v5 = vpop.f32.mrf.mxu2 }
 0x254   : > { %v3605_v3 = vadd.f32 %v3604_v46, %v3574_v36  ;;  %v2776_v2 = vadd.f32 %v2700_v5, %v2429_v20  ;;  %v3046_v44 = vpop.f32.mrf.mxu3  ;;  %v2940_v20 = vunpack.c.l.b16 %v2859_v41  ;;  %v2941_v5 = vunpack.c.l.b16 %v2860_v60 }
 0x255   : > { %v2356_v17 = vpop.f32.mrf.mxu1 }
 0x256   : > { %v3122_v25 = vadd.f32 %v3046_v44, %v2776_v2  ;;  %v2430_v43 = vadd.f32 %v2356_v17, %v9014_v12  ;;  %v3286_v2 = vunpack.c.l.b16 %v3205_v19  ;;  %v3287_v44 = vunpack.c.l.b16 %v3206_v32 }
 0x257   : > { %v3395_v38 = vpop.f32.mrf.mxu0 }
 0x258   : > { %v3468_v40 = vadd.f32 %v3392_v62, %v3122_v25  ;;  %2395 = vmatmul.bf16.gmra.mxu1 %v3305_v7  ;;  %2742 = vmatmul.bf16.gmra.mxu2 %v2614_v1  ;;  %v2513_v62 = vpack.c.bf16 %v2481_v59, %v2481_v59  ;;  %v2514_v7 = vpack.c.bf16 %v2482_v16, %v2482_v16 }
 0x259   : > { %3088 = vmatmul.bf16.gmra.mxu3 %v2960_v26 }
 0x25a   : > { %3434 = vmatmul.bf16.gmra.mxu0 %v3306_v58  ;;  %3502 = vst [vmem:[%s9122_s22 + $0x18] sm:$0xff] %v3468_v40  ;;  %v3534_v31 = vadd.f32 %v3533_v45, %v3468_v40  ;;  %v3575_v46 = vmul.f32 %v3468_v40, %v3468_v40  ;;  %v2594_v36 = vunpack.c.l.b16 %v2513_v62  ;;  %v2595_v12 = vunpack.c.l.b16 %v2514_v7  ;;  %v3175_v62 = vld [vmem:[#allocation2 + $0x152] sm:$0xff]  ;;  %v3176_v7 = vld [vmem:[#allocation2 + $0x15a] sm:$0xff] }
 0x25b   : > { %v2703_v29 = vpop.f32.mrf.mxu2 }
 0x25c   : > { %v3606_v21 = vadd.f32 %v3605_v3, %v3575_v46  ;;  %v2777_v63 = vadd.f32 %v2703_v29, %v2430_v43  ;;  %v3049_v23 = vpop.f32.mrf.mxu3  ;;  %v2615_v16 = vpack.c.b16 %v2595_v12, %v2594_v36  ;;  %v2961_v46 = vpack.c.b16 %v2941_v5, %v2940_v20  ;;  %v2829_v29 = vld [vmem:[#allocation2 + $0x151] sm:$0xff] }
 0x25d   : > { %v2358_v22 = vpop.f32.mrf.mxu1  ;;  %v3207_v36 = vpack.c.bf16 %v3175_v62, %v3175_v62  ;;  %v3208_v12 = vpack.c.bf16 %v3176_v7, %v3176_v7  ;;  %v2831_v62 = vld [vmem:[#allocation2 + $0x169] sm:$0xff] }
 0x25e   : > { %v3123_v14 = vadd.f32 %v3049_v23, %v2777_v63  ;;  %v2431_v17 = vadd.f32 %v2358_v22, %v9017_v10  ;;  %v2830_v23 = vld [vmem:[#allocation2 + $0x159] sm:$0xff] }
 0x25f   : > { %v3397_v54 = vpop.f32.mrf.mxu0 }
 0x260   : > { %v3469_v45 = vadd.f32 %v3395_v38, %v3123_v14  ;;  %v3307_v38 = vpack.c.b16 %v3287_v44, %v3286_v2 }
 0x262   : > { %3503 = vst [vmem:[%s9122_s22 + $0x20] sm:$0xff] %v3469_v45  ;;  %v3535_v3 = vadd.f32 %v3534_v31, %v3469_v45  ;;  %v3576_v1 = vmul.f32 %v3469_v45, %v3469_v45  ;;  %v2483_v31 = vld [vmem:[#allocation2 + $0x150] sm:$0xff]  ;;  %v2862_v45 = vpack.c.bf16 %v2830_v23, %v2830_v23 }
 0x263   : > { %v2705_v26 = vpop.f32.mrf.mxu2  ;;  %v2515_v32 = vpack.c.bf16 %v2483_v31, %v2483_v31  ;;  %v2486_v23 = vld [vmem:[#allocation2 + $0x170] sm:$0xff] }
 0x264   : > { %v3607_v25 = vadd.f32 %v3606_v21, %v3576_v1  ;;  %v2778_v40 = vadd.f32 %v2705_v26, %v2431_v17  ;;  %v3051_v59 = vpop.f32.mrf.mxu3  ;;  %v2943_v1 = vunpack.c.l.b16 %v2862_v45  ;;  %v3288_v17 = vunpack.c.l.b16 %v3207_v36 }
 0x265   : > { %v2361_v13 = vpop.f32.mrf.mxu1  ;;  %v2596_v44 = vunpack.c.l.b16 %v2515_v32  ;;  %v3289_v26 = vunpack.c.l.b16 %v3208_v12  ;;  %v2863_v12 = vpack.c.bf16 %v2831_v62, %v2831_v62 }
 0x266   : > { %v3124_v43 = vadd.f32 %v3051_v59, %v2778_v40  ;;  %v2432_v63 = vadd.f32 %v2361_v13, %v9020_v4 }
 0x267   : > { %v3400_v37 = vpop.f32.mrf.mxu0 }
 0x268   : > { %v3470_v27 = vadd.f32 %v3397_v54, %v3124_v43  ;;  %2400 = vmatmul.bf16.gmra.mxu1 %v3306_v58  ;;  %2747 = vmatmul.bf16.gmra.mxu2 %v2615_v16  ;;  %v2516_v58 = vpack.c.bf16 %v2484_v9, %v2484_v9  ;;  %v2861_v54 = vpack.c.bf16 %v2829_v29, %v2829_v29 }
 0x269   : > { %3093 = vmatmul.bf16.gmra.mxu3 %v2961_v46 }
 0x26a   : > { %3439 = vmatmul.bf16.gmra.mxu0 %v3307_v38  ;;  %3504 = vst [vmem:[%s9122_s22 + $0x28] sm:$0xff] %v3470_v27  ;;  %v3536_v10 = vadd.f32 %v3535_v3, %v3470_v27  ;;  %v3577_v21 = vmul.f32 %v3470_v27, %v3470_v27  ;;  %v2597_v4 = vunpack.c.l.b16 %v2516_v58  ;;  %v2942_v3 = vunpack.c.l.b16 %v2861_v54 }
 0x26b   : > { %v2708_v22 = vpop.f32.mrf.mxu2 }
 0x26c   : > { %v3608_v41 = vadd.f32 %v3607_v25, %v3577_v21  ;;  %v2779_v60 = vadd.f32 %v2708_v22, %v2432_v63  ;;  %v3054_v19 = vpop.f32.mrf.mxu3  ;;  %v2616_v27 = vpack.c.b16 %v2597_v4, %v2596_v44  ;;  %v2962_v9 = vpack.c.b16 %v2943_v1, %v2942_v3 }
 0x26d   : > { %v2363_v14 = vpop.f32.mrf.mxu1 }
 0x26e   : > { %v3125_v20 = vadd.f32 %v3054_v19, %v2779_v60  ;;  %v2433_v59 = vadd.f32 %v2363_v14, %v9022_v51  ;;  %v3177_v60 = vld [vmem:[#allocation2 + $0x16a] sm:$0xff]  ;;  %v3178_v19 = vld [vmem:[#allocation2 + $0x172] sm:$0xff] }
 0x26f   : > { %v3402_v5 = vpop.f32.mrf.mxu0 }
 0x270   : > { %v3471_v2 = vadd.f32 %v3400_v37, %v3125_v20  ;;  %v3308_v37 = vpack.c.b16 %v3289_v26, %v3288_v17  ;;  %v2944_v17 = vunpack.c.l.b16 %v2863_v12 }
 0x272   : > { %3505 = vst [vmem:[%s9122_s22 + $0x30] sm:$0xff] %v3471_v2  ;;  %v3537_v25 = vadd.f32 %v3536_v10, %v3471_v2  ;;  %v3578_v40 = vmul.f32 %v3471_v2, %v3471_v2  ;;  %v2485_v10 = vld [vmem:[#allocation2 + $0x168] sm:$0xff]  ;;  %v3210_v2 = vpack.c.bf16 %v3178_v19, %v3178_v19 }
 0x273   : > { %v2710_v16 = vpop.f32.mrf.mxu2  ;;  %v2517_v45 = vpack.c.bf16 %v2485_v10, %v2485_v10  ;;  %v2834_v19 = vld [vmem:[#allocation2 + $0x189] sm:$0xff] }
 0x274   : > { %v3609_v13 = vadd.f32 %v3608_v41, %v3578_v40  ;;  %v2780_v46 = vadd.f32 %v2710_v16, %v2433_v59  ;;  %v3056_v43 = vpop.f32.mrf.mxu3  ;;  %v2832_v41 = vld [vmem:[#allocation2 + $0x171] sm:$0xff]  ;;  %v3291_v40 = vunpack.c.l.b16 %v3210_v2 }
 0x275   : > { %v2366_v31 = vpop.f32.mrf.mxu1  ;;  %v2864_v20 = vpack.c.bf16 %v2832_v41, %v2832_v41  ;;  %v2598_v1 = vunpack.c.l.b16 %v2517_v45 }
 0x276   : > { %v3126_v29 = vadd.f32 %v3056_v43, %v2780_v46  ;;  %v2434_v22 = vadd.f32 %v2366_v31, %v9045_v42 }
 0x277   : > { %v3405_v21 = vpop.f32.mrf.mxu0  ;;  %v2945_v26 = vunpack.c.l.b16 %v2864_v20 }
 0x278   : > { %v3472_v63 = vadd.f32 %v3402_v5, %v3126_v29  ;;  %2405 = vmatmul.bf16.gmra.mxu1 %v3307_v38  ;;  %2752 = vmatmul.bf16.gmra.mxu2 %v2616_v27  ;;  %v2518_v38 = vpack.c.bf16 %v2486_v23, %v2486_v23  ;;  %v3209_v5 = vpack.c.bf16 %v3177_v60, %v3177_v60 }
 0x279   : > { %3098 = vmatmul.bf16.gmra.mxu3 %v2962_v9 }
 0x27a   : > { %3444 = vmatmul.bf16.gmra.mxu0 %v3308_v37  ;;  %3506 = vst [vmem:[%s9122_s22 + $0x38] sm:$0xff] %v3472_v63  ;;  %v3538_v51 = vadd.f32 %v3537_v25, %v3472_v63  ;;  %v3579_v7 = vmul.f32 %v3472_v63, %v3472_v63  ;;  %v2599_v42 = vunpack.c.l.b16 %v2518_v38  ;;  %v3290_v25 = vunpack.c.l.b16 %v3209_v5 }
 0x27b   : > { %v2713_v32 = vpop.f32.mrf.mxu2  ;;  %v2963_v63 = vpack.c.b16 %v2945_v26, %v2944_v17  ;;  %v2866_v5 = vpack.c.bf16 %v2834_v19, %v2834_v19  ;;  %v2836_v19 = vld [vmem:[#allocation2 + $0x1a1] sm:$0xff] }
 0x27c   : > { %v3610_v58 = vadd.f32 %v3609_v13, %v3579_v7  ;;  %v2781_v14 = vadd.f32 %v2713_v32, %v2434_v22  ;;  %v3059_v54 = vpop.f32.mrf.mxu3  ;;  %v2617_v9 = vpack.c.b16 %v2599_v42, %v2598_v1  ;;  %v2488_v7 = vld [vmem:[#allocation2 + $0x188] sm:$0xff] }
 0x27d   : > { %v2368_v36 = vpop.f32.mrf.mxu1  ;;  %v2833_v22 = vld [vmem:[#allocation2 + $0x181] sm:$0xff]  ;;  %v2947_v26 = vunpack.c.l.b16 %v2866_v5 }
 0x27e   : > { %v3127_v44 = vadd.f32 %v3059_v54, %v2781_v14  ;;  %v2435_v13 = vadd.f32 %v2368_v36, %v9048_v6  ;;  %v3179_v32 = vld [vmem:[#allocation2 + $0x182] sm:$0xff]  ;;  %v2865_v20 = vpack.c.bf16 %v2833_v22, %v2833_v22 }
 0x27f   : > { %v3407_v4 = vpop.f32.mrf.mxu0  ;;  %v3211_v2 = vpack.c.bf16 %v3179_v32, %v3179_v32  ;;  %v2490_v22 = vld [vmem:[#allocation2 + $0x1a0] sm:$0xff] }
 0x280   : > { %v3473_v3 = vadd.f32 %v3405_v21, %v3127_v44  ;;  %v3309_v21 = vpack.c.b16 %v3291_v40, %v3290_v25  ;;  %v2946_v17 = vunpack.c.l.b16 %v2865_v20  ;;  %v3181_v32 = vld [vmem:[#allocation2 + $0x19a] sm:$0xff]  ;;  %v2868_v20 = vpack.c.bf16 %v2836_v19, %v2836_v19 }
 0x281   : > { %v3292_v25 = vunpack.c.l.b16 %v3211_v2  ;;  %v3213_v5 = vpack.c.bf16 %v3181_v32, %v3181_v32 }
 0x282   : > { %3507 = vst [vmem:[%s9122_s22 + $0x40] sm:$0xff] %v3473_v3  ;;  %v3539_v59 = vadd.f32 %v3538_v51, %v3473_v3  ;;  %v3580_v16 = vmul.f32 %v3473_v3, %v3473_v3  ;;  %v2487_v51 = vld [vmem:[#allocation2 + $0x180] sm:$0xff] }
 0x283   : > { %v2715_v46 = vpop.f32.mrf.mxu2  ;;  %v2519_v36 = vpack.c.bf16 %v2487_v51, %v2487_v51 }
 0x284   : > { %v3611_v43 = vadd.f32 %v3610_v58, %v3580_v16  ;;  %v2782_v27 = vadd.f32 %v2715_v46, %v2435_v13  ;;  %v3061_v31 = vpop.f32.mrf.mxu3  ;;  %v3180_v58 = vld [vmem:[#allocation2 + $0x18a] sm:$0xff] }
 0x285   : > { %v2371_v29 = vpop.f32.mrf.mxu1  ;;  %v3212_v44 = vpack.c.bf16 %v3180_v58, %v3180_v58  ;;  %v2600_v42 = vunpack.c.l.b16 %v2519_v36  ;;  %v3182_v58 = vld [vmem:[#allocation2 + $0x1a2] sm:$0xff] }
 0x286   : > { %v3128_v10 = vadd.f32 %v3061_v31, %v2782_v27  ;;  %v2436_v60 = vadd.f32 %v2371_v29, %v9051_v61  ;;  %v3214_v2 = vpack.c.bf16 %v3182_v58, %v3182_v58 }
 0x287   : > { %v3410_v23 = vpop.f32.mrf.mxu0  ;;  %v3293_v40 = vunpack.c.l.b16 %v3212_v44 }
 0x288   : > { %v3474_v62 = vadd.f32 %v3407_v4, %v3128_v10  ;;  %2410 = vmatmul.bf16.gmra.mxu1 %v3308_v37  ;;  %2757 = vmatmul.bf16.gmra.mxu2 %v2617_v9  ;;  %v2520_v37 = vpack.c.bf16 %v2488_v7, %v2488_v7  ;;  %v2489_v7 = vld [vmem:[#allocation2 + $0x198] sm:$0xff] }
 0x289   : > { %3103 = vmatmul.bf16.gmra.mxu3 %v2963_v63  ;;  %v2964_v63 = vpack.c.b16 %v2947_v26, %v2946_v17  ;;  %v3310_v10 = vpack.c.b16 %v3293_v40, %v3292_v25  ;;  %v2521_v36 = vpack.c.bf16 %v2489_v7, %v2489_v7  ;;  %v3294_v17 = vunpack.c.l.b16 %v3213_v5 }
 0x28a   : > { %3449 = vmatmul.bf16.gmra.mxu0 %v3309_v21  ;;  %3508 = vst [vmem:[%s9122_s22 + $0x48] sm:$0xff] %v3474_v62  ;;  %v3540_v6 = vadd.f32 %v3539_v59, %v3474_v62  ;;  %v3581_v41 = vmul.f32 %v3474_v62, %v3474_v62  ;;  %v2601_v61 = vunpack.c.l.b16 %v2520_v37  ;;  %v3295_v26 = vunpack.c.l.b16 %v3214_v2 }
 0x28b   : > { %v2718_v14 = vpop.f32.mrf.mxu2 }
 0x28c   : > { %v3612_v54 = vadd.f32 %v3611_v43, %v3581_v41  ;;  %v2783_v45 = vadd.f32 %v2718_v14, %v2436_v60  ;;  %v3064_v38 = vpop.f32.mrf.mxu3  ;;  %v2618_v9 = vpack.c.b16 %v2601_v61, %v2600_v42  ;;  %v2949_v61 = vunpack.c.l.b16 %v2868_v20 }
 0x28d   : > { %v2373_v12 = vpop.f32.mrf.mxu1 }
 0x28e   : > { %v3129_v4 = vadd.f32 %v3064_v38, %v2783_v45  ;;  %v2437_v13 = vadd.f32 %v2373_v12, %v9054_v55 }
 0x28f   : > { %v3412_v3 = vpop.f32.mrf.mxu0 }
 0x290   : > { %v3475_v1 = vadd.f32 %v3410_v23, %v3129_v4 }
 0x292   : > { %3509 = vst [vmem:[%s9122_s22 + $0x50] sm:$0xff] %v3475_v1  ;;  %v3541_v59 = vadd.f32 %v3540_v6, %v3475_v1  ;;  %v3582_v16 = vmul.f32 %v3475_v1, %v3475_v1  ;;  %v2835_v6 = vld [vmem:[#allocation2 + $0x199] sm:$0xff]  ;;  %v2602_v1 = vunpack.c.l.b16 %v2521_v36 }
 0x293   : > { %v2720_v46 = vpop.f32.mrf.mxu2  ;;  %v2867_v12 = vpack.c.bf16 %v2835_v6, %v2835_v6 }
 0x294   : > { %v3613_v43 = vadd.f32 %v3612_v54, %v3582_v16  ;;  %v2784_v27 = vadd.f32 %v2720_v46, %v2437_v13  ;;  %v3066_v31 = vpop.f32.mrf.mxu3 }
 0x295   : > { %v2376_v29 = vpop.f32.mrf.mxu1  ;;  %v2948_v42 = vunpack.c.l.b16 %v2867_v12 }
 0x296   : > { %v3130_v23 = vadd.f32 %v3066_v31, %v2784_v27  ;;  %v2438_v60 = vadd.f32 %v2376_v29, %v9061_v57  ;;  %v3311_v29 = vpack.c.b16 %v3295_v26, %v3294_v17 }
 0x297   : > { %v3415_v62 = vpop.f32.mrf.mxu0 }
 0x298   : > { %v3476_v51 = vadd.f32 %v3412_v3, %v3130_v23  ;;  %2415 = vmatmul.bf16.gmra.mxu1 %v3309_v21  ;;  %2762 = vmatmul.bf16.gmra.mxu2 %v2618_v9  ;;  %v2522_v21 = vpack.c.bf16 %v2490_v22, %v2490_v22  ;;  %v2965_v9 = vpack.c.b16 %v2949_v61, %v2948_v42 }
 0x299   : > { %3108 = vmatmul.bf16.gmra.mxu3 %v2964_v63 }
 0x29a   : > { %3454 = vmatmul.bf16.gmra.mxu0 %v3310_v10  ;;  %3510 = vst [vmem:[%s9122_s22 + $0x58] sm:$0xff] %v3476_v51  ;;  %v3542_v55 = vadd.f32 %v3541_v59, %v3476_v51  ;;  %v3583_v41 = vmul.f32 %v3476_v51, %v3476_v51  ;;  %v2603_v57 = vunpack.c.l.b16 %v2522_v21 }
 0x29b   : > { %v2723_v14 = vpop.f32.mrf.mxu2 }
 0x29c   : > { %v3614_v54 = vadd.f32 %v3613_v43, %v3583_v41  ;;  %v2785_v45 = vadd.f32 %v2723_v14, %v2438_v60  ;;  %v3069_v38 = vpop.f32.mrf.mxu3  ;;  %v2619_v27 = vpack.c.b16 %v2603_v57, %v2602_v1 }
 0x29d   : > { %v2378_v37 = vpop.f32.mrf.mxu1 }
 0x29e   : > { %v3131_v44 = vadd.f32 %v3069_v38, %v2785_v45  ;;  %v2439_v59 = vadd.f32 %v2378_v37, %v9064_v30 }
 0x29f   : > { %v3417_v4 = vpop.f32.mrf.mxu0 }
 0x2a0   : > { %v3477_v3 = vadd.f32 %v3415_v62, %v3131_v44 }
 0x2a2   : > { %3511 = vst [vmem:[%s9122_s22 + $0x60] sm:$0xff] %v3477_v3  ;;  %v3543_v25 = vadd.f32 %v3542_v55, %v3477_v3  ;;  %v3584_v40 = vmul.f32 %v3477_v3, %v3477_v3 }
 0x2a3   : > { %v2725_v16 = vpop.f32.mrf.mxu2 }
 0x2a4   : > { %v3615_v13 = vadd.f32 %v3614_v54, %v3584_v40  ;;  %v2786_v46 = vadd.f32 %v2725_v16, %v2439_v59  ;;  %v3071_v43 = vpop.f32.mrf.mxu3 }
 0x2a5   : > { %v2381_v31 = vpop.f32.mrf.mxu1 }
 0x2a6   : > { %v3132_v63 = vadd.f32 %v3071_v43, %v2786_v46  ;;  %v2440_v7 = vadd.f32 %v2381_v31, %v9067_v15 }
 0x2a7   : > { %v3420_v23 = vpop.f32.mrf.mxu0 }
 0x2a8   : > { %v3478_v62 = vadd.f32 %v3417_v4, %v3132_v63  ;;  %2420 = vmatmul.bf16.gmra.mxu1 %v3310_v10  ;;  %2767 = vmatmul.bf16.gmra.mxu2 %v2619_v27 }
 0x2a9   : > { %3113 = vmatmul.bf16.gmra.mxu3 %v2965_v9 }
 0x2aa   : > { %3459 = vmatmul.bf16.gmra.mxu0 %v3311_v29  ;;  %3512 = vst [vmem:[%s9122_s22 + $0x68] sm:$0xff] %v3478_v62  ;;  %v3544_v51 = vadd.f32 %v3543_v25, %v3478_v62  ;;  %v3585_v30 = vmul.f32 %v3478_v62, %v3478_v62 }
 0x2ab   : > { %v2728_v22 = vpop.f32.mrf.mxu2 }
 0x2ac   : > { %v3616_v6 = vadd.f32 %v3615_v13, %v3585_v30  ;;  %v2787_v55 = vadd.f32 %v2728_v22, %v2440_v7  ;;  %v3074_v41 = vpop.f32.mrf.mxu3 }
 0x2ad   : > { %v2383_v60 = vpop.f32.mrf.mxu1 }
 0x2ae   : > { %v3133_v19 = vadd.f32 %v3074_v41, %v2787_v55  ;;  %v2441_v54 = vadd.f32 %v2383_v60, %v9070_v33 }
 0x2af   : > { %v3422_v32 = vpop.f32.mrf.mxu0 }
 0x2b0   : > { %v3479_v58 = vadd.f32 %v3420_v23, %v3133_v19 }
 0x2b2   : > { %3513 = vst [vmem:[%s9122_s22 + $0x70] sm:$0xff] %v3479_v58  ;;  %v3545_v10 = vadd.f32 %v3544_v51, %v3479_v58  ;;  %v3586_v14 = vmul.f32 %v3479_v58, %v3479_v58 }
 0x2b3   : > { %v2730_v45 = vpop.f32.mrf.mxu2 }
 0x2b4   : > { %v3617_v38 = vadd.f32 %v3616_v6, %v3586_v14  ;;  %v2788_v36 = vadd.f32 %v2730_v45, %v2441_v54  ;;  %v3076_v21 = vpop.f32.mrf.mxu3 }
 0x2b5   : > { %v2386_v37 = vpop.f32.mrf.mxu1 }
 0x2b6   : > { %v3134_v15 = vadd.f32 %v3076_v21, %v2788_v36  ;;  %v2442_v44 = vadd.f32 %v2386_v37, %v9073_v34 }
 0x2b7   : > { %v3425_v12 = vpop.f32.mrf.mxu0 }
 0x2b8   : > { %v3480_v20 = vadd.f32 %v3422_v32, %v3134_v15 }
 0x2ba   : > { %3514 = vst [vmem:[%s9122_s22 + $0x78] sm:$0xff] %v3480_v20  ;;  %v3546_v5 = vadd.f32 %v3545_v10, %v3480_v20  ;;  %v3587_v2 = vmul.f32 %v3480_v20, %v3480_v20 }
 0x2bb   : > { %v2733_v4 = vpop.f32.mrf.mxu2 }
 0x2bc   : > { %v3618_v3 = vadd.f32 %v3617_v38, %v3587_v2  ;;  %v2789_v1 = vadd.f32 %v2733_v4, %v2442_v44  ;;  %v3079_v57 = vpop.f32.mrf.mxu3 }
 0x2bd   : > { %v2388_v42 = vpop.f32.mrf.mxu1 }
 0x2be   : > { %v3135_v33 = vadd.f32 %v3079_v57, %v2789_v1  ;;  %v2443_v40 = vadd.f32 %v2388_v42, %v9076_v56 }
 0x2bf   : > { %v3427_v61 = vpop.f32.mrf.mxu0 }
 0x2c0   : > { %v3481_v17 = vadd.f32 %v3425_v12, %v3135_v33 }
 0x2c2   : > { %3515 = vst [vmem:[%s9122_s22 + $0x80] sm:$0xff] %v3481_v17  ;;  %v3547_v26 = vadd.f32 %v3546_v5, %v3481_v17  ;;  %v3588_v25 = vmul.f32 %v3481_v17, %v3481_v17 }
 0x2c3   : > { %v2735_v59 = vpop.f32.mrf.mxu2 }
 0x2c4   : > { %v3619_v16 = vadd.f32 %v3618_v3, %v3588_v25  ;;  %v2790_v13 = vadd.f32 %v2735_v59, %v2443_v40  ;;  %v3081_v46 = vpop.f32.mrf.mxu3 }
 0x2c5   : > { %v2391_v43 = vpop.f32.mrf.mxu1 }
 0x2c6   : > { %v3136_v34 = vadd.f32 %v3081_v46, %v2790_v13  ;;  %v2444_v63 = vadd.f32 %v2391_v43, %v9079_v35 }
 0x2c7   : > { %v3430_v27 = vpop.f32.mrf.mxu0 }
 0x2c8   : > { %v3482_v31 = vadd.f32 %v3427_v61, %v3136_v34 }
 0x2ca   : > { %3516 = vst [vmem:[%s9122_s22 + $0x88] sm:$0xff] %v3482_v31  ;;  %v3548_v9 = vadd.f32 %v3547_v26, %v3482_v31  ;;  %v3589_v29 = vmul.f32 %v3482_v31, %v3482_v31 }
 0x2cb   : > { %v2738_v23 = vpop.f32.mrf.mxu2 }
 0x2cc   : > { %v3620_v62 = vadd.f32 %v3619_v16, %v3589_v29  ;;  %v2791_v51 = vadd.f32 %v2738_v23, %v2444_v63  ;;  %v3084_v30 = vpop.f32.mrf.mxu3 }
 0x2cd   : > { %v2393_v7 = vpop.f32.mrf.mxu1 }
 0x2ce   : > { %v3137_v56 = vadd.f32 %v3084_v30, %v2791_v51  ;;  %v2445_v60 = vadd.f32 %v2393_v7, %v9082_v49 }
 0x2cf   : > { %v3432_v22 = vpop.f32.mrf.mxu0 }
 0x2d0   : > { %v3483_v6 = vadd.f32 %v3430_v27, %v3137_v56 }
 0x2d2   : > { %3517 = vst [vmem:[%s9122_s22 + $0x90] sm:$0xff] %v3483_v6  ;;  %v3549_v55 = vadd.f32 %v3548_v9, %v3483_v6  ;;  %v3590_v41 = vmul.f32 %v3483_v6, %v3483_v6 }
 0x2d3   : > { %v2740_v19 = vpop.f32.mrf.mxu2 }
 0x2d4   : > { %v3621_v32 = vadd.f32 %v3620_v62, %v3590_v41  ;;  %v2792_v58 = vadd.f32 %v2740_v19, %v2445_v60  ;;  %v3086_v10 = vpop.f32.mrf.mxu3 }
 0x2d5   : > { %v2396_v14 = vpop.f32.mrf.mxu1 }
 0x2d6   : > { %v3138_v35 = vadd.f32 %v3086_v10, %v2792_v58  ;;  %v2446_v21 = vadd.f32 %v2396_v14, %v9085_v39 }
 0x2d7   : > { %v3435_v54 = vpop.f32.mrf.mxu0 }
 0x2d8   : > { %v3484_v45 = vadd.f32 %v3432_v22, %v3138_v35 }
 0x2da   : > { %3518 = vst [vmem:[%s9122_s22 + $0x98] sm:$0xff] %v3484_v45  ;;  %v3550_v38 = vadd.f32 %v3549_v55, %v3484_v45  ;;  %v3591_v36 = vmul.f32 %v3484_v45, %v3484_v45 }
 0x2db   : > { %v2743_v37 = vpop.f32.mrf.mxu2 }
 0x2dc   : > { %v3622_v15 = vadd.f32 %v3621_v32, %v3591_v36  ;;  %v2793_v12 = vadd.f32 %v2743_v37, %v2446_v21  ;;  %v3089_v20 = vpop.f32.mrf.mxu3 }
 0x2dd   : > { %v2398_v5 = vpop.f32.mrf.mxu1 }
 0x2de   : > { %v3139_v49 = vadd.f32 %v3089_v20, %v2793_v12  ;;  %v2447_v1 = vadd.f32 %v2398_v5, %v9088_v28 }
 0x2df   : > { %v3437_v2 = vpop.f32.mrf.mxu0 }
 0x2e0   : > { %v3485_v44 = vadd.f32 %v3435_v54, %v3139_v49 }
 0x2e2   : > { %3519 = vst [vmem:[%s9122_s22 + $0xa0] sm:$0xff] %v3485_v44  ;;  %v3551_v4 = vadd.f32 %v3550_v38, %v3485_v44  ;;  %v3592_v3 = vmul.f32 %v3485_v44, %v3485_v44 }
 0x2e3   : > { %v2745_v57 = vpop.f32.mrf.mxu2 }
 0x2e4   : > { %v3623_v42 = vadd.f32 %v3622_v15, %v3592_v3  ;;  %v2794_v33 = vadd.f32 %v2745_v57, %v2447_v1  ;;  %v3091_v61 = vpop.f32.mrf.mxu3 }
 0x2e5   : > { %v2401_v17 = vpop.f32.mrf.mxu1 }
 0x2e6   : > { %v3140_v39 = vadd.f32 %v3091_v61, %v2794_v33  ;;  %v2448_v16 = vadd.f32 %v2401_v17, %v9091_v47 }
 0x2e7   : > { %v3440_v26 = vpop.f32.mrf.mxu0 }
 0x2e8   : > { %v3486_v25 = vadd.f32 %v3437_v2, %v3140_v39 }
 0x2ea   : > { %3520 = vst [vmem:[%s9122_s22 + $0xa8] sm:$0xff] %v3486_v25  ;;  %v3552_v40 = vadd.f32 %v3551_v4, %v3486_v25  ;;  %v3593_v59 = vmul.f32 %v3486_v25, %v3486_v25 }
 0x2eb   : > { %v2748_v13 = vpop.f32.mrf.mxu2 }
 0x2ec   : > { %v3624_v46 = vadd.f32 %v3623_v42, %v3593_v59  ;;  %v2795_v43 = vadd.f32 %v2748_v13, %v2448_v16  ;;  %v3094_v34 = vpop.f32.mrf.mxu3 }
 0x2ed   : > { %v2403_v27 = vpop.f32.mrf.mxu1 }
 0x2ee   : > { %v3141_v28 = vadd.f32 %v3094_v34, %v2795_v43  ;;  %v2449_v23 = vadd.f32 %v2403_v27, %v9094_v48 }
 0x2ef   : > { %v3442_v31 = vpop.f32.mrf.mxu0 }
 0x2f0   : > { %v3487_v9 = vadd.f32 %v3440_v26, %v3141_v28 }
 0x2f2   : > { %3521 = vst [vmem:[%s9122_s22 + $0xb0] sm:$0xff] %v3487_v9  ;;  %v3553_v29 = vadd.f32 %v3552_v40, %v3487_v9  ;;  %v3594_v63 = vmul.f32 %v3487_v9, %v3487_v9 }
 0x2f3   : > { %v2750_v62 = vpop.f32.mrf.mxu2 }
 0x2f4   : > { %v3625_v51 = vadd.f32 %v3624_v46, %v3594_v63  ;;  %v2796_v30 = vadd.f32 %v2750_v62, %v2449_v23  ;;  %v3096_v7 = vpop.f32.mrf.mxu3 }
 0x2f5   : > { %v2406_v56 = vpop.f32.mrf.mxu1 }
 0x2f6   : > { %v3142_v47 = vadd.f32 %v3096_v7, %v2796_v30  ;;  %v2450_v60 = vadd.f32 %v2406_v56, %v9097_v53 }
 0x2f7   : > { %v3445_v22 = vpop.f32.mrf.mxu0 }
 0x2f8   : > { %v3488_v6 = vadd.f32 %v3442_v31, %v3142_v47 }
 0x2fa   : > { %3522 = vst [vmem:[%s9122_s22 + $0xb8] sm:$0xff] %v3488_v6  ;;  %v3554_v55 = vadd.f32 %v3553_v29, %v3488_v6  ;;  %v3595_v41 = vmul.f32 %v3488_v6, %v3488_v6 }
 0x2fb   : > { %v2753_v19 = vpop.f32.mrf.mxu2 }
 0x2fc   : > { %v3626_v32 = vadd.f32 %v3625_v51, %v3595_v41  ;;  %v2797_v58 = vadd.f32 %v2753_v19, %v2450_v60  ;;  %v3099_v10 = vpop.f32.mrf.mxu3 }
 0x2fd   : > { %v2408_v14 = vpop.f32.mrf.mxu1 }
 0x2fe   : > { %v3143_v48 = vadd.f32 %v3099_v10, %v2797_v58  ;;  %v2451_v36 = vadd.f32 %v2408_v14, %v9100_v8 }
 0x2ff   : > { %v3447_v35 = vpop.f32.mrf.mxu0 }
 0x300   : > { %v3489_v54 = vadd.f32 %v3445_v22, %v3143_v48 }
 0x302   : > { %3523 = vst [vmem:[%s9122_s22 + $0xc0] sm:$0xff] %v3489_v54  ;;  %v3555_v45 = vadd.f32 %v3554_v55, %v3489_v54  ;;  %v3596_v38 = vmul.f32 %v3489_v54, %v3489_v54 }
 0x303   : > { %v2755_v21 = vpop.f32.mrf.mxu2 }
 0x304   : > { %v3627_v37 = vadd.f32 %v3626_v32, %v3596_v38  ;;  %v2798_v15 = vadd.f32 %v2755_v21, %v2451_v36  ;;  %v3101_v12 = vpop.f32.mrf.mxu3 }
 0x305   : > { %v2411_v20 = vpop.f32.mrf.mxu1 }
 0x306   : > { %v3144_v53 = vadd.f32 %v3101_v12, %v2798_v15  ;;  %v2452_v4 = vadd.f32 %v2411_v20, %v9103_v50 }
 0x307   : > { %v3450_v5 = vpop.f32.mrf.mxu0 }
 0x308   : > { %v3490_v49 = vadd.f32 %v3447_v35, %v3144_v53 }
 0x30a   : > { %3524 = vst [vmem:[%s9122_s22 + $0xc8] sm:$0xff] %v3490_v49  ;;  %v3556_v2 = vadd.f32 %v3555_v45, %v3490_v49  ;;  %v3597_v44 = vmul.f32 %v3490_v49, %v3490_v49 }
 0x30b   : > { %v2758_v3 = vpop.f32.mrf.mxu2 }
 0x30c   : > { %v3628_v1 = vadd.f32 %v3627_v37, %v3597_v44  ;;  %v2799_v57 = vadd.f32 %v2758_v3, %v2452_v4  ;;  %v3104_v42 = vpop.f32.mrf.mxu3 }
 0x30d   : > { %v2413_v33 = vpop.f32.mrf.mxu1 }
 0x30e   : > { %v3145_v8 = vadd.f32 %v3104_v42, %v2799_v57  ;;  %v2453_v25 = vadd.f32 %v2413_v33, %v9106_v18 }
 0x30f   : > { %v3452_v61 = vpop.f32.mrf.mxu0 }
 0x310   : > { %v3491_v17 = vadd.f32 %v3450_v5, %v3145_v8 }
 0x312   : > { %3525 = vst [vmem:[%s9122_s22 + $0xd0] sm:$0xff] %v3491_v17  ;;  %v3557_v39 = vadd.f32 %v3556_v2, %v3491_v17  ;;  %v3598_v26 = vmul.f32 %v3491_v17, %v3491_v17 }
 0x313   : > { %v2760_v40 = vpop.f32.mrf.mxu2 }
 0x314   : > { %v3629_v59 = vadd.f32 %v3628_v1, %v3598_v26  ;;  %v2800_v16 = vadd.f32 %v2760_v40, %v2453_v25  ;;  %v3106_v13 = vpop.f32.mrf.mxu3  ;;  %v3531_v26 = vld [vmem:[#allocation5] sm:$0x1] }
 0x315   : > { %v2416_v50 = vpop.f32.mrf.mxu1 }
 0x316   : > { %v3146_v46 = vadd.f32 %v3106_v13, %v2800_v16  ;;  %v2454_v31 = vadd.f32 %v2416_v50, %v9109_v24 }
 0x317   : > { %v3455_v34 = vpop.f32.mrf.mxu0 }
 0x318   : > { %v3492_v43 = vadd.f32 %v3452_v61, %v3146_v46 }
 0x31a   : > { %3526 = vst [vmem:[%s9122_s22 + $0xd8] sm:$0xff] %v3492_v43  ;;  %v3558_v27 = vadd.f32 %v3557_v39, %v3492_v43  ;;  %v3599_v28 = vmul.f32 %v3492_v43, %v3492_v43 }
 0x31b   : > { %v2763_v9 = vpop.f32.mrf.mxu2 }
 0x31c   : > { %v3630_v29 = vadd.f32 %v3629_v59, %v3599_v28  ;;  %v2801_v63 = vadd.f32 %v2763_v9, %v2454_v31  ;;  %v3109_v23 = vpop.f32.mrf.mxu3  ;;  %v3571_v59 = vld [vmem:[#allocation6] sm:$0x1] }
 0x31d   : > { %v2418_v18 = vpop.f32.mrf.mxu1 }
 0x31e   : > { %v3147_v62 = vadd.f32 %v3109_v23, %v2801_v63  ;;  %v2455_v56 = vadd.f32 %v2418_v18, %v9112_v0 }
 0x31f   : > { %v3457_v47 = vpop.f32.mrf.mxu0 }
 0x320   : > { %v3493_v51 = vadd.f32 %v3455_v34, %v3147_v62 }
 0x322   : > { %3527 = vst [vmem:[%s9122_s22 + $0xe0] sm:$0xff] %v3493_v51  ;;  %v3559_v30 = vadd.f32 %v3558_v27, %v3493_v51  ;;  %v3600_v7 = vmul.f32 %v3493_v51, %v3493_v51 }
 0x323   : > { %v2765_v22 = vpop.f32.mrf.mxu2 }
 0x324   : > { %v3631_v6 = vadd.f32 %v3630_v29, %v3600_v7  ;;  %v2802_v55 = vadd.f32 %v2765_v22, %v2455_v56  ;;  %v3111_v41 = vpop.f32.mrf.mxu3 }
 0x325   : > { %v2421_v24 = vpop.f32.mrf.mxu1 }
 0x326   : > { %v3148_v60 = vadd.f32 %v3111_v41, %v2802_v55  ;;  %v2456_v10 = vadd.f32 %v2421_v24, %v9115_v11 }
 0x327   : > { %v3460_v0 = vpop.f32.mrf.mxu0 }
 0x328   : > { %v3494_v19 = vadd.f32 %v3457_v47, %v3148_v60 }
 0x32a   : > { %3528 = vst [vmem:[%s9122_s22 + $0xe8] sm:$0xff] %v3494_v19  ;;  %v3560_v32 = vadd.f32 %v3559_v30, %v3494_v19  ;;  %v3601_v58 = vmul.f32 %v3494_v19, %v3494_v19 }
 0x32b   : > { %v2768_v14 = vpop.f32.mrf.mxu2 }
 0x32c   : > { %v3632_v48 = vadd.f32 %v3631_v6, %v3601_v58  ;;  %v2803_v35 = vadd.f32 %v2768_v14, %v2456_v10  ;;  %v3114_v54 = vpop.f32.mrf.mxu3 }
 0x32d   : > { %v2423_v38 = vpop.f32.mrf.mxu1 }
 0x32e   : > { %v3149_v45 = vadd.f32 %v3114_v54, %v2803_v35  ;;  %v2457_v15 = vadd.f32 %v2423_v38, %v9118_v52 }
 0x32f   : > { %v3462_v11 = vpop.f32.mrf.mxu0 }
 0x330   : > { %v3495_v36 = vadd.f32 %v3460_v0, %v3149_v45 }
 0x332   : > { %3529 = vst [vmem:[%s9122_s22 + $0xf0] sm:$0xff] %v3495_v36  ;;  %v3561_v21 = vadd.f32 %v3560_v32, %v3495_v36  ;;  %v3602_v37 = vmul.f32 %v3495_v36, %v3495_v36 }
 0x333   : > { %v2770_v12 = vpop.f32.mrf.mxu2 }
 0x334   : > { %v3633_v20 = vadd.f32 %v3632_v48, %v3602_v37  ;;  %v2804_v53 = vadd.f32 %v2770_v12, %v2457_v15  ;;  %v3116_v5 = vpop.f32.mrf.mxu3 }
 0x336   : > { %v3150_v49 = vadd.f32 %v3116_v5, %v2804_v53 }
 0x338   : > { %v3496_v2 = vadd.f32 %v3462_v11, %v3150_v49 }
 0x33a   : > { %3530 = vst [vmem:[%s9122_s22 + $0xf8] sm:$0xff] %v3496_v2  ;;  %v3562_v44 = vadd.f32 %v3561_v21, %v3496_v2  ;;  %v3603_v4 = vmul.f32 %v3496_v2, %v3496_v2 }
 0x33c   : > { %v3563_v3 = vrot.slane %v3562_v44, 4  ;;  %v3634_v1 = vadd.f32 %v3633_v20, %v3603_v4 }
 0x33e   : > { %v3564_v57 = vadd.f32 %v3563_v3, %v3562_v44  ;;  %v3635_v42 = vrot.slane %v3634_v1, 4 }
 0x340   : > { %v3565_v33 = vrot.slane %v3564_v57, 2  ;;  %v3636_v8 = vadd.f32 %v3635_v42, %v3634_v1 }
 0x342   : > { %v3566_v61 = vadd.f32 %v3565_v33, %v3564_v57  ;;  %v3637_v17 = vrot.slane %v3636_v8, 2 }
 0x344   : > { %v3567_v39 = vrot.slane %v3566_v61, 1  ;;  %v3638_v52 = vadd.f32 %v3637_v17, %v3636_v8 }
 0x346   : > { %v3568_v25 = vadd.f32 %v3567_v39, %v3566_v61  ;;  %v3639_v40 = vrot.slane %v3638_v52, 1 }
 0x348   : > { %v3569_v16 = vadd.f32 %v3568_v25, %v3531_v26  ;;  %v3640_v13 = vadd.f32 %v3639_v40, %v3638_v52 }
 0x34a   : > { %3570 = vst [vmem:[#allocation5] sm:$0x1] %v3569_v16  ;;  %v3641_v50 = vadd.f32 %v3640_v13, %v3571_v59 }
 0x34c   : > { %3642 = vst [vmem:[#allocation6] sm:$0x1] %v3641_v50 }
 0x34d PF: > { %p7737_p12 = scmp.ne.s32.totalorder %s8424_s25, 1 }
 0x34e   : > { %s7738_s22 = sshll.u32 (!%p7737_p12), %s8420_s24, 8 }
 0x34f   : > { %3646 = sbr.rel (%p7737_p12) target bundleno = 1626 (0x65a), region = 60  ;;  %s9234_s20 = scalar_lea.vmem (!%p7737_p12), [#allocation3], %s7738_s22 }
 0x350   : > { %s9777_s10 = scalar_lea.vmem (!%p7737_p12), [#allocation4], %s7738_s22 }
 0x354   : > { %v8248_v46 = vld [vmem:[%s10025_s4 + $0x78] sm:$0xff]  ;;  %v8247_v43 = vld [vmem:[%s10025_s4 + $0x70] sm:$0xff]  ;;  %v8246_v29 = vld [vmem:[%s10025_s4 + $0x68] sm:$0xff] }
 0x355   : > { %8329 = vmatpush.bf16.msra.mxu1 %v8248_v46  ;;  %8330 = vmatpush.bf16.msra.mxu2 %v8248_v46  ;;  %v3647_v34 = vld [vmem:[#allocation5] sm:$0x1]  ;;  %v3649_v28 = vld [vmem:[#allocation6] sm:$0x1]  ;;  %v8245_v18 = vld [vmem:[%s10025_s4 + $0x60] sm:$0xff] }
 0x356   : > { %8331 = vmatpush.bf16.msra.mxu3 %v8248_v46  ;;  %4144 = vmatpush.bf16.msra.mxu0 %v8248_v46  ;;  %v9194_v27 = vmul.f32 0.001953125, %v3647_v34  ;;  %v3650_v31 = vmul.f32 0.001953125, %v3649_v28  ;;  %v8244_v51 = vld [vmem:[%s10025_s4 + $0x58] sm:$0xff]  ;;  %v8243_v30 = vld [vmem:[%s10025_s4 + $0x50] sm:$0xff]  ;;  %v3919_v56 = vld [vmem:[#allocation2 + $0x1] sm:$0xff] }
 0x357   : > { %v3920_v47 = vld [vmem:[#allocation2 + $0x9] sm:$0xff]  ;;  %v3951_v41 = vpack.c.bf16 %v3919_v56, %v3919_v56  ;;  %v8241_v19 = vld [vmem:[%s10025_s4 + $0x40] sm:$0xff]  ;;  %v8256_v35 = vld [vmem:[%s10025_s4 + $0xb8] sm:$0xff] }
 0x358   : > { %v3651_v9 = vmul.f32 %v9194_v27, %v9194_v27  ;;  %v8242_v6 = vld [vmem:[%s10025_s4 + $0x48] sm:$0xff]  ;;  %v3952_v24 = vpack.c.bf16 %v3920_v47, %v3920_v47  ;;  %v3654_v14 = vld [vmem:[%s10023_s2] sm:$0x1]  ;;  %v8264_v54 = vld [vmem:[%s10025_s4 + $0xf8] sm:$0xff] }
 0x359   : > { %8332 = vmatpush.bf16.msra.mxu1 %v8247_v43  ;;  %8333 = vmatpush.bf16.msra.mxu2 %v8247_v43  ;;  %v4032_v58 = vunpack.c.l.b16 %v3951_v41  ;;  %v8240_v0 = vld [vmem:[%s10025_s4 + $0x38] sm:$0xff]  ;;  %v3678_v36 = vld [vmem:[%s9234_s20 + $0x30] sm:$0xff]  ;;  %v3667_v15 = vld [vmem:[%s10024_s3] sm:$0x1] }
 0x35a   : > { %8334 = vmatpush.bf16.msra.mxu3 %v8247_v43  ;;  %4145 = vmatpush.bf16.msra.mxu0 %v8247_v43  ;;  %v3652_v63 = vsub.f32 %v3650_v31, %v3651_v9  ;;  %v4033_v10 = vunpack.c.l.b16 %v3952_v24  ;;  %v8272_v45 = vld [vmem:[%s10025_s4 + $0x138] sm:$0xff]  ;;  %v3686_v20 = vld [vmem:[%s9234_s20 + $0x70] sm:$0xff]  ;;  %v3680_v1 = vld [vmem:[%s9234_s20 + $0x40] sm:$0xff] }
 0x35b   : > { %v3679_v12 = vld [vmem:[%s9234_s20 + $0x38] sm:$0xff]  ;;  %v8255_v5 = vld [vmem:[%s10025_s4 + $0xb0] sm:$0xff]  ;;  %v3681_v57 = vld [vmem:[%s9234_s20 + $0x48] sm:$0xff] }
 0x35c   : > { %v3653_v23 = vmax.f32 %v3652_v63, 0.0  ;;  %v4064_v21 = vpack.c.b16 %v4033_v10, %v4032_v58  ;;  %v3687_v53 = vld [vmem:[%s9234_s20 + $0x78] sm:$0xff]  ;;  %v8263_v49 = vld [vmem:[%s10025_s4 + $0xf0] sm:$0xff]  ;;  %v3688_v39 = vld [vmem:[%s9234_s20 + $0x80] sm:$0xff] }
 0x35d   : > { %8335 = vmatpush.bf16.msra.mxu1 %v8246_v29  ;;  %8336 = vmatpush.bf16.msra.mxu2 %v8246_v29  ;;  %v3694_v44 = vld [vmem:[%s9234_s20 + $0xb0] sm:$0xff]  ;;  %v3695_v4 = vld [vmem:[%s9234_s20 + $0xb8] sm:$0xff]  ;;  %v3689_v52 = vld [vmem:[%s9234_s20 + $0x88] sm:$0xff] }
 0x35e   : > { %8337 = vmatpush.bf16.msra.mxu3 %v8246_v29  ;;  %4146 = vmatpush.bf16.msra.mxu0 %v8246_v29  ;;  %v3655_v62 = vadd.f32 1e-05, %v3653_v23  ;;  %v8239_v3 = vld [vmem:[%s10025_s4 + $0x30] sm:$0xff]  ;;  %v3696_v26 = vld [vmem:[%s9234_s20 + $0xc0] sm:$0xff]  ;;  %v8254_v16 = vld [vmem:[%s10025_s4 + $0xa8] sm:$0xff] }
 0x35f   : > { %v8271_v42 = vld [vmem:[%s10025_s4 + $0x130] sm:$0xff]  ;;  %v8262_v43 = vld [vmem:[%s10025_s4 + $0xe8] sm:$0xff]  ;;  %v3672_v47 = vld [vmem:[%s9234_s20] sm:$0xff] }
 0x360   : > { %8394 = vrsqrt.f32 %v3655_v62  ;;  %vm3662_vm0 = vweird.f32 %v3655_v62  ;;  %v8238_v34 = vld [vmem:[%s10025_s4 + $0x28] sm:$0xff]  ;;  %v8253_v24 = vld [vmem:[%s10025_s4 + $0xa0] sm:$0xff] }
 0x361   : > { %8338 = vmatpush.bf16.msra.mxu1 %v8245_v18  ;;  %8339 = vmatpush.bf16.msra.mxu2 %v8245_v18  ;;  %v8270_v9 = vld [vmem:[%s10025_s4 + $0x128] sm:$0xff] }
 0x362   : > { %8340 = vmatpush.bf16.msra.mxu3 %v8245_v18  ;;  %4147 = vmatpush.bf16.msra.mxu0 %v8245_v18 }
 0x365   : > { %8341 = vmatpush.bf16.msra.mxu1 %v8244_v51  ;;  %8342 = vmatpush.bf16.msra.mxu2 %v8244_v51 }
 0x366   : > { %v8395_v7 = vpop.eup %8394  ;;  %8343 = vmatpush.bf16.msra.mxu3 %v8244_v51  ;;  %4148 = vmatpush.bf16.msra.mxu0 %v8244_v51 }
 0x367   : > { %v3657_v22 = vmul.f32 %v8395_v7, %v3655_v62  ;;  %vm3663_vm1 = vweird.f32 %v8395_v7  ;;  %v3697_v62 = vld [vmem:[%s9234_s20 + $0xc8] sm:$0xff] }
 0x368   : > { %vm3664_vm2 = vmor %vm3662_vm0, %vm3663_vm1 }
 0x369   : > { %8344 = vmatpush.bf16.msra.mxu1 %v8243_v30  ;;  %8345 = vmatpush.bf16.msra.mxu2 %v8243_v30  ;;  %v3658_v55 = vmul.f32 %v8395_v7, %v3657_v22 }
 0x36a   : > { %8346 = vmatpush.bf16.msra.mxu3 %v8243_v30  ;;  %4149 = vmatpush.bf16.msra.mxu0 %v8243_v30 }
 0x36b   : > { %v3659_v60 = vmul.f32 0.5, %v3658_v55 }
 0x36d   : > { %8347 = vmatpush.bf16.msra.mxu1 %v8242_v6  ;;  %8348 = vmatpush.bf16.msra.mxu2 %v8242_v6  ;;  %v3660_v32 = vsub.f32 1.5, %v3659_v60  ;;  %v8261_v60 = vld [vmem:[%s10025_s4 + $0xe0] sm:$0xff] }
 0x36e   : > { %8349 = vmatpush.bf16.msra.mxu3 %v8242_v6  ;;  %4150 = vmatpush.bf16.msra.mxu0 %v8242_v6 }
 0x36f   : > { %v3661_v48 = vmul.f32 %v8395_v7, %v3660_v32 }
 0x371   : > { %8350 = vmatpush.bf16.msra.mxu1 %v8241_v19  ;;  %8351 = vmatpush.bf16.msra.mxu2 %v8241_v19  ;;  %v3665_v38 = vsel %vm3664_vm2, %v8395_v7, %v3661_v48 }
 0x372   : > { %8352 = vmatpush.bf16.msra.mxu3 %v8241_v19  ;;  %4151 = vmatpush.bf16.msra.mxu0 %v8241_v19  ;;  %v3666_v37 = vmul.f32 %v3665_v38, %v3654_v14  ;;  %v8237_v14 = vld [vmem:[%s10025_s4 + $0x20] sm:$0xff] }
 0x374   : > { %v3668_v11 = vmul.f32 %v3666_v37, %v9194_v27  ;;  %v9250_v2 = vperm.slane %v3666_v37, 0 }
 0x375   : > { %4691 = vmatpush.bf16.msrb.mxu2 %v8256_v35  ;;  %4377 = vmatpush.bf16.msrb.mxu1 %v8240_v0 }
 0x376   : > { %5037 = vmatpush.bf16.msrb.mxu3 %v8264_v54  ;;  %5383 = vmatpush.bf16.msrb.mxu0 %v8272_v45  ;;  %v3669_v33 = vsub.f32 %v3667_v15, %v3668_v11  ;;  %v3713_v8 = vmul.f32 %v9250_v2, %v3678_v36  ;;  %v3714_v61 = vmul.f32 %v9250_v2, %v3679_v12  ;;  %v3673_v11 = vld [vmem:[%s9234_s20 + $0x8] sm:$0xff] }
 0x377   : > { %4152 = vmatmul.bf16.vlgmr.msra.gmra.mxu0 %v4064_v21  ;;  %v3721_v17 = vmul.f32 %v9250_v2, %v3686_v20  ;;  %v3722_v25 = vmul.f32 %v9250_v2, %v3687_v53  ;;  %v3729_v40 = vmul.f32 %v9250_v2, %v3694_v44  ;;  %v3730_v59 = vmul.f32 %v9250_v2, %v3695_v4 }
 0x378   : > { %v9274_v13 = vperm.slane %v3669_v33, 0  ;;  %v3715_v50 = vmul.f32 %v9250_v2, %v3680_v1  ;;  %v3716_v46 = vmul.f32 %v9250_v2, %v3681_v57  ;;  %v3723_v27 = vmul.f32 %v9250_v2, %v3688_v39  ;;  %v3682_v57 = vld [vmem:[%s9234_s20 + $0x50] sm:$0xff] }
 0x379   : > { %4692 = vmatpush.bf16.msrb.mxu2 %v8255_v5  ;;  %4378 = vmatpush.bf16.msrb.mxu1 %v8239_v3  ;;  %v3724_v28 = vmul.f32 %v9250_v2, %v3689_v52  ;;  %v3731_v31 = vmul.f32 %v9250_v2, %v3696_v26  ;;  %v3732_v10 = vmul.f32 %v9250_v2, %v3697_v62 }
 0x37a   : > { %5038 = vmatpush.bf16.msrb.mxu3 %v8263_v49  ;;  %5384 = vmatpush.bf16.msrb.mxu0 %v8271_v42  ;;  %v3748_v29 = vadd.f32 %v9274_v13, %v3713_v8  ;;  %v3749_v63 = vadd.f32 %v9274_v13, %v3714_v61  ;;  %v3756_v23 = vadd.f32 %v9274_v13, %v3721_v17  ;;  %v3683_v42 = vld [vmem:[%s9234_s20 + $0x58] sm:$0xff] }
 0x37b   : > { %v3757_v18 = vadd.f32 %v9274_v13, %v3722_v25  ;;  %v3764_v51 = vadd.f32 %v9274_v13, %v3729_v40  ;;  %v3765_v30 = vadd.f32 %v9274_v13, %v3730_v59  ;;  %v3750_v7 = vadd.f32 %v9274_v13, %v3715_v50 }
 0x37c   : > { %v3751_v56 = vadd.f32 %v9274_v13, %v3716_v46  ;;  %v3780_v22 = vmax.f32 %v3748_v29, 0.0  ;;  %v3781_v6 = vmax.f32 %v3749_v63, 0.0  ;;  %v3788_v55 = vmax.f32 %v3756_v23, 0.0  ;;  %v8252_v46 = vld [vmem:[%s10025_s4 + $0x98] sm:$0xff] }
 0x37d   : > { %4693 = vmatpush.bf16.msrb.mxu2 %v8254_v16  ;;  %v3789_v41 = vmax.f32 %v3757_v18, 0.0  ;;  %4379 = vmatpush.bf16.msrb.mxu1 %v8238_v34  ;;  %v3796_v19 = vmax.f32 %v3764_v51, 0.0  ;;  %v3797_v32 = vmax.f32 %v3765_v30, 0.0  ;;  %v9306_v58 = vmax.f32 %v3750_v7, 0.0  ;;  %v8269_v34 = vld [vmem:[%s10025_s4 + $0x120] sm:$0xff]  ;;  %v8236_v29 = vld [vmem:[%s10025_s4 + $0x18] sm:$0xff] }
 0x37e   : > { %5039 = vmatpush.bf16.msrb.mxu3 %v8262_v43  ;;  %5385 = vmatpush.bf16.msrb.mxu0 %v8270_v9  ;;  %3813 = vst [vmem:[#allocation2 + $0x61] sm:$0xff] %v3780_v22  ;;  %v3959_v48 = vpack.c.bf16 %v3780_v22, %v3780_v22  ;;  %v3960_v35 = vpack.c.bf16 %v3781_v6, %v3781_v6  ;;  %v9312_v36 = vmax.f32 %v3751_v56, 0.0  ;;  %v8260_v43 = vld [vmem:[%s10025_s4 + $0xd8] sm:$0xff]  ;;  %v3690_v51 = vld [vmem:[%s9234_s20 + $0x90] sm:$0xff] }
 0x37f   : > { %v3967_v54 = vpack.c.bf16 %v3788_v55, %v3788_v55  ;;  %v3968_v0 = vpack.c.bf16 %v3789_v41, %v3789_v41  ;;  %3814 = vst [vmem:[#allocation2 + $0x69] sm:$0xff] %v3781_v6  ;;  %v3975_v45 = vpack.c.bf16 %v3796_v19, %v3796_v19  ;;  %v3976_v38 = vpack.c.bf16 %v3797_v32, %v3797_v32  ;;  %v3691_v56 = vld [vmem:[%s9234_s20 + $0x98] sm:$0xff]  ;;  %v8251_v22 = vld [vmem:[%s10025_s4 + $0x90] sm:$0xff] }
 0x380   : > { %v3707_v21 = vmul.f32 %v9250_v2, %v3672_v47  ;;  %v4040_v37 = vunpack.c.l.b16 %v3959_v48  ;;  %v4041_v15 = vunpack.c.l.b16 %v3960_v35  ;;  %3821 = vst [vmem:[#allocation2 + $0xc1] sm:$0xff] %v3788_v55  ;;  %v3961_v49 = vpack.c.bf16 %v9306_v58, %v9306_v58  ;;  %v3698_v47 = vld [vmem:[%s9234_s20 + $0xd0] sm:$0xff] }
 0x381   : > { %v4048_v12 = vunpack.c.l.b16 %v3967_v54  ;;  %v4049_v20 = vunpack.c.l.b16 %v3968_v0  ;;  %4694 = vmatpush.bf16.msrb.mxu2 %v8253_v24  ;;  %3822 = vst [vmem:[#allocation2 + $0xc9] sm:$0xff] %v3789_v41  ;;  %v4056_v53 = vunpack.c.l.b16 %v3975_v45  ;;  %v4057_v5 = vunpack.c.l.b16 %v3976_v38  ;;  %4380 = vmatpush.bf16.msrb.mxu1 %v8237_v14  ;;  %v3674_v35 = vld [vmem:[%s9234_s20 + $0x10] sm:$0xff] }
 0x382   : > { %5040 = vmatpush.bf16.msrb.mxu3 %v8261_v60  ;;  %v4068_v44 = vpack.c.b16 %v4041_v15, %v4040_v37  ;;  %3829 = vst [vmem:[#allocation2 + $0x121] sm:$0xff] %v3796_v19  ;;  %v3758_v3 = vadd.f32 %v9274_v13, %v3723_v27  ;;  %v3759_v1 = vadd.f32 %v9274_v13, %v3724_v28  ;;  %v4042_v6 = vunpack.c.l.b16 %v3961_v49  ;;  %v3699_v60 = vld [vmem:[%s9234_s20 + $0xd8] sm:$0xff]  ;;  %v8259_v19 = vld [vmem:[%s10025_s4 + $0xd0] sm:$0xff]  ;;  %v3684_v49 = vld [vmem:[%s9234_s20 + $0x60] sm:$0xff] }
 0x383   : > { %v4072_v4 = vpack.c.b16 %v4049_v20, %v4048_v12  ;;  %3830 = vst [vmem:[#allocation2 + $0x129] sm:$0xff] %v3797_v32  ;;  %v4076_v33 = vpack.c.b16 %v4057_v5, %v4056_v53  ;;  %v3962_v8 = vpack.c.bf16 %v9312_v36, %v9312_v36  ;;  %v3766_v61 = vadd.f32 %v9274_v13, %v3731_v31  ;;  %v8268_v32 = vld [vmem:[%s10025_s4 + $0x118] sm:$0xff]  ;;  %v8235_v54 = vld [vmem:[%s10025_s4 + $0x10] sm:$0xff] }
 0x384   : > { %v3767_v17 = vadd.f32 %v9274_v13, %v3732_v10  ;;  %4172 = vmatmul.bf16.vlgmr.msra.gmra.mxu1 %v4068_v44  ;;  %3815 = vst [vmem:[#allocation2 + $0x79] sm:$0xff] %v9306_v58  ;;  %v3790_v39 = vmax.f32 %v3758_v3, 0.0  ;;  %v3791_v52 = vmax.f32 %v3759_v1, 0.0  ;;  %v3708_v26 = vmul.f32 %v9250_v2, %v3673_v11  ;;  %5386 = vmatpush.bf16.msrb.mxu0 %v8269_v34  ;;  %v3675_v20 = vld [vmem:[%s9234_s20 + $0x18] sm:$0xff]  ;;  %v3685_v1 = vld [vmem:[%s9234_s20 + $0x68] sm:$0xff] }
 0x385   : > { %4192 = vmatmul.bf16.vlgmr.msra.gmra.mxu2 %v4072_v4  ;;  %v3742_v25 = vadd.f32 %v9274_v13, %v3707_v21  ;;  %4212 = vmatmul.bf16.vlgmr.msra.gmra.mxu3 %v4076_v33  ;;  %3816 = vst [vmem:[#allocation2 + $0x81] sm:$0xff] %v9312_v36  ;;  %v3798_v40 = vmax.f32 %v3766_v61, 0.0  ;;  %v3717_v16 = vmul.f32 %v9250_v2, %v3682_v57  ;;  %v4043_v55 = vunpack.c.l.b16 %v3962_v8 }
 0x386   : > { %v3799_v59 = vmax.f32 %v3767_v17, 0.0  ;;  %v3718_v50 = vmul.f32 %v9250_v2, %v3683_v42  ;;  %3823 = vst [vmem:[#allocation2 + $0xd9] sm:$0xff] %v3790_v39  ;;  %v3969_v27 = vpack.c.bf16 %v3790_v39, %v3790_v39  ;;  %v3970_v28 = vpack.c.bf16 %v3791_v52, %v3791_v52  ;;  %4695 = vmatpush.bf16.msrb.mxu2 %v8252_v46 }
 0x387   : > { %v3743_v31 = vadd.f32 %v9274_v13, %v3708_v26  ;;  %v3774_v9 = vmax.f32 %v3742_v25, 0.0  ;;  %3824 = vst [vmem:[#allocation2 + $0xe1] sm:$0xff] %v3791_v52  ;;  %v3977_v63 = vpack.c.bf16 %v3798_v40, %v3798_v40  ;;  %v3752_v18 = vadd.f32 %v9274_v13, %v3717_v16  ;;  %5041 = vmatpush.bf16.msrb.mxu3 %v8260_v43  ;;  %v3692_v16 = vld [vmem:[%s9234_s20 + $0xa0] sm:$0xff] }
 0x388   : > { %v3978_v23 = vpack.c.bf16 %v3799_v59, %v3799_v59  ;;  %v3753_v62 = vadd.f32 %v9274_v13, %v3718_v50  ;;  %3831 = vst [vmem:[#allocation2 + $0x139] sm:$0xff] %v3798_v40  ;;  %v9353_v41 = vunpack.c.l.b16 %v3969_v27  ;;  %v4051_v24 = vunpack.c.l.b16 %v3970_v28  ;;  %4381 = vmatpush.bf16.msrb.mxu1 %v8236_v29  ;;  %5387 = vmatpush.bf16.msrb.mxu0 %v8268_v32  ;;  %v3693_v27 = vld [vmem:[%s9234_s20 + $0xa8] sm:$0xff] }
 0x389   : > { %v3775_v30 = vmax.f32 %v3743_v31, 0.0  ;;  %v3953_v7 = vpack.c.bf16 %v3774_v9, %v3774_v9  ;;  %3832 = vst [vmem:[#allocation2 + $0x141] sm:$0xff] %v3799_v59  ;;  %v9362_v14 = vmax.f32 %v3752_v18, 0.0  ;;  %v3725_v48 = vmul.f32 %v9250_v2, %v3690_v51  ;;  %v3701_v29 = vld [vmem:[%s9234_s20 + $0xe8] sm:$0xff] }
 0x38a   : > { %3807 = vst [vmem:[#allocation2 + $0x19] sm:$0xff] %v3774_v9  ;;  %v4058_v0 = vunpack.c.l.b16 %v3977_v63  ;;  %v4059_v45 = vunpack.c.l.b16 %v3978_v23  ;;  %v9369_v38 = vmax.f32 %v3753_v62, 0.0  ;;  %v3726_v36 = vmul.f32 %v9250_v2, %v3691_v56  ;;  %4696 = vmatpush.bf16.msrb.mxu2 %v8251_v22  ;;  %v3700_v9 = vld [vmem:[%s9234_s20 + $0xe0] sm:$0xff]  ;;  %v8250_v51 = vld [vmem:[%s10025_s4 + $0x88] sm:$0xff] }
 0x38b   : > { %v3954_v58 = vpack.c.bf16 %v3775_v30, %v3775_v30  ;;  %v4034_v10 = vunpack.c.l.b16 %v3953_v7  ;;  %3808 = vst [vmem:[#allocation2 + $0x21] sm:$0xff] %v3775_v30  ;;  %v3760_v37 = vadd.f32 %v9274_v13, %v3725_v48  ;;  %v3733_v15 = vmul.f32 %v9250_v2, %v3698_v47  ;;  %5042 = vmatpush.bf16.msrb.mxu3 %v8259_v19  ;;  %v3676_v63 = vld [vmem:[%s9234_s20 + $0x20] sm:$0xff]  ;;  %v8258_v30 = vld [vmem:[%s10025_s4 + $0xc8] sm:$0xff]  ;;  %v8267_v7 = vld [vmem:[%s10025_s4 + $0x110] sm:$0xff] }
 0x38c   : > { %3817 = vst [vmem:[#allocation2 + $0x91] sm:$0xff] %v9362_v14  ;;  %v3734_v12 = vmul.f32 %v9250_v2, %v3699_v60  ;;  %v3761_v53 = vadd.f32 %v9274_v13, %v3726_v36  ;;  %v3709_v5 = vmul.f32 %v9250_v2, %v3674_v35  ;;  %4382 = vmatpush.bf16.msrb.mxu1 %v8235_v54  ;;  %v3677_v32 = vld [vmem:[%s9234_s20 + $0x28] sm:$0xff]  ;;  %v8257_v54 = vld [vmem:[%s10025_s4 + $0xc0] sm:$0xff] }
 0x38d   : > { %v4035_v21 = vunpack.c.l.b16 %v3954_v58  ;;  %3818 = vst [vmem:[#allocation2 + $0x99] sm:$0xff] %v9369_v38  ;;  %v9383_v44 = vmax.f32 %v3760_v37, 0.0  ;;  %v3768_v4 = vadd.f32 %v9274_v13, %v3733_v15  ;;  %v9388_v57 = vpack.c.b16 %v4043_v55, %v4042_v6  ;;  %v8234_v55 = vld [vmem:[%s10025_s4 + $0x8] sm:$0xff]  ;;  %v8249_v58 = vld [vmem:[%s10025_s4 + $0x80] sm:$0xff]  ;;  %5388 = vmatpush.bf16.msrb.mxu0 %v8267_v7 }
 0x38e   : > { %v3769_v3 = vadd.f32 %v9274_v13, %v3734_v12  ;;  %v9390_v42 = vmax.f32 %v3761_v53, 0.0  ;;  %v3710_v33 = vmul.f32 %v9250_v2, %v3675_v20  ;;  %v3744_v8 = vadd.f32 %v9274_v13, %v3709_v5  ;;  %4697 = vmatpush.bf16.msrb.mxu2 %v8250_v51  ;;  %v8233_v37 = vld [vmem:[%s10025_s4] sm:$0xff] }
 0x38f   : > { %v9381_v11 = vpack.c.b16 %v4035_v21, %v4034_v10  ;;  %v4073_v61 = vpack.c.b16 %v4051_v24, %v9353_v41  ;;  %v4077_v17 = vpack.c.b16 %v4059_v45, %v4058_v0  ;;  %3825 = vst [vmem:[#allocation2 + $0xf1] sm:$0xff] %v9383_v44  ;;  %v9397_v39 = vmax.f32 %v3768_v4, 0.0  ;;  %5043 = vmatpush.bf16.msrb.mxu3 %v8258_v30  ;;  %v8266_v0 = vld [vmem:[%s10025_s4 + $0x108] sm:$0xff] }
 0x390   : > { %v3719_v52 = vmul.f32 %v9250_v2, %v3684_v49  ;;  %3826 = vst [vmem:[#allocation2 + $0xf9] sm:$0xff] %v9390_v42  ;;  %v9401_v26 = vmax.f32 %v3769_v3, 0.0  ;;  %v3745_v25 = vadd.f32 %v9274_v13, %v3710_v33  ;;  %v3776_v40 = vmax.f32 %v3744_v8, 0.0  ;;  %4383 = vmatpush.bf16.msrb.mxu1 %v8234_v55 }
 0x391   : > { %4157 = vmatmul.bf16.gmra.mxu0 %v9381_v11  ;;  %v3720_v59 = vmul.f32 %v9250_v2, %v3685_v1  ;;  %3833 = vst [vmem:[#allocation2 + $0x151] sm:$0xff] %v9397_v39  ;;  %v3727_v31 = vmul.f32 %v9250_v2, %v3692_v16  ;;  %v3963_v23 = vpack.c.bf16 %v9362_v14, %v9362_v14  ;;  %v8288_v16 = vld [vmem:[%s10025_s4 + $0x1b8] sm:$0xff] }
 0x392   : > { %v3754_v50 = vadd.f32 %v9274_v13, %v3719_v52  ;;  %3834 = vst [vmem:[#allocation2 + $0x159] sm:$0xff] %v9401_v26  ;;  %v3777_v46 = vmax.f32 %v3745_v25, 0.0  ;;  %v3955_v43 = vpack.c.bf16 %v3776_v40, %v3776_v40  ;;  %v3964_v56 = vpack.c.bf16 %v9369_v38, %v9369_v38  ;;  %4698 = vmatpush.bf16.msrb.mxu2 %v8249_v58  ;;  %v4813_v58 = vld [vmem:[#allocation2 + $0x20] sm:$0xff] }
 0x393   : > { %v3755_v34 = vadd.f32 %v9274_v13, %v3720_v59  ;;  %3809 = vst [vmem:[#allocation2 + $0x31] sm:$0xff] %v3776_v40  ;;  %v3971_v47 = vpack.c.bf16 %v9383_v44, %v9383_v44  ;;  %v3728_v22 = vmul.f32 %v9250_v2, %v3693_v27  ;;  %v3762_v6 = vadd.f32 %v9274_v13, %v3727_v31 }
 0x394   : > { %4177 = vmatmul.bf16.gmra.mxu1 %v9388_v57  ;;  %v9412_v28 = vmax.f32 %v3754_v50, 0.0  ;;  %3810 = vst [vmem:[#allocation2 + $0x39] sm:$0xff] %v3777_v46  ;;  %v3956_v18 = vpack.c.bf16 %v3777_v46, %v3777_v46  ;;  %v3972_v41 = vpack.c.bf16 %v9390_v42, %v9390_v42  ;;  %v4036_v24 = vunpack.c.l.b16 %v3955_v43  ;;  %5044 = vmatpush.bf16.msrb.mxu3 %v8257_v54  ;;  %v8296_v50 = vld [vmem:[%s10025_s4 + $0x1f8] sm:$0xff] }
 0x395   : > { %4197 = vmatmul.bf16.gmra.mxu2 %v4073_v61  ;;  %4217 = vmatmul.bf16.gmra.mxu3 %v4077_v17  ;;  %v9420_v62 = vmax.f32 %v3755_v34, 0.0  ;;  %v3735_v60 = vmul.f32 %v9250_v2, %v3700_v9  ;;  %v3736_v19 = vmul.f32 %v9250_v2, %v3701_v29  ;;  %v3763_v14 = vadd.f32 %v9274_v13, %v3728_v22  ;;  %v8265_v17 = vld [vmem:[%s10025_s4 + $0x100] sm:$0xff]  ;;  %v8280_v46 = vld [vmem:[%s10025_s4 + $0x178] sm:$0xff] }
 0x396   : > { %3819 = vst [vmem:[#allocation2 + $0xa9] sm:$0xff] %v9412_v28  ;;  %v4037_v10 = vunpack.c.l.b16 %v3956_v18  ;;  %v9451_v48 = vmax.f32 %v3762_v6, 0.0  ;;  %v3711_v35 = vmul.f32 %v9250_v2, %v3676_v63  ;;  %v3979_v45 = vpack.c.bf16 %v9397_v39, %v9397_v39  ;;  %5389 = vmatpush.bf16.msrb.mxu0 %v8266_v0  ;;  %4384 = vmatpush.bf16.msrb.mxu1 %v8233_v37  ;;  %v8304_v43 = vld [vmem:[%s10025_s4 + $0x238] sm:$0xff] }
 0x397   : > { %3820 = vst [vmem:[#allocation2 + $0xb1] sm:$0xff] %v9420_v62  ;;  %v3980_v38 = vpack.c.bf16 %v9401_v26, %v9401_v26  ;;  %v3770_v36 = vadd.f32 %v9274_v13, %v3735_v60  ;;  %v3771_v21 = vadd.f32 %v9274_v13, %v3736_v19  ;;  %v3795_v15 = vmax.f32 %v3763_v14, 0.0  ;;  %6076 = vmatpush.bf16.msra.mxu2 %v8288_v16  ;;  %v4466_v60 = vld [vmem:[#allocation2 + $0x2] sm:$0xff]  ;;  %v4467_v19 = vld [vmem:[#allocation2 + $0xa] sm:$0xff] }
 0x398   : > { %3827 = vst [vmem:[#allocation2 + $0x109] sm:$0xff] %v9451_v48  ;;  %v3712_v12 = vmul.f32 %v9250_v2, %v3677_v32  ;;  %v3746_v20 = vadd.f32 %v9274_v13, %v3711_v35  ;;  %v4044_v53 = vunpack.c.l.b16 %v3963_v23  ;;  %v4045_v5 = vunpack.c.l.b16 %v3964_v56  ;;  %6422 = vmatpush.bf16.msra.mxu3 %v8296_v50  ;;  %v4812_v32 = vld [vmem:[#allocation2 + $0x18] sm:$0xff] }
 0x399   : > { %v4052_v49 = vunpack.c.l.b16 %v3971_v47  ;;  %v3802_v44 = vmax.f32 %v3770_v36, 0.0  ;;  %v4053_v4 = vunpack.c.l.b16 %v3972_v41  ;;  %v9472_v3 = vpack.c.b16 %v4037_v10, %v4036_v24  ;;  %3828 = vst [vmem:[#allocation2 + $0x111] sm:$0xff] %v3795_v15  ;;  %v3839_v41 = vld [vmem:[#allocation2] sm:$0xff]  ;;  %v3840_v24 = vld [vmem:[#allocation2 + $0x8] sm:$0xff] }
 0x39a   : > { %v3803_v1 = vmax.f32 %v3771_v21, 0.0  ;;  %v3747_v42 = vadd.f32 %v9274_v13, %v3712_v12  ;;  %v4060_v33 = vunpack.c.l.b16 %v3979_v45  ;;  %v4061_v8 = vunpack.c.l.b16 %v3980_v38  ;;  %5390 = vmatpush.bf16.msrb.mxu0 %v8265_v17  ;;  %5729 = vmatpush.bf16.msra.mxu1 %v8280_v46 }
 0x39b   : > { %3835 = vst [vmem:[#allocation2 + $0x169] sm:$0xff] %v3802_v44  ;;  %v3778_v61 = vmax.f32 %v3746_v20, 0.0  ;;  %v9478_v52 = vpack.c.b16 %v4045_v5, %v4044_v53  ;;  %v4074_v26 = vpack.c.b16 %v4053_v4, %v4052_v49  ;;  %v3965_v34 = vpack.c.bf16 %v9412_v28, %v9412_v28  ;;  %v4468_v5 = vld [vmem:[#allocation2 + $0x1a] sm:$0xff]  ;;  %v4469_v49 = vld [vmem:[#allocation2 + $0x22] sm:$0xff]  ;;  %v8295_v4 = vld [vmem:[%s10025_s4 + $0x1f0] sm:$0xff] }
 0x39c   : > { %3836 = vst [vmem:[#allocation2 + $0x171] sm:$0xff] %v3803_v1  ;;  %v3779_v39 = vmax.f32 %v3747_v42, 0.0  ;;  %v4078_v25 = vpack.c.b16 %v4061_v8, %v4060_v33  ;;  %v3966_v27 = vpack.c.bf16 %v9420_v62, %v9420_v62  ;;  %v3973_v31 = vpack.c.bf16 %v9451_v48, %v9451_v48  ;;  %v4814_v42 = vld [vmem:[#allocation2 + $0x30] sm:$0xff]  ;;  %6423 = vmatpush.bf16.msra.mxu3 %v8295_v4 }
 0x39d   : > { %3811 = vst [vmem:[#allocation2 + $0x49] sm:$0xff] %v3778_v61  ;;  %v3957_v40 = vpack.c.bf16 %v3778_v61, %v3778_v61  ;;  %v3974_v9 = vpack.c.bf16 %v3795_v15, %v3795_v15  ;;  %v3981_v23 = vpack.c.bf16 %v3802_v44, %v3802_v44  ;;  %v3982_v18 = vpack.c.bf16 %v3803_v1, %v3803_v1  ;;  %v8287_v44 = vld [vmem:[%s10025_s4 + $0x1b0] sm:$0xff] }
 0x39e   : > { %3812 = vst [vmem:[#allocation2 + $0x51] sm:$0xff] %v3779_v39  ;;  %v3958_v59 = vpack.c.bf16 %v3779_v39, %v3779_v39  ;;  %6768 = vmatpush.bf16.msra.mxu0 %v8304_v43  ;;  %v4046_v51 = vunpack.c.l.b16 %v3965_v34  ;;  %v4047_v30 = vunpack.c.l.b16 %v3966_v27  ;;  %v4054_v7 = vunpack.c.l.b16 %v3973_v31  ;;  %v8279_v1 = vld [vmem:[%s10025_s4 + $0x170] sm:$0xff]  ;;  %6077 = vmatpush.bf16.msra.mxu2 %v8287_v44  ;;  %v4471_v43 = vld [vmem:[#allocation2 + $0x3a] sm:$0xff] }
 0x39f   : > { %v4038_v29 = vunpack.c.l.b16 %v3957_v40  ;;  %v4055_v56 = vunpack.c.l.b16 %v3974_v9  ;;  %v4062_v47 = vunpack.c.l.b16 %v3981_v23  ;;  %v4063_v62 = vunpack.c.l.b16 %v3982_v18  ;;  %v8303_v33 = vld [vmem:[%s10025_s4 + $0x230] sm:$0xff]  ;;  %5730 = vmatpush.bf16.msra.mxu1 %v8279_v1 }
 0x3a0   : > { %v4039_v63 = vunpack.c.l.b16 %v3958_v59  ;;  %v9502_v22 = vpack.c.b16 %v4047_v30, %v4046_v51  ;;  %v3871_v10 = vpack.c.bf16 %v3839_v41, %v3839_v41  ;;  %v3872_v14 = vpack.c.bf16 %v3840_v24, %v3840_v24  ;;  %v4470_v46 = vld [vmem:[#allocation2 + $0x32] sm:$0xff]  ;;  %v8286_v24 = vld [vmem:[%s10025_s4 + $0x1a8] sm:$0xff] }
 0x3a1   : > { %4162 = vmatmul.bf16.gmra.mxu0 %v9472_v3  ;;  %v4075_v6 = vpack.c.b16 %v4055_v56, %v4054_v7  ;;  %v4079_v55 = vpack.c.b16 %v4063_v62, %v4062_v47  ;;  %v4498_v48 = vpack.c.bf16 %v4466_v60, %v4466_v60  ;;  %v4499_v35 = vpack.c.bf16 %v4467_v19, %v4467_v19  ;;  %v5164_v56 = vld [vmem:[#allocation2 + $0x61] sm:$0xff]  ;;  %v5165_v47 = vld [vmem:[#allocation2 + $0x69] sm:$0xff] }
 0x3a2   : > { %v9500_v28 = vpack.c.b16 %v4039_v63, %v4038_v29  ;;  %v4844_v54 = vpack.c.bf16 %v4812_v32, %v4812_v32  ;;  %v4845_v0 = vpack.c.bf16 %v4813_v58, %v4813_v58  ;;  %v4265_v45 = vunpack.c.l.b16 %v3871_v10  ;;  %6769 = vmatpush.bf16.msra.mxu0 %v8303_v33  ;;  %v8294_v60 = vld [vmem:[%s10025_s4 + $0x1e8] sm:$0xff]  ;;  %v4818_v19 = vld [vmem:[#allocation2 + $0x60] sm:$0xff]  ;;  %6078 = vmatpush.bf16.msra.mxu2 %v8286_v24 }
 0x3a3   : > { %v4266_v38 = vunpack.c.l.b16 %v3872_v14  ;;  %v4579_v36 = vunpack.c.l.b16 %v4498_v48  ;;  %v4580_v21 = vunpack.c.l.b16 %v4499_v35  ;;  %v4500_v8 = vpack.c.bf16 %v4468_v5, %v4468_v5  ;;  %6424 = vmatpush.bf16.msra.mxu3 %v8294_v60  ;;  %v8278_v48 = vld [vmem:[%s10025_s4 + $0x168] sm:$0xff]  ;;  %v4820_v5 = vld [vmem:[#allocation2 + $0x78] sm:$0xff] }
 0x3a4   : > { %4182 = vmatmul.bf16.gmra.mxu1 %v9478_v52  ;;  %v4925_v37 = vunpack.c.l.b16 %v4844_v54  ;;  %v4926_v15 = vunpack.c.l.b16 %v4845_v0  ;;  %v4501_v61 = vpack.c.bf16 %v4469_v49, %v4469_v49  ;;  %v4846_v17 = vpack.c.bf16 %v4814_v42, %v4814_v42  ;;  %v4816_v34 = vld [vmem:[#allocation2 + $0x48] sm:$0xff]  ;;  %v4821_v49 = vld [vmem:[#allocation2 + $0x80] sm:$0xff] }
 0x3a5   : > { %4202 = vmatmul.bf16.gmra.mxu2 %v4074_v26  ;;  %4222 = vmatmul.bf16.gmra.mxu3 %v4078_v25  ;;  %v4297_v12 = vpack.c.b16 %v4266_v38, %v4265_v45  ;;  %v4611_v20 = vpack.c.b16 %v4580_v21, %v4579_v36  ;;  %v4581_v26 = vunpack.c.l.b16 %v4500_v8  ;;  %v4817_v27 = vld [vmem:[#allocation2 + $0x50] sm:$0xff]  ;;  %v4502_v31 = vpack.c.bf16 %v4470_v46, %v4470_v46  ;;  %v8302_v0 = vld [vmem:[%s10025_s4 + $0x228] sm:$0xff]  ;;  %v8293_v46 = vld [vmem:[%s10025_s4 + $0x1e0] sm:$0xff] }
 0x3a6   : > { %v4957_v53 = vpack.c.b16 %v4926_v15, %v4925_v37  ;;  %v4582_v25 = vunpack.c.l.b16 %v4501_v61  ;;  %v4927_v40 = vunpack.c.l.b16 %v4846_v17  ;;  %v4503_v9 = vpack.c.bf16 %v4471_v43, %v4471_v43  ;;  %v4472_v62 = vld [vmem:[#allocation2 + $0x4a] sm:$0xff]  ;;  %v4473_v41 = vld [vmem:[#allocation2 + $0x52] sm:$0xff]  ;;  %5731 = vmatpush.bf16.msra.mxu1 %v8278_v48  ;;  %6770 = vmatpush.bf16.msra.mxu0 %v8302_v0 }
 0x3a7   : > { %v4848_v29 = vpack.c.bf16 %v4816_v34, %v4816_v34  ;;  %v4849_v63 = vpack.c.bf16 %v4817_v27, %v4817_v27  ;;  %v4583_v23 = vunpack.c.l.b16 %v4502_v31  ;;  %v4504_v32 = vpack.c.bf16 %v4472_v62, %v4472_v62  ;;  %v4822_v43 = vld [vmem:[#allocation2 + $0x90] sm:$0xff]  ;;  %6425 = vmatpush.bf16.msra.mxu3 %v8293_v46 }
 0x3a8   : > { %v4612_v16 = vpack.c.b16 %v4582_v25, %v4581_v26  ;;  %v4584_v18 = vunpack.c.l.b16 %v4503_v9  ;;  %v4505_v58 = vpack.c.bf16 %v4473_v41, %v4473_v41  ;;  %v4850_v35 = vpack.c.bf16 %v4818_v19, %v4818_v19  ;;  %v4478_v19 = vld [vmem:[#allocation2 + $0x92] sm:$0xff] }
 0x3a9   : > { %v4929_v51 = vunpack.c.l.b16 %v4848_v29  ;;  %v4930_v30 = vunpack.c.l.b16 %v4849_v63  ;;  %v4585_v45 = vunpack.c.l.b16 %v4504_v32  ;;  %v4852_v42 = vpack.c.bf16 %v4820_v5, %v4820_v5  ;;  %v8277_v29 = vld [vmem:[%s10025_s4 + $0x160] sm:$0xff]  ;;  %v4824_v32 = vld [vmem:[#allocation2 + $0xa8] sm:$0xff] }
 0x3aa   : > { %v4613_v7 = vpack.c.b16 %v4584_v18, %v4583_v23  ;;  %v4586_v38 = vunpack.c.l.b16 %v4505_v58  ;;  %v4931_v21 = vunpack.c.l.b16 %v4850_v35  ;;  %v4854_v23 = vpack.c.bf16 %v4822_v43, %v4822_v43  ;;  %5732 = vmatpush.bf16.msra.mxu1 %v8277_v29  ;;  %v4825_v58 = vld [vmem:[#allocation2 + $0xb0] sm:$0xff]  ;;  %v8276_v29 = vld [vmem:[%s10025_s4 + $0x158] sm:$0xff] }
 0x3ab   : > { %v4933_v61 = vunpack.c.l.b16 %v4852_v42  ;;  %v4510_v48 = vpack.c.bf16 %v4478_v19, %v4478_v19  ;;  %v4857_v0 = vpack.c.bf16 %v4825_v58, %v4825_v58  ;;  %v5174_v58 = vld [vmem:[#allocation2 + $0xd9] sm:$0xff] }
 0x3ac   : > { %v4614_v15 = vpack.c.b16 %v4586_v38, %v4585_v45 }
 0x3ad   : > { %v4591_v45 = vunpack.c.l.b16 %v4510_v48  ;;  %v5175_v48 = vld [vmem:[#allocation2 + $0xe1] sm:$0xff] }
 0x3ae   : > { %5733 = vmatpush.bf16.msra.mxu1 %v8276_v29 }
 0x3b1   : > { %4167 = vmatmul.bf16.gmra.mxu0 %v9500_v28 }
 0x3b4   : > { %4187 = vmatmul.bf16.gmra.mxu1 %v9502_v22 }
 0x3b5   : > { %4207 = vmatmul.bf16.gmra.mxu2 %v4075_v6  ;;  %4227 = vmatmul.bf16.gmra.mxu3 %v4079_v55  ;;  %v5196_v6 = vpack.c.bf16 %v5164_v56, %v5164_v56  ;;  %v5197_v55 = vpack.c.bf16 %v5165_v47, %v5165_v47  ;;  %v4935_v56 = vunpack.c.l.b16 %v4854_v23  ;;  %v8300_v23 = vld [vmem:[%s10025_s4 + $0x218] sm:$0xff] }
 0x3b7   : > { %v5277_v10 = vunpack.c.l.b16 %v5196_v6  ;;  %v5278_v14 = vunpack.c.l.b16 %v5197_v55 }
 0x3b9   : > { %v5306_v36 = vpack.c.b16 %v5278_v14, %v5277_v10 }
 0x3c1   : > { %5391 = vmatmul.bf16.vlgmr.msrb.gmra.mxu0 %v9381_v11  ;;  %v4815_v11 = vld [vmem:[#allocation2 + $0x38] sm:$0xff] }
 0x3c2   : > { %v4847_v39 = vpack.c.bf16 %v4815_v11, %v4815_v11  ;;  %v4853_v11 = vpack.c.bf16 %v4821_v49, %v4821_v49  ;;  %v5172_v49 = vld [vmem:[#allocation2 + $0xc1] sm:$0xff] }
 0x3c3   : > { %v5204_v42 = vpack.c.bf16 %v5172_v49, %v5172_v49 }
 0x3c4   : > { %4385 = vmatmul.bf16.vlgmr.msrb.gmra.mxu1 %v4297_v12  ;;  %v4928_v59 = vunpack.c.l.b16 %v4847_v39  ;;  %v4934_v17 = vunpack.c.l.b16 %v4853_v11 }
 0x3c5   : > { %4699 = vmatmul.bf16.vlgmr.msrb.gmra.mxu2 %v4611_v20  ;;  %5045 = vmatmul.bf16.vlgmr.msrb.gmra.mxu3 %v4957_v53  ;;  %v4474_v20 = vld [vmem:[#allocation2 + $0x62] sm:$0xff]  ;;  %v5285_v46 = vunpack.c.l.b16 %v5204_v42 }
 0x3c6   : > { %v4958_v50 = vpack.c.b16 %v4928_v59, %v4927_v40  ;;  %v4506_v44 = vpack.c.bf16 %v4474_v20, %v4474_v20  ;;  %v4961_v25 = vpack.c.b16 %v4934_v17, %v4933_v61  ;;  %v4476_v59 = vld [vmem:[#allocation2 + $0x7a] sm:$0xff] }
 0x3c7   : > { %v4508_v31 = vpack.c.bf16 %v4476_v59, %v4476_v59  ;;  %v8284_v61 = vld [vmem:[%s10025_s4 + $0x198] sm:$0xff]  ;;  %v4826_v17 = vld [vmem:[#allocation2 + $0xc0] sm:$0xff] }
 0x3c8   : > { %v4587_v33 = vunpack.c.l.b16 %v4506_v44  ;;  %v5173_v44 = vld [vmem:[#allocation2 + $0xc9] sm:$0xff] }
 0x3c9   : > { %v5205_v11 = vpack.c.bf16 %v5173_v44, %v5173_v44 }
 0x3cb   : > { %v5286_v43 = vunpack.c.l.b16 %v5205_v11 }
 0x3d1   : > { %5396 = vmatmul.bf16.gmra.mxu0 %v9472_v3  ;;  %v4959_v3 = vpack.c.b16 %v4930_v30, %v4929_v51  ;;  %v8301_v51 = vld [vmem:[%s10025_s4 + $0x220] sm:$0xff]  ;;  %v4589_v30 = vunpack.c.l.b16 %v4508_v31  ;;  %v4858_v31 = vpack.c.bf16 %v4826_v17, %v4826_v17 }
 0x3d2   : > { %6771 = vmatpush.bf16.msra.mxu0 %v8301_v51 }
 0x3d4   : > { %4390 = vmatmul.bf16.gmra.mxu1 %v4957_v53  ;;  %v4475_v53 = vld [vmem:[#allocation2 + $0x6a] sm:$0xff] }
 0x3d5   : > { %4704 = vmatmul.bf16.gmra.mxu2 %v4612_v16  ;;  %5050 = vmatmul.bf16.gmra.mxu3 %v4958_v50  ;;  %v4507_v4 = vpack.c.bf16 %v4475_v53, %v4475_v53  ;;  %v4477_v16 = vld [vmem:[#allocation2 + $0x82] sm:$0xff] }
 0x3d6   : > { %v4509_v9 = vpack.c.bf16 %v4477_v16, %v4477_v16  ;;  %6772 = vmatpush.bf16.msra.mxu0 %v8300_v23 }
 0x3d7   : > { %v4588_v8 = vunpack.c.l.b16 %v4507_v4  ;;  %v4480_v4 = vld [vmem:[#allocation2 + $0xaa] sm:$0xff] }
 0x3d8   : > { %v4512_v16 = vpack.c.bf16 %v4480_v4, %v4480_v4 }
 0x3d9   : > { %v4615_v39 = vpack.c.b16 %v4588_v8, %v4587_v33  ;;  %v4481_v8 = vld [vmem:[#allocation2 + $0xb2] sm:$0xff] }
 0x3e1   : > { %5401 = vmatmul.bf16.gmra.mxu0 %v9500_v28  ;;  %v4819_v28 = vld [vmem:[#allocation2 + $0x68] sm:$0xff] }
 0x3e2   : > { %v4851_v54 = vpack.c.bf16 %v4819_v28, %v4819_v28  ;;  %v4479_v28 = vld [vmem:[#allocation2 + $0x9a] sm:$0xff] }
 0x3e3   : > { %v4511_v35 = vpack.c.bf16 %v4479_v28, %v4479_v28 }
 0x3e4   : > { %4395 = vmatmul.bf16.gmra.mxu1 %v4958_v50  ;;  %v4932_v37 = vunpack.c.l.b16 %v4851_v54  ;;  %v8285_v50 = vld [vmem:[%s10025_s4 + $0x1a0] sm:$0xff] }
 0x3e5   : > { %4709 = vmatmul.bf16.gmra.mxu2 %v4613_v7  ;;  %5055 = vmatmul.bf16.gmra.mxu3 %v4959_v3  ;;  %v4590_v7 = vunpack.c.l.b16 %v4509_v9  ;;  %v4592_v38 = vunpack.c.l.b16 %v4511_v35  ;;  %v5206_v35 = vpack.c.bf16 %v5174_v58, %v5174_v58  ;;  %v4485_v58 = vld [vmem:[#allocation2 + $0xe2] sm:$0xff] }
 0x3e6   : > { %v4960_v12 = vpack.c.b16 %v4932_v37, %v4931_v21  ;;  %6079 = vmatpush.bf16.msra.mxu2 %v8285_v50  ;;  %v4938_v37 = vunpack.c.l.b16 %v4857_v0  ;;  %v4513_v50 = vpack.c.bf16 %v4481_v8, %v4481_v8 }
 0x3e7   : > { %v4616_v55 = vpack.c.b16 %v4590_v7, %v4589_v30  ;;  %v4617_v20 = vpack.c.b16 %v4592_v38, %v4591_v45  ;;  %v5310_v30 = vpack.c.b16 %v5286_v43, %v5285_v46  ;;  %v4482_v45 = vld [vmem:[#allocation2 + $0xc2] sm:$0xff]  ;;  %v4483_v38 = vld [vmem:[#allocation2 + $0xca] sm:$0xff]  ;;  %v5287_v42 = vunpack.c.l.b16 %v5206_v35 }
 0x3e8   : > { %v4594_v51 = vunpack.c.l.b16 %v4513_v50  ;;  %v4514_v44 = vpack.c.bf16 %v4482_v45, %v4482_v45  ;;  %v4515_v4 = vpack.c.bf16 %v4483_v38, %v4483_v38  ;;  %v8291_v35 = vld [vmem:[%s10025_s4 + $0x1d0] sm:$0xff]  ;;  %v4831_v38 = vld [vmem:[#allocation2 + $0xf8] sm:$0xff] }
 0x3e9   : > { %v4830_v45 = vld [vmem:[#allocation2 + $0xf0] sm:$0xff] }
 0x3ea   : > { %6080 = vmatpush.bf16.msra.mxu2 %v8284_v61  ;;  %v4596_v17 = vunpack.c.l.b16 %v4515_v4  ;;  %v4517_v4 = vpack.c.bf16 %v4485_v58, %v4485_v58 }
 0x3f1   : > { %5406 = vmatmul.bf16.gmra.mxu0 %v5306_v36 }
 0x3f4   : > { %4400 = vmatmul.bf16.gmra.mxu1 %v4959_v3  ;;  %v9533_v1 = vpop.f32.mrf.mxu0 }
 0x3f5   : > { %4714 = vmatmul.bf16.gmra.mxu2 %v4614_v15  ;;  %5060 = vmatmul.bf16.gmra.mxu3 %v4960_v12 }
 0x3fc   : > { %v9538_v40 = vpop.f32.mrf.mxu0 }
 0x401   : > { %5411 = vmatmul.bf16.gmra.mxu0 %v9388_v57  ;;  %v9536_v26 = vpop.f32.mrf.mxu1  ;;  %v4823_v57 = vld [vmem:[#allocation2 + $0x98] sm:$0xff] }
 0x402   : > { %v4855_v18 = vpack.c.bf16 %v4823_v57, %v4823_v57 }
 0x404   : > { %4405 = vmatmul.bf16.gmra.mxu1 %v4960_v12  ;;  %v4936_v47 = vunpack.c.l.b16 %v4855_v18  ;;  %v4593_v18 = vunpack.c.l.b16 %v4512_v16 }
 0x405   : > { %4719 = vmatmul.bf16.gmra.mxu2 %v4615_v39  ;;  %5065 = vmatmul.bf16.gmra.mxu3 %v4961_v25  ;;  %v4827_v39 = vld [vmem:[#allocation2 + $0xc8] sm:$0xff] }
 0x406   : > { %v4962_v24 = vpack.c.b16 %v4936_v47, %v4935_v56  ;;  %v4859_v9 = vpack.c.bf16 %v4827_v39, %v4827_v39  ;;  %v4939_v56 = vunpack.c.l.b16 %v4858_v31  ;;  %v4618_v19 = vpack.c.b16 %v4594_v51, %v4593_v18  ;;  %v5176_v18 = vld [vmem:[#allocation2 + $0xf1] sm:$0xff]  ;;  %v5177_v51 = vld [vmem:[#allocation2 + $0xf9] sm:$0xff] }
 0x408   : > { %v9546_v34 = vpop.f32.mrf.mxu2  ;;  %v9548_v27 = vpop.f32.mrf.mxu3  ;;  %v4940_v47 = vunpack.c.l.b16 %v4859_v9 }
 0x409   : > { %v9553_v63 = vpop.f32.mrf.mxu1 }
 0x40e   : > { %v9558_v3 = vpop.f32.mrf.mxu0 }
 0x410   : > { %v9560_v62 = vpop.f32.mrf.mxu2  ;;  %v9562_v6 = vpop.f32.mrf.mxu3 }
 0x411   : > { %5416 = vmatmul.bf16.gmra.mxu0 %v9478_v52  ;;  %v9565_v41 = vpop.f32.mrf.mxu1  ;;  %v4856_v52 = vpack.c.bf16 %v4824_v32, %v4824_v32  ;;  %v4964_v32 = vpack.c.b16 %v4940_v47, %v4939_v56  ;;  %v5208_v56 = vpack.c.bf16 %v5176_v18, %v5176_v18  ;;  %v5209_v47 = vpack.c.bf16 %v5177_v51, %v5177_v51 }
 0x413   : > { %v4937_v21 = vunpack.c.l.b16 %v4856_v52  ;;  %v5207_v52 = vpack.c.bf16 %v5175_v48, %v5175_v48  ;;  %v8283_v48 = vld [vmem:[%s10025_s4 + $0x190] sm:$0xff] }
 0x414   : > { %4410 = vmatmul.bf16.gmra.mxu1 %v4961_v25  ;;  %6081 = vmatpush.bf16.msra.mxu2 %v8283_v48 }
 0x415   : > { %4724 = vmatmul.bf16.gmra.mxu2 %v4616_v55  ;;  %5070 = vmatmul.bf16.gmra.mxu3 %v4962_v24  ;;  %v4963_v5 = vpack.c.b16 %v4938_v37, %v4937_v21  ;;  %v4828_v21 = vld [vmem:[#allocation2 + $0xd8] sm:$0xff]  ;;  %v4829_v37 = vld [vmem:[#allocation2 + $0xe0] sm:$0xff]  ;;  %v5288_v11 = vunpack.c.l.b16 %v5207_v52 }
 0x416   : > { %v9567_v60 = vpop.f32.mrf.mxu0  ;;  %v4861_v61 = vpack.c.bf16 %v4829_v37, %v4829_v37 }
 0x417   : > { %v5311_v39 = vpack.c.b16 %v5288_v11, %v5287_v42  ;;  %v5289_v42 = vunpack.c.l.b16 %v5208_v56  ;;  %v5290_v11 = vunpack.c.l.b16 %v5209_v47 }
 0x418   : > { %v9569_v10 = vpop.f32.mrf.mxu2  ;;  %v9571_v14 = vpop.f32.mrf.mxu3  ;;  %v4942_v46 = vunpack.c.l.b16 %v4861_v61  ;;  %v4862_v61 = vpack.c.bf16 %v4830_v45, %v4830_v45  ;;  %v5178_v45 = vld [vmem:[#allocation2 + $0x109] sm:$0xff] }
 0x419   : > { %v9573_v54 = vpop.f32.mrf.mxu1 }
 0x41e   : > { %v9575_v36 = vpop.f32.mrf.mxu0 }
 0x420   : > { %v9577_v15 = vpop.f32.mrf.mxu2  ;;  %v9579_v12 = vpop.f32.mrf.mxu3 }
 0x421   : > { %5421 = vmatmul.bf16.gmra.mxu0 %v9502_v22  ;;  %v9582_v53 = vpop.f32.mrf.mxu1  ;;  %v8292_v22 = vld [vmem:[%s10025_s4 + $0x1d8] sm:$0xff] }
 0x422   : > { %6426 = vmatpush.bf16.msra.mxu3 %v8292_v22  ;;  %v4595_v22 = vunpack.c.l.b16 %v4514_v44 }
 0x424   : > { %4415 = vmatmul.bf16.gmra.mxu1 %v4962_v24  ;;  %v4619_v9 = vpack.c.b16 %v4596_v17, %v4595_v22  ;;  %v4863_v22 = vpack.c.bf16 %v4831_v38, %v4831_v38  ;;  %v5179_v38 = vld [vmem:[#allocation2 + $0x111] sm:$0xff] }
 0x425   : > { %4729 = vmatmul.bf16.gmra.mxu2 %v4617_v20  ;;  %5075 = vmatmul.bf16.gmra.mxu3 %v4963_v5 }
 0x426   : > { %v9584_v33 = vpop.f32.mrf.mxu0  ;;  %6427 = vmatpush.bf16.msra.mxu3 %v8291_v35  ;;  %v4944_v56 = vunpack.c.l.b16 %v4863_v22 }
 0x428   : > { %v9592_v25 = vpop.f32.mrf.mxu2  ;;  %v9594_v59 = vpop.f32.mrf.mxu3 }
 0x429   : > { %v9596_v57 = vpop.f32.mrf.mxu1 }
 0x42e   : > { %v9604_v7 = vpop.f32.mrf.mxu0 }
 0x430   : > { %v9606_v55 = vpop.f32.mrf.mxu2  ;;  %v9608_v24 = vpop.f32.mrf.mxu3 }
 0x431   : > { %5426 = vmatmul.bf16.gmra.mxu0 %v5310_v30  ;;  %v9610_v28 = vpop.f32.mrf.mxu1  ;;  %v4484_v30 = vld [vmem:[#allocation2 + $0xda] sm:$0xff] }
 0x434   : > { %4420 = vmatmul.bf16.gmra.mxu1 %v4963_v5  ;;  %v4860_v5 = vpack.c.bf16 %v4828_v21, %v4828_v21  ;;  %v4516_v21 = vpack.c.bf16 %v4484_v30, %v4484_v30  ;;  %v4943_v30 = vunpack.c.l.b16 %v4862_v61  ;;  %v4833_v61 = vld [vmem:[#allocation2 + $0x110] sm:$0xff] }
 0x435   : > { %4734 = vmatmul.bf16.gmra.mxu2 %v4618_v19  ;;  %5080 = vmatmul.bf16.gmra.mxu3 %v4964_v32 }
 0x436   : > { %v9612_v0 = vpop.f32.mrf.mxu0  ;;  %v4941_v50 = vunpack.c.l.b16 %v4860_v5 }
 0x438   : > { %v9614_v20 = vpop.f32.mrf.mxu2  ;;  %v9616_v49 = vpop.f32.mrf.mxu3  ;;  %v4965_v23 = vpack.c.b16 %v4942_v46, %v4941_v50  ;;  %v8299_v50 = vld [vmem:[%s10025_s4 + $0x210] sm:$0xff]  ;;  %v4597_v46 = vunpack.c.l.b16 %v4516_v21 }
 0x439   : > { %v9618_v8 = vpop.f32.mrf.mxu1  ;;  %6773 = vmatpush.bf16.msra.mxu0 %v8299_v50 }
 0x43e   : > { %v5392_v16 = vpop.f32.mrf.mxu0 }
 0x440   : > { %v9620_v43 = vpop.f32.mrf.mxu2  ;;  %v9622_v31 = vpop.f32.mrf.mxu3 }
 0x441   : > { %5431 = vmatmul.bf16.gmra.mxu0 %v5311_v39  ;;  %v4386_v29 = vpop.f32.mrf.mxu1 }
 0x442   : > { %v4387_v52 = vadd.f32 %v4386_v29, %v9533_v1  ;;  %v8275_v1 = vld [vmem:[%s10025_s4 + $0x150] sm:$0xff]  ;;  %v5312_v29 = vpack.c.b16 %v5290_v11, %v5289_v42  ;;  %v4487_v11 = vld [vmem:[#allocation2 + $0xfa] sm:$0xff] }
 0x443   : > { %5734 = vmatpush.bf16.msra.mxu1 %v8275_v1  ;;  %v4519_v50 = vpack.c.bf16 %v4487_v11, %v4487_v11  ;;  %v5180_v11 = vld [vmem:[#allocation2 + $0x121] sm:$0xff] }
 0x444   : > { %4425 = vmatmul.bf16.gmra.mxu1 %v4964_v32 }
 0x445   : > { %4739 = vmatmul.bf16.gmra.mxu2 %v4619_v9  ;;  %5085 = vmatmul.bf16.gmra.mxu3 %v4965_v23  ;;  %v4598_v9 = vunpack.c.l.b16 %v4517_v4 }
 0x446   : > { %v5394_v19 = vpop.f32.mrf.mxu0 }
 0x447   : > { %v4620_v48 = vpack.c.b16 %v4598_v9, %v4597_v46 }
 0x448   : > { %v4700_v32 = vpop.f32.mrf.mxu2  ;;  %v5046_v44 = vpop.f32.mrf.mxu3 }
 0x449   : > { %v4780_v37 = vadd.f32 %v4700_v32, %v4387_v52  ;;  %v4388_v5 = vpop.f32.mrf.mxu1  ;;  %v4966_v52 = vpack.c.b16 %v4944_v56, %v4943_v30 }
 0x44a   : > { %v4389_v39 = vadd.f32 %v4388_v5, %v9538_v40  ;;  %v4832_v5 = vld [vmem:[#allocation2 + $0x108] sm:$0xff] }
 0x44b   : > { %v5126_v17 = vadd.f32 %v5046_v44, %v4780_v37  ;;  %v4486_v37 = vld [vmem:[#allocation2 + $0xf2] sm:$0xff]  ;;  %v5211_v44 = vpack.c.bf16 %v5179_v38, %v5179_v38 }
 0x44d   : > { %v9638_v18 = vadd.f32 %v5392_v16, %v5126_v17  ;;  %v5210_v16 = vpack.c.bf16 %v5178_v45, %v5178_v45  ;;  %v4518_v17 = vpack.c.bf16 %v4486_v37, %v4486_v37  ;;  %v5292_v9 = vunpack.c.l.b16 %v5211_v44 }
 0x44e   : > { %v5397_v51 = vpop.f32.mrf.mxu0 }
 0x44f   : > { %v5291_v46 = vunpack.c.l.b16 %v5210_v16 }
 0x450   : > { %v4702_v47 = vpop.f32.mrf.mxu2  ;;  %v5048_v58 = vpop.f32.mrf.mxu3 }
 0x451   : > { %v4781_v40 = vadd.f32 %v4702_v47, %v4389_v39  ;;  %5436 = vmatmul.bf16.gmra.mxu0 %v5312_v29  ;;  %v4391_v35 = vpop.f32.mrf.mxu1  ;;  %v4865_v29 = vpack.c.bf16 %v4833_v61, %v4833_v61  ;;  %v4600_v47 = vunpack.c.l.b16 %v4519_v50  ;;  %v4489_v50 = vld [vmem:[#allocation2 + $0x112] sm:$0xff] }
 0x452   : > { %v4392_v21 = vadd.f32 %v4391_v35, %v9558_v3 }
 0x453   : > { %v5127_v32 = vadd.f32 %v5048_v58, %v4781_v40  ;;  %v5313_v40 = vpack.c.b16 %v5292_v9, %v5291_v46  ;;  %v4946_v45 = vunpack.c.l.b16 %v4865_v29  ;;  %v8282_v46 = vld [vmem:[%s10025_s4 + $0x188] sm:$0xff] }
 0x454   : > { %4430 = vmatmul.bf16.gmra.mxu1 %v4965_v23  ;;  %v4864_v23 = vpack.c.bf16 %v4832_v5, %v4832_v5  ;;  %v5181_v5 = vld [vmem:[#allocation2 + $0x129] sm:$0xff]  ;;  %6082 = vmatpush.bf16.msra.mxu2 %v8282_v46 }
 0x455   : > { %4744 = vmatmul.bf16.gmra.mxu2 %v4620_v48  ;;  %v9641_v4 = vadd.f32 %v5394_v19, %v5127_v32  ;;  %5090 = vmatmul.bf16.gmra.mxu3 %v4966_v52  ;;  %v4599_v19 = vunpack.c.l.b16 %v4518_v17  ;;  %v5213_v17 = vpack.c.bf16 %v5181_v5, %v5181_v5  ;;  %v8290_v9 = vld [vmem:[%s10025_s4 + $0x1c8] sm:$0xff] }
 0x456   : > { %v5399_v42 = vpop.f32.mrf.mxu0  ;;  %v4945_v35 = vunpack.c.l.b16 %v4864_v23  ;;  %6428 = vmatpush.bf16.msra.mxu3 %v8290_v9 }
 0x457   : > { %v4621_v37 = vpack.c.b16 %v4600_v47, %v4599_v19  ;;  %v5294_v19 = vunpack.c.l.b16 %v5213_v17 }
 0x458   : > { %v4705_v22 = vpop.f32.mrf.mxu2  ;;  %v5051_v1 = vpop.f32.mrf.mxu3  ;;  %v4967_v44 = vpack.c.b16 %v4946_v45, %v4945_v35 }
 0x459   : > { %v4782_v39 = vadd.f32 %v4705_v22, %v4392_v21  ;;  %v4393_v3 = vpop.f32.mrf.mxu1  ;;  %v4488_v22 = vld [vmem:[#allocation2 + $0x10a] sm:$0xff] }
 0x45a   : > { %v4394_v56 = vadd.f32 %v4393_v3, %v9567_v60  ;;  %v4834_v3 = vld [vmem:[#allocation2 + $0x120] sm:$0xff]  ;;  %v4520_v23 = vpack.c.bf16 %v4488_v22, %v4488_v22 }
 0x45b   : > { %v5128_v30 = vadd.f32 %v5051_v1, %v4782_v39 }
 0x45d   : > { %v9644_v58 = vadd.f32 %v5397_v51, %v5128_v30  ;;  %v5212_v51 = vpack.c.bf16 %v5180_v11, %v5180_v11  ;;  %v4521_v30 = vpack.c.bf16 %v4489_v50, %v4489_v50 }
 0x45e   : > { %v5402_v48 = vpop.f32.mrf.mxu0 }
 0x460   : > { %v4707_v38 = vpop.f32.mrf.mxu2  ;;  %v5053_v21 = vpop.f32.mrf.mxu3 }
 0x461   : > { %v4783_v32 = vadd.f32 %v4707_v38, %v4394_v56  ;;  %5441 = vmatmul.bf16.gmra.mxu0 %v5313_v40  ;;  %v4396_v16 = vpop.f32.mrf.mxu1  ;;  %v5293_v56 = vunpack.c.l.b16 %v5212_v51  ;;  %v4866_v40 = vpack.c.bf16 %v4834_v3, %v4834_v3  ;;  %v5182_v3 = vld [vmem:[#allocation2 + $0x139] sm:$0xff] }
 0x462   : > { %v4397_v60 = vadd.f32 %v4396_v16, %v9575_v36  ;;  %v4835_v36 = vld [vmem:[#allocation2 + $0x128] sm:$0xff]  ;;  %v4602_v16 = vunpack.c.l.b16 %v4521_v30 }
 0x463   : > { %v5129_v61 = vadd.f32 %v5053_v21, %v4783_v32  ;;  %v4867_v35 = vpack.c.bf16 %v4835_v36, %v4835_v36  ;;  %v8274_v32 = vld [vmem:[%s10025_s4 + $0x148] sm:$0xff]  ;;  %v5314_v11 = vpack.c.b16 %v5294_v19, %v5293_v56 }
 0x464   : > { %4435 = vmatmul.bf16.gmra.mxu1 %v4966_v52  ;;  %v8298_v21 = vld [vmem:[%s10025_s4 + $0x208] sm:$0xff] }
 0x465   : > { %4749 = vmatmul.bf16.gmra.mxu2 %v4621_v37  ;;  %v9647_v39 = vadd.f32 %v5399_v42, %v5129_v61  ;;  %5095 = vmatmul.bf16.gmra.mxu3 %v4967_v44  ;;  %v4601_v37 = vunpack.c.l.b16 %v4520_v23  ;;  %v4948_v22 = vunpack.c.l.b16 %v4867_v35  ;;  %v5183_v36 = vld [vmem:[#allocation2 + $0x141] sm:$0xff]  ;;  %v4491_v19 = vld [vmem:[#allocation2 + $0x12a] sm:$0xff] }
 0x466   : > { %v5404_v1 = vpop.f32.mrf.mxu0  ;;  %5735 = vmatpush.bf16.msra.mxu1 %v8274_v32  ;;  %6774 = vmatpush.bf16.msra.mxu0 %v8298_v21  ;;  %v4523_v21 = vpack.c.bf16 %v4491_v19, %v4491_v19 }
 0x467   : > { %v4622_v50 = vpack.c.b16 %v4602_v16, %v4601_v37 }
 0x468   : > { %v4710_v52 = vpop.f32.mrf.mxu2  ;;  %v5056_v42 = vpop.f32.mrf.mxu3 }
 0x469   : > { %v4784_v29 = vadd.f32 %v4710_v52, %v4397_v60  ;;  %v4398_v47 = vpop.f32.mrf.mxu1  ;;  %v4947_v60 = vunpack.c.l.b16 %v4866_v40  ;;  %v4837_v40 = vld [vmem:[#allocation2 + $0x140] sm:$0xff] }
 0x46a   : > { %v4399_v38 = vadd.f32 %v4398_v47, %v9584_v33  ;;  %v4836_v47 = vld [vmem:[#allocation2 + $0x138] sm:$0xff] }
 0x46b   : > { %v5130_v45 = vadd.f32 %v5056_v42, %v4784_v29  ;;  %v4968_v9 = vpack.c.b16 %v4948_v22, %v4947_v60  ;;  %v4490_v29 = vld [vmem:[#allocation2 + $0x122] sm:$0xff]  ;;  %v5215_v42 = vpack.c.bf16 %v5183_v36, %v5183_v36 }
 0x46d   : > { %v9662_v5 = vadd.f32 %v5402_v48, %v5130_v45  ;;  %v5214_v48 = vpack.c.bf16 %v5182_v3, %v5182_v3  ;;  %v4522_v45 = vpack.c.bf16 %v4490_v29, %v4490_v29  ;;  %v5296_v16 = vunpack.c.l.b16 %v5215_v42 }
 0x46e   : > { %v5407_v61 = vpop.f32.mrf.mxu0 }
 0x46f   : > { %v5295_v37 = vunpack.c.l.b16 %v5214_v48  ;;  %v4603_v22 = vunpack.c.l.b16 %v4522_v45  ;;  %v3702_v48 = vld [vmem:[%s9234_s20 + $0xf0] sm:$0xff] }
 0x470   : > { %v4712_v51 = vpop.f32.mrf.mxu2  ;;  %v5058_v17 = vpop.f32.mrf.mxu3  ;;  %v3737_v45 = vmul.f32 %v9250_v2, %v3702_v48 }
 0x471   : > { %v4785_v33 = vadd.f32 %v4712_v51, %v4399_v38  ;;  %5446 = vmatmul.bf16.gmra.mxu0 %v5314_v11  ;;  %v4401_v46 = vpop.f32.mrf.mxu1  ;;  %v4869_v11 = vpack.c.bf16 %v4837_v40, %v4837_v40  ;;  %v4604_v51 = vunpack.c.l.b16 %v4523_v21  ;;  %v5185_v40 = vld [vmem:[#allocation2 + $0x159] sm:$0xff] }
 0x472   : > { %v4402_v23 = vadd.f32 %v4401_v46, %v9604_v7  ;;  %v5217_v21 = vpack.c.bf16 %v5185_v40, %v5185_v40  ;;  %v8297_v40 = vld [vmem:[%s10025_s4 + $0x200] sm:$0xff] }
 0x473   : > { %v5131_v52 = vadd.f32 %v5058_v17, %v4785_v33  ;;  %v5315_v33 = vpack.c.b16 %v5296_v16, %v5295_v37  ;;  %v4950_v3 = vunpack.c.l.b16 %v4869_v11  ;;  %v4623_v29 = vpack.c.b16 %v4604_v51, %v4603_v22  ;;  %v8289_v11 = vld [vmem:[%s10025_s4 + $0x1c0] sm:$0xff]  ;;  %6775 = vmatpush.bf16.msra.mxu0 %v8297_v40 }
 0x474   : > { %4440 = vmatmul.bf16.gmra.mxu1 %v4967_v44  ;;  %v4868_v44 = vpack.c.bf16 %v4836_v47, %v4836_v47  ;;  %v5184_v47 = vld [vmem:[#allocation2 + $0x151] sm:$0xff]  ;;  %6429 = vmatpush.bf16.msra.mxu3 %v8289_v11 }
 0x475   : > { %4754 = vmatmul.bf16.gmra.mxu2 %v4622_v50  ;;  %v9665_v30 = vadd.f32 %v5404_v1, %v5131_v52  ;;  %5100 = vmatmul.bf16.gmra.mxu3 %v4968_v9 }
 0x476   : > { %v5409_v56 = vpop.f32.mrf.mxu0  ;;  %v4949_v46 = vunpack.c.l.b16 %v4868_v44  ;;  %v8281_v44 = vld [vmem:[%s10025_s4 + $0x180] sm:$0xff] }
 0x477   : > { %6083 = vmatpush.bf16.msra.mxu2 %v8281_v44 }
 0x478   : > { %v4715_v35 = vpop.f32.mrf.mxu2  ;;  %v5061_v32 = vpop.f32.mrf.mxu3  ;;  %v4969_v19 = vpack.c.b16 %v4950_v3, %v4949_v46 }
 0x479   : > { %v4786_v38 = vadd.f32 %v4715_v35, %v4402_v23  ;;  %v4403_v7 = vpop.f32.mrf.mxu1 }
 0x47a   : > { %v4404_v1 = vadd.f32 %v4403_v7, %v9612_v0  ;;  %v3703_v0 = vld [vmem:[%s9234_s20 + $0xf8] sm:$0xff]  ;;  %v4493_v7 = vld [vmem:[#allocation2 + $0x142] sm:$0xff] }
 0x47b   : > { %v5132_v60 = vadd.f32 %v5061_v32, %v4786_v38  ;;  %v4492_v38 = vld [vmem:[#allocation2 + $0x13a] sm:$0xff]  ;;  %v5216_v32 = vpack.c.bf16 %v5184_v47, %v5184_v47 }
 0x47c   : > { %v4524_v51 = vpack.c.bf16 %v4492_v38, %v4492_v38 }
 0x47d   : > { %v9668_v17 = vadd.f32 %v5407_v61, %v5132_v60  ;;  %v3738_v61 = vmul.f32 %v9250_v2, %v3703_v0  ;;  %v3772_v2 = vadd.f32 %v9274_v13, %v3737_v45 }
 0x47e   : > { %v5412_v50 = vpop.f32.mrf.mxu0  ;;  %v4605_v0 = vunpack.c.l.b16 %v4524_v51 }
 0x480   : > { %v4717_v36 = vpop.f32.mrf.mxu2  ;;  %v5063_v23 = vpop.f32.mrf.mxu3 }
 0x481   : > { %v4787_v52 = vadd.f32 %v4717_v36, %v4404_v1  ;;  %5451 = vmatmul.bf16.gmra.mxu0 %v5315_v33  ;;  %v4406_v42 = vpop.f32.mrf.mxu1  ;;  %v4838_v1 = vld [vmem:[#allocation2 + $0x150] sm:$0xff]  ;;  %v9685_v33 = vmax.f32 %v3772_v2, 0.0 }
 0x482   : > { %v4407_v60 = vadd.f32 %v4406_v42, %v9536_v26  ;;  %v4870_v47 = vpack.c.bf16 %v4838_v1, %v4838_v1  ;;  %v8273_v42 = vld [vmem:[%s10025_s4 + $0x140] sm:$0xff] }
 0x483   : > { %v5133_v35 = vadd.f32 %v5063_v23, %v4787_v52  ;;  %v4525_v52 = vpack.c.bf16 %v4493_v7, %v4493_v7  ;;  %v5297_v23 = vunpack.c.l.b16 %v5216_v32  ;;  %3837 = vst [vmem:[#allocation2 + $0x181] sm:$0xff] %v9685_v33  ;;  %5736 = vmatpush.bf16.msra.mxu1 %v8273_v42 }
 0x484   : > { %4445 = vmatmul.bf16.gmra.mxu1 %v4968_v9  ;;  %v3773_v9 = vadd.f32 %v9274_v13, %v3738_v61  ;;  %v4951_v32 = vunpack.c.l.b16 %v4870_v47  ;;  %v4841_v47 = vld [vmem:[#allocation2 + $0x170] sm:$0xff] }
 0x485   : > { %4759 = vmatmul.bf16.gmra.mxu2 %v4623_v29  ;;  %v9674_v37 = vadd.f32 %v5409_v56, %v5133_v35  ;;  %5105 = vmatmul.bf16.gmra.mxu3 %v4969_v19  ;;  %v4839_v56 = vld [vmem:[#allocation2 + $0x158] sm:$0xff]  ;;  %v5298_v29 = vunpack.c.l.b16 %v5217_v21  ;;  %v4606_v35 = vunpack.c.l.b16 %v4525_v52 }
 0x486   : > { %v5414_v16 = vpop.f32.mrf.mxu0  ;;  %v9687_v46 = vmax.f32 %v3773_v9, 0.0  ;;  %v4871_v13 = vpack.c.bf16 %v4839_v56, %v4839_v56  ;;  %v5186_v56 = vld [vmem:[#allocation2 + $0x169] sm:$0xff] }
 0x487   : > { %v5316_v45 = vpack.c.b16 %v5298_v29, %v5297_v23  ;;  %v4624_v9 = vpack.c.b16 %v4606_v35, %v4605_v0 }
 0x488   : > { %v4720_v22 = vpop.f32.mrf.mxu2  ;;  %v5066_v36 = vpop.f32.mrf.mxu3  ;;  %3838 = vst [vmem:[#allocation2 + $0x189] sm:$0xff] %v9687_v46  ;;  %v4952_v21 = vunpack.c.l.b16 %v4871_v13 }
 0x489   : > { %v4788_v3 = vadd.f32 %v4720_v22, %v4407_v60  ;;  %v4408_v48 = vpop.f32.mrf.mxu1  ;;  %v5187_v22 = vld [vmem:[#allocation2 + $0x171] sm:$0xff] }
 0x48a   : > { %v4409_v7 = vadd.f32 %v4408_v48, %v9553_v63  ;;  %v4970_v1 = vpack.c.b16 %v4952_v21, %v4951_v32  ;;  %v4495_v63 = vld [vmem:[#allocation2 + $0x15a] sm:$0xff]  ;;  %v4840_v48 = vld [vmem:[#allocation2 + $0x168] sm:$0xff]  ;;  %v4873_v21 = vpack.c.bf16 %v4841_v47, %v4841_v47  ;;  %v5221_v47 = vpack.c.bf16 %v9687_v46, %v9687_v46 }
 0x48b   : > { %v5134_v26 = vadd.f32 %v5066_v36, %v4788_v3  ;;  %v4494_v3 = vld [vmem:[#allocation2 + $0x152] sm:$0xff]  ;;  %v5219_v36 = vpack.c.bf16 %v5187_v22, %v5187_v22  ;;  %v4527_v0 = vpack.c.bf16 %v4495_v63, %v4495_v63  ;;  %v4872_v32 = vpack.c.bf16 %v4840_v48, %v4840_v48  ;;  %v4496_v48 = vld [vmem:[#allocation2 + $0x16a] sm:$0xff] }
 0x48d   : > { %v9697_v61 = vadd.f32 %v5412_v50, %v5134_v26  ;;  %v5218_v50 = vpack.c.bf16 %v5186_v56, %v5186_v56  ;;  %v4526_v26 = vpack.c.bf16 %v4494_v3, %v4494_v3 }
 0x48e   : > { %v5417_v38 = vpop.f32.mrf.mxu0 }
 0x48f   : > { %v5299_v35 = vunpack.c.l.b16 %v5218_v50 }
 0x490   : > { %v4722_v44 = vpop.f32.mrf.mxu2  ;;  %v5068_v2 = vpop.f32.mrf.mxu3 }
 0x491   : > { %v4789_v11 = vadd.f32 %v4722_v44, %v4409_v7  ;;  %5456 = vmatmul.bf16.gmra.mxu0 %v5316_v45  ;;  %v4411_v60 = vpop.f32.mrf.mxu1  ;;  %v4608_v44 = vunpack.c.l.b16 %v4527_v0  ;;  %v4843_v0 = vld [vmem:[#allocation2 + $0x188] sm:$0xff] }
 0x492   : > { %v4412_v29 = vadd.f32 %v4411_v60, %v9565_v41  ;;  %v4953_v41 = vunpack.c.l.b16 %v4872_v32  ;;  %v4954_v60 = vunpack.c.l.b16 %v4873_v21 }
 0x493   : > { %v5135_v51 = vadd.f32 %v5068_v2, %v4789_v11 }
 0x494   : > { %4450 = vmatmul.bf16.gmra.mxu1 %v4969_v19  ;;  %v5300_v19 = vunpack.c.l.b16 %v5219_v36  ;;  %v4971_v36 = vpack.c.b16 %v4954_v60, %v4953_v41 }
 0x495   : > { %4764 = vmatmul.bf16.gmra.mxu2 %v4624_v9  ;;  %v9700_v52 = vadd.f32 %v5414_v16, %v5135_v51  ;;  %5110 = vmatmul.bf16.gmra.mxu3 %v4970_v1  ;;  %v4607_v16 = vunpack.c.l.b16 %v4526_v26  ;;  %v4497_v26 = vld [vmem:[#allocation2 + $0x172] sm:$0xff] }
 0x496   : > { %v5419_v23 = vpop.f32.mrf.mxu0  ;;  %v5317_v11 = vpack.c.b16 %v5300_v19, %v5299_v35  ;;  %v4528_v19 = vpack.c.bf16 %v4496_v48, %v4496_v48  ;;  %v4529_v32 = vpack.c.bf16 %v4497_v26, %v4497_v26  ;;  %v6544_v26 = vld [vmem:[#allocation2 + $0x3a] sm:$0xff] }
 0x497   : > { %v4625_v63 = vpack.c.b16 %v4608_v44, %v4607_v16  ;;  %v4875_v44 = vpack.c.bf16 %v4843_v0, %v4843_v0  ;;  %v5851_v0 = vld [vmem:[#allocation2 + $0x30] sm:$0xff] }
 0x498   : > { %v4725_v13 = vpop.f32.mrf.mxu2  ;;  %v5071_v40 = vpop.f32.mrf.mxu3 }
 0x499   : > { %v4790_v42 = vadd.f32 %v4725_v13, %v4412_v29  ;;  %v4413_v45 = vpop.f32.mrf.mxu1 }
 0x49a   : > { %v4414_v56 = vadd.f32 %v4413_v45, %v9573_v54 }
 0x49b   : > { %v5136_v7 = vadd.f32 %v5071_v40, %v4790_v42  ;;  %v4842_v40 = vld [vmem:[#allocation2 + $0x180] sm:$0xff] }
 0x49c   : > { %v4874_v16 = vpack.c.bf16 %v4842_v40, %v4842_v40  ;;  %v5504_v40 = vld [vmem:[#allocation2 + $0x1a] sm:$0xff] }
 0x49d   : > { %v9703_v2 = vadd.f32 %v5417_v38, %v5136_v7  ;;  %v5220_v38 = vpack.c.bf16 %v9685_v33, %v9685_v33  ;;  %v5302_v7 = vunpack.c.l.b16 %v5221_v47  ;;  %v6543_v47 = vld [vmem:[#allocation2 + $0x32] sm:$0xff] }
 0x49e   : > { %v5422_v9 = vpop.f32.mrf.mxu0 }
 0x49f   : > { %v5301_v21 = vunpack.c.l.b16 %v5220_v38 }
 0x4a0   : > { %v4727_v22 = vpop.f32.mrf.mxu2  ;;  %v5073_v3 = vpop.f32.mrf.mxu3 }
 0x4a1   : > { %v4791_v51 = vadd.f32 %v4727_v22, %v4414_v56  ;;  %5461 = vmatmul.bf16.gmra.mxu0 %v5317_v11  ;;  %v4416_v50 = vpop.f32.mrf.mxu1  ;;  %v4610_v11 = vunpack.c.l.b16 %v4529_v32  ;;  %v5318_v41 = vpack.c.b16 %v5302_v7, %v5301_v21  ;;  %v4956_v22 = vunpack.c.l.b16 %v4875_v44  ;;  %v6197_v21 = vld [vmem:[#allocation2 + $0x31] sm:$0xff]  ;;  %v6198_v7 = vld [vmem:[#allocation2 + $0x39] sm:$0xff] }
 0x4a2   : > { %v4417_v42 = vadd.f32 %v4416_v50, %v9582_v53  ;;  %v4955_v53 = vunpack.c.l.b16 %v4874_v16  ;;  %v5536_v16 = vpack.c.bf16 %v5504_v40, %v5504_v40 }
 0x4a3   : > { %v5137_v29 = vadd.f32 %v5073_v3, %v4791_v51 }
 0x4a4   : > { %4455 = vmatmul.bf16.gmra.mxu1 %v4970_v1  ;;  %v4972_v38 = vpack.c.b16 %v4956_v22, %v4955_v53 }
 0x4a5   : > { %4769 = vmatmul.bf16.gmra.mxu2 %v4625_v63  ;;  %v9710_v13 = vadd.f32 %v5419_v23, %v5137_v29  ;;  %5115 = vmatmul.bf16.gmra.mxu3 %v4971_v36  ;;  %v4609_v23 = vunpack.c.l.b16 %v4528_v19  ;;  %v6576_v19 = vpack.c.bf16 %v6544_v26, %v6544_v26 }
 0x4a6   : > { %v5424_v54 = vpop.f32.mrf.mxu0 }
 0x4a7   : > { %v4626_v29 = vpack.c.b16 %v4610_v11, %v4609_v23  ;;  %v6657_v53 = vunpack.c.l.b16 %v6576_v19 }
 0x4a8   : > { %v4730_v35 = vpop.f32.mrf.mxu2  ;;  %v5076_v45 = vpop.f32.mrf.mxu3 }
 0x4a9   : > { %v4792_v1 = vadd.f32 %v4730_v35, %v4417_v42  ;;  %v4418_v33 = vpop.f32.mrf.mxu1  ;;  %v6575_v35 = vpack.c.bf16 %v6543_v47, %v6543_v47 }
 0x4aa   : > { %v4419_v51 = vadd.f32 %v4418_v33, %v9596_v57 }
 0x4ab   : > { %v5138_v46 = vadd.f32 %v5076_v45, %v4792_v1  ;;  %v5852_v45 = vld [vmem:[#allocation2 + $0x38] sm:$0xff] }
 0x4ac   : > { %v5884_v11 = vpack.c.bf16 %v5852_v45, %v5852_v45 }
 0x4ad   : > { %v9713_v60 = vadd.f32 %v5422_v9, %v5138_v46  ;;  %v5505_v9 = vld [vmem:[#allocation2 + $0x22] sm:$0xff]  ;;  %v5883_v46 = vpack.c.bf16 %v5851_v0, %v5851_v0 }
 0x4ae   : > { %v5427_v56 = vpop.f32.mrf.mxu0  ;;  %v5537_v44 = vpack.c.bf16 %v5505_v9, %v5505_v9 }
 0x4b0   : > { %v4732_v3 = vpop.f32.mrf.mxu2  ;;  %v5078_v50 = vpop.f32.mrf.mxu3 }
 0x4b1   : > { %v4793_v63 = vadd.f32 %v4732_v3, %v4419_v51  ;;  %5466 = vmatmul.bf16.gmra.mxu0 %v5318_v41  ;;  %v4421_v48 = vpop.f32.mrf.mxu1  ;;  %v6656_v41 = vunpack.c.l.b16 %v6575_v35  ;;  %v6229_v51 = vpack.c.bf16 %v6197_v21, %v6197_v21 }
 0x4b2   : > { %v4422_v32 = vadd.f32 %v4421_v48, %v9610_v28 }
 0x4b3   : > { %v5139_v42 = vadd.f32 %v5078_v50, %v4793_v63  ;;  %v5617_v63 = vunpack.c.l.b16 %v5536_v16  ;;  %v5618_v50 = vunpack.c.l.b16 %v5537_v44  ;;  %v6688_v28 = vpack.c.b16 %v6657_v53, %v6656_v41  ;;  %v6199_v41 = vld [vmem:[#allocation2 + $0x49] sm:$0xff]  ;;  %v6200_v53 = vld [vmem:[#allocation2 + $0x51] sm:$0xff] }
 0x4b4   : > { %4460 = vmatmul.bf16.gmra.mxu1 %v4971_v36  ;;  %v6310_v26 = vunpack.c.l.b16 %v6229_v51 }
 0x4b5   : > { %4774 = vmatmul.bf16.gmra.mxu2 %v4626_v29  ;;  %v9716_v1 = vadd.f32 %v5424_v54, %v5139_v42  ;;  %5120 = vmatmul.bf16.gmra.mxu3 %v4972_v38  ;;  %v6230_v54 = vpack.c.bf16 %v6198_v7, %v6198_v7  ;;  %v5964_v29 = vunpack.c.l.b16 %v5883_v46  ;;  %v5965_v38 = vunpack.c.l.b16 %v5884_v11  ;;  %v6545_v7 = vld [vmem:[#allocation2 + $0x4a] sm:$0xff] }
 0x4b6   : > { %v5429_v57 = vpop.f32.mrf.mxu0  ;;  %v5649_v19 = vpack.c.b16 %v5618_v50, %v5617_v63  ;;  %v6577_v44 = vpack.c.bf16 %v6545_v7, %v6545_v7 }
 0x4b7   : > { %v6311_v42 = vunpack.c.l.b16 %v6230_v54  ;;  %v5996_v45 = vpack.c.b16 %v5965_v38, %v5964_v29 }
 0x4b8   : > { %v4735_v33 = vpop.f32.mrf.mxu2  ;;  %v5081_v23 = vpop.f32.mrf.mxu3  ;;  %v6658_v50 = vunpack.c.l.b16 %v6577_v44 }
 0x4b9   : > { %v4794_v36 = vadd.f32 %v4735_v33, %v4422_v32  ;;  %v4423_v22 = vpop.f32.mrf.mxu1  ;;  %v6342_v21 = vpack.c.b16 %v6311_v42, %v6310_v26  ;;  %v6546_v33 = vld [vmem:[#allocation2 + $0x52] sm:$0xff]  ;;  %v6231_v26 = vpack.c.bf16 %v6199_v41, %v6199_v41  ;;  %v6232_v42 = vpack.c.bf16 %v6200_v53, %v6200_v53  ;;  %v5855_v41 = vld [vmem:[#allocation2 + $0x60] sm:$0xff] }
 0x4ba   : > { %v4424_v40 = vadd.f32 %v4423_v22, %v9618_v8  ;;  %v6578_v46 = vpack.c.bf16 %v6546_v33, %v6546_v33 }
 0x4bb   : > { %v5140_v3 = vadd.f32 %v5081_v23, %v4794_v36  ;;  %v5854_v23 = vld [vmem:[#allocation2 + $0x50] sm:$0xff] }
 0x4bc   : > { %v5886_v63 = vpack.c.bf16 %v5854_v23, %v5854_v23  ;;  %v6659_v29 = vunpack.c.l.b16 %v6578_v46  ;;  %v6547_v46 = vld [vmem:[#allocation2 + $0x62] sm:$0xff]  ;;  %v6548_v23 = vld [vmem:[#allocation2 + $0x6a] sm:$0xff] }
 0x4bd   : > { %v9719_v48 = vadd.f32 %v5427_v56, %v5140_v3  ;;  %v5853_v56 = vld [vmem:[#allocation2 + $0x48] sm:$0xff]  ;;  %v6580_v53 = vpack.c.bf16 %v6548_v23, %v6548_v23 }
 0x4be   : > { %v5432_v47 = vpop.f32.mrf.mxu0  ;;  %v5885_v51 = vpack.c.bf16 %v5853_v56, %v5853_v56 }
 0x4c0   : > { %v4737_v9 = vpop.f32.mrf.mxu2  ;;  %v5083_v35 = vpop.f32.mrf.mxu3 }
 0x4c1   : > { %v4795_v0 = vadd.f32 %v4737_v9, %v4424_v40  ;;  %6776 = vmatmul.bf16.vlgmr.msra.gmra.mxu0 %v6688_v28  ;;  %v4426_v32 = vpop.f32.mrf.mxu1  ;;  %v5967_v9 = vunpack.c.l.b16 %v5886_v63  ;;  %v6202_v63 = vld [vmem:[#allocation2 + $0x69] sm:$0xff] }
 0x4c2   : > { %v4427_v11 = vadd.f32 %v4426_v32, %v9546_v34  ;;  %v6312_v34 = vunpack.c.l.b16 %v6231_v26 }
 0x4c3   : > { %v5141_v16 = vadd.f32 %v5083_v35, %v4795_v0  ;;  %v6689_v0 = vpack.c.b16 %v6659_v29, %v6658_v50  ;;  %v5887_v29 = vpack.c.bf16 %v5855_v41, %v5855_v41 }
 0x4c4   : > { %5737 = vmatmul.bf16.vlgmr.msra.gmra.mxu1 %v5649_v19 }
 0x4c5   : > { %6084 = vmatmul.bf16.vlgmr.msra.gmra.mxu2 %v5996_v45  ;;  %v9722_v36 = vadd.f32 %v5429_v57, %v5141_v16  ;;  %6430 = vmatmul.bf16.vlgmr.msra.gmra.mxu3 %v6342_v21  ;;  %v5966_v57 = vunpack.c.l.b16 %v5885_v51  ;;  %v6313_v45 = vunpack.c.l.b16 %v6232_v42 }
 0x4c6   : > { %v5434_v8 = vpop.f32.mrf.mxu0 }
 0x4c7   : > { %v5997_v16 = vpack.c.b16 %v5967_v9, %v5966_v57  ;;  %v6343_v44 = vpack.c.b16 %v6313_v45, %v6312_v34  ;;  %v6234_v34 = vpack.c.bf16 %v6202_v63, %v6202_v63 }
 0x4c8   : > { %v4740_v22 = vpop.f32.mrf.mxu2  ;;  %v5086_v3 = vpop.f32.mrf.mxu3 }
 0x4c9   : > { %v4796_v54 = vadd.f32 %v4740_v22, %v4427_v11  ;;  %v4428_v38 = vpop.f32.mrf.mxu1 }
 0x4ca   : > { %v4429_v32 = vadd.f32 %v4428_v38, %v9560_v62  ;;  %v5856_v62 = vld [vmem:[#allocation2 + $0x68] sm:$0xff] }
 0x4cb   : > { %v5142_v40 = vadd.f32 %v5086_v3, %v4796_v54  ;;  %v6201_v3 = vld [vmem:[#allocation2 + $0x61] sm:$0xff]  ;;  %v5888_v42 = vpack.c.bf16 %v5856_v62, %v5856_v62 }
 0x4cc   : > { %v6233_v9 = vpack.c.bf16 %v6201_v3, %v6201_v3  ;;  %v6550_v62 = vld [vmem:[#allocation2 + $0x82] sm:$0xff]  ;;  %v5857_v3 = vld [vmem:[#allocation2 + $0x78] sm:$0xff] }
 0x4cd   : > { %v9725_v35 = vadd.f32 %v5432_v47, %v5142_v40  ;;  %v6579_v47 = vpack.c.bf16 %v6547_v46, %v6547_v46  ;;  %v6582_v63 = vpack.c.bf16 %v6550_v62, %v6550_v62 }
 0x4ce   : > { %v5437_v19 = vpop.f32.mrf.mxu0 }
 0x4cf   : > { %v6660_v40 = vunpack.c.l.b16 %v6579_v47 }
 0x4d0   : > { %v4742_v21 = vpop.f32.mrf.mxu2  ;;  %v5088_v33 = vpop.f32.mrf.mxu3 }
 0x4d1   : > { %v4797_v7 = vadd.f32 %v4742_v21, %v4429_v32  ;;  %6781 = vmatmul.bf16.gmra.mxu0 %v6689_v0  ;;  %v4431_v56 = vpop.f32.mrf.mxu1  ;;  %v5969_v32 = vunpack.c.l.b16 %v5888_v42  ;;  %v6204_v42 = vld [vmem:[#allocation2 + $0x81] sm:$0xff] }
 0x4d2   : > { %v4432_v54 = vadd.f32 %v4431_v56, %v9569_v10  ;;  %v6314_v10 = vunpack.c.l.b16 %v6233_v9 }
 0x4d3   : > { %v5143_v11 = vadd.f32 %v5088_v33, %v4797_v7 }
 0x4d4   : > { %5742 = vmatmul.bf16.gmra.mxu1 %v6688_v28  ;;  %v6661_v28 = vunpack.c.l.b16 %v6580_v53  ;;  %v6549_v53 = vld [vmem:[#allocation2 + $0x7a] sm:$0xff] }
 0x4d5   : > { %6089 = vmatmul.bf16.gmra.mxu2 %v5997_v16  ;;  %v9728_v22 = vadd.f32 %v5434_v8, %v5143_v11  ;;  %6435 = vmatmul.bf16.gmra.mxu3 %v6343_v44  ;;  %v5968_v8 = vunpack.c.l.b16 %v5887_v29  ;;  %v6315_v16 = vunpack.c.l.b16 %v6234_v34 }
 0x4d6   : > { %v5439_v51 = vpop.f32.mrf.mxu0  ;;  %v6690_v21 = vpack.c.b16 %v6661_v28, %v6660_v40  ;;  %v5889_v28 = vpack.c.bf16 %v5857_v3, %v5857_v3 }
 0x4d7   : > { %v5998_v11 = vpack.c.b16 %v5969_v32, %v5968_v8  ;;  %v6344_v47 = vpack.c.b16 %v6315_v16, %v6314_v10  ;;  %v6236_v10 = vpack.c.bf16 %v6204_v42, %v6204_v42 }
 0x4d8   : > { %v4745_v50 = vpop.f32.mrf.mxu2  ;;  %v5091_v26 = vpop.f32.mrf.mxu3 }
 0x4d9   : > { %v4798_v38 = vadd.f32 %v4745_v50, %v4432_v54  ;;  %v4433_v57 = vpop.f32.mrf.mxu1 }
 0x4da   : > { %v4434_v56 = vadd.f32 %v4433_v57, %v9577_v15  ;;  %v5858_v15 = vld [vmem:[#allocation2 + $0x80] sm:$0xff] }
 0x4db   : > { %v5144_v45 = vadd.f32 %v5091_v26, %v4798_v38  ;;  %v6203_v26 = vld [vmem:[#allocation2 + $0x79] sm:$0xff]  ;;  %v5890_v34 = vpack.c.bf16 %v5858_v15, %v5858_v15 }
 0x4dc   : > { %v6235_v32 = vpack.c.bf16 %v6203_v26, %v6203_v26  ;;  %v6552_v15 = vld [vmem:[#allocation2 + $0x9a] sm:$0xff]  ;;  %v5859_v26 = vld [vmem:[#allocation2 + $0x90] sm:$0xff] }
 0x4dd   : > { %v9731_v7 = vadd.f32 %v5437_v19, %v5144_v45  ;;  %v6581_v19 = vpack.c.bf16 %v6549_v53, %v6549_v53  ;;  %v6584_v42 = vpack.c.bf16 %v6552_v15, %v6552_v15 }
 0x4de   : > { %v5442_v33 = vpop.f32.mrf.mxu0 }
 0x4df   : > { %v6662_v45 = vunpack.c.l.b16 %v6581_v19 }
 0x4e0   : > { %v4747_v44 = vpop.f32.mrf.mxu2  ;;  %v5093_v23 = vpop.f32.mrf.mxu3 }
 0x4e1   : > { %v4799_v46 = vadd.f32 %v4747_v44, %v4434_v56  ;;  %6786 = vmatmul.bf16.gmra.mxu0 %v6690_v21  ;;  %v4436_v41 = vpop.f32.mrf.mxu1  ;;  %v5971_v56 = vunpack.c.l.b16 %v5890_v34  ;;  %v6206_v34 = vld [vmem:[#allocation2 + $0x99] sm:$0xff] }
 0x4e2   : > { %v4437_v38 = vadd.f32 %v4436_v41, %v9592_v25  ;;  %v6316_v25 = vunpack.c.l.b16 %v6235_v32 }
 0x4e3   : > { %v5145_v54 = vadd.f32 %v5093_v23, %v4799_v46 }
 0x4e4   : > { %5747 = vmatmul.bf16.gmra.mxu1 %v6689_v0  ;;  %v6663_v0 = vunpack.c.l.b16 %v6582_v63  ;;  %v6551_v63 = vld [vmem:[#allocation2 + $0x92] sm:$0xff] }
 0x4e5   : > { %6094 = vmatmul.bf16.gmra.mxu2 %v5998_v11  ;;  %v9734_v50 = vadd.f32 %v5439_v51, %v5145_v54  ;;  %6440 = vmatmul.bf16.gmra.mxu3 %v6344_v47  ;;  %v5970_v51 = vunpack.c.l.b16 %v5889_v28  ;;  %v6317_v11 = vunpack.c.l.b16 %v6236_v10 }
 0x4e6   : > { %v5444_v29 = vpop.f32.mrf.mxu0  ;;  %v6691_v44 = vpack.c.b16 %v6663_v0, %v6662_v45  ;;  %v5891_v0 = vpack.c.bf16 %v5859_v26, %v5859_v26 }
 0x4e7   : > { %v5999_v54 = vpack.c.b16 %v5971_v56, %v5970_v51  ;;  %v6345_v19 = vpack.c.b16 %v6317_v11, %v6316_v25  ;;  %v6238_v25 = vpack.c.bf16 %v6206_v34, %v6206_v34 }
 0x4e8   : > { %v4750_v40 = vpop.f32.mrf.mxu2  ;;  %v5096_v9 = vpop.f32.mrf.mxu3 }
 0x4e9   : > { %v4800_v57 = vadd.f32 %v4750_v40, %v4437_v38  ;;  %v4438_v8 = vpop.f32.mrf.mxu1 }
 0x4ea   : > { %v4439_v41 = vadd.f32 %v4438_v8, %v9606_v55  ;;  %v5860_v55 = vld [vmem:[#allocation2 + $0x98] sm:$0xff] }
 0x4eb   : > { %v5146_v16 = vadd.f32 %v5096_v9, %v4800_v57  ;;  %v6205_v9 = vld [vmem:[#allocation2 + $0x91] sm:$0xff]  ;;  %v5892_v10 = vpack.c.bf16 %v5860_v55, %v5860_v55 }
 0x4ec   : > { %v6237_v56 = vpack.c.bf16 %v6205_v9, %v6205_v9  ;;  %v6554_v55 = vld [vmem:[#allocation2 + $0xb2] sm:$0xff]  ;;  %v5861_v9 = vld [vmem:[#allocation2 + $0xa8] sm:$0xff] }
 0x4ed   : > { %v9737_v46 = vadd.f32 %v5442_v33, %v5146_v16  ;;  %v6583_v33 = vpack.c.bf16 %v6551_v63, %v6551_v63  ;;  %v6586_v34 = vpack.c.bf16 %v6554_v55, %v6554_v55 }
 0x4ee   : > { %v5447_v23 = vpop.f32.mrf.mxu0 }
 0x4ef   : > { %v6664_v16 = vunpack.c.l.b16 %v6583_v33 }
 0x4f0   : > { %v4752_v47 = vpop.f32.mrf.mxu2  ;;  %v5098_v62 = vpop.f32.mrf.mxu3 }
 0x4f1   : > { %v4801_v53 = vadd.f32 %v4752_v47, %v4439_v41  ;;  %6791 = vmatmul.bf16.gmra.mxu0 %v6691_v44  ;;  %v4441_v3 = vpop.f32.mrf.mxu1  ;;  %v5973_v41 = vunpack.c.l.b16 %v5892_v10  ;;  %v6208_v10 = vld [vmem:[#allocation2 + $0xb1] sm:$0xff] }
 0x4f2   : > { %v4442_v57 = vadd.f32 %v4441_v3, %v9614_v20  ;;  %v6318_v20 = vunpack.c.l.b16 %v6237_v56 }
 0x4f3   : > { %v5147_v38 = vadd.f32 %v5098_v62, %v4801_v53 }
 0x4f4   : > { %5752 = vmatmul.bf16.gmra.mxu1 %v6690_v21  ;;  %v6665_v21 = vunpack.c.l.b16 %v6584_v42  ;;  %v6553_v42 = vld [vmem:[#allocation2 + $0xaa] sm:$0xff] }
 0x4f5   : > { %6099 = vmatmul.bf16.gmra.mxu2 %v5999_v54  ;;  %v9740_v40 = vadd.f32 %v5444_v29, %v5147_v38  ;;  %6445 = vmatmul.bf16.gmra.mxu3 %v6345_v19  ;;  %v5972_v29 = vunpack.c.l.b16 %v5891_v0  ;;  %v6319_v54 = vunpack.c.l.b16 %v6238_v25 }
 0x4f6   : > { %v5449_v28 = vpop.f32.mrf.mxu0  ;;  %v6692_v47 = vpack.c.b16 %v6665_v21, %v6664_v16  ;;  %v5893_v21 = vpack.c.bf16 %v5861_v9, %v5861_v9 }
 0x4f7   : > { %v6000_v38 = vpack.c.b16 %v5973_v41, %v5972_v29  ;;  %v6346_v33 = vpack.c.b16 %v6319_v54, %v6318_v20  ;;  %v6240_v20 = vpack.c.bf16 %v6208_v10, %v6208_v10 }
 0x4f8   : > { %v4755_v45 = vpop.f32.mrf.mxu2  ;;  %v5101_v32 = vpop.f32.mrf.mxu3 }
 0x4f9   : > { %v4802_v8 = vadd.f32 %v4755_v45, %v4442_v57  ;;  %v4443_v51 = vpop.f32.mrf.mxu1 }
 0x4fa   : > { %v4444_v3 = vadd.f32 %v4443_v51, %v9620_v43  ;;  %v5862_v43 = vld [vmem:[#allocation2 + $0xb0] sm:$0xff] }
 0x4fb   : > { %v5148_v11 = vadd.f32 %v5101_v32, %v4802_v8  ;;  %v6207_v32 = vld [vmem:[#allocation2 + $0xa9] sm:$0xff]  ;;  %v5894_v25 = vpack.c.bf16 %v5862_v43, %v5862_v43 }
 0x4fc   : > { %v6239_v41 = vpack.c.bf16 %v6207_v32, %v6207_v32  ;;  %v6556_v43 = vld [vmem:[#allocation2 + $0xca] sm:$0xff]  ;;  %v5863_v32 = vld [vmem:[#allocation2 + $0xc0] sm:$0xff] }
 0x4fd   : > { %v9743_v53 = vadd.f32 %v5447_v23, %v5148_v11  ;;  %v6585_v23 = vpack.c.bf16 %v6553_v42, %v6553_v42  ;;  %v6588_v10 = vpack.c.bf16 %v6556_v43, %v6556_v43 }
 0x4fe   : > { %v5452_v62 = vpop.f32.mrf.mxu0 }
 0x4ff   : > { %v6666_v11 = vunpack.c.l.b16 %v6585_v23 }
 0x500   : > { %v4757_v19 = vpop.f32.mrf.mxu2  ;;  %v5103_v15 = vpop.f32.mrf.mxu3 }
 0x501   : > { %v4803_v63 = vadd.f32 %v4757_v19, %v4444_v3  ;;  %6796 = vmatmul.bf16.gmra.mxu0 %v6692_v47  ;;  %v4446_v26 = vpop.f32.mrf.mxu1  ;;  %v5975_v3 = vunpack.c.l.b16 %v5894_v25  ;;  %v6210_v25 = vld [vmem:[#allocation2 + $0xc9] sm:$0xff] }
 0x502   : > { %v4447_v8 = vadd.f32 %v4446_v26, %v9548_v27  ;;  %v6320_v27 = vunpack.c.l.b16 %v6239_v41 }
 0x503   : > { %v5149_v57 = vadd.f32 %v5103_v15, %v4803_v63 }
 0x504   : > { %5757 = vmatmul.bf16.gmra.mxu1 %v6691_v44  ;;  %v6667_v44 = vunpack.c.l.b16 %v6586_v34  ;;  %v6555_v34 = vld [vmem:[#allocation2 + $0xc2] sm:$0xff] }
 0x505   : > { %6104 = vmatmul.bf16.gmra.mxu2 %v6000_v38  ;;  %v9746_v45 = vadd.f32 %v5449_v28, %v5149_v57  ;;  %6450 = vmatmul.bf16.gmra.mxu3 %v6346_v33  ;;  %v5974_v28 = vunpack.c.l.b16 %v5893_v21  ;;  %v6321_v38 = vunpack.c.l.b16 %v6240_v20 }
 0x506   : > { %v5454_v0 = vpop.f32.mrf.mxu0  ;;  %v6693_v19 = vpack.c.b16 %v6667_v44, %v6666_v11  ;;  %v5895_v44 = vpack.c.bf16 %v5863_v32, %v5863_v32 }
 0x507   : > { %v6001_v57 = vpack.c.b16 %v5975_v3, %v5974_v28  ;;  %v6347_v23 = vpack.c.b16 %v6321_v38, %v6320_v27  ;;  %v6242_v27 = vpack.c.bf16 %v6210_v25, %v6210_v25 }
 0x508   : > { %v4760_v16 = vpop.f32.mrf.mxu2  ;;  %v5106_v56 = vpop.f32.mrf.mxu3 }
 0x509   : > { %v4804_v51 = vadd.f32 %v4760_v16, %v4447_v8  ;;  %v4448_v29 = vpop.f32.mrf.mxu1 }
 0x50a   : > { %v4449_v26 = vadd.f32 %v4448_v29, %v9562_v6  ;;  %v5864_v6 = vld [vmem:[#allocation2 + $0xc8] sm:$0xff] }
 0x50b   : > { %v5150_v54 = vadd.f32 %v5106_v56, %v4804_v51  ;;  %v6209_v56 = vld [vmem:[#allocation2 + $0xc1] sm:$0xff]  ;;  %v5896_v20 = vpack.c.bf16 %v5864_v6, %v5864_v6 }
 0x50c   : > { %v6241_v3 = vpack.c.bf16 %v6209_v56, %v6209_v56  ;;  %v6558_v6 = vld [vmem:[#allocation2 + $0xe2] sm:$0xff]  ;;  %v5865_v56 = vld [vmem:[#allocation2 + $0xd8] sm:$0xff] }
 0x50d   : > { %v9749_v63 = vadd.f32 %v5452_v62, %v5150_v54  ;;  %v6587_v62 = vpack.c.bf16 %v6555_v34, %v6555_v34  ;;  %v6590_v25 = vpack.c.bf16 %v6558_v6, %v6558_v6 }
 0x50e   : > { %v5457_v15 = vpop.f32.mrf.mxu0 }
 0x50f   : > { %v6668_v54 = vunpack.c.l.b16 %v6587_v62 }
 0x510   : > { %v4762_v33 = vpop.f32.mrf.mxu2  ;;  %v5108_v55 = vpop.f32.mrf.mxu3 }
 0x511   : > { %v4805_v42 = vadd.f32 %v4762_v33, %v4449_v26  ;;  %6801 = vmatmul.bf16.gmra.mxu0 %v6693_v19  ;;  %v4451_v9 = vpop.f32.mrf.mxu1  ;;  %v5977_v26 = vunpack.c.l.b16 %v5896_v20  ;;  %v6212_v20 = vld [vmem:[#allocation2 + $0xe1] sm:$0xff] }
 0x512   : > { %v4452_v51 = vadd.f32 %v4451_v9, %v9571_v14  ;;  %v6322_v14 = vunpack.c.l.b16 %v6241_v3 }
 0x513   : > { %v5151_v8 = vadd.f32 %v5108_v55, %v4805_v42 }
 0x514   : > { %5762 = vmatmul.bf16.gmra.mxu1 %v6692_v47  ;;  %v6669_v47 = vunpack.c.l.b16 %v6588_v10  ;;  %v6557_v10 = vld [vmem:[#allocation2 + $0xda] sm:$0xff] }
 0x515   : > { %6109 = vmatmul.bf16.gmra.mxu2 %v6001_v57  ;;  %v9752_v16 = vadd.f32 %v5454_v0, %v5151_v8  ;;  %6455 = vmatmul.bf16.gmra.mxu3 %v6347_v23  ;;  %v5976_v0 = vunpack.c.l.b16 %v5895_v44  ;;  %v6323_v57 = vunpack.c.l.b16 %v6242_v27 }
 0x516   : > { %v5459_v21 = vpop.f32.mrf.mxu0  ;;  %v6694_v33 = vpack.c.b16 %v6669_v47, %v6668_v54  ;;  %v5897_v47 = vpack.c.bf16 %v5865_v56, %v5865_v56 }
 0x517   : > { %v6002_v8 = vpack.c.b16 %v5977_v26, %v5976_v0  ;;  %v6348_v62 = vpack.c.b16 %v6323_v57, %v6322_v14  ;;  %v6244_v14 = vpack.c.bf16 %v6212_v20, %v6212_v20 }
 0x518   : > { %v4765_v11 = vpop.f32.mrf.mxu2  ;;  %v5111_v41 = vpop.f32.mrf.mxu3 }
 0x519   : > { %v4806_v29 = vadd.f32 %v4765_v11, %v4452_v51  ;;  %v4453_v28 = vpop.f32.mrf.mxu1 }
 0x51a   : > { %v4454_v9 = vadd.f32 %v4453_v28, %v9579_v12  ;;  %v5866_v12 = vld [vmem:[#allocation2 + $0xe0] sm:$0xff] }
 0x51b   : > { %v5152_v38 = vadd.f32 %v5111_v41, %v4806_v29  ;;  %v6211_v41 = vld [vmem:[#allocation2 + $0xd9] sm:$0xff]  ;;  %v5898_v27 = vpack.c.bf16 %v5866_v12, %v5866_v12 }
 0x51c   : > { %v6243_v26 = vpack.c.bf16 %v6211_v41, %v6211_v41  ;;  %v6560_v12 = vld [vmem:[#allocation2 + $0xfa] sm:$0xff]  ;;  %v5867_v41 = vld [vmem:[#allocation2 + $0xf0] sm:$0xff] }
 0x51d   : > { %v9755_v42 = vadd.f32 %v5457_v15, %v5152_v38  ;;  %v6589_v15 = vpack.c.bf16 %v6557_v10, %v6557_v10  ;;  %v6592_v20 = vpack.c.bf16 %v6560_v12, %v6560_v12 }
 0x51e   : > { %v5462_v55 = vpop.f32.mrf.mxu0 }
 0x51f   : > { %v6670_v38 = vunpack.c.l.b16 %v6589_v15 }
 0x520   : > { %v4767_v23 = vpop.f32.mrf.mxu2  ;;  %v5113_v43 = vpop.f32.mrf.mxu3 }
 0x521   : > { %v4807_v34 = vadd.f32 %v4767_v23, %v4454_v9  ;;  %6806 = vmatmul.bf16.gmra.mxu0 %v6694_v33  ;;  %v4456_v32 = vpop.f32.mrf.mxu1  ;;  %v5979_v9 = vunpack.c.l.b16 %v5898_v27  ;;  %v6214_v27 = vld [vmem:[#allocation2 + $0xf9] sm:$0xff] }
 0x522   : > { %v4457_v29 = vadd.f32 %v4456_v32, %v9594_v59  ;;  %v6324_v59 = vunpack.c.l.b16 %v6243_v26 }
 0x523   : > { %v5153_v51 = vadd.f32 %v5113_v43, %v4807_v34 }
 0x524   : > { %5767 = vmatmul.bf16.gmra.mxu1 %v6693_v19  ;;  %v6671_v19 = vunpack.c.l.b16 %v6590_v25  ;;  %v6559_v25 = vld [vmem:[#allocation2 + $0xf2] sm:$0xff] }
 0x525   : > { %6114 = vmatmul.bf16.gmra.mxu2 %v6002_v8  ;;  %v9758_v11 = vadd.f32 %v5459_v21, %v5153_v51  ;;  %6460 = vmatmul.bf16.gmra.mxu3 %v6348_v62  ;;  %v5978_v21 = vunpack.c.l.b16 %v5897_v47  ;;  %v6325_v8 = vunpack.c.l.b16 %v6244_v14 }
 0x526   : > { %v5464_v44 = vpop.f32.mrf.mxu0  ;;  %v6695_v23 = vpack.c.b16 %v6671_v19, %v6670_v38  ;;  %v5899_v19 = vpack.c.bf16 %v5867_v41, %v5867_v41 }
 0x527   : > { %v6003_v51 = vpack.c.b16 %v5979_v9, %v5978_v21  ;;  %v6349_v15 = vpack.c.b16 %v6325_v8, %v6324_v59  ;;  %v6246_v59 = vpack.c.bf16 %v6214_v27, %v6214_v27 }
 0x528   : > { %v4770_v54 = vpop.f32.mrf.mxu2  ;;  %v5116_v3 = vpop.f32.mrf.mxu3 }
 0x529   : > { %v4808_v28 = vadd.f32 %v4770_v54, %v4457_v29  ;;  %v4458_v0 = vpop.f32.mrf.mxu1 }
 0x52a   : > { %v4459_v32 = vadd.f32 %v4458_v0, %v9608_v24  ;;  %v5868_v24 = vld [vmem:[#allocation2 + $0xf8] sm:$0xff] }
 0x52b   : > { %v5154_v57 = vadd.f32 %v5116_v3, %v4808_v28  ;;  %v6213_v3 = vld [vmem:[#allocation2 + $0xf1] sm:$0xff]  ;;  %v5900_v14 = vpack.c.bf16 %v5868_v24, %v5868_v24 }
 0x52c   : > { %v6245_v9 = vpack.c.bf16 %v6213_v3, %v6213_v3  ;;  %v6562_v24 = vld [vmem:[#allocation2 + $0x112] sm:$0xff]  ;;  %v5869_v3 = vld [vmem:[#allocation2 + $0x108] sm:$0xff] }
 0x52d   : > { %v9761_v34 = vadd.f32 %v5462_v55, %v5154_v57  ;;  %v6591_v55 = vpack.c.bf16 %v6559_v25, %v6559_v25  ;;  %v6594_v27 = vpack.c.bf16 %v6562_v24, %v6562_v24 }
 0x52e   : > { %v5467_v43 = vpop.f32.mrf.mxu0 }
 0x52f   : > { %v6672_v57 = vunpack.c.l.b16 %v6591_v55 }
 0x530   : > { %v4772_v62 = vpop.f32.mrf.mxu2  ;;  %v5118_v6 = vpop.f32.mrf.mxu3 }
 0x531   : > { %v4809_v10 = vadd.f32 %v4772_v62, %v4459_v32  ;;  %6811 = vmatmul.bf16.gmra.mxu0 %v6695_v23  ;;  %v4461_v56 = vpop.f32.mrf.mxu1  ;;  %v5981_v32 = vunpack.c.l.b16 %v5900_v14  ;;  %v6216_v14 = vld [vmem:[#allocation2 + $0x111] sm:$0xff] }
 0x532   : > { %v4462_v28 = vadd.f32 %v4461_v56, %v9616_v49  ;;  %v6326_v49 = vunpack.c.l.b16 %v6245_v9 }
 0x533   : > { %v5155_v29 = vadd.f32 %v5118_v6, %v4809_v10 }
 0x534   : > { %5772 = vmatmul.bf16.gmra.mxu1 %v6694_v33  ;;  %v6673_v33 = vunpack.c.l.b16 %v6592_v20  ;;  %v6561_v20 = vld [vmem:[#allocation2 + $0x10a] sm:$0xff] }
 0x535   : > { %6119 = vmatmul.bf16.gmra.mxu2 %v6003_v51  ;;  %v9764_v54 = vadd.f32 %v5464_v44, %v5155_v29  ;;  %6465 = vmatmul.bf16.gmra.mxu3 %v6349_v15  ;;  %v5980_v44 = vunpack.c.l.b16 %v5899_v19  ;;  %v6327_v51 = vunpack.c.l.b16 %v6246_v59 }
 0x536   : > { %v5469_v47 = vpop.f32.mrf.mxu0  ;;  %v6696_v62 = vpack.c.b16 %v6673_v33, %v6672_v57  ;;  %v5901_v33 = vpack.c.bf16 %v5869_v3, %v5869_v3 }
 0x537   : > { %v6004_v29 = vpack.c.b16 %v5981_v32, %v5980_v44  ;;  %v6350_v55 = vpack.c.b16 %v6327_v51, %v6326_v49  ;;  %v6248_v49 = vpack.c.bf16 %v6216_v14, %v6216_v14  ;;  %v5872_v14 = vld [vmem:[#allocation2 + $0x128] sm:$0xff] }
 0x538   : > { %v4775_v38 = vpop.f32.mrf.mxu2  ;;  %v5121_v26 = vpop.f32.mrf.mxu3 }
 0x539   : > { %v4810_v0 = vadd.f32 %v4775_v38, %v4462_v28  ;;  %v4463_v21 = vpop.f32.mrf.mxu1 }
 0x53a   : > { %v4464_v56 = vadd.f32 %v4463_v21, %v9622_v31  ;;  %v5870_v31 = vld [vmem:[#allocation2 + $0x110] sm:$0xff] }
 0x53b   : > { %v5156_v8 = vadd.f32 %v5121_v26, %v4810_v0  ;;  %v6215_v26 = vld [vmem:[#allocation2 + $0x109] sm:$0xff]  ;;  %v5902_v59 = vpack.c.bf16 %v5870_v31, %v5870_v31 }
 0x53c   : > { %v6247_v32 = vpack.c.bf16 %v6215_v26, %v6215_v26  ;;  %v5871_v26 = vld [vmem:[#allocation2 + $0x120] sm:$0xff] }
 0x53d   : > { %v9767_v10 = vadd.f32 %v5467_v43, %v5156_v8  ;;  %v6593_v43 = vpack.c.bf16 %v6561_v20, %v6561_v20  ;;  %v6675_v8 = vunpack.c.l.b16 %v6594_v27  ;;  %v6564_v27 = vld [vmem:[#allocation2 + $0x12a] sm:$0xff] }
 0x53e   : > { %v6777_v6 = vpop.f32.mrf.mxu0 }
 0x540   : > { %v4777_v15 = vpop.f32.mrf.mxu2  ;;  %v5123_v12 = vpop.f32.mrf.mxu3 }
 0x541   : > { %v4811_v25 = vadd.f32 %v4777_v15, %v4464_v56  ;;  %6816 = vmatmul.bf16.gmra.mxu0 %v6696_v62  ;;  %v5738_v41 = vpop.f32.mrf.mxu1  ;;  %v5982_v56 = vunpack.c.l.b16 %v5901_v33  ;;  %v5983_v15 = vunpack.c.l.b16 %v5902_v59  ;;  %v6596_v33 = vpack.c.bf16 %v6564_v27, %v6564_v27 }
 0x542   : > { %v5818_v0 = vadd.f32 %v5738_v41, %v9638_v18 }
 0x543   : > { %v5157_v28 = vadd.f32 %v5123_v12, %v4811_v25  ;;  %v6328_v12 = vunpack.c.l.b16 %v6247_v32 }
 0x544   : > { %5777 = vmatmul.bf16.gmra.mxu1 %v6695_v23  ;;  %v6674_v23 = vunpack.c.l.b16 %v6593_v43  ;;  %v6563_v43 = vld [vmem:[#allocation2 + $0x122] sm:$0xff] }
 0x545   : > { %6124 = vmatmul.bf16.gmra.mxu2 %v6004_v29  ;;  %v9770_v38 = vadd.f32 %v5469_v47, %v5157_v28  ;;  %6470 = vmatmul.bf16.gmra.mxu3 %v6350_v55  ;;  %v6329_v29 = vunpack.c.l.b16 %v6248_v49  ;;  %v6005_v28 = vpack.c.b16 %v5983_v15, %v5982_v56  ;;  %v5903_v49 = vpack.c.bf16 %v5871_v26, %v5871_v26 }
 0x546   : > { %v6779_v19 = vpop.f32.mrf.mxu0  ;;  %v9773_v25 = vpack.c.b16 %v6675_v8, %v6674_v23  ;;  %v6217_v8 = vld [vmem:[#allocation2 + $0x121] sm:$0xff] }
 0x547   : > { %v6351_v3 = vpack.c.b16 %v6329_v29, %v6328_v12  ;;  %v6677_v12 = vunpack.c.l.b16 %v6596_v33 }
 0x548   : > { %v6085_v57 = vpop.f32.mrf.mxu2  ;;  %v6431_v9 = vpop.f32.mrf.mxu3 }
 0x549   : > { %v6165_v21 = vadd.f32 %v6085_v57, %v5818_v0  ;;  %v5740_v44 = vpop.f32.mrf.mxu1  ;;  %v6595_v57 = vpack.c.bf16 %v6563_v43, %v6563_v43 }
 0x54a   : > { %v5819_v41 = vadd.f32 %v5740_v44, %v9641_v4  ;;  %v6218_v44 = vld [vmem:[#allocation2 + $0x129] sm:$0xff] }
 0x54b   : > { %v6511_v47 = vadd.f32 %v6431_v9, %v6165_v21  ;;  %v6676_v15 = vunpack.c.l.b16 %v6595_v57 }
 0x54d   : > { %v6857_v51 = vadd.f32 %v6777_v6, %v6511_v47  ;;  %v5904_v47 = vpack.c.bf16 %v5872_v14, %v5872_v14 }
 0x54e   : > { %v6782_v18 = vpop.f32.mrf.mxu0 }
 0x54f   : > { %6890 = vst [vmem:[%s9777_s10] sm:$0xff] %v6857_v51  ;;  %v6963_v21 = vmul.f32 %v6857_v51, %v6857_v51 }
 0x550   : > { %v6087_v55 = vpop.f32.mrf.mxu2  ;;  %v6433_v24 = vpop.f32.mrf.mxu3 }
 0x551   : > { %v6166_v20 = vadd.f32 %v6087_v55, %v5819_v41  ;;  %6821 = vmatmul.bf16.gmra.mxu0 %v9773_v25  ;;  %v5743_v6 = vpop.f32.mrf.mxu1  ;;  %v6249_v41 = vpack.c.bf16 %v6217_v8, %v6217_v8  ;;  %v6250_v55 = vpack.c.bf16 %v6218_v44, %v6218_v44  ;;  %v6566_v8 = vld [vmem:[#allocation2 + $0x142] sm:$0xff] }
 0x552   : > { %v5820_v23 = vadd.f32 %v5743_v6, %v9644_v58 }
 0x553   : > { %v6512_v31 = vadd.f32 %v6433_v24, %v6166_v20  ;;  %v6330_v6 = vunpack.c.l.b16 %v6249_v41  ;;  %v6331_v43 = vunpack.c.l.b16 %v6250_v55 }
 0x554   : > { %5782 = vmatmul.bf16.gmra.mxu1 %v6696_v62 }
 0x555   : > { %v6858_v0 = vadd.f32 %v6779_v19, %v6512_v31  ;;  %6129 = vmatmul.bf16.gmra.mxu2 %v6005_v28  ;;  %6475 = vmatmul.bf16.gmra.mxu3 %v6351_v3  ;;  %v5985_v28 = vunpack.c.l.b16 %v5904_v47  ;;  %v9784_v3 = vpack.c.b16 %v6677_v12, %v6676_v15  ;;  %v6598_v47 = vpack.c.bf16 %v6566_v8, %v6566_v8  ;;  %v6219_v12 = vld [vmem:[#allocation2 + $0x139] sm:$0xff] }
 0x556   : > { %v6784_v4 = vpop.f32.mrf.mxu0 }
 0x557   : > { %6891 = vst [vmem:[%s9777_s10 + $0x8] sm:$0xff] %v6858_v0  ;;  %v6923_v9 = vadd.f32 %v6858_v0, %v6857_v51  ;;  %v6964_v59 = vmul.f32 %v6858_v0, %v6858_v0  ;;  %v5984_v51 = vunpack.c.l.b16 %v5903_v49  ;;  %v5874_v49 = vld [vmem:[#allocation2 + $0x140] sm:$0xff] }
 0x558   : > { %v6090_v32 = vpop.f32.mrf.mxu2  ;;  %v6436_v56 = vpop.f32.mrf.mxu3 }
 0x559   : > { %v6995_v19 = vadd.f32 %v6964_v59, %v6963_v21  ;;  %v6167_v62 = vadd.f32 %v6090_v32, %v5820_v23  ;;  %v5745_v29 = vpop.f32.mrf.mxu1  ;;  %v6006_v21 = vpack.c.b16 %v5985_v28, %v5984_v51  ;;  %v6352_v59 = vpack.c.b16 %v6331_v43, %v6330_v6  ;;  %v6565_v23 = vld [vmem:[#allocation2 + $0x13a] sm:$0xff] }
 0x55a   : > { %v5821_v0 = vadd.f32 %v5745_v29, %v9647_v39  ;;  %v6597_v39 = vpack.c.bf16 %v6565_v23, %v6565_v23  ;;  %v6220_v29 = vld [vmem:[#allocation2 + $0x141] sm:$0xff]  ;;  %v6679_v28 = vunpack.c.l.b16 %v6598_v47  ;;  %v6251_v43 = vpack.c.bf16 %v6219_v12, %v6219_v12  ;;  %v6567_v47 = vld [vmem:[#allocation2 + $0x152] sm:$0xff] }
 0x55b   : > { %v6513_v20 = vadd.f32 %v6436_v56, %v6167_v62 }
 0x55c   : > { %v6678_v51 = vunpack.c.l.b16 %v6597_v39 }
 0x55d   : > { %v6859_v24 = vadd.f32 %v6782_v18, %v6513_v20  ;;  %v5906_v20 = vpack.c.bf16 %v5874_v49, %v5874_v49 }
 0x55e   : > { %v6787_v58 = vpop.f32.mrf.mxu0 }
 0x55f   : > { %6892 = vst [vmem:[%s9777_s10 + $0x10] sm:$0xff] %v6859_v24  ;;  %v6924_v27 = vadd.f32 %v6923_v9, %v6859_v24  ;;  %v6965_v31 = vmul.f32 %v6859_v24, %v6859_v24  ;;  %v5873_v9 = vld [vmem:[#allocation2 + $0x138] sm:$0xff] }
 0x560   : > { %v6092_v26 = vpop.f32.mrf.mxu2  ;;  %v6438_v33 = vpop.f32.mrf.mxu3  ;;  %v5905_v55 = vpack.c.bf16 %v5873_v9, %v5873_v9 }
 0x561   : > { %v6996_v14 = vadd.f32 %v6995_v19, %v6965_v31  ;;  %v6168_v57 = vadd.f32 %v6092_v26, %v5821_v0  ;;  %6826 = vmatmul.bf16.gmra.mxu0 %v9784_v3  ;;  %v5748_v18 = vpop.f32.mrf.mxu1  ;;  %v6252_v31 = vpack.c.bf16 %v6220_v29, %v6220_v29  ;;  %v5876_v29 = vld [vmem:[#allocation2 + $0x158] sm:$0xff] }
 0x562   : > { %v5822_v15 = vadd.f32 %v5748_v18, %v9662_v5 }
 0x563   : > { %v6514_v44 = vadd.f32 %v6438_v33, %v6168_v57  ;;  %v5987_v57 = vunpack.c.l.b16 %v5906_v20  ;;  %v9792_v33 = vpack.c.b16 %v6679_v28, %v6678_v51  ;;  %v6333_v18 = vunpack.c.l.b16 %v6252_v31  ;;  %v6222_v51 = vld [vmem:[#allocation2 + $0x159] sm:$0xff] }
 0x564   : > { %5787 = vmatmul.bf16.gmra.mxu1 %v9773_v25 }
 0x565   : > { %v6860_v32 = vadd.f32 %v6784_v4, %v6514_v44  ;;  %6134 = vmatmul.bf16.gmra.mxu2 %v6006_v21  ;;  %6480 = vmatmul.bf16.gmra.mxu3 %v6352_v59  ;;  %v6332_v21 = vunpack.c.l.b16 %v6251_v43  ;;  %v5908_v43 = vpack.c.bf16 %v5876_v29, %v5876_v29  ;;  %v6569_v29 = vld [vmem:[#allocation2 + $0x16a] sm:$0xff] }
 0x566   : > { %v6789_v19 = vpop.f32.mrf.mxu0 }
 0x567   : > { %6893 = vst [vmem:[%s9777_s10 + $0x18] sm:$0xff] %v6860_v32  ;;  %v6925_v62 = vadd.f32 %v6924_v27, %v6860_v32  ;;  %v6966_v56 = vmul.f32 %v6860_v32, %v6860_v32  ;;  %v5986_v27 = vunpack.c.l.b16 %v5905_v55  ;;  %v6353_v39 = vpack.c.b16 %v6333_v18, %v6332_v21 }
 0x568   : > { %v6095_v41 = vpop.f32.mrf.mxu2  ;;  %v6441_v24 = vpop.f32.mrf.mxu3  ;;  %v6254_v21 = vpack.c.bf16 %v6222_v51, %v6222_v51 }
 0x569   : > { %v6997_v4 = vadd.f32 %v6996_v14, %v6966_v56  ;;  %v6169_v25 = vadd.f32 %v6095_v41, %v5822_v15  ;;  %v5750_v6 = vpop.f32.mrf.mxu1  ;;  %v6007_v49 = vpack.c.b16 %v5987_v57, %v5986_v27  ;;  %v6568_v56 = vld [vmem:[#allocation2 + $0x15a] sm:$0xff] }
 0x56a   : > { %v5823_v23 = vadd.f32 %v5750_v6, %v9665_v30  ;;  %v6599_v30 = vpack.c.bf16 %v6567_v47, %v6567_v47  ;;  %v6600_v41 = vpack.c.bf16 %v6568_v56, %v6568_v56 }
 0x56b   : > { %v6515_v0 = vadd.f32 %v6441_v24, %v6169_v25  ;;  %v6221_v24 = vld [vmem:[#allocation2 + $0x151] sm:$0xff] }
 0x56c   : > { %v6253_v57 = vpack.c.bf16 %v6221_v24, %v6221_v24 }
 0x56d   : > { %v6861_v26 = vadd.f32 %v6787_v58, %v6515_v0  ;;  %v6680_v0 = vunpack.c.l.b16 %v6599_v30  ;;  %v6570_v30 = vld [vmem:[#allocation2 + $0x172] sm:$0xff] }
 0x56e   : > { %v6792_v5 = vpop.f32.mrf.mxu0  ;;  %v6602_v24 = vpack.c.bf16 %v6570_v30, %v6570_v30 }
 0x56f   : > { %6894 = vst [vmem:[%s9777_s10 + $0x20] sm:$0xff] %v6861_v26  ;;  %v6926_v59 = vadd.f32 %v6925_v62, %v6861_v26  ;;  %v6967_v14 = vmul.f32 %v6861_v26, %v6861_v26  ;;  %v5875_v62 = vld [vmem:[#allocation2 + $0x150] sm:$0xff]  ;;  %v6681_v26 = vunpack.c.l.b16 %v6600_v41 }
 0x570   : > { %v6097_v8 = vpop.f32.mrf.mxu2  ;;  %v6443_v9 = vpop.f32.mrf.mxu3  ;;  %v5907_v6 = vpack.c.bf16 %v5875_v62, %v5875_v62 }
 0x571   : > { %v6998_v44 = vadd.f32 %v6997_v4, %v6967_v14  ;;  %v6170_v32 = vadd.f32 %v6097_v8, %v5823_v23  ;;  %6831 = vmatmul.bf16.gmra.mxu0 %v9792_v33  ;;  %v5753_v58 = vpop.f32.mrf.mxu1  ;;  %v5989_v23 = vunpack.c.l.b16 %v5908_v43  ;;  %v9800_v8 = vpack.c.b16 %v6681_v26, %v6680_v0 }
 0x572   : > { %v5824_v25 = vadd.f32 %v5753_v58, %v9668_v17 }
 0x573   : > { %v6516_v15 = vadd.f32 %v6443_v9, %v6170_v32  ;;  %v6334_v32 = vunpack.c.l.b16 %v6253_v57  ;;  %v6335_v9 = vunpack.c.l.b16 %v6254_v21  ;;  %v6683_v21 = vunpack.c.l.b16 %v6602_v24  ;;  %v5879_v24 = vld [vmem:[#allocation2 + $0x180] sm:$0xff] }
 0x574   : > { %5792 = vmatmul.bf16.gmra.mxu1 %v9784_v3 }
 0x575   : > { %v6862_v12 = vadd.f32 %v6789_v19, %v6516_v15  ;;  %6139 = vmatmul.bf16.gmra.mxu2 %v6007_v49  ;;  %6485 = vmatmul.bf16.gmra.mxu3 %v6353_v39  ;;  %v6354_v62 = vpack.c.b16 %v6335_v9, %v6334_v32 }
 0x576   : > { %v6794_v55 = vpop.f32.mrf.mxu0 }
 0x577   : > { %6895 = vst [vmem:[%s9777_s10 + $0x28] sm:$0xff] %v6862_v12  ;;  %v6927_v20 = vadd.f32 %v6926_v59, %v6862_v12  ;;  %v6968_v4 = vmul.f32 %v6862_v12, %v6862_v12  ;;  %v5988_v59 = vunpack.c.l.b16 %v5907_v6 }
 0x578   : > { %v6100_v28 = vpop.f32.mrf.mxu2  ;;  %v6446_v31 = vpop.f32.mrf.mxu3 }
 0x579   : > { %v6999_v19 = vadd.f32 %v6998_v44, %v6968_v4  ;;  %v6171_v3 = vadd.f32 %v6100_v28, %v5824_v25  ;;  %v5755_v27 = vpop.f32.mrf.mxu1  ;;  %v6008_v12 = vpack.c.b16 %v5989_v23, %v5988_v59  ;;  %v5878_v25 = vld [vmem:[#allocation2 + $0x170] sm:$0xff] }
 0x57a   : > { %v5825_v58 = vadd.f32 %v5755_v27, %v9674_v37  ;;  %v6601_v37 = vpack.c.bf16 %v6569_v29, %v6569_v29  ;;  %v5910_v26 = vpack.c.bf16 %v5878_v25, %v5878_v25 }
 0x57b   : > { %v6517_v18 = vadd.f32 %v6446_v31, %v6171_v3  ;;  %v6224_v3 = vld [vmem:[#allocation2 + $0x171] sm:$0xff] }
 0x57c   : > { %v6682_v57 = vunpack.c.l.b16 %v6601_v37  ;;  %v6256_v59 = vpack.c.bf16 %v6224_v3, %v6224_v3 }
 0x57d   : > { %v6863_v14 = vadd.f32 %v6792_v5, %v6517_v18 }
 0x57e   : > { %v6797_v17 = vpop.f32.mrf.mxu0 }
 0x57f   : > { %6896 = vst [vmem:[%s9777_s10 + $0x30] sm:$0xff] %v6863_v14  ;;  %v6928_v49 = vadd.f32 %v6927_v20, %v6863_v14  ;;  %v6969_v44 = vmul.f32 %v6863_v14, %v6863_v14  ;;  %v5877_v20 = vld [vmem:[#allocation2 + $0x168] sm:$0xff] }
 0x580   : > { %v6102_v39 = vpop.f32.mrf.mxu2  ;;  %v6448_v15 = vpop.f32.mrf.mxu3  ;;  %v5909_v0 = vpack.c.bf16 %v5877_v20, %v5877_v20  ;;  %v6572_v20 = vld [vmem:[#allocation2 + $0x18a] sm:$0xff] }
 0x581   : > { %v7000_v47 = vadd.f32 %v6999_v19, %v6969_v44  ;;  %v6172_v56 = vadd.f32 %v6102_v39, %v5825_v58  ;;  %6836 = vmatmul.bf16.gmra.mxu0 %v9800_v8  ;;  %v5758_v5 = vpop.f32.mrf.mxu1  ;;  %v6223_v19 = vld [vmem:[#allocation2 + $0x169] sm:$0xff]  ;;  %v9808_v44 = vpack.c.b16 %v6683_v21, %v6682_v57  ;;  %v6337_v39 = vunpack.c.l.b16 %v6256_v59 }
 0x582   : > { %v5826_v43 = vadd.f32 %v5758_v5, %v9697_v61  ;;  %v6255_v14 = vpack.c.bf16 %v6223_v19, %v6223_v19  ;;  %v5990_v9 = vunpack.c.l.b16 %v5909_v0  ;;  %v6225_v0 = vld [vmem:[#allocation2 + $0x181] sm:$0xff] }
 0x583   : > { %v6518_v41 = vadd.f32 %v6448_v15, %v6172_v56  ;;  %v6257_v59 = vpack.c.bf16 %v6225_v0, %v6225_v0 }
 0x584   : > { %5797 = vmatmul.bf16.gmra.mxu1 %v9792_v33  ;;  %v6336_v58 = vunpack.c.l.b16 %v6255_v14 }
 0x585   : > { %v6864_v4 = vadd.f32 %v6794_v55, %v6518_v41  ;;  %6144 = vmatmul.bf16.gmra.mxu2 %v6008_v12  ;;  %6490 = vmatmul.bf16.gmra.mxu3 %v6354_v62 }
 0x586   : > { %v6799_v51 = vpop.f32.mrf.mxu0  ;;  %v6355_v41 = vpack.c.b16 %v6337_v39, %v6336_v58 }
 0x587   : > { %6897 = vst [vmem:[%s9777_s10 + $0x38] sm:$0xff] %v6864_v4  ;;  %v6929_v28 = vadd.f32 %v6928_v49, %v6864_v4  ;;  %v6970_v6 = vmul.f32 %v6864_v4, %v6864_v4  ;;  %v5991_v49 = vunpack.c.l.b16 %v5910_v26  ;;  %v6571_v4 = vld [vmem:[#allocation2 + $0x182] sm:$0xff] }
 0x588   : > { %v6105_v31 = vpop.f32.mrf.mxu2  ;;  %v6451_v27 = vpop.f32.mrf.mxu3  ;;  %v6226_v26 = vld [vmem:[#allocation2 + $0x189] sm:$0xff] }
 0x589   : > { %v7001_v55 = vadd.f32 %v7000_v47, %v6970_v6  ;;  %v6173_v33 = vadd.f32 %v6105_v31, %v5826_v43  ;;  %v5760_v18 = vpop.f32.mrf.mxu1  ;;  %v6009_v30 = vpack.c.b16 %v5991_v49, %v5990_v9  ;;  %v6604_v6 = vpack.c.bf16 %v6572_v20, %v6572_v20  ;;  %v6573_v20 = vld [vmem:[#allocation2 + $0x19a] sm:$0xff] }
 0x58a   : > { %v5827_v15 = vadd.f32 %v5760_v18, %v9700_v52  ;;  %v6603_v52 = vpack.c.bf16 %v6571_v4, %v6571_v4 }
 0x58b   : > { %v6519_v23 = vadd.f32 %v6451_v27, %v6173_v33  ;;  %v5911_v33 = vpack.c.bf16 %v5879_v24, %v5879_v24  ;;  %v6685_v18 = vunpack.c.l.b16 %v6604_v6 }
 0x58c   : > { %v6684_v21 = vunpack.c.l.b16 %v6603_v52  ;;  %v5882_v52 = vld [vmem:[#allocation2 + $0x1a0] sm:$0xff] }
 0x58d   : > { %v6865_v32 = vadd.f32 %v6797_v17, %v6519_v23  ;;  %v6258_v23 = vpack.c.bf16 %v6226_v26, %v6226_v26  ;;  %v5992_v49 = vunpack.c.l.b16 %v5911_v33  ;;  %v6227_v26 = vld [vmem:[#allocation2 + $0x199] sm:$0xff] }
 0x58e   : > { %v6802_v61 = vpop.f32.mrf.mxu0  ;;  %v9816_v39 = vpack.c.b16 %v6685_v18, %v6684_v21 }
 0x58f   : > { %6898 = vst [vmem:[%s9777_s10 + $0x40] sm:$0xff] %v6865_v32  ;;  %v6930_v56 = vadd.f32 %v6929_v28, %v6865_v32  ;;  %v6971_v47 = vmul.f32 %v6865_v32, %v6865_v32  ;;  %v5880_v28 = vld [vmem:[#allocation2 + $0x188] sm:$0xff] }
 0x590   : > { %v6107_v12 = vpop.f32.mrf.mxu2  ;;  %v6453_v29 = vpop.f32.mrf.mxu3  ;;  %v5912_v27 = vpack.c.bf16 %v5880_v28, %v5880_v28  ;;  %v5881_v28 = vld [vmem:[#allocation2 + $0x198] sm:$0xff] }
 0x591   : > { %v7002_v5 = vadd.f32 %v7001_v55, %v6971_v47  ;;  %v6174_v62 = vadd.f32 %v6107_v12, %v5827_v15  ;;  %6841 = vmatmul.bf16.gmra.mxu0 %v9808_v44  ;;  %v5763_v17 = vpop.f32.mrf.mxu1  ;;  %v6339_v47 = vunpack.c.l.b16 %v6258_v23 }
 0x592   : > { %v5828_v31 = vadd.f32 %v5763_v17, %v9703_v2  ;;  %v5993_v58 = vunpack.c.l.b16 %v5912_v27  ;;  %v5913_v27 = vpack.c.bf16 %v5881_v28, %v5881_v28 }
 0x593   : > { %v6520_v25 = vadd.f32 %v6453_v29, %v6174_v62 }
 0x594   : > { %5802 = vmatmul.bf16.gmra.mxu1 %v9800_v8 }
 0x595   : > { %v6866_v37 = vadd.f32 %v6799_v51, %v6520_v25  ;;  %6149 = vmatmul.bf16.gmra.mxu2 %v6009_v30  ;;  %6495 = vmatmul.bf16.gmra.mxu3 %v6355_v41  ;;  %v6010_v41 = vpack.c.b16 %v5993_v58, %v5992_v49  ;;  %v6574_v25 = vld [vmem:[#allocation2 + $0x1a2] sm:$0xff] }
 0x596   : > { %v6804_v43 = vpop.f32.mrf.mxu0  ;;  %v6606_v6 = vpack.c.bf16 %v6574_v25, %v6574_v25 }
 0x597   : > { %6899 = vst [vmem:[%s9777_s10 + $0x48] sm:$0xff] %v6866_v37  ;;  %v6931_v19 = vadd.f32 %v6930_v56, %v6866_v37  ;;  %v6972_v3 = vmul.f32 %v6866_v37, %v6866_v37  ;;  %v6338_v56 = vunpack.c.l.b16 %v6257_v59 }
 0x598   : > { %v6110_v55 = vpop.f32.mrf.mxu2  ;;  %v6456_v57 = vpop.f32.mrf.mxu3  ;;  %v6687_v21 = vunpack.c.l.b16 %v6606_v6 }
 0x599   : > { %v7003_v51 = vadd.f32 %v7002_v5, %v6972_v3  ;;  %v6175_v8 = vadd.f32 %v6110_v55, %v5828_v31  ;;  %v5765_v14 = vpop.f32.mrf.mxu1  ;;  %v6356_v4 = vpack.c.b16 %v6339_v47, %v6338_v56  ;;  %v6228_v55 = vld [vmem:[#allocation2 + $0x1a1] sm:$0xff] }
 0x59a   : > { %v5829_v5 = vadd.f32 %v5765_v14, %v9710_v13  ;;  %v6605_v13 = vpack.c.bf16 %v6573_v20, %v6573_v20  ;;  %v6259_v14 = vpack.c.bf16 %v6227_v26, %v6227_v26  ;;  %v6260_v59 = vpack.c.bf16 %v6228_v55, %v6228_v55 }
 0x59b   : > { %v6521_v32 = vadd.f32 %v6456_v57, %v6175_v8 }
 0x59c   : > { %v6686_v57 = vunpack.c.l.b16 %v6605_v13  ;;  %v6340_v56 = vunpack.c.l.b16 %v6259_v14  ;;  %v6341_v47 = vunpack.c.l.b16 %v6260_v59 }
 0x59d   : > { %v6867_v9 = vadd.f32 %v6802_v61, %v6521_v32 }
 0x59e   : > { %v6807_v2 = vpop.f32.mrf.mxu0  ;;  %v6703_v58 = vpack.c.b16 %v6687_v21, %v6686_v57 }
 0x59f   : > { %6900 = vst [vmem:[%s9777_s10 + $0x50] sm:$0xff] %v6867_v9  ;;  %v6932_v15 = vadd.f32 %v6931_v19, %v6867_v9  ;;  %v6973_v12 = vmul.f32 %v6867_v9, %v6867_v9  ;;  %v5994_v9 = vunpack.c.l.b16 %v5913_v27 }
 0x5a0   : > { %v6112_v62 = vpop.f32.mrf.mxu2  ;;  %v6458_v17 = vpop.f32.mrf.mxu3 }
 0x5a1   : > { %v7004_v29 = vadd.f32 %v7003_v51, %v6973_v12  ;;  %v6176_v30 = vadd.f32 %v6112_v62, %v5829_v5  ;;  %6846 = vmatmul.bf16.gmra.mxu0 %v9816_v39  ;;  %v5768_v61 = vpop.f32.mrf.mxu1  ;;  %v5914_v51 = vpack.c.bf16 %v5882_v52, %v5882_v52 }
 0x5a2   : > { %v5830_v0 = vadd.f32 %v5768_v61, %v9713_v60 }
 0x5a3   : > { %v6522_v37 = vadd.f32 %v6458_v17, %v6176_v30  ;;  %v5995_v49 = vunpack.c.l.b16 %v5914_v51 }
 0x5a4   : > { %5807 = vmatmul.bf16.gmra.mxu1 %v9808_v44 }
 0x5a5   : > { %v6868_v24 = vadd.f32 %v6804_v43, %v6522_v37  ;;  %6154 = vmatmul.bf16.gmra.mxu2 %v6010_v41  ;;  %6500 = vmatmul.bf16.gmra.mxu3 %v6356_v4  ;;  %v6011_v41 = vpack.c.b16 %v5995_v49, %v5994_v9 }
 0x5a6   : > { %v6809_v19 = vpop.f32.mrf.mxu0 }
 0x5a7   : > { %6901 = vst [vmem:[%s9777_s10 + $0x58] sm:$0xff] %v6868_v24  ;;  %v6933_v3 = vadd.f32 %v6932_v15, %v6868_v24  ;;  %v6974_v31 = vmul.f32 %v6868_v24, %v6868_v24 }
 0x5a8   : > { %v6115_v33 = vpop.f32.mrf.mxu2  ;;  %v6461_v8 = vpop.f32.mrf.mxu3 }
 0x5a9   : > { %v7005_v43 = vadd.f32 %v7004_v29, %v6974_v31  ;;  %v6177_v44 = vadd.f32 %v6115_v33, %v5830_v0  ;;  %v5770_v18 = vpop.f32.mrf.mxu1 }
 0x5aa   : > { %v5831_v5 = vadd.f32 %v5770_v18, %v9716_v1 }
 0x5ab   : > { %v6523_v23 = vadd.f32 %v6461_v8, %v6177_v44 }
 0x5ad   : > { %v6869_v32 = vadd.f32 %v6807_v2, %v6523_v23  ;;  %v6357_v2 = vpack.c.b16 %v6341_v47, %v6340_v56 }
 0x5ae   : > { %v6812_v60 = vpop.f32.mrf.mxu0 }
 0x5af   : > { %6902 = vst [vmem:[%s9777_s10 + $0x60] sm:$0xff] %v6869_v32  ;;  %v6934_v15 = vadd.f32 %v6933_v3, %v6869_v32  ;;  %v6975_v12 = vmul.f32 %v6869_v32, %v6869_v32 }
 0x5b0   : > { %v6117_v62 = vpop.f32.mrf.mxu2  ;;  %v6463_v17 = vpop.f32.mrf.mxu3 }
 0x5b1   : > { %v7006_v29 = vadd.f32 %v7005_v43, %v6975_v12  ;;  %v6178_v30 = vadd.f32 %v6117_v62, %v5831_v5  ;;  %6851 = vmatmul.bf16.gmra.mxu0 %v6703_v58  ;;  %v5773_v61 = vpop.f32.mrf.mxu1 }
 0x5b2   : > { %v5832_v1 = vadd.f32 %v5773_v61, %v9719_v48 }
 0x5b3   : > { %v6524_v4 = vadd.f32 %v6463_v17, %v6178_v30 }
 0x5b4   : > { %5812 = vmatmul.bf16.gmra.mxu1 %v9816_v39 }
 0x5b5   : > { %v6870_v20 = vadd.f32 %v6809_v19, %v6524_v4  ;;  %6159 = vmatmul.bf16.gmra.mxu2 %v6011_v41  ;;  %6505 = vmatmul.bf16.gmra.mxu3 %v6357_v2 }
 0x5b6   : > { %v6814_v25 = vpop.f32.mrf.mxu0 }
 0x5b7   : > { %6903 = vst [vmem:[%s9777_s10 + $0x68] sm:$0xff] %v6870_v20  ;;  %v6935_v37 = vadd.f32 %v6934_v15, %v6870_v20  ;;  %v6976_v24 = vmul.f32 %v6870_v20, %v6870_v20 }
 0x5b8   : > { %v6120_v28 = vpop.f32.mrf.mxu2  ;;  %v6466_v6 = vpop.f32.mrf.mxu3 }
 0x5b9   : > { %v7007_v52 = vadd.f32 %v7006_v29, %v6976_v24  ;;  %v6179_v13 = vadd.f32 %v6120_v28, %v5832_v1  ;;  %v5775_v3 = vpop.f32.mrf.mxu1 }
 0x5ba   : > { %v5833_v55 = vadd.f32 %v5775_v3, %v9722_v36 }
 0x5bb   : > { %v6525_v31 = vadd.f32 %v6466_v6, %v6179_v13 }
 0x5bd   : > { %v6871_v0 = vadd.f32 %v6812_v60, %v6525_v31 }
 0x5be   : > { %v6817_v19 = vpop.f32.mrf.mxu0 }
 0x5bf   : > { %6904 = vst [vmem:[%s9777_s10 + $0x70] sm:$0xff] %v6871_v0  ;;  %v6936_v39 = vadd.f32 %v6935_v37, %v6871_v0  ;;  %v6977_v26 = vmul.f32 %v6871_v0, %v6871_v0 }
 0x5c0   : > { %v6122_v33 = vpop.f32.mrf.mxu2  ;;  %v6468_v43 = vpop.f32.mrf.mxu3 }
 0x5c1   : > { %v7008_v27 = vadd.f32 %v7007_v52, %v6977_v26  ;;  %v6180_v51 = vadd.f32 %v6122_v33, %v5833_v55  ;;  %v5778_v44 = vpop.f32.mrf.mxu1 }
 0x5c2   : > { %v5834_v14 = vadd.f32 %v5778_v44, %v9725_v35 }
 0x5c3   : > { %v6526_v48 = vadd.f32 %v6468_v43, %v6180_v51 }
 0x5c5   : > { %v6872_v8 = vadd.f32 %v6814_v25, %v6526_v48 }
 0x5c6   : > { %v6819_v57 = vpop.f32.mrf.mxu0 }
 0x5c7   : > { %6905 = vst [vmem:[%s9777_s10 + $0x78] sm:$0xff] %v6872_v8  ;;  %v6937_v21 = vadd.f32 %v6936_v39, %v6872_v8  ;;  %v6978_v18 = vmul.f32 %v6872_v8, %v6872_v8 }
 0x5c8   : > { %v6125_v59 = vpop.f32.mrf.mxu2  ;;  %v6471_v9 = vpop.f32.mrf.mxu3 }
 0x5c9   : > { %v7009_v23 = vadd.f32 %v7008_v27, %v6978_v18  ;;  %v6181_v32 = vadd.f32 %v6125_v59, %v5834_v14  ;;  %v5780_v49 = vpop.f32.mrf.mxu1 }
 0x5ca   : > { %v5835_v15 = vadd.f32 %v5780_v49, %v9728_v22 }
 0x5cb   : > { %v6527_v36 = vadd.f32 %v6471_v9, %v6181_v32 }
 0x5cd   : > { %v6873_v58 = vadd.f32 %v6817_v19, %v6527_v36 }
 0x5ce   : > { %v6822_v60 = vpop.f32.mrf.mxu0 }
 0x5cf   : > { %6906 = vst [vmem:[%s9777_s10 + $0x80] sm:$0xff] %v6873_v58  ;;  %v6938_v56 = vadd.f32 %v6937_v21, %v6873_v58  ;;  %v6979_v47 = vmul.f32 %v6873_v58, %v6873_v58 }
 0x5d0   : > { %v6127_v12 = vpop.f32.mrf.mxu2  ;;  %v6473_v29 = vpop.f32.mrf.mxu3 }
 0x5d1   : > { %v7010_v5 = vadd.f32 %v7009_v23, %v6979_v47  ;;  %v6182_v62 = vadd.f32 %v6127_v12, %v5835_v15  ;;  %v5783_v30 = vpop.f32.mrf.mxu1 }
 0x5d2   : > { %v5836_v4 = vadd.f32 %v5783_v30, %v9731_v7 }
 0x5d3   : > { %v6528_v35 = vadd.f32 %v6473_v29, %v6182_v62 }
 0x5d5   : > { %v6874_v17 = vadd.f32 %v6819_v57, %v6528_v35 }
 0x5d6   : > { %v6824_v41 = vpop.f32.mrf.mxu0 }
 0x5d7   : > { %6907 = vst [vmem:[%s9777_s10 + $0x88] sm:$0xff] %v6874_v17  ;;  %v6939_v61 = vadd.f32 %v6938_v56, %v6874_v17  ;;  %v6980_v2 = vmul.f32 %v6874_v17, %v6874_v17 }
 0x5d8   : > { %v6130_v20 = vpop.f32.mrf.mxu2  ;;  %v6476_v24 = vpop.f32.mrf.mxu3 }
 0x5d9   : > { %v7011_v25 = vadd.f32 %v7010_v5, %v6980_v2  ;;  %v6183_v37 = vadd.f32 %v6130_v20, %v5836_v4  ;;  %v5785_v1 = vpop.f32.mrf.mxu1 }
 0x5da   : > { %v5837_v3 = vadd.f32 %v5785_v1, %v9734_v50 }
 0x5db   : > { %v6529_v22 = vadd.f32 %v6476_v24, %v6183_v37 }
 0x5dd   : > { %v6875_v28 = vadd.f32 %v6822_v60, %v6529_v22 }
 0x5de   : > { %v6827_v52 = vpop.f32.mrf.mxu0 }
 0x5df   : > { %6908 = vst [vmem:[%s9777_s10 + $0x90] sm:$0xff] %v6875_v28  ;;  %v6940_v13 = vadd.f32 %v6939_v61, %v6875_v28  ;;  %v6981_v6 = vmul.f32 %v6875_v28, %v6875_v28 }
 0x5e0   : > { %v6132_v31 = vpop.f32.mrf.mxu2  ;;  %v6478_v39 = vpop.f32.mrf.mxu3 }
 0x5e1   : > { %v7012_v0 = vadd.f32 %v7011_v25, %v6981_v6  ;;  %v6184_v19 = vadd.f32 %v6132_v31, %v5837_v3  ;;  %v5788_v26 = vpop.f32.mrf.mxu1 }
 0x5e2   : > { %v5838_v43 = vadd.f32 %v5788_v26, %v9737_v46 }
 0x5e3   : > { %v6530_v7 = vadd.f32 %v6478_v39, %v6184_v19 }
 0x5e5   : > { %v6876_v55 = vadd.f32 %v6824_v41, %v6530_v7 }
 0x5e6   : > { %v6829_v33 = vpop.f32.mrf.mxu0 }
 0x5e7   : > { %6909 = vst [vmem:[%s9777_s10 + $0x98] sm:$0xff] %v6876_v55  ;;  %v6941_v27 = vadd.f32 %v6940_v13, %v6876_v55  ;;  %v6982_v51 = vmul.f32 %v6876_v55, %v6876_v55 }
 0x5e8   : > { %v6135_v44 = vpop.f32.mrf.mxu2  ;;  %v6481_v57 = vpop.f32.mrf.mxu3 }
 0x5e9   : > { %v7013_v48 = vadd.f32 %v7012_v0, %v6982_v51  ;;  %v6185_v8 = vadd.f32 %v6135_v44, %v5838_v43  ;;  %v5790_v21 = vpop.f32.mrf.mxu1 }
 0x5ea   : > { %v5839_v32 = vadd.f32 %v5790_v21, %v9740_v40 }
 0x5eb   : > { %v6531_v50 = vadd.f32 %v6481_v57, %v6185_v8 }
 0x5ed   : > { %v6877_v18 = vadd.f32 %v6827_v52, %v6531_v50 }
 0x5ee   : > { %v6832_v14 = vpop.f32.mrf.mxu0 }
 0x5ef   : > { %6910 = vst [vmem:[%s9777_s10 + $0xa0] sm:$0xff] %v6877_v18  ;;  %v6942_v59 = vadd.f32 %v6941_v27, %v6877_v18  ;;  %v6983_v23 = vmul.f32 %v6877_v18, %v6877_v18 }
 0x5f0   : > { %v6137_v9 = vpop.f32.mrf.mxu2  ;;  %v6483_v58 = vpop.f32.mrf.mxu3 }
 0x5f1   : > { %v7014_v49 = vadd.f32 %v7013_v48, %v6983_v23  ;;  %v6186_v36 = vadd.f32 %v6137_v9, %v5839_v32  ;;  %v5793_v60 = vpop.f32.mrf.mxu1 }
 0x5f2   : > { %v5840_v5 = vadd.f32 %v5793_v60, %v9743_v53 }
 0x5f3   : > { %v6532_v46 = vadd.f32 %v6483_v58, %v6186_v36 }
 0x5f5   : > { %v6878_v56 = vadd.f32 %v6829_v33, %v6532_v46 }
 0x5f6   : > { %v6834_v47 = vpop.f32.mrf.mxu0 }
 0x5f7   : > { %6911 = vst [vmem:[%s9777_s10 + $0xa8] sm:$0xff] %v6878_v56  ;;  %v6943_v15 = vadd.f32 %v6942_v59, %v6878_v56  ;;  %v6984_v12 = vmul.f32 %v6878_v56, %v6878_v56 }
 0x5f8   : > { %v6140_v62 = vpop.f32.mrf.mxu2  ;;  %v6486_v35 = vpop.f32.mrf.mxu3 }
 0x5f9   : > { %v7015_v29 = vadd.f32 %v7014_v49, %v6984_v12  ;;  %v6187_v30 = vadd.f32 %v6140_v62, %v5840_v5  ;;  %v5795_v40 = vpop.f32.mrf.mxu1 }
 0x5fa   : > { %v5841_v20 = vadd.f32 %v5795_v40, %v9746_v45 }
 0x5fb   : > { %v6533_v17 = vadd.f32 %v6486_v35, %v6187_v30 }
 0x5fd   : > { %v6879_v41 = vadd.f32 %v6832_v14, %v6533_v17 }
 0x5fe   : > { %v6837_v61 = vpop.f32.mrf.mxu0 }
 0x5ff   : > { %6912 = vst [vmem:[%s9777_s10 + $0xb0] sm:$0xff] %v6879_v41  ;;  %v6944_v2 = vadd.f32 %v6943_v15, %v6879_v41  ;;  %v6985_v4 = vmul.f32 %v6879_v41, %v6879_v41 }
 0x600   : > { %v6142_v25 = vpop.f32.mrf.mxu2  ;;  %v6488_v1 = vpop.f32.mrf.mxu3 }
 0x601   : > { %v7016_v37 = vadd.f32 %v7015_v29, %v6985_v4  ;;  %v6188_v24 = vadd.f32 %v6142_v25, %v5841_v20  ;;  %v5798_v53 = vpop.f32.mrf.mxu1 }
 0x602   : > { %v5842_v6 = vadd.f32 %v5798_v53, %v9749_v63 }
 0x603   : > { %v6534_v22 = vadd.f32 %v6488_v1, %v6188_v24 }
 0x605   : > { %v6880_v28 = vadd.f32 %v6834_v47, %v6534_v22 }
 0x606   : > { %v6839_v31 = vpop.f32.mrf.mxu0 }
 0x607   : > { %6913 = vst [vmem:[%s9777_s10 + $0xb8] sm:$0xff] %v6880_v28  ;;  %v6945_v52 = vadd.f32 %v6944_v2, %v6880_v28  ;;  %v6986_v13 = vmul.f32 %v6880_v28, %v6880_v28 }
 0x608   : > { %v6145_v3 = vpop.f32.mrf.mxu2  ;;  %v6491_v39 = vpop.f32.mrf.mxu3 }
 0x609   : > { %v7017_v0 = vadd.f32 %v7016_v37, %v6986_v13  ;;  %v6189_v19 = vadd.f32 %v6145_v3, %v5842_v6  ;;  %v5800_v45 = vpop.f32.mrf.mxu1 }
 0x60a   : > { %v5843_v27 = vadd.f32 %v5800_v45, %v9752_v16 }
 0x60b   : > { %v6535_v26 = vadd.f32 %v6491_v39, %v6189_v19 }
 0x60d   : > { %v6881_v7 = vadd.f32 %v6837_v61, %v6535_v26 }
 0x60e   : > { %v6842_v63 = vpop.f32.mrf.mxu0 }
 0x60f   : > { %6914 = vst [vmem:[%s9777_s10 + $0xc0] sm:$0xff] %v6881_v7  ;;  %v6946_v55 = vadd.f32 %v6945_v52, %v6881_v7  ;;  %v6987_v33 = vmul.f32 %v6881_v7, %v6881_v7 }
 0x610   : > { %v6147_v51 = vpop.f32.mrf.mxu2  ;;  %v6493_v48 = vpop.f32.mrf.mxu3 }
 0x611   : > { %v7018_v43 = vadd.f32 %v7017_v0, %v6987_v33  ;;  %v6190_v44 = vadd.f32 %v6147_v51, %v5843_v27  ;;  %v5803_v8 = vpop.f32.mrf.mxu1 }
 0x612   : > { %v5844_v14 = vadd.f32 %v5803_v8, %v9755_v42 }
 0x613   : > { %v6536_v57 = vadd.f32 %v6493_v48, %v6190_v44 }
 0x615   : > { %v6882_v21 = vadd.f32 %v6839_v31, %v6536_v57 }
 0x616   : > { %v6844_v36 = vpop.f32.mrf.mxu0 }
 0x617   : > { %6915 = vst [vmem:[%s9777_s10 + $0xc8] sm:$0xff] %v6882_v21  ;;  %v6947_v50 = vadd.f32 %v6946_v55, %v6882_v21  ;;  %v6988_v18 = vmul.f32 %v6882_v21, %v6882_v21 }
 0x618   : > { %v6150_v59 = vpop.f32.mrf.mxu2  ;;  %v6496_v9 = vpop.f32.mrf.mxu3 }
 0x619   : > { %v7019_v23 = vadd.f32 %v7018_v43, %v6988_v18  ;;  %v6191_v32 = vadd.f32 %v6150_v59, %v5844_v14  ;;  %v5805_v49 = vpop.f32.mrf.mxu1 }
 0x61a   : > { %v5845_v56 = vadd.f32 %v5805_v49, %v9758_v11 }
 0x61b   : > { %v6537_v16 = vadd.f32 %v6496_v9, %v6191_v32 }
 0x61d   : > { %v6883_v58 = vadd.f32 %v6842_v63, %v6537_v16 }
 0x61e   : > { %v6847_v30 = vpop.f32.mrf.mxu0 }
 0x61f   : > { %6916 = vst [vmem:[%s9777_s10 + $0xd0] sm:$0xff] %v6883_v58  ;;  %v6948_v60 = vadd.f32 %v6947_v50, %v6883_v58  ;;  %v6989_v46 = vmul.f32 %v6883_v58, %v6883_v58 }
 0x620   : > { %v6152_v47 = vpop.f32.mrf.mxu2  ;;  %v6498_v5 = vpop.f32.mrf.mxu3 }
 0x621   : > { %v7020_v15 = vadd.f32 %v7019_v23, %v6989_v46  ;;  %v6192_v12 = vadd.f32 %v6152_v47, %v5845_v56  ;;  %v5808_v42 = vpop.f32.mrf.mxu1  ;;  %v6922_v46 = vld [vmem:[#allocation7] sm:$0x1] }
 0x622   : > { %v5846_v17 = vadd.f32 %v5808_v42, %v9761_v34 }
 0x623   : > { %v6538_v62 = vadd.f32 %v6498_v5, %v6192_v12 }
 0x625   : > { %v6884_v29 = vadd.f32 %v6844_v36, %v6538_v62 }
 0x626   : > { %v6849_v53 = vpop.f32.mrf.mxu0 }
 0x627   : > { %6917 = vst [vmem:[%s9777_s10 + $0xd8] sm:$0xff] %v6884_v29  ;;  %v6949_v35 = vadd.f32 %v6948_v60, %v6884_v29  ;;  %v6990_v40 = vmul.f32 %v6884_v29, %v6884_v29 }
 0x628   : > { %v6155_v41 = vpop.f32.mrf.mxu2  ;;  %v6501_v4 = vpop.f32.mrf.mxu3 }
 0x629   : > { %v7021_v61 = vadd.f32 %v7020_v15, %v6990_v40  ;;  %v6193_v2 = vadd.f32 %v6155_v41, %v5846_v17  ;;  %v5810_v11 = vpop.f32.mrf.mxu1  ;;  %v6962_v15 = vld [vmem:[#allocation8] sm:$0x1] }
 0x62a   : > { %v5847_v1 = vadd.f32 %v5810_v11, %v9764_v54 }
 0x62b   : > { %v6539_v20 = vadd.f32 %v6501_v4, %v6193_v2 }
 0x62d   : > { %v6885_v25 = vadd.f32 %v6847_v30, %v6539_v20 }
 0x62e   : > { %v6852_v54 = vpop.f32.mrf.mxu0 }
 0x62f   : > { %6918 = vst [vmem:[%s9777_s10 + $0xe0] sm:$0xff] %v6885_v25  ;;  %v6950_v37 = vadd.f32 %v6949_v35, %v6885_v25  ;;  %v6991_v24 = vmul.f32 %v6885_v25, %v6885_v25 }
 0x630   : > { %v6157_v22 = vpop.f32.mrf.mxu2  ;;  %v6503_v13 = vpop.f32.mrf.mxu3 }
 0x631   : > { %v7022_v28 = vadd.f32 %v7021_v61, %v6991_v24  ;;  %v6194_v52 = vadd.f32 %v6157_v22, %v5847_v1  ;;  %v5813_v34 = vpop.f32.mrf.mxu1 }
 0x632   : > { %v5848_v19 = vadd.f32 %v5813_v34, %v9767_v10 }
 0x633   : > { %v6540_v6 = vadd.f32 %v6503_v13, %v6194_v52 }
 0x635   : > { %v6886_v3 = vadd.f32 %v6849_v53, %v6540_v6 }
 0x636   : > { %v6854_v10 = vpop.f32.mrf.mxu0 }
 0x637   : > { %6919 = vst [vmem:[%s9777_s10 + $0xe8] sm:$0xff] %v6886_v3  ;;  %v6951_v31 = vadd.f32 %v6950_v37, %v6886_v3  ;;  %v6992_v0 = vmul.f32 %v6886_v3, %v6886_v3 }
 0x638   : > { %v6160_v39 = vpop.f32.mrf.mxu2  ;;  %v6506_v7 = vpop.f32.mrf.mxu3 }
 0x639   : > { %v7023_v45 = vadd.f32 %v7022_v28, %v6992_v0  ;;  %v6195_v26 = vadd.f32 %v6160_v39, %v5848_v19  ;;  %v5815_v33 = vpop.f32.mrf.mxu1 }
 0x63a   : > { %v5849_v44 = vadd.f32 %v5815_v33, %v9770_v38 }
 0x63b   : > { %v6541_v55 = vadd.f32 %v6506_v7, %v6195_v26 }
 0x63d   : > { %v6887_v27 = vadd.f32 %v6852_v54, %v6541_v55 }
 0x63f   : > { %6920 = vst [vmem:[%s9777_s10 + $0xf0] sm:$0xff] %v6887_v27  ;;  %v6952_v51 = vadd.f32 %v6951_v31, %v6887_v27  ;;  %v6993_v43 = vmul.f32 %v6887_v27, %v6887_v27 }
 0x640   : > { %v6162_v48 = vpop.f32.mrf.mxu2  ;;  %v6508_v57 = vpop.f32.mrf.mxu3 }
 0x641   : > { %v7024_v8 = vadd.f32 %v7023_v45, %v6993_v43  ;;  %v6196_v63 = vadd.f32 %v6162_v48, %v5849_v44 }
 0x643   : > { %v6542_v21 = vadd.f32 %v6508_v57, %v6196_v63 }
 0x645   : > { %v6888_v50 = vadd.f32 %v6854_v10, %v6542_v21 }
 0x647   : > { %6921 = vst [vmem:[%s9777_s10 + $0xf8] sm:$0xff] %v6888_v50  ;;  %v6953_v18 = vadd.f32 %v6952_v51, %v6888_v50  ;;  %v6994_v14 = vmul.f32 %v6888_v50, %v6888_v50 }
 0x649   : > { %v6954_v59 = vrot.slane %v6953_v18, 4  ;;  %v7025_v23 = vadd.f32 %v7024_v8, %v6994_v14 }
 0x64b   : > { %v6955_v32 = vadd.f32 %v6954_v59, %v6953_v18  ;;  %v7026_v9 = vrot.slane %v7025_v23, 4 }
 0x64d   : > { %v6956_v49 = vrot.slane %v6955_v32, 2  ;;  %v7027_v16 = vadd.f32 %v7026_v9, %v7025_v23 }
 0x64f   : > { %v6957_v36 = vadd.f32 %v6956_v49, %v6955_v32  ;;  %v7028_v58 = vrot.slane %v7027_v16, 2 }
 0x651   : > { %v6958_v60 = vrot.slane %v6957_v36, 1  ;;  %v7029_v38 = vadd.f32 %v7028_v58, %v7027_v16 }
 0x653   : > { %v6959_v56 = vadd.f32 %v6958_v60, %v6957_v36  ;;  %v7030_v47 = vrot.slane %v7029_v38, 1 }
 0x655   : > { %v6960_v12 = vadd.f32 %v6959_v56, %v6922_v46  ;;  %v7031_v5 = vadd.f32 %v7030_v47, %v7029_v38 }
 0x657   : > { %6961 = vst [vmem:[#allocation7] sm:$0x1] %v6960_v12  ;;  %v7032_v42 = vadd.f32 %v7031_v5, %v6962_v15 }
 0x659   : > { %7033 = vst [vmem:[#allocation8] sm:$0x1] %v7032_v42 }
 0x65a PF: > { %p8155_p13 = scmp.ne.s32.totalorder %s8424_s25, 2 }
 0x65b   : > { %s8156_s22 = sshll.u32 (!%p8155_p13), %s8420_s24, 8 }
 0x65c   : > { %7037 = sbr.rel (%p8155_p13) target bundleno = 1706 (0x6aa), region = 64  ;;  %s9872_s15 = scalar_lea.vmem (!%p8155_p13), [#allocation4], %s8156_s22 }
 0x661   : > { %v7038_v62 = vld [vmem:[#allocation7] sm:$0x1]  ;;  %v7040_v29 = vld [vmem:[#allocation8] sm:$0x1]  ;;  %v7045_v37 = vld [vmem:[%s10026_s5] sm:$0x1] }
 0x662   : > { %v7039_v30 = vmul.f32 0.001953125, %v7038_v62  ;;  %v7041_v35 = vmul.f32 0.001953125, %v7040_v29  ;;  %v7058_v22 = vld [vmem:[%s10027_s6] sm:$0x1]  ;;  %v7064_v52 = vld [vmem:[%s9872_s15 + $0x8] sm:$0xff]  ;;  %v7065_v13 = vld [vmem:[%s9872_s15 + $0x10] sm:$0xff] }
 0x663   : > { %v7063_v28 = vld [vmem:[%s9872_s15] sm:$0xff]  ;;  %v7066_v3 = vld [vmem:[%s9872_s15 + $0x18] sm:$0xff]  ;;  %v7068_v0 = vld [vmem:[%s9872_s15 + $0x28] sm:$0xff] }
 0x664   : > { %v7042_v40 = vmul.f32 %v7039_v30, %v7039_v30  ;;  %v7067_v31 = vld [vmem:[%s9872_s15 + $0x20] sm:$0xff]  ;;  %v7069_v19 = vld [vmem:[%s9872_s15 + $0x30] sm:$0xff]  ;;  %v7070_v54 = vld [vmem:[%s9872_s15 + $0x38] sm:$0xff] }
 0x665   : > { %v7071_v55 = vld [vmem:[%s9872_s15 + $0x40] sm:$0xff]  ;;  %v7072_v48 = vld [vmem:[%s9872_s15 + $0x48] sm:$0xff]  ;;  %v7073_v8 = vld [vmem:[%s9872_s15 + $0x50] sm:$0xff] }
 0x666   : > { %v7043_v17 = vsub.f32 %v7041_v35, %v7042_v40  ;;  %v7074_v14 = vld [vmem:[%s9872_s15 + $0x58] sm:$0xff]  ;;  %v7075_v49 = vld [vmem:[%s9872_s15 + $0x60] sm:$0xff]  ;;  %v7076_v38 = vld [vmem:[%s9872_s15 + $0x68] sm:$0xff] }
 0x667   : > { %v7077_v15 = vld [vmem:[%s9872_s15 + $0x70] sm:$0xff]  ;;  %v7078_v62 = vld [vmem:[%s9872_s15 + $0x78] sm:$0xff]  ;;  %v7079_v40 = vld [vmem:[%s9872_s15 + $0x80] sm:$0xff] }
 0x668   : > { %v7044_v41 = vmax.f32 %v7043_v17, 0.0 }
 0x66a   : > { %v7046_v61 = vadd.f32 1e-05, %v7044_v41 }
 0x66c   : > { %8396 = vrsqrt.f32 %v7046_v61  ;;  %vm7053_vm3 = vweird.f32 %v7046_v61 }
 0x672   : > { %v8397_v2 = vpop.eup %8396 }
 0x673   : > { %v7048_v4 = vmul.f32 %v8397_v2, %v7046_v61  ;;  %vm7054_vm4 = vweird.f32 %v8397_v2 }
 0x674   : > { %vm7055_vm5 = vmor %vm7053_vm3, %vm7054_vm4 }
 0x675   : > { %v7049_v11 = vmul.f32 %v8397_v2, %v7048_v4 }
 0x677   : > { %v7050_v20 = vmul.f32 0.5, %v7049_v11 }
 0x679   : > { %v7051_v25 = vsub.f32 1.5, %v7050_v20 }
 0x67b   : > { %v7052_v24 = vmul.f32 %v8397_v2, %v7051_v25  ;;  %v7081_v25 = vld [vmem:[%s9872_s15 + $0x90] sm:$0xff] }
 0x67d   : > { %v7056_v1 = vsel %vm7055_vm5, %v8397_v2, %v7052_v24  ;;  %v7080_v2 = vld [vmem:[%s9872_s15 + $0x88] sm:$0xff] }
 0x67e   : > { %v7057_v53 = vmul.f32 %v7056_v1, %v7045_v37 }
 0x680   : > { %v7059_v34 = vmul.f32 %v7057_v53, %v7039_v30  ;;  %v9877_v6 = vperm.slane %v7057_v53, 0  ;;  %v7082_v53 = vld [vmem:[%s9872_s15 + $0x98] sm:$0xff] }
 0x682   : > { %v7060_v39 = vsub.f32 %v7058_v22, %v7059_v34  ;;  %v7098_v45 = vmul.f32 %v9877_v6, %v7063_v28  ;;  %v7099_v26 = vmul.f32 %v9877_v6, %v7064_v52  ;;  %v7100_v7 = vmul.f32 %v9877_v6, %v7065_v13  ;;  %v7083_v13 = vld [vmem:[%s9872_s15 + $0xa0] sm:$0xff] }
 0x683   : > { %v7101_v33 = vmul.f32 %v9877_v6, %v7066_v3  ;;  %v7102_v27 = vmul.f32 %v9877_v6, %v7067_v31  ;;  %v7103_v51 = vmul.f32 %v9877_v6, %v7068_v0  ;;  %v7104_v44 = vmul.f32 %v9877_v6, %v7069_v19  ;;  %v7084_v0 = vld [vmem:[%s9872_s15 + $0xa8] sm:$0xff] }
 0x684   : > { %v9891_v43 = vperm.slane %v7060_v39, 0  ;;  %v7105_v63 = vmul.f32 %v9877_v6, %v7070_v54  ;;  %v7106_v57 = vmul.f32 %v9877_v6, %v7071_v55  ;;  %v7107_v32 = vmul.f32 %v9877_v6, %v7072_v48  ;;  %v7087_v48 = vld [vmem:[%s9872_s15 + $0xc0] sm:$0xff] }
 0x685   : > { %v7108_v9 = vmul.f32 %v9877_v6, %v7073_v8  ;;  %v7109_v47 = vmul.f32 %v9877_v6, %v7074_v14  ;;  %v7110_v42 = vmul.f32 %v9877_v6, %v7075_v49  ;;  %v7111_v35 = vmul.f32 %v9877_v6, %v7076_v38  ;;  %v7089_v14 = vld [vmem:[%s9872_s15 + $0xd0] sm:$0xff] }
 0x686   : > { %v7133_v21 = vadd.f32 %v9891_v43, %v7098_v45  ;;  %v7134_v10 = vadd.f32 %v9891_v43, %v7099_v26  ;;  %v7135_v50 = vadd.f32 %v9891_v43, %v7100_v7  ;;  %v7136_v18 = vadd.f32 %v9891_v43, %v7101_v33  ;;  %v7085_v26 = vld [vmem:[%s9872_s15 + $0xb0] sm:$0xff]  ;;  %v7086_v33 = vld [vmem:[%s9872_s15 + $0xb8] sm:$0xff] }
 0x687   : > { %v7137_v59 = vadd.f32 %v9891_v43, %v7102_v27  ;;  %v7138_v23 = vadd.f32 %v9891_v43, %v7103_v51  ;;  %v7139_v60 = vadd.f32 %v9891_v43, %v7104_v44  ;;  %v7140_v56 = vadd.f32 %v9891_v43, %v7105_v63 }
 0x688   : > { %v7165_v16 = vmax.f32 %v7133_v21, 0.0  ;;  %v7166_v36 = vmax.f32 %v7134_v10, 0.0  ;;  %v7167_v58 = vmax.f32 %v7135_v50, 0.0  ;;  %v7168_v46 = vmax.f32 %v7136_v18, 0.0  ;;  %v7088_v21 = vld [vmem:[%s9872_s15 + $0xc8] sm:$0xff] }
 0x689   : > { %v7169_v12 = vmax.f32 %v7137_v59, 0.0  ;;  %v7141_v5 = vadd.f32 %v9891_v43, %v7106_v57  ;;  %v7170_v29 = vmax.f32 %v7138_v23, 0.0  ;;  %v7142_v30 = vadd.f32 %v9891_v43, %v7107_v32 }
 0x68a   : > { %7197 = vst [vmem:[%s8526_s17] sm:$0xff] %v7165_v16  ;;  %v7171_v17 = vmax.f32 %v7139_v60, 0.0  ;;  %v7143_v41 = vadd.f32 %v9891_v43, %v7108_v9  ;;  %v7112_v61 = vmul.f32 %v9877_v6, %v7077_v15  ;;  %v7172_v4 = vmax.f32 %v7140_v56, 0.0  ;;  %v7090_v9 = vld [vmem:[%s9872_s15 + $0xd8] sm:$0xff]  ;;  %v7092_v56 = vld [vmem:[%s9872_s15 + $0xe8] sm:$0xff] }
 0x68b   : > { %7198 = vst [vmem:[%s8526_s17 + $0x8] sm:$0xff] %v7166_v36  ;;  %v7144_v11 = vadd.f32 %v9891_v43, %v7109_v47  ;;  %v7113_v20 = vmul.f32 %v9877_v6, %v7078_v62  ;;  %v7173_v37 = vmax.f32 %v7141_v5, 0.0  ;;  %v7145_v24 = vadd.f32 %v9891_v43, %v7110_v42  ;;  %v7093_v5 = vld [vmem:[%s9872_s15 + $0xf0] sm:$0xff] }
 0x68c   : > { %7199 = vst [vmem:[%s8526_s17 + $0x10] sm:$0xff] %v7167_v58  ;;  %v7114_v1 = vmul.f32 %v9877_v6, %v7079_v40  ;;  %v7174_v22 = vmax.f32 %v7142_v30, 0.0  ;;  %v7146_v28 = vadd.f32 %v9891_v43, %v7111_v35  ;;  %v7115_v52 = vmul.f32 %v9877_v6, %v7080_v2  ;;  %v7091_v58 = vld [vmem:[%s9872_s15 + $0xe0] sm:$0xff]  ;;  %v7094_v30 = vld [vmem:[%s9872_s15 + $0xf8] sm:$0xff] }
 0x68d   : > { %7200 = vst [vmem:[%s8526_s17 + $0x18] sm:$0xff] %v7168_v46  ;;  %v7175_v34 = vmax.f32 %v7143_v41, 0.0  ;;  %v7147_v3 = vadd.f32 %v9891_v43, %v7112_v61  ;;  %v7116_v31 = vmul.f32 %v9877_v6, %v7081_v25  ;;  %v7176_v19 = vmax.f32 %v7144_v11, 0.0 }
 0x68e   : > { %7201 = vst [vmem:[%s8526_s17 + $0x20] sm:$0xff] %v7169_v12  ;;  %v7148_v39 = vadd.f32 %v9891_v43, %v7113_v20  ;;  %v7117_v45 = vmul.f32 %v9877_v6, %v7082_v53  ;;  %v7177_v7 = vmax.f32 %v7145_v24, 0.0  ;;  %v7149_v54 = vadd.f32 %v9891_v43, %v7114_v1 }
 0x68f   : > { %7202 = vst [vmem:[%s8526_s17 + $0x28] sm:$0xff] %v7170_v29  ;;  %v7118_v55 = vmul.f32 %v9877_v6, %v7083_v13  ;;  %v7178_v27 = vmax.f32 %v7146_v28, 0.0  ;;  %v7150_v51 = vadd.f32 %v9891_v43, %v7115_v52  ;;  %v7119_v44 = vmul.f32 %v9877_v6, %v7084_v0 }
 0x690   : > { %7203 = vst [vmem:[%s8526_s17 + $0x30] sm:$0xff] %v7171_v17  ;;  %v7179_v8 = vmax.f32 %v7147_v3, 0.0  ;;  %v7151_v63 = vadd.f32 %v9891_v43, %v7116_v31  ;;  %v7120_v57 = vmul.f32 %v9877_v6, %v7085_v26  ;;  %v7180_v10 = vmax.f32 %v7148_v39, 0.0 }
 0x691   : > { %7204 = vst [vmem:[%s8526_s17 + $0x38] sm:$0xff] %v7172_v4  ;;  %v7152_v50 = vadd.f32 %v9891_v43, %v7117_v45  ;;  %v7121_v18 = vmul.f32 %v9877_v6, %v7086_v33  ;;  %v7181_v59 = vmax.f32 %v7149_v54, 0.0  ;;  %v7153_v23 = vadd.f32 %v9891_v43, %v7118_v55 }
 0x692   : > { %7205 = vst [vmem:[%s8526_s17 + $0x40] sm:$0xff] %v7173_v37  ;;  %v7122_v32 = vmul.f32 %v9877_v6, %v7087_v48  ;;  %v7182_v49 = vmax.f32 %v7150_v51, 0.0  ;;  %v7154_v16 = vadd.f32 %v9891_v43, %v7119_v44  ;;  %v7123_v36 = vmul.f32 %v9877_v6, %v7088_v21 }
 0x693   : > { %7206 = vst [vmem:[%s8526_s17 + $0x48] sm:$0xff] %v7174_v22  ;;  %v7183_v60 = vmax.f32 %v7151_v63, 0.0  ;;  %v7155_v38 = vadd.f32 %v9891_v43, %v7120_v57  ;;  %v7124_v46 = vmul.f32 %v9877_v6, %v7089_v14  ;;  %v7184_v47 = vmax.f32 %v7152_v50, 0.0 }
 0x694   : > { %7207 = vst [vmem:[%s8526_s17 + $0x50] sm:$0xff] %v7175_v34  ;;  %v7156_v15 = vadd.f32 %v9891_v43, %v7121_v18  ;;  %v7125_v12 = vmul.f32 %v9877_v6, %v7090_v9  ;;  %v7185_v42 = vmax.f32 %v7153_v23, 0.0  ;;  %v7157_v62 = vadd.f32 %v9891_v43, %v7122_v32 }
 0x695   : > { %7208 = vst [vmem:[%s8526_s17 + $0x58] sm:$0xff] %v7176_v19  ;;  %v7126_v29 = vmul.f32 %v9877_v6, %v7091_v58  ;;  %v7186_v35 = vmax.f32 %v7154_v16, 0.0  ;;  %v7158_v40 = vadd.f32 %v9891_v43, %v7123_v36  ;;  %v7127_v17 = vmul.f32 %v9877_v6, %v7092_v56 }
 0x696   : > { %7209 = vst [vmem:[%s8526_s17 + $0x60] sm:$0xff] %v7177_v7  ;;  %v7187_v41 = vmax.f32 %v7155_v38, 0.0  ;;  %v7159_v61 = vadd.f32 %v9891_v43, %v7124_v46  ;;  %v7128_v2 = vmul.f32 %v9877_v6, %v7093_v5  ;;  %v7188_v4 = vmax.f32 %v7156_v15, 0.0 }
 0x697   : > { %7210 = vst [vmem:[%s8526_s17 + $0x68] sm:$0xff] %v7178_v27  ;;  %v7160_v11 = vadd.f32 %v9891_v43, %v7125_v12  ;;  %v7129_v20 = vmul.f32 %v9877_v6, %v7094_v30  ;;  %v7189_v25 = vmax.f32 %v7157_v62, 0.0  ;;  %v7161_v37 = vadd.f32 %v9891_v43, %v7126_v29 }
 0x698   : > { %7211 = vst [vmem:[%s8526_s17 + $0x70] sm:$0xff] %v7179_v8  ;;  %v7190_v24 = vmax.f32 %v7158_v40, 0.0  ;;  %v7162_v1 = vadd.f32 %v9891_v43, %v7127_v17  ;;  %v7191_v53 = vmax.f32 %v7159_v61, 0.0  ;;  %v7163_v22 = vadd.f32 %v9891_v43, %v7128_v2 }
 0x699   : > { %7212 = vst [vmem:[%s8526_s17 + $0x78] sm:$0xff] %v7180_v10  ;;  %v7192_v6 = vmax.f32 %v7160_v11, 0.0  ;;  %v7164_v28 = vadd.f32 %v9891_v43, %v7129_v20  ;;  %v7193_v52 = vmax.f32 %v7161_v37, 0.0 }
 0x69a   : > { %7213 = vst [vmem:[%s8526_s17 + $0x80] sm:$0xff] %v7181_v59  ;;  %v7194_v13 = vmax.f32 %v7162_v1, 0.0  ;;  %v7195_v34 = vmax.f32 %v7163_v22, 0.0 }
 0x69b   : > { %7214 = vst [vmem:[%s8526_s17 + $0x88] sm:$0xff] %v7182_v49  ;;  %v7196_v3 = vmax.f32 %v7164_v28, 0.0 }
 0x69c   : > { %7215 = vst [vmem:[%s8526_s17 + $0x90] sm:$0xff] %v7183_v60 }
 0x69d   : > { %7216 = vst [vmem:[%s8526_s17 + $0x98] sm:$0xff] %v7184_v47 }
 0x69e   : > { %7217 = vst [vmem:[%s8526_s17 + $0xa0] sm:$0xff] %v7185_v42 }
 0x69f   : > { %7218 = vst [vmem:[%s8526_s17 + $0xa8] sm:$0xff] %v7186_v35 }
 0x6a0   : > { %7219 = vst [vmem:[%s8526_s17 + $0xb0] sm:$0xff] %v7187_v41 }
 0x6a1   : > { %7220 = vst [vmem:[%s8526_s17 + $0xb8] sm:$0xff] %v7188_v4 }
 0x6a2   : > { %7221 = vst [vmem:[%s8526_s17 + $0xc0] sm:$0xff] %v7189_v25 }
 0x6a3   : > { %7222 = vst [vmem:[%s8526_s17 + $0xc8] sm:$0xff] %v7190_v24 }
 0x6a4   : > { %7223 = vst [vmem:[%s8526_s17 + $0xd0] sm:$0xff] %v7191_v53 }
 0x6a5   : > { %7224 = vst [vmem:[%s8526_s17 + $0xd8] sm:$0xff] %v7192_v6 }
 0x6a6   : > { %7225 = vst [vmem:[%s8526_s17 + $0xe0] sm:$0xff] %v7193_v52 }
 0x6a7   : > { %7226 = vst [vmem:[%s8526_s17 + $0xe8] sm:$0xff] %v7194_v13 }
 0x6a8   : > { %7227 = vst [vmem:[%s8526_s17 + $0xf0] sm:$0xff] %v7195_v34 }
 0x6a9   : > { %7228 = vst [vmem:[%s8526_s17 + $0xf8] sm:$0xff] %v7196_v3 }
 0x6aa PF: > { %s17_s28 = sadd.s32 1, %s8436_s28   ;;  %s10029_s24 = smov %s8428_s26 }
 0x6ab   : > { %p14_p0 = scmp.ge.s32.totalorder %s17_s28, 8   ;;  %s10030_s25 = smov %s8432_s27 }
 0x6ac   : > { %s10031_s26 = smov %s10034_s29  ;;  %s10032_s27 = smov %s10038_s30 }
 0x6ad   :  { %16 = sbr.rel (!%p14_p0) target bundleno = 3 (0x3), region = 118 }

</bundles_post_ra>
